<compile_context>
chip_gen: v7x
topology: tpu7x:2x2x1
jax: 0.10.0
libtpu: 0.0.40
codegen_flags: <defaults>
</compile_context>

<pallas_src>
import math

import jax
import jax.numpy as jnp
from jax.experimental import pallas as pl
from jax.experimental.pallas import tpu as pltpu


# ----------------------------------------------------------------------------
# Fused kernel
# ----------------------------------------------------------------------------
def make_scm_kernel(concept_sizes, n_hidden, n_classes, use_sigmoid, use_relu, hard):
    n1, n2, n3, n4, n5 = concept_sizes

    def lsel(h):
        # (h//2, h) 0/1 matrix selecting even rows.
        u = jax.lax.broadcasted_iota(jnp.int32, (h // 2, h), 0)
        r = jax.lax.broadcasted_iota(jnp.int32, (h // 2, h), 1)
        return (r == 2 * u).astype(jnp.float32)

    def rsel(w, c):
        # (w*c, (w//2)*c) 0/1 matrix selecting even w-blocks of c lanes.
        rows, cols = w * c, (w // 2) * c
        r = jax.lax.broadcasted_iota(jnp.int32, (rows, cols), 0)
        q = jax.lax.broadcasted_iota(jnp.int32, (rows, cols), 1)
        s = int(math.log2(c))                              # c is a power of two
        same_ch = jnp.bitwise_and(r, c - 1) == jnp.bitwise_and(q, c - 1)
        even_w = jnp.right_shift(r, s) == 2 * jnp.right_shift(q, s)
        return (same_ch & even_w).astype(jnp.float32)

    def conv_pool(a, m_ref, bias_ref, w, cin, cout):
        # a: (H, W*Cin) f32  ->  (H//2, (W//2)*Cout) f32
        h = a.shape[0]
        zero = jnp.zeros((1, w * cin), jnp.float32)
        ap = jnp.concatenate([zero, a, zero], axis=0)                   # (H+2, W*Cin)
        acat = jnp.concatenate([ap[0:h], ap[1:h + 1], ap[2:h + 2]], axis=1)
        conv = jnp.dot(acat.astype(jnp.bfloat16), m_ref[...],
                       preferred_element_type=jnp.float32)              # (H, W*Cout)
        conv = jnp.maximum(conv + bias_ref[...], 0.0)                   # bias + ReLU
        # 2x2 max-pool: pairwise max along rows / along w-blocks, then keep
        # even rows / even w-blocks via tiny 0/1 selection matmuls.
        down = jnp.concatenate([conv[1:], conv[:1]], axis=0)            # row h+1
        pm = jnp.maximum(conv, down)
        left = jnp.concatenate([pm[:, cout:], pm[:, :cout]], axis=1)    # w-block +1
        pm = jnp.maximum(pm, left)
        pm = jnp.dot(lsel(h), pm, preferred_element_type=jnp.float32)
        pm = jnp.dot(pm, rsel(w, cout), preferred_element_type=jnp.float32)
        return pm

    def reduce_concepts(a, w_ref, b_ref):
        # Narrow concept layer as VPU multiply + full reduce per output unit.
        cols = []
        for i in range(w_ref.shape[0]):
            prod = a * w_ref[i]
            cols.append(jnp.sum(jnp.sum(prod, axis=1, keepdims=True),
                                axis=0, keepdims=True))
        c = cols[0] if len(cols) == 1 else jnp.concatenate(cols, axis=1)
        return c + b_ref[...]

    def kernel(x_ref, m1_ref, b1_ref, m2_ref, b2_ref, m3_ref, b3_ref,
               c1w_ref, c1b_ref, c2w_ref, c2b_ref, c3w_ref, c3b_ref,
               fc1w_ref, fc1b_ref, c4ic_ref, c4b_ref, icb_ref,
               c5f_ref, c5b_ref, wfy_ref, wfb_ref,
               logits_ref, concepts_ref):
        a0 = x_ref[0]                                    # (64, 64*3)  f32
        a1 = conv_pool(a0, m1_ref, b1_ref, 64, 3, 8)     # (32, 32*8)
        a2 = conv_pool(a1, m2_ref, b2_ref, 32, 8, 16)    # (16, 16*16)
        a3 = conv_pool(a2, m3_ref, b3_ref, 16, 16, 32)   # (8,  8*32)

        c1 = reduce_concepts(a1, c1w_ref, c1b_ref)       # (1, n1)
        c2 = reduce_concepts(a2, c2w_ref, c2b_ref)       # (1, n2)
        c3 = reduce_concepts(a3, c3w_ref, c3b_ref)       # (1, n3)

        # Flatten a3 (rows in (h, w, c) order) by lane concatenation; fc1's
        # weight rows were permuted to this order at prep time.
        f3 = jnp.concatenate([a3[i:i + 1, :] for i in range(a3.shape[0])], axis=1)
        hidden = jnp.dot(f3.astype(jnp.bfloat16), fc1w_ref[...],
                         preferred_element_type=jnp.float32) + fc1b_ref[...]
        hidden = jnp.maximum(hidden, 0.0)                # relu(fc1(flat3))  (1, 64)

        t = jnp.dot(hidden, c4ic_ref[...], preferred_element_type=jnp.float32)
        c4 = t[:, 0:n4] + c4b_ref[...]
        z = jnp.maximum(t[:, n4:n4 + n_hidden] + icb_ref[...], 0.0)     # (1, 16)

        t2 = jnp.dot(z, c5f_ref[...], preferred_element_type=jnp.float32)
        c5 = t2[:, 0:n5] + c5b_ref[...]
        logit_z = t2[:, n5:n5 + n_classes]               # z @ final_w[:16]

        concepts = jnp.concatenate([c1, c2, c3, c4, c5], axis=1)        # (1, n_attr)
        concepts_ref[0] = concepts                        # single contiguous store

        y = concepts
        if use_sigmoid:
            y = jax.nn.sigmoid(y)
        elif use_relu:
            y = jnp.maximum(y, 0.0)
        if hard:
            y = jnp.round(y)

        logits = logit_z + jnp.dot(y, wfy_ref[...],
                                   preferred_element_type=jnp.float32) + wfb_ref[...]
        logits_ref[0] = logits

    return kernel


# ----------------------------------------------------------------------------
# One-time weight re-layout (plain XLA on tiny tensors, outside the kernel)
# ----------------------------------------------------------------------------
def _band_matrix(k, w):
    """(Cout, Cin, 3, 3) conv weight -> (3*W*Cin, W*Cout) banded matrix.

    Row index (kh, w_in, c_in), column index (w_out, c_out).  Encodes the kw
    shifts (incl. zero padding) and channel mixing of a 3x3 SAME conv so that
    conv == row_shift_concat(A) @ band.
    """
    cin = k.shape[1]
    off = jnp.arange(w)[:, None] - jnp.arange(w)[None, :] + 1        # w_in - w_out + 1
    valid = ((off >= 0) & (off <= 2)).astype(k.dtype)
    offc = jnp.clip(off, 0, 2)
    kt = jnp.transpose(k, (2, 3, 1, 0))                              # (kh, kw, cin, cout)
    band = kt[:, offc] * valid[None, :, :, None, None]               # (3, w, w, cin, cout)
    band = jnp.transpose(band, (0, 1, 3, 2, 4))                      # (3, w_in, cin, w_out, cout)
    return band.reshape(3 * w * cin, w * k.shape[0])


def _concept_weight(w, c, h, wd):
    """(C*H*W, n) NCHW-flat weight -> (n, H, W*C) matching the kernel layout."""
    n = w.shape[1]
    return jnp.transpose(w.reshape(c, h, wd, n), (3, 1, 2, 0)).reshape(n, h, wd * c)


def _fc_weight(w, c, h, wd):
    """(C*H*W, out) NCHW-flat rows -> rows reordered to the kernel's (h, w, c) flatten."""
    out = w.shape[1]
    return jnp.transpose(w.reshape(c, h, wd, out), (1, 2, 0, 3)).reshape(c * h * wd, out)


# ----------------------------------------------------------------------------
# Forward
# ----------------------------------------------------------------------------
def shapes_scm_forward(x_nchw, p, concept_sizes, cfg):
    n_classes = cfg["n_classes"]
    n_hidden = cfg["n_hidden"]
    n_attr = sum(concept_sizes)
    b = x_nchw.shape[0]

    # Input: NCHW -> rows = h, lanes = (w, c).
    x2 = jnp.transpose(x_nchw.astype(jnp.float32), (0, 2, 3, 1)).reshape(b, 64, 64 * 3)

    # Banded conv matrices (bf16) + lane-tiled biases.
    m1 = _band_matrix(p["conv1_w"], 64).astype(jnp.bfloat16)
    m2 = _band_matrix(p["conv2_w"], 32).astype(jnp.bfloat16)
    m3 = _band_matrix(p["conv3_w"], 16).astype(jnp.bfloat16)
    b1 = jnp.tile(p["conv1_b"], 64).reshape(1, -1)
    b2 = jnp.tile(p["conv2_b"], 32).reshape(1, -1)
    b3 = jnp.tile(p["conv3_b"], 16).reshape(1, -1)

    # Linear weights permuted to the kernel's activation layouts.
    c1w = _concept_weight(p["c1_w"], 8, 32, 32)
    c2w = _concept_weight(p["c2_w"], 16, 16, 16)
    c3w = _concept_weight(p["c3_w"], 32, 8, 8)
    fc1w = _fc_weight(p["fc1_w"], 32, 8, 8).astype(jnp.bfloat16)

    # Fused head weights.
    c4ic = jnp.concatenate([p["c4_w"], p["ic_w"]], axis=1)               # (64, n4+16)
    c5f = jnp.concatenate([p["c5_w"], p["final_w"][:n_hidden]], axis=1)  # (16, n5+3)
    wfy = p["final_w"][n_hidden:]                                        # (n_attr, 3)

    def row(v):
        return v.reshape(1, -1).astype(jnp.float32)

    operands = [
        x2,
        m1, b1, m2, b2, m3, b3,
        c1w, row(p["c1_b"]), c2w, row(p["c2_b"]), c3w, row(p["c3_b"]),
        fc1w, row(p["fc1_b"]),
        c4ic, row(p["c4_b"]), row(p["ic_b"]),
        c5f, row(p["c5_b"]),
        wfy, row(p["final_b"]),
    ]

    def full_spec(arr):
        nd = arr.ndim
        return pl.BlockSpec(arr.shape, lambda i, nd=nd: (0,) * nd)

    in_specs = [pl.BlockSpec((1, 64, 192), lambda i: (i, 0, 0))]
    in_specs += [full_spec(a) for a in operands[1:]]

    kernel = make_scm_kernel(tuple(concept_sizes), n_hidden, n_classes,
                             cfg["use_sigmoid"], cfg["use_relu"], cfg["hard"])

    logits, concepts = pl.pallas_call(
        kernel,
        out_shape=(jax.ShapeDtypeStruct((b, 1, n_classes), jnp.float32),
                   jax.ShapeDtypeStruct((b, 1, n_attr), jnp.float32)),
        grid=(b,),
        in_specs=in_specs,
        out_specs=(pl.BlockSpec((1, 1, n_classes), lambda i: (i, 0, 0)),
                   pl.BlockSpec((1, 1, n_attr), lambda i: (i, 0, 0))),
        compiler_params=pltpu.CompilerParams(
            dimension_semantics=("parallel",),
            vmem_limit_bytes=32 * 1024 * 1024),
    )(*operands)

    return logits[:, 0, :], concepts[:, 0, :]


# ----------------------------------------------------------------------------
# Parameter init (torch-equivalent layouts)
# ----------------------------------------------------------------------------
def init_params(key, n_classes, n_attr, n_linear_output, n_hidden):
    sizes = [1, 1, 1, 1, 1]
    for i in range(n_attr - 5):
        sizes[i % 5] += 1

    keys = iter(jax.random.split(key, 40))

    def uniform(shape, bound):
        return jax.random.uniform(next(keys), shape, jnp.float32, -bound, bound)

    def linear(fan_in, fan_out):
        bound = 1.0 / math.sqrt(fan_in)
        return uniform((fan_in, fan_out), bound), uniform((fan_out,), bound)

    def conv(cin, cout):
        bound = 1.0 / math.sqrt(cin * 9)
        return uniform((cout, cin, 3, 3), bound), uniform((cout,), bound)

    p = {}
    p["conv1_w"], p["conv1_b"] = conv(3, 8)
    p["conv2_w"], p["conv2_b"] = conv(8, 16)
    p["conv3_w"], p["conv3_b"] = conv(16, 32)
    p["c1_w"], p["c1_b"] = linear(8192, sizes[0])
    p["c2_w"], p["c2_b"] = linear(4096, sizes[1])
    p["c3_w"], p["c3_b"] = linear(2048, sizes[2])
    p["fc1_w"], p["fc1_b"] = linear(2048, n_linear_output)
    p["c4_w"], p["c4_b"] = linear(n_linear_output, sizes[3])
    p["ic_w"], p["ic_b"] = linear(n_linear_output, n_hidden)
    p["c5_w"], p["c5_b"] = linear(n_hidden, sizes[4])
    p["final_w"], p["final_b"] = linear(n_hidden + n_attr, n_classes)
    return p, sizes


# ----------------------------------------------------------------------------
# Pure-JAX reference (numerical verification)
# ----------------------------------------------------------------------------
def reference_forward(x_nchw, p, sizes, cfg):
    hp = jax.lax.Precision.HIGHEST
    x = x_nchw.astype(jnp.float32)

    def conv_block(a, w, b):
        y = jax.lax.conv_general_dilated(
            a, w, window_strides=(1, 1), padding="SAME",
            dimension_numbers=("NCHW", "OIHW", "NCHW"), precision=hp)
        y = jnp.maximum(y + b.reshape(1, -1, 1, 1), 0.0)
        n, c, h, wd = y.shape
        return y.reshape(n, c, h // 2, 2, wd // 2, 2).max(axis=(3, 5))

    bsz = x.shape[0]
    a1 = conv_block(x, p["conv1_w"], p["conv1_b"]); f1 = a1.reshape(bsz, -1)
    a2 = conv_block(a1, p["conv2_w"], p["conv2_b"]); f2 = a2.reshape(bsz, -1)
    a3 = conv_block(a2, p["conv3_w"], p["conv3_b"]); f3 = a3.reshape(bsz, -1)

    dot = lambda a, b: jnp.dot(a, b, precision=hp)
    c1 = dot(f1, p["c1_w"]) + p["c1_b"]
    c2 = dot(f2, p["c2_w"]) + p["c2_b"]
    c3 = dot(f3, p["c3_w"]) + p["c3_b"]
    h = jnp.maximum(dot(f3, p["fc1_w"]) + p["fc1_b"], 0.0)
    c4 = dot(h, p["c4_w"]) + p["c4_b"]
    z = jnp.maximum(dot(h, p["ic_w"]) + p["ic_b"], 0.0)
    c5 = dot(z, p["c5_w"]) + p["c5_b"]
    concepts = jnp.concatenate([c1, c2, c3, c4, c5], axis=1)
    y = concepts
    if cfg["use_sigmoid"]:
        y = jax.nn.sigmoid(y)
    elif cfg["use_relu"]:
        y = jnp.maximum(y, 0.0)
    if cfg["hard"]:
        y = jnp.round(y)
    logits = dot(jnp.concatenate([z, y], axis=1), p["final_w"]) + p["final_b"]
    return logits, concepts


if __name__ == "__main__":
    # TODO(synk): nn.Dropout layers are treated as identity (eval-mode inference).
    cfg = dict(n_classes=3, n_attr=5, n_linear_output=64, n_hidden=16,
               use_sigmoid=False, use_relu=False, hard=False)

    key = jax.random.PRNGKey(0)
    pkey, xkey = jax.random.split(key)
    params, concept_sizes = init_params(
        pkey, cfg["n_classes"], cfg["n_attr"], cfg["n_linear_output"], cfg["n_hidden"])

    # fc1 in_features = 2048 = 32*8*8 implies 64x64 RGB input.
    x = jax.random.normal(xkey, (2, 3, 64, 64), jnp.float32)     # NCHW like PyTorch

    fwd = jax.jit(lambda xx, pp: shapes_scm_forward(xx, pp, concept_sizes, cfg))
    logits, concepts = fwd(x, params)
    jax.block_until_ready((logits, concepts))

    ref_logits, ref_concepts = reference_forward(x, params, concept_sizes, cfg)
    assert logits.shape == (2, cfg["n_classes"])
    assert concepts.shape == (2, cfg["n_attr"])
    assert jnp.allclose(logits, ref_logits, atol=1e-1, rtol=1e-2), \
        float(jnp.max(jnp.abs(logits - ref_logits)))
    assert jnp.allclose(concepts, ref_concepts, atol=1e-1, rtol=1e-2), \
        float(jnp.max(jnp.abs(concepts - ref_concepts)))

    print("KERNEL_OK")
</pallas_src>

<mosaic_0001>
module attributes {stable_mosaic.version = 11 : i64} {
  func.func @kernel(%arg0: i32, %arg1: memref<1x64x192xf32, #tpu.memory_space<vmem>>, %arg2: memref<576x512xbf16, #tpu.memory_space<vmem>>, %arg3: memref<1x512xf32, #tpu.memory_space<vmem>>, %arg4: memref<768x512xbf16, #tpu.memory_space<vmem>>, %arg5: memref<1x512xf32, #tpu.memory_space<vmem>>, %arg6: memref<768x512xbf16, #tpu.memory_space<vmem>>, %arg7: memref<1x512xf32, #tpu.memory_space<vmem>>, %arg8: memref<1x32x256xf32, #tpu.memory_space<vmem>>, %arg9: memref<1x1xf32, #tpu.memory_space<vmem>>, %arg10: memref<1x16x256xf32, #tpu.memory_space<vmem>>, %arg11: memref<1x1xf32, #tpu.memory_space<vmem>>, %arg12: memref<1x8x256xf32, #tpu.memory_space<vmem>>, %arg13: memref<1x1xf32, #tpu.memory_space<vmem>>, %arg14: memref<2048x64xbf16, #tpu.memory_space<vmem>>, %arg15: memref<1x64xf32, #tpu.memory_space<vmem>>, %arg16: memref<64x17xf32, #tpu.memory_space<vmem>>, %arg17: memref<1x1xf32, #tpu.memory_space<vmem>>, %arg18: memref<1x16xf32, #tpu.memory_space<vmem>>, %arg19: memref<16x4xf32, #tpu.memory_space<vmem>>, %arg20: memref<1x1xf32, #tpu.memory_space<vmem>>, %arg21: memref<5x3xf32, #tpu.memory_space<vmem>>, %arg22: memref<1x3xf32, #tpu.memory_space<vmem>>, %arg23: memref<1x1x3xf32, #tpu.memory_space<vmem>>, %arg24: memref<1x1x5xf32, #tpu.memory_space<vmem>>) attributes {dimension_semantics = [#tpu.dimension_semantics<parallel>], iteration_bounds = array<i64: 2>, scalar_prefetch = 0 : i64, scratch_operands = 0 : i64, tpu.core_type = #tpu.core_type<tc>, window_params = [{transform_indices = @transform_0, window_bounds = array<i64: 1, 64, 192>}, {pipeline_mode = #tpu.pipeline_mode<synchronous>, transform_indices = @transform_1, window_bounds = array<i64: 576, 512>}, {pipeline_mode = #tpu.pipeline_mode<synchronous>, transform_indices = @transform_2, window_bounds = array<i64: 1, 512>}, {pipeline_mode = #tpu.pipeline_mode<synchronous>, transform_indices = @transform_3, window_bounds = array<i64: 768, 512>}, {pipeline_mode = #tpu.pipeline_mode<synchronous>, transform_indices = @transform_4, window_bounds = array<i64: 1, 512>}, {pipeline_mode = #tpu.pipeline_mode<synchronous>, transform_indices = @transform_5, window_bounds = array<i64: 768, 512>}, {pipeline_mode = #tpu.pipeline_mode<synchronous>, transform_indices = @transform_6, window_bounds = array<i64: 1, 512>}, {pipeline_mode = #tpu.pipeline_mode<synchronous>, transform_indices = @transform_7, window_bounds = array<i64: 1, 32, 256>}, {pipeline_mode = #tpu.pipeline_mode<synchronous>, transform_indices = @transform_8, window_bounds = array<i64: 1, 1>}, {pipeline_mode = #tpu.pipeline_mode<synchronous>, transform_indices = @transform_9, window_bounds = array<i64: 1, 16, 256>}, {pipeline_mode = #tpu.pipeline_mode<synchronous>, transform_indices = @transform_10, window_bounds = array<i64: 1, 1>}, {pipeline_mode = #tpu.pipeline_mode<synchronous>, transform_indices = @transform_11, window_bounds = array<i64: 1, 8, 256>}, {pipeline_mode = #tpu.pipeline_mode<synchronous>, transform_indices = @transform_12, window_bounds = array<i64: 1, 1>}, {pipeline_mode = #tpu.pipeline_mode<synchronous>, transform_indices = @transform_13, window_bounds = array<i64: 2048, 64>}, {pipeline_mode = #tpu.pipeline_mode<synchronous>, transform_indices = @transform_14, window_bounds = array<i64: 1, 64>}, {pipeline_mode = #tpu.pipeline_mode<synchronous>, transform_indices = @transform_15, window_bounds = array<i64: 64, 17>}, {pipeline_mode = #tpu.pipeline_mode<synchronous>, transform_indices = @transform_16, window_bounds = array<i64: 1, 1>}, {pipeline_mode = #tpu.pipeline_mode<synchronous>, transform_indices = @transform_17, window_bounds = array<i64: 1, 16>}, {pipeline_mode = #tpu.pipeline_mode<synchronous>, transform_indices = @transform_18, window_bounds = array<i64: 16, 4>}, {pipeline_mode = #tpu.pipeline_mode<synchronous>, transform_indices = @transform_19, window_bounds = array<i64: 1, 1>}, {pipeline_mode = #tpu.pipeline_mode<synchronous>, transform_indices = @transform_20, window_bounds = array<i64: 5, 3>}, {pipeline_mode = #tpu.pipeline_mode<synchronous>, transform_indices = @transform_21, window_bounds = array<i64: 1, 3>}, {transform_indices = @transform_22, window_bounds = array<i64: 1, 1, 3>}, {transform_indices = @transform_23, window_bounds = array<i64: 1, 1, 5>}]} {
    %c0 = arith.constant 0 : index
    %c0_0 = arith.constant 0 : index
    %c0_1 = arith.constant 0 : index
    %0 = vector.load %arg1[%c0, %c0_0, %c0_1] : memref<1x64x192xf32, #tpu.memory_space<vmem>>, vector<1x64x192xf32>
    %1 = vector.shape_cast %0 : vector<1x64x192xf32> to vector<64x192xf32>
    %cst = arith.constant 0.000000e+00 : f32
    %2 = vector.broadcast %cst : f32 to vector<1x192xf32>
    %3 = tpu.concatenate %2, %1, %2 in 0 : vector<1x192xf32>, vector<64x192xf32>, vector<1x192xf32> -> vector<66x192xf32>
    %4 = vector.extract_strided_slice %3 {offsets = [0, 0], sizes = [64, 192], strides = [1, 1]} : vector<66x192xf32> to vector<64x192xf32>
    %5 = vector.extract_strided_slice %3 {offsets = [1, 0], sizes = [64, 192], strides = [1, 1]} : vector<66x192xf32> to vector<64x192xf32>
    %6 = vector.extract_strided_slice %3 {offsets = [2, 0], sizes = [64, 192], strides = [1, 1]} : vector<66x192xf32> to vector<64x192xf32>
    %7 = tpu.concatenate %4, %5, %6 in 1 : vector<64x192xf32>, vector<64x192xf32>, vector<64x192xf32> -> vector<64x576xf32>
    %8 = arith.truncf %7 : vector<64x576xf32> to vector<64x576xbf16>
    %c0_2 = arith.constant 0 : index
    %c0_3 = arith.constant 0 : index
    %9 = vector.load %arg2[%c0_2, %c0_3] : memref<576x512xbf16, #tpu.memory_space<vmem>>, vector<576x512xbf16>
    %cst_4 = arith.constant dense<0.000000e+00> : vector<64x512xf32>
    %10 = tpu.matmul %8, %9, %cst_4 {dimension_numbers = #tpu.dot_dimension_numbers<[1], [0], [0], [1], [0, 0, 1, 1], [], []>} : vector<64x576xbf16>, vector<576x512xbf16>, vector<64x512xf32> -> vector<64x512xf32>
    %c0_5 = arith.constant 0 : index
    %c0_6 = arith.constant 0 : index
    %11 = vector.load %arg3[%c0_5, %c0_6] : memref<1x512xf32, #tpu.memory_space<vmem>>, vector<1x512xf32>
    %12 = vector.broadcast %11 : vector<1x512xf32> to vector<64x512xf32>
    %13 = arith.addf %10, %12 : vector<64x512xf32>
    %cst_7 = arith.constant 0.000000e+00 : f32
    %14 = vector.broadcast %cst_7 : f32 to vector<64x512xf32>
    %15 = arith.maximumf %13, %14 : vector<64x512xf32>
    %16 = vector.extract_strided_slice %15 {offsets = [1, 0], sizes = [63, 512], strides = [1, 1]} : vector<64x512xf32> to vector<63x512xf32>
    %17 = vector.extract_strided_slice %15 {offsets = [0, 0], sizes = [1, 512], strides = [1, 1]} : vector<64x512xf32> to vector<1x512xf32>
    %18 = tpu.concatenate %16, %17 in 0 : vector<63x512xf32>, vector<1x512xf32> -> vector<64x512xf32>
    %19 = arith.maximumf %15, %18 : vector<64x512xf32>
    %20 = vector.extract_strided_slice %19 {offsets = [0, 8], sizes = [64, 504], strides = [1, 1]} : vector<64x512xf32> to vector<64x504xf32>
    %21 = vector.extract_strided_slice %19 {offsets = [0, 0], sizes = [64, 8], strides = [1, 1]} : vector<64x512xf32> to vector<64x8xf32>
    %22 = tpu.concatenate %20, %21 in 1 : vector<64x504xf32>, vector<64x8xf32> -> vector<64x512xf32>
    %23 = arith.maximumf %19, %22 : vector<64x512xf32>
    %24 = tpu.iota {dimensions = array<i32: 0>} : vector<32x64xi32>
    %25 = tpu.iota {dimensions = array<i32: 1>} : vector<32x64xi32>
    %c2_i32 = arith.constant 2 : i32
    %26 = vector.broadcast %c2_i32 : i32 to vector<32x64xi32>
    %27 = arith.muli %26, %24 : vector<32x64xi32>
    %28 = arith.cmpi eq, %25, %27 : vector<32x64xi32>
    %29 = arith.extui %28 : vector<32x64xi1> to vector<32x64xi32>
    %30 = arith.sitofp %29 : vector<32x64xi32> to vector<32x64xf32>
    %cst_8 = arith.constant dense<0.000000e+00> : vector<32x512xf32>
    %31 = tpu.matmul %30, %23, %cst_8 {dimension_numbers = #tpu.dot_dimension_numbers<[1], [0], [0], [1], [0, 0, 1, 1], [], []>} : vector<32x64xf32>, vector<64x512xf32>, vector<32x512xf32> -> vector<32x512xf32>
    %32 = tpu.iota {dimensions = array<i32: 0>} : vector<512x256xi32>
    %33 = tpu.iota {dimensions = array<i32: 1>} : vector<512x256xi32>
    %c7_i32 = arith.constant 7 : i32
    %34 = vector.broadcast %c7_i32 : i32 to vector<512x256xi32>
    %35 = arith.andi %32, %34 : vector<512x256xi32>
    %c7_i32_9 = arith.constant 7 : i32
    %36 = vector.broadcast %c7_i32_9 : i32 to vector<512x256xi32>
    %37 = arith.andi %33, %36 : vector<512x256xi32>
    %38 = arith.cmpi eq, %35, %37 : vector<512x256xi32>
    %c3_i32 = arith.constant 3 : i32
    %39 = vector.broadcast %c3_i32 : i32 to vector<512x256xi32>
    %40 = arith.shrsi %32, %39 : vector<512x256xi32>
    %c3_i32_10 = arith.constant 3 : i32
    %41 = vector.broadcast %c3_i32_10 : i32 to vector<512x256xi32>
    %42 = arith.shrsi %33, %41 : vector<512x256xi32>
    %c2_i32_11 = arith.constant 2 : i32
    %43 = vector.broadcast %c2_i32_11 : i32 to vector<512x256xi32>
    %44 = arith.muli %43, %42 : vector<512x256xi32>
    %45 = arith.cmpi eq, %40, %44 : vector<512x256xi32>
    %46 = arith.andi %38, %45 : vector<512x256xi1>
    %47 = arith.extui %46 : vector<512x256xi1> to vector<512x256xi32>
    %48 = arith.sitofp %47 : vector<512x256xi32> to vector<512x256xf32>
    %cst_12 = arith.constant dense<0.000000e+00> : vector<32x256xf32>
    %49 = tpu.matmul %31, %48, %cst_12 {dimension_numbers = #tpu.dot_dimension_numbers<[1], [0], [0], [1], [0, 0, 1, 1], [], []>} : vector<32x512xf32>, vector<512x256xf32>, vector<32x256xf32> -> vector<32x256xf32>
    %cst_13 = arith.constant 0.000000e+00 : f32
    %50 = vector.broadcast %cst_13 : f32 to vector<1x256xf32>
    %51 = tpu.concatenate %50, %49, %50 in 0 : vector<1x256xf32>, vector<32x256xf32>, vector<1x256xf32> -> vector<34x256xf32>
    %52 = vector.extract_strided_slice %51 {offsets = [0, 0], sizes = [32, 256], strides = [1, 1]} : vector<34x256xf32> to vector<32x256xf32>
    %53 = vector.extract_strided_slice %51 {offsets = [1, 0], sizes = [32, 256], strides = [1, 1]} : vector<34x256xf32> to vector<32x256xf32>
    %54 = vector.extract_strided_slice %51 {offsets = [2, 0], sizes = [32, 256], strides = [1, 1]} : vector<34x256xf32> to vector<32x256xf32>
    %55 = tpu.concatenate %52, %53, %54 in 1 : vector<32x256xf32>, vector<32x256xf32>, vector<32x256xf32> -> vector<32x768xf32>
    %56 = arith.truncf %55 : vector<32x768xf32> to vector<32x768xbf16>
    %c0_14 = arith.constant 0 : index
    %c0_15 = arith.constant 0 : index
    %57 = vector.load %arg4[%c0_14, %c0_15] : memref<768x512xbf16, #tpu.memory_space<vmem>>, vector<768x512xbf16>
    %cst_16 = arith.constant dense<0.000000e+00> : vector<32x512xf32>
    %58 = tpu.matmul %56, %57, %cst_16 {dimension_numbers = #tpu.dot_dimension_numbers<[1], [0], [0], [1], [0, 0, 1, 1], [], []>} : vector<32x768xbf16>, vector<768x512xbf16>, vector<32x512xf32> -> vector<32x512xf32>
    %c0_17 = arith.constant 0 : index
    %c0_18 = arith.constant 0 : index
    %59 = vector.load %arg5[%c0_17, %c0_18] : memref<1x512xf32, #tpu.memory_space<vmem>>, vector<1x512xf32>
    %60 = vector.broadcast %59 : vector<1x512xf32> to vector<32x512xf32>
    %61 = arith.addf %58, %60 : vector<32x512xf32>
    %cst_19 = arith.constant 0.000000e+00 : f32
    %62 = vector.broadcast %cst_19 : f32 to vector<32x512xf32>
    %63 = arith.maximumf %61, %62 : vector<32x512xf32>
    %64 = vector.extract_strided_slice %63 {offsets = [1, 0], sizes = [31, 512], strides = [1, 1]} : vector<32x512xf32> to vector<31x512xf32>
    %65 = vector.extract_strided_slice %63 {offsets = [0, 0], sizes = [1, 512], strides = [1, 1]} : vector<32x512xf32> to vector<1x512xf32>
    %66 = tpu.concatenate %64, %65 in 0 : vector<31x512xf32>, vector<1x512xf32> -> vector<32x512xf32>
    %67 = arith.maximumf %63, %66 : vector<32x512xf32>
    %68 = vector.extract_strided_slice %67 {offsets = [0, 16], sizes = [32, 496], strides = [1, 1]} : vector<32x512xf32> to vector<32x496xf32>
    %69 = vector.extract_strided_slice %67 {offsets = [0, 0], sizes = [32, 16], strides = [1, 1]} : vector<32x512xf32> to vector<32x16xf32>
    %70 = tpu.concatenate %68, %69 in 1 : vector<32x496xf32>, vector<32x16xf32> -> vector<32x512xf32>
    %71 = arith.maximumf %67, %70 : vector<32x512xf32>
    %72 = tpu.iota {dimensions = array<i32: 0>} : vector<16x32xi32>
    %73 = tpu.iota {dimensions = array<i32: 1>} : vector<16x32xi32>
    %c2_i32_20 = arith.constant 2 : i32
    %74 = vector.broadcast %c2_i32_20 : i32 to vector<16x32xi32>
    %75 = arith.muli %74, %72 : vector<16x32xi32>
    %76 = arith.cmpi eq, %73, %75 : vector<16x32xi32>
    %77 = arith.extui %76 : vector<16x32xi1> to vector<16x32xi32>
    %78 = arith.sitofp %77 : vector<16x32xi32> to vector<16x32xf32>
    %cst_21 = arith.constant dense<0.000000e+00> : vector<16x512xf32>
    %79 = tpu.matmul %78, %71, %cst_21 {dimension_numbers = #tpu.dot_dimension_numbers<[1], [0], [0], [1], [0, 0, 1, 1], [], []>} : vector<16x32xf32>, vector<32x512xf32>, vector<16x512xf32> -> vector<16x512xf32>
    %80 = tpu.iota {dimensions = array<i32: 0>} : vector<512x256xi32>
    %81 = tpu.iota {dimensions = array<i32: 1>} : vector<512x256xi32>
    %c15_i32 = arith.constant 15 : i32
    %82 = vector.broadcast %c15_i32 : i32 to vector<512x256xi32>
    %83 = arith.andi %80, %82 : vector<512x256xi32>
    %c15_i32_22 = arith.constant 15 : i32
    %84 = vector.broadcast %c15_i32_22 : i32 to vector<512x256xi32>
    %85 = arith.andi %81, %84 : vector<512x256xi32>
    %86 = arith.cmpi eq, %83, %85 : vector<512x256xi32>
    %c4_i32 = arith.constant 4 : i32
    %87 = vector.broadcast %c4_i32 : i32 to vector<512x256xi32>
    %88 = arith.shrsi %80, %87 : vector<512x256xi32>
    %c4_i32_23 = arith.constant 4 : i32
    %89 = vector.broadcast %c4_i32_23 : i32 to vector<512x256xi32>
    %90 = arith.shrsi %81, %89 : vector<512x256xi32>
    %c2_i32_24 = arith.constant 2 : i32
    %91 = vector.broadcast %c2_i32_24 : i32 to vector<512x256xi32>
    %92 = arith.muli %91, %90 : vector<512x256xi32>
    %93 = arith.cmpi eq, %88, %92 : vector<512x256xi32>
    %94 = arith.andi %86, %93 : vector<512x256xi1>
    %95 = arith.extui %94 : vector<512x256xi1> to vector<512x256xi32>
    %96 = arith.sitofp %95 : vector<512x256xi32> to vector<512x256xf32>
    %cst_25 = arith.constant dense<0.000000e+00> : vector<16x256xf32>
    %97 = tpu.matmul %79, %96, %cst_25 {dimension_numbers = #tpu.dot_dimension_numbers<[1], [0], [0], [1], [0, 0, 1, 1], [], []>} : vector<16x512xf32>, vector<512x256xf32>, vector<16x256xf32> -> vector<16x256xf32>
    %cst_26 = arith.constant 0.000000e+00 : f32
    %98 = vector.broadcast %cst_26 : f32 to vector<1x256xf32>
    %99 = tpu.concatenate %98, %97, %98 in 0 : vector<1x256xf32>, vector<16x256xf32>, vector<1x256xf32> -> vector<18x256xf32>
    %100 = vector.extract_strided_slice %99 {offsets = [0, 0], sizes = [16, 256], strides = [1, 1]} : vector<18x256xf32> to vector<16x256xf32>
    %101 = vector.extract_strided_slice %99 {offsets = [1, 0], sizes = [16, 256], strides = [1, 1]} : vector<18x256xf32> to vector<16x256xf32>
    %102 = vector.extract_strided_slice %99 {offsets = [2, 0], sizes = [16, 256], strides = [1, 1]} : vector<18x256xf32> to vector<16x256xf32>
    %103 = tpu.concatenate %100, %101, %102 in 1 : vector<16x256xf32>, vector<16x256xf32>, vector<16x256xf32> -> vector<16x768xf32>
    %104 = arith.truncf %103 : vector<16x768xf32> to vector<16x768xbf16>
    %c0_27 = arith.constant 0 : index
    %c0_28 = arith.constant 0 : index
    %105 = vector.load %arg6[%c0_27, %c0_28] : memref<768x512xbf16, #tpu.memory_space<vmem>>, vector<768x512xbf16>
    %cst_29 = arith.constant dense<0.000000e+00> : vector<16x512xf32>
    %106 = tpu.matmul %104, %105, %cst_29 {dimension_numbers = #tpu.dot_dimension_numbers<[1], [0], [0], [1], [0, 0, 1, 1], [], []>} : vector<16x768xbf16>, vector<768x512xbf16>, vector<16x512xf32> -> vector<16x512xf32>
    %c0_30 = arith.constant 0 : index
    %c0_31 = arith.constant 0 : index
    %107 = vector.load %arg7[%c0_30, %c0_31] : memref<1x512xf32, #tpu.memory_space<vmem>>, vector<1x512xf32>
    %108 = vector.broadcast %107 : vector<1x512xf32> to vector<16x512xf32>
    %109 = arith.addf %106, %108 : vector<16x512xf32>
    %cst_32 = arith.constant 0.000000e+00 : f32
    %110 = vector.broadcast %cst_32 : f32 to vector<16x512xf32>
    %111 = arith.maximumf %109, %110 : vector<16x512xf32>
    %112 = vector.extract_strided_slice %111 {offsets = [1, 0], sizes = [15, 512], strides = [1, 1]} : vector<16x512xf32> to vector<15x512xf32>
    %113 = vector.extract_strided_slice %111 {offsets = [0, 0], sizes = [1, 512], strides = [1, 1]} : vector<16x512xf32> to vector<1x512xf32>
    %114 = tpu.concatenate %112, %113 in 0 : vector<15x512xf32>, vector<1x512xf32> -> vector<16x512xf32>
    %115 = arith.maximumf %111, %114 : vector<16x512xf32>
    %116 = vector.extract_strided_slice %115 {offsets = [0, 32], sizes = [16, 480], strides = [1, 1]} : vector<16x512xf32> to vector<16x480xf32>
    %117 = vector.extract_strided_slice %115 {offsets = [0, 0], sizes = [16, 32], strides = [1, 1]} : vector<16x512xf32> to vector<16x32xf32>
    %118 = tpu.concatenate %116, %117 in 1 : vector<16x480xf32>, vector<16x32xf32> -> vector<16x512xf32>
    %119 = arith.maximumf %115, %118 : vector<16x512xf32>
    %120 = tpu.iota {dimensions = array<i32: 0>} : vector<8x16xi32>
    %121 = tpu.iota {dimensions = array<i32: 1>} : vector<8x16xi32>
    %c2_i32_33 = arith.constant 2 : i32
    %122 = vector.broadcast %c2_i32_33 : i32 to vector<8x16xi32>
    %123 = arith.muli %122, %120 : vector<8x16xi32>
    %124 = arith.cmpi eq, %121, %123 : vector<8x16xi32>
    %125 = arith.extui %124 : vector<8x16xi1> to vector<8x16xi32>
    %126 = arith.sitofp %125 : vector<8x16xi32> to vector<8x16xf32>
    %cst_34 = arith.constant dense<0.000000e+00> : vector<8x512xf32>
    %127 = tpu.matmul %126, %119, %cst_34 {dimension_numbers = #tpu.dot_dimension_numbers<[1], [0], [0], [1], [0, 0, 1, 1], [], []>} : vector<8x16xf32>, vector<16x512xf32>, vector<8x512xf32> -> vector<8x512xf32>
    %128 = tpu.iota {dimensions = array<i32: 0>} : vector<512x256xi32>
    %129 = tpu.iota {dimensions = array<i32: 1>} : vector<512x256xi32>
    %c31_i32 = arith.constant 31 : i32
    %130 = vector.broadcast %c31_i32 : i32 to vector<512x256xi32>
    %131 = arith.andi %128, %130 : vector<512x256xi32>
    %c31_i32_35 = arith.constant 31 : i32
    %132 = vector.broadcast %c31_i32_35 : i32 to vector<512x256xi32>
    %133 = arith.andi %129, %132 : vector<512x256xi32>
    %134 = arith.cmpi eq, %131, %133 : vector<512x256xi32>
    %c5_i32 = arith.constant 5 : i32
    %135 = vector.broadcast %c5_i32 : i32 to vector<512x256xi32>
    %136 = arith.shrsi %128, %135 : vector<512x256xi32>
    %c5_i32_36 = arith.constant 5 : i32
    %137 = vector.broadcast %c5_i32_36 : i32 to vector<512x256xi32>
    %138 = arith.shrsi %129, %137 : vector<512x256xi32>
    %c2_i32_37 = arith.constant 2 : i32
    %139 = vector.broadcast %c2_i32_37 : i32 to vector<512x256xi32>
    %140 = arith.muli %139, %138 : vector<512x256xi32>
    %141 = arith.cmpi eq, %136, %140 : vector<512x256xi32>
    %142 = arith.andi %134, %141 : vector<512x256xi1>
    %143 = arith.extui %142 : vector<512x256xi1> to vector<512x256xi32>
    %144 = arith.sitofp %143 : vector<512x256xi32> to vector<512x256xf32>
    %cst_38 = arith.constant dense<0.000000e+00> : vector<8x256xf32>
    %145 = tpu.matmul %127, %144, %cst_38 {dimension_numbers = #tpu.dot_dimension_numbers<[1], [0], [0], [1], [0, 0, 1, 1], [], []>} : vector<8x512xf32>, vector<512x256xf32>, vector<8x256xf32> -> vector<8x256xf32>
    %c0_39 = arith.constant 0 : index
    %c0_40 = arith.constant 0 : index
    %c0_41 = arith.constant 0 : index
    %146 = vector.load %arg8[%c0_39, %c0_40, %c0_41] : memref<1x32x256xf32, #tpu.memory_space<vmem>>, vector<1x32x256xf32>
    %147 = vector.shape_cast %146 : vector<1x32x256xf32> to vector<32x256xf32>
    %148 = arith.mulf %49, %147 : vector<32x256xf32>
    %cst_42 = arith.constant dense<0.000000e+00> : vector<32xf32>
    %149 = vector.multi_reduction <add>, %148, %cst_42 [1] : vector<32x256xf32> to vector<32xf32>
    %150 = vector.shape_cast %149 : vector<32xf32> to vector<32x1xf32>
    %cst_43 = arith.constant dense<0.000000e+00> : vector<1xf32>
    %151 = vector.multi_reduction <add>, %150, %cst_43 [0] : vector<32x1xf32> to vector<1xf32>
    %152 = vector.shape_cast %151 : vector<1xf32> to vector<1x1xf32>
    %c0_44 = arith.constant 0 : index
    %c0_45 = arith.constant 0 : index
    %153 = vector.load %arg9[%c0_44, %c0_45] : memref<1x1xf32, #tpu.memory_space<vmem>>, vector<1x1xf32>
    %154 = arith.addf %152, %153 : vector<1x1xf32>
    %c0_46 = arith.constant 0 : index
    %c0_47 = arith.constant 0 : index
    %c0_48 = arith.constant 0 : index
    %155 = vector.load %arg10[%c0_46, %c0_47, %c0_48] : memref<1x16x256xf32, #tpu.memory_space<vmem>>, vector<1x16x256xf32>
    %156 = vector.shape_cast %155 : vector<1x16x256xf32> to vector<16x256xf32>
    %157 = arith.mulf %97, %156 : vector<16x256xf32>
    %cst_49 = arith.constant dense<0.000000e+00> : vector<16xf32>
    %158 = vector.multi_reduction <add>, %157, %cst_49 [1] : vector<16x256xf32> to vector<16xf32>
    %159 = vector.shape_cast %158 : vector<16xf32> to vector<16x1xf32>
    %cst_50 = arith.constant dense<0.000000e+00> : vector<1xf32>
    %160 = vector.multi_reduction <add>, %159, %cst_50 [0] : vector<16x1xf32> to vector<1xf32>
    %161 = vector.shape_cast %160 : vector<1xf32> to vector<1x1xf32>
    %c0_51 = arith.constant 0 : index
    %c0_52 = arith.constant 0 : index
    %162 = vector.load %arg11[%c0_51, %c0_52] : memref<1x1xf32, #tpu.memory_space<vmem>>, vector<1x1xf32>
    %163 = arith.addf %161, %162 : vector<1x1xf32>
    %c0_53 = arith.constant 0 : index
    %c0_54 = arith.constant 0 : index
    %c0_55 = arith.constant 0 : index
    %164 = vector.load %arg12[%c0_53, %c0_54, %c0_55] : memref<1x8x256xf32, #tpu.memory_space<vmem>>, vector<1x8x256xf32>
    %165 = vector.shape_cast %164 : vector<1x8x256xf32> to vector<8x256xf32>
    %166 = arith.mulf %145, %165 : vector<8x256xf32>
    %cst_56 = arith.constant dense<0.000000e+00> : vector<8xf32>
    %167 = vector.multi_reduction <add>, %166, %cst_56 [1] : vector<8x256xf32> to vector<8xf32>
    %168 = vector.shape_cast %167 : vector<8xf32> to vector<8x1xf32>
    %cst_57 = arith.constant dense<0.000000e+00> : vector<1xf32>
    %169 = vector.multi_reduction <add>, %168, %cst_57 [0] : vector<8x1xf32> to vector<1xf32>
    %170 = vector.shape_cast %169 : vector<1xf32> to vector<1x1xf32>
    %c0_58 = arith.constant 0 : index
    %c0_59 = arith.constant 0 : index
    %171 = vector.load %arg13[%c0_58, %c0_59] : memref<1x1xf32, #tpu.memory_space<vmem>>, vector<1x1xf32>
    %172 = arith.addf %170, %171 : vector<1x1xf32>
    %173 = vector.extract_strided_slice %145 {offsets = [0, 0], sizes = [1, 256], strides = [1, 1]} : vector<8x256xf32> to vector<1x256xf32>
    %174 = vector.extract_strided_slice %145 {offsets = [1, 0], sizes = [1, 256], strides = [1, 1]} : vector<8x256xf32> to vector<1x256xf32>
    %175 = vector.extract_strided_slice %145 {offsets = [2, 0], sizes = [1, 256], strides = [1, 1]} : vector<8x256xf32> to vector<1x256xf32>
    %176 = vector.extract_strided_slice %145 {offsets = [3, 0], sizes = [1, 256], strides = [1, 1]} : vector<8x256xf32> to vector<1x256xf32>
    %177 = vector.extract_strided_slice %145 {offsets = [4, 0], sizes = [1, 256], strides = [1, 1]} : vector<8x256xf32> to vector<1x256xf32>
    %178 = vector.extract_strided_slice %145 {offsets = [5, 0], sizes = [1, 256], strides = [1, 1]} : vector<8x256xf32> to vector<1x256xf32>
    %179 = vector.extract_strided_slice %145 {offsets = [6, 0], sizes = [1, 256], strides = [1, 1]} : vector<8x256xf32> to vector<1x256xf32>
    %180 = vector.extract_strided_slice %145 {offsets = [7, 0], sizes = [1, 256], strides = [1, 1]} : vector<8x256xf32> to vector<1x256xf32>
    %181 = tpu.concatenate %173, %174, %175, %176, %177, %178, %179, %180 in 1 : vector<1x256xf32>, vector<1x256xf32>, vector<1x256xf32>, vector<1x256xf32>, vector<1x256xf32>, vector<1x256xf32>, vector<1x256xf32>, vector<1x256xf32> -> vector<1x2048xf32>
    %182 = arith.truncf %181 : vector<1x2048xf32> to vector<1x2048xbf16>
    %c0_60 = arith.constant 0 : index
    %c0_61 = arith.constant 0 : index
    %183 = vector.load %arg14[%c0_60, %c0_61] : memref<2048x64xbf16, #tpu.memory_space<vmem>>, vector<2048x64xbf16>
    %cst_62 = arith.constant dense<0.000000e+00> : vector<1x64xf32>
    %184 = tpu.matmul %182, %183, %cst_62 {dimension_numbers = #tpu.dot_dimension_numbers<[1], [0], [0], [1], [0, 0, 1, 1], [], []>} : vector<1x2048xbf16>, vector<2048x64xbf16>, vector<1x64xf32> -> vector<1x64xf32>
    %c0_63 = arith.constant 0 : index
    %c0_64 = arith.constant 0 : index
    %185 = vector.load %arg15[%c0_63, %c0_64] : memref<1x64xf32, #tpu.memory_space<vmem>>, vector<1x64xf32>
    %186 = arith.addf %184, %185 : vector<1x64xf32>
    %cst_65 = arith.constant 0.000000e+00 : f32
    %187 = vector.broadcast %cst_65 : f32 to vector<1x64xf32>
    %188 = arith.maximumf %186, %187 : vector<1x64xf32>
    %c0_66 = arith.constant 0 : index
    %c0_67 = arith.constant 0 : index
    %189 = vector.load %arg16[%c0_66, %c0_67] : memref<64x17xf32, #tpu.memory_space<vmem>>, vector<64x17xf32>
    %cst_68 = arith.constant dense<0.000000e+00> : vector<1x17xf32>
    %190 = tpu.matmul %188, %189, %cst_68 {dimension_numbers = #tpu.dot_dimension_numbers<[1], [0], [0], [1], [0, 0, 1, 1], [], []>} : vector<1x64xf32>, vector<64x17xf32>, vector<1x17xf32> -> vector<1x17xf32>
    %191 = vector.extract_strided_slice %190 {offsets = [0, 0], sizes = [1, 1], strides = [1, 1]} : vector<1x17xf32> to vector<1x1xf32>
    %c0_69 = arith.constant 0 : index
    %c0_70 = arith.constant 0 : index
    %192 = vector.load %arg17[%c0_69, %c0_70] : memref<1x1xf32, #tpu.memory_space<vmem>>, vector<1x1xf32>
    %193 = arith.addf %191, %192 : vector<1x1xf32>
    %194 = vector.extract_strided_slice %190 {offsets = [0, 1], sizes = [1, 16], strides = [1, 1]} : vector<1x17xf32> to vector<1x16xf32>
    %c0_71 = arith.constant 0 : index
    %c0_72 = arith.constant 0 : index
    %195 = vector.load %arg18[%c0_71, %c0_72] : memref<1x16xf32, #tpu.memory_space<vmem>>, vector<1x16xf32>
    %196 = arith.addf %194, %195 : vector<1x16xf32>
    %cst_73 = arith.constant 0.000000e+00 : f32
    %197 = vector.broadcast %cst_73 : f32 to vector<1x16xf32>
    %198 = arith.maximumf %196, %197 : vector<1x16xf32>
    %c0_74 = arith.constant 0 : index
    %c0_75 = arith.constant 0 : index
    %199 = vector.load %arg19[%c0_74, %c0_75] : memref<16x4xf32, #tpu.memory_space<vmem>>, vector<16x4xf32>
    %cst_76 = arith.constant dense<0.000000e+00> : vector<1x4xf32>
    %200 = tpu.matmul %198, %199, %cst_76 {dimension_numbers = #tpu.dot_dimension_numbers<[1], [0], [0], [1], [0, 0, 1, 1], [], []>} : vector<1x16xf32>, vector<16x4xf32>, vector<1x4xf32> -> vector<1x4xf32>
    %201 = vector.extract_strided_slice %200 {offsets = [0, 0], sizes = [1, 1], strides = [1, 1]} : vector<1x4xf32> to vector<1x1xf32>
    %c0_77 = arith.constant 0 : index
    %c0_78 = arith.constant 0 : index
    %202 = vector.load %arg20[%c0_77, %c0_78] : memref<1x1xf32, #tpu.memory_space<vmem>>, vector<1x1xf32>
    %203 = arith.addf %201, %202 : vector<1x1xf32>
    %204 = vector.extract_strided_slice %200 {offsets = [0, 1], sizes = [1, 3], strides = [1, 1]} : vector<1x4xf32> to vector<1x3xf32>
    %205 = tpu.concatenate %154, %163, %172, %193, %203 in 1 : vector<1x1xf32>, vector<1x1xf32>, vector<1x1xf32>, vector<1x1xf32>, vector<1x1xf32> -> vector<1x5xf32>
    %c0_79 = arith.constant 0 : index
    %c0_80 = arith.constant 0 : index
    %c0_81 = arith.constant 0 : index
    %206 = vector.load %arg24[%c0_79, %c0_80, %c0_81] : memref<1x1x5xf32, #tpu.memory_space<vmem>>, vector<1x1x5xf32>
    %207 = vector.shape_cast %206 : vector<1x1x5xf32> to vector<1x5xf32>
    %208 = vector.shape_cast %205 : vector<1x5xf32> to vector<1x1x5xf32>
    tpu.vector_store %arg24[%c0_79, %c0_80, %c0_81], %208 {strides = array<i32>} : memref<1x1x5xf32, #tpu.memory_space<vmem>>, vector<1x1x5xf32>,
    %c0_82 = arith.constant 0 : index
    %c0_83 = arith.constant 0 : index
    %209 = vector.load %arg21[%c0_82, %c0_83] : memref<5x3xf32, #tpu.memory_space<vmem>>, vector<5x3xf32>
    %cst_84 = arith.constant dense<0.000000e+00> : vector<1x3xf32>
    %210 = tpu.matmul %205, %209, %cst_84 {dimension_numbers = #tpu.dot_dimension_numbers<[1], [0], [0], [1], [0, 0, 1, 1], [], []>} : vector<1x5xf32>, vector<5x3xf32>, vector<1x3xf32> -> vector<1x3xf32>
    %211 = arith.addf %204, %210 : vector<1x3xf32>
    %c0_85 = arith.constant 0 : index
    %c0_86 = arith.constant 0 : index
    %212 = vector.load %arg22[%c0_85, %c0_86] : memref<1x3xf32, #tpu.memory_space<vmem>>, vector<1x3xf32>
    %213 = arith.addf %211, %212 : vector<1x3xf32>
    %c0_87 = arith.constant 0 : index
    %c0_88 = arith.constant 0 : index
    %c0_89 = arith.constant 0 : index
    %214 = vector.load %arg23[%c0_87, %c0_88, %c0_89] : memref<1x1x3xf32, #tpu.memory_space<vmem>>, vector<1x1x3xf32>
    %215 = vector.shape_cast %214 : vector<1x1x3xf32> to vector<1x3xf32>
    %216 = vector.shape_cast %213 : vector<1x3xf32> to vector<1x1x3xf32>
    tpu.vector_store %arg23[%c0_87, %c0_88, %c0_89], %216 {strides = array<i32>} : memref<1x1x3xf32, #tpu.memory_space<vmem>>, vector<1x1x3xf32>,
    return
  }
  func.func @transform_0(%arg0: i32) -> (i32, i32, i32) {
    %c0_i32 = arith.constant 0 : i32
    %c0_i32_0 = arith.constant 0 : i32
    %c0_i32_1 = arith.constant 0 : i32
    return %arg0, %c0_i32, %c0_i32_0 : i32, i32, i32
  }
  func.func @transform_1(%arg0: i32) -> (i32, i32) {
    %c0_i32 = arith.constant 0 : i32
    %c0_i32_0 = arith.constant 0 : i32
    %c0_i32_1 = arith.constant 0 : i32
    return %c0_i32, %c0_i32_0 : i32, i32
  }
  func.func @transform_2(%arg0: i32) -> (i32, i32) {
    %c0_i32 = arith.constant 0 : i32
    %c0_i32_0 = arith.constant 0 : i32
    %c0_i32_1 = arith.constant 0 : i32
    return %c0_i32, %c0_i32_0 : i32, i32
  }
  func.func @transform_3(%arg0: i32) -> (i32, i32) {
    %c0_i32 = arith.constant 0 : i32
    %c0_i32_0 = arith.constant 0 : i32
    %c0_i32_1 = arith.constant 0 : i32
    return %c0_i32, %c0_i32_0 : i32, i32
  }
  func.func @transform_4(%arg0: i32) -> (i32, i32) {
    %c0_i32 = arith.constant 0 : i32
    %c0_i32_0 = arith.constant 0 : i32
    %c0_i32_1 = arith.constant 0 : i32
    return %c0_i32, %c0_i32_0 : i32, i32
  }
  func.func @transform_5(%arg0: i32) -> (i32, i32) {
    %c0_i32 = arith.constant 0 : i32
    %c0_i32_0 = arith.constant 0 : i32
    %c0_i32_1 = arith.constant 0 : i32
    return %c0_i32, %c0_i32_0 : i32, i32
  }
  func.func @transform_6(%arg0: i32) -> (i32, i32) {
    %c0_i32 = arith.constant 0 : i32
    %c0_i32_0 = arith.constant 0 : i32
    %c0_i32_1 = arith.constant 0 : i32
    return %c0_i32, %c0_i32_0 : i32, i32
  }
  func.func @transform_7(%arg0: i32) -> (i32, i32, i32) {
    %c0_i32 = arith.constant 0 : i32
    %c0_i32_0 = arith.constant 0 : i32
    %c0_i32_1 = arith.constant 0 : i32
    %c0_i32_2 = arith.constant 0 : i32
    return %c0_i32, %c0_i32_0, %c0_i32_1 : i32, i32, i32
  }
  func.func @transform_8(%arg0: i32) -> (i32, i32) {
    %c0_i32 = arith.constant 0 : i32
    %c0_i32_0 = arith.constant 0 : i32
    %c0_i32_1 = arith.constant 0 : i32
    return %c0_i32, %c0_i32_0 : i32, i32
  }
  func.func @transform_9(%arg0: i32) -> (i32, i32, i32) {
    %c0_i32 = arith.constant 0 : i32
    %c0_i32_0 = arith.constant 0 : i32
    %c0_i32_1 = arith.constant 0 : i32
    %c0_i32_2 = arith.constant 0 : i32
    return %c0_i32, %c0_i32_0, %c0_i32_1 : i32, i32, i32
  }
  func.func @transform_10(%arg0: i32) -> (i32, i32) {
    %c0_i32 = arith.constant 0 : i32
    %c0_i32_0 = arith.constant 0 : i32
    %c0_i32_1 = arith.constant 0 : i32
    return %c0_i32, %c0_i32_0 : i32, i32
  }
  func.func @transform_11(%arg0: i32) -> (i32, i32, i32) {
    %c0_i32 = arith.constant 0 : i32
    %c0_i32_0 = arith.constant 0 : i32
    %c0_i32_1 = arith.constant 0 : i32
    %c0_i32_2 = arith.constant 0 : i32
    return %c0_i32, %c0_i32_0, %c0_i32_1 : i32, i32, i32
  }
  func.func @transform_12(%arg0: i32) -> (i32, i32) {
    %c0_i32 = arith.constant 0 : i32
    %c0_i32_0 = arith.constant 0 : i32
    %c0_i32_1 = arith.constant 0 : i32
    return %c0_i32, %c0_i32_0 : i32, i32
  }
  func.func @transform_13(%arg0: i32) -> (i32, i32) {
    %c0_i32 = arith.constant 0 : i32
    %c0_i32_0 = arith.constant 0 : i32
    %c0_i32_1 = arith.constant 0 : i32
    return %c0_i32, %c0_i32_0 : i32, i32
  }
  func.func @transform_14(%arg0: i32) -> (i32, i32) {
    %c0_i32 = arith.constant 0 : i32
    %c0_i32_0 = arith.constant 0 : i32
    %c0_i32_1 = arith.constant 0 : i32
    return %c0_i32, %c0_i32_0 : i32, i32
  }
  func.func @transform_15(%arg0: i32) -> (i32, i32) {
    %c0_i32 = arith.constant 0 : i32
    %c0_i32_0 = arith.constant 0 : i32
    %c0_i32_1 = arith.constant 0 : i32
    return %c0_i32, %c0_i32_0 : i32, i32
  }
  func.func @transform_16(%arg0: i32) -> (i32, i32) {
    %c0_i32 = arith.constant 0 : i32
    %c0_i32_0 = arith.constant 0 : i32
    %c0_i32_1 = arith.constant 0 : i32
    return %c0_i32, %c0_i32_0 : i32, i32
  }
  func.func @transform_17(%arg0: i32) -> (i32, i32) {
    %c0_i32 = arith.constant 0 : i32
    %c0_i32_0 = arith.constant 0 : i32
    %c0_i32_1 = arith.constant 0 : i32
    return %c0_i32, %c0_i32_0 : i32, i32
  }
  func.func @transform_18(%arg0: i32) -> (i32, i32) {
    %c0_i32 = arith.constant 0 : i32
    %c0_i32_0 = arith.constant 0 : i32
    %c0_i32_1 = arith.constant 0 : i32
    return %c0_i32, %c0_i32_0 : i32, i32
  }
  func.func @transform_19(%arg0: i32) -> (i32, i32) {
    %c0_i32 = arith.constant 0 : i32
    %c0_i32_0 = arith.constant 0 : i32
    %c0_i32_1 = arith.constant 0 : i32
    return %c0_i32, %c0_i32_0 : i32, i32
  }
  func.func @transform_20(%arg0: i32) -> (i32, i32) {
    %c0_i32 = arith.constant 0 : i32
    %c0_i32_0 = arith.constant 0 : i32
    %c0_i32_1 = arith.constant 0 : i32
    return %c0_i32, %c0_i32_0 : i32, i32
  }
  func.func @transform_21(%arg0: i32) -> (i32, i32) {
    %c0_i32 = arith.constant 0 : i32
    %c0_i32_0 = arith.constant 0 : i32
    %c0_i32_1 = arith.constant 0 : i32
    return %c0_i32, %c0_i32_0 : i32, i32
  }
  func.func @transform_22(%arg0: i32) -> (i32, i32, i32) {
    %c0_i32 = arith.constant 0 : i32
    %c0_i32_0 = arith.constant 0 : i32
    %c0_i32_1 = arith.constant 0 : i32
    return %arg0, %c0_i32, %c0_i32_0 : i32, i32, i32
  }
  func.func @transform_23(%arg0: i32) -> (i32, i32, i32) {
    %c0_i32 = arith.constant 0 : i32
    %c0_i32_0 = arith.constant 0 : i32
    %c0_i32_1 = arith.constant 0 : i32
    return %arg0, %c0_i32, %c0_i32_0 : i32, i32, i32
  }
}

</mosaic_0001>

<bundles_post_ra>
// kernel: tile.18
= control target key start
LH: loop header
LB: loop body
LE: loop exit
PB: predicated region body
PF: predicated region fallthrough
CT: control target
= control target key end

     0   :  { %s64_s0 = inlined_call_operand.vmem [shape: f32[8], index: 0, kind: input, shape index: {}]   ;;  %s65_s1 = inlined_call_operand.vmem [shape: f32[64,8], index: 1, kind: output, shape index: {}]  }
   0x1   :  { %v4_v0 = vld [vmem:[%s64_s0] ss:$0 sm:$0xff] }
   0x2   :  { %5 = vst [vmem:[%s65_s1] sm:$0xff] %v4_v0  ;;  %20 = vst [vmem:[%s65_s1 + $0x8] sm:$0xff] %v4_v0 }
   0x3   :  { %21 = vst [vmem:[%s65_s1 + $0x10] sm:$0xff] %v4_v0  ;;  %22 = vst [vmem:[%s65_s1 + $0x18] sm:$0xff] %v4_v0 }
   0x4   :  { %23 = vst [vmem:[%s65_s1 + $0x20] sm:$0xff] %v4_v0  ;;  %24 = vst [vmem:[%s65_s1 + $0x28] sm:$0xff] %v4_v0 }
   0x5   :  { %25 = vst [vmem:[%s65_s1 + $0x30] sm:$0xff] %v4_v0  ;;  %26 = vst [vmem:[%s65_s1 + $0x38] sm:$0xff] %v4_v0 }

// kernel: tile.19
= control target key start
LH: loop header
LB: loop body
LE: loop exit
PB: predicated region body
PF: predicated region fallthrough
CT: control target
= control target key end

     0   :  { %vm6_vm0 = vcmask 1043458   ;;  %s11_s6 = smov 3  ;;  %s14_s7 = smov 12  ;;  %vm8_vm1 = vcmask 64512   ;;  %vm20_vm2 = vcmask 1048512   ;;  %vm32_vm3 = vcmask 982912   ;;  %s412_s0 = inlined_call_operand.vmem [shape: f32[64,8], index: 0, kind: input, shape index: {}]   ;;  %s413_s1 = inlined_call_operand.vmem [shape: f32[1,512], index: 1, kind: output, shape index: {}]  }
   0x1   :  { %v215_v0 = vld [vmem:[%s412_s0 + $0xf] ss:$16 sm:%s11_s6]   ;;  %s35_s12 = smov 3  ;;  %s38_s15 = smov 12  ;;  %vm44_vm4 = vcmask 917312   ;;  %vm56_vm5 = vcmask 851712  }
   0x2   :  { %v216_v1 = vld [vmem:[%s412_s0 + $0xf] ss:$16 sm:%s14_s7]   ;;  %v219_v3 = vld [vmem:[%s412_s0 + $0xd] ss:$16 sm:%s35_s12]   ;;  %s263_s16 = smov 120   ;;  %s23_s19 = smov 3 }
   0x3   :  { %v17_v2 = vsel %vm6_vm0, %v216_v1, %v215_v0  ;;  %v220_v4 = vld [vmem:[%s412_s0 + $0xd] ss:$16 sm:%s38_s15]   ;;  %s26_s20 = smov 12  ;;  %v217_v6 = vld [vmem:[%s412_s0 + $0xe] ss:$16 sm:%s23_s19]   ;;  %s47_s25 = smov 3 }
   0x4   :  { %18 = vrot.lane.b32.xlu0 %v17_v2, %s263_s16  ;;  %v41_v5 = vsel %vm6_vm0, %v220_v4, %v219_v3  ;;  %v218_v7 = vld [vmem:[%s412_s0 + $0xe] ss:$16 sm:%s26_s20]   ;;  %s264_s26 = smov 104   ;;  %s50_s29 = smov 12  ;;  %vm68_vm6 = vcmask 786112   ;;  %vm80_vm7 = vcmask 720512  }
   0x5   :  { %42 = vrot.lane.b32.xlu1 %v41_v5, %s264_s26  ;;  %v29_v8 = vsel %vm6_vm0, %v218_v7, %v217_v6  ;;  %v221_v9 = vld [vmem:[%s412_s0 + $0xc] ss:$16 sm:%s47_s25]   ;;  %s59_s3 = smov 3  ;;  %s62_s4 = smov 12  ;;  %vm92_vm8 = vcmask 654912   ;;  %vm104_vm9 = vcmask 589312  }
   0x6   :  { %v222_v10 = vld [vmem:[%s412_s0 + $0xc] ss:$16 sm:%s50_s29]   ;;  %s265_s5 = smov 112   ;;  %v223_v12 = vld [vmem:[%s412_s0 + $0xb] ss:$16 sm:%s59_s3]   ;;  %s71_s8 = smov 3 }
   0x7   :  { %v53_v11 = vsel %vm6_vm0, %v222_v10, %v221_v9  ;;  %v224_v13 = vld [vmem:[%s412_s0 + $0xb] ss:$16 sm:%s62_s4]   ;;  %v225_v14 = vld [vmem:[%s412_s0 + $0xa] ss:$16 sm:%s71_s8]   ;;  %s74_s13 = smov 12  ;;  %s266_s14 = smov 96  }
   0x8   :  { %30 = vrot.lane.b32.xlu0 %v29_v8, %s265_s5  ;;  %v65_v15 = vsel %vm6_vm0, %v224_v13, %v223_v12  ;;  %v226_v16 = vld [vmem:[%s412_s0 + $0xa] ss:$16 sm:%s74_s13]   ;;  %s83_s17 = smov 3  ;;  %s86_s18 = smov 12  ;;  %vm116_vm10 = vcmask 523712   ;;  %vm128_vm11 = vcmask 458112  }
   0x9   :  { %54 = vrot.lane.b32.xlu1 %v53_v11, %s266_s14  ;;  %v77_v17 = vsel %vm6_vm0, %v226_v16, %v225_v14  ;;  %v227_v18 = vld [vmem:[%s412_s0 + $0x9] ss:$16 sm:%s83_s17]   ;;  %s95_s23 = smov 3  ;;  %s267_s24 = smov 88   ;;  %vm140_vm12 = vcmask 392512   ;;  %vm152_vm13 = vcmask 326912  }
   0xa   :  { %v228_v19 = vld [vmem:[%s412_s0 + $0x9] ss:$16 sm:%s86_s18]   ;;  %v229_v20 = vld [vmem:[%s412_s0 + $0x8] ss:$16 sm:%s95_s23]   ;;  %s98_s27 = smov 12  ;;  %s107_s30 = smov 3 }
   0xb   :  { %v89_v21 = vsel %vm6_vm0, %v228_v19, %v227_v18  ;;  %v230_v22 = vld [vmem:[%s412_s0 + $0x8] ss:$16 sm:%s98_s27]   ;;  %s110_s2 = smov 12  ;;  %s268_s3 = smov 80   ;;  %v231_v23 = vld [vmem:[%s412_s0 + $0x7] ss:$16 sm:%s107_s30]  }
   0xc   :  { %66 = vrot.lane.b32.xlu0 %v65_v15, %s267_s24  ;;  %s119_s6 = smov 3  ;;  %v101_v24 = vsel %vm6_vm0, %v230_v22, %v229_v20  ;;  %v232_v25 = vld [vmem:[%s412_s0 + $0x7] ss:$16 sm:%s110_s2]   ;;  %s122_s11 = smov 12  ;;  %vm164_vm14 = vcmask 261312   ;;  %vm176_vm15 = vcmask 195712  }
   0xd   :  { %78 = vrot.lane.b32.xlu1 %v77_v17, %s268_s3  ;;  %v233_v26 = vld [vmem:[%s412_s0 + $0x6] ss:$16 sm:%s119_s6]   ;;  %s269_s12 = smov 72   ;;  %s131_s15 = smov 3  ;;  %v113_v28 = vsel %vm6_vm0, %v232_v25, %v231_v23 }
   0xe   :  { %v234_v27 = vld [vmem:[%s412_s0 + $0x6] ss:$16 sm:%s122_s11]   ;;  %s134_s16 = smov 12  ;;  %v235_v29 = vld [vmem:[%s412_s0 + $0x5] ss:$16 sm:%s131_s15]   ;;  %s143_s19 = smov 3 }
   0xf   :  { %s270_s20 = smov 64   ;;  %v236_v30 = vld [vmem:[%s412_s0 + $0x5] ss:$16 sm:%s134_s16]   ;;  %s146_s23 = smov 12  ;;  %v125_v31 = vsel %vm6_vm0, %v234_v27, %v233_v26  ;;  %v237_v32 = vld [vmem:[%s412_s0 + $0x4] ss:$16 sm:%s143_s19]  }
  0x10   :  { %90 = vrot.lane.b32.xlu0 %v89_v21, %s269_s12  ;;  %s155_s26 = smov 3  ;;  %s158_s27 = smov 12  ;;  %v238_v33 = vld [vmem:[%s412_s0 + $0x4] ss:$16 sm:%s146_s23]   ;;  %v137_v34 = vsel %vm6_vm0, %v236_v30, %v235_v29 }
  0x11   :  { %102 = vrot.lane.b32.xlu1 %v101_v24, %s270_s20  ;;  %s271_s28 = smov 56   ;;  %s167_s2 = smov 3  ;;  %v239_v35 = vld [vmem:[%s412_s0 + $0x3] ss:$16 sm:%s155_s26]   ;;  %v149_v37 = vsel %vm6_vm0, %v238_v33, %v237_v32 }
  0x12   :  { %s170_s5 = smov 12  ;;  %s272_s6 = smov 48   ;;  %v240_v36 = vld [vmem:[%s412_s0 + $0x3] ss:$16 sm:%s158_s27]   ;;  %v241_v38 = vld [vmem:[%s412_s0 + $0x2] ss:$16 sm:%s167_s2]  }
  0x13   :  { %s179_s9 = smov 3  ;;  %v242_v39 = vld [vmem:[%s412_s0 + $0x2] ss:$16 sm:%s170_s5]   ;;  %s182_s14 = smov 12  ;;  %v161_v41 = vsel %vm6_vm0, %v240_v36, %v239_v35 }
  0x14   :  { %114 = vrot.lane.b32.xlu0 %v113_v28, %s271_s28  ;;  %s2_s15 = smov 3  ;;  %s273_s16 = smov 40   ;;  %v243_v42 = vld [vmem:[%s412_s0 + $0x1] ss:$16 sm:%s179_s9]   ;;  %v173_v46 = vsel %vm6_vm0, %v242_v39, %v241_v38 }
  0x15   :  { %126 = vrot.lane.b32.xlu1 %v125_v31, %s272_s6  ;;  %v3_v40 = vld [vmem:[%s412_s0] ss:$16 sm:%s2_s15]   ;;  %s4_s19 = smov 12  ;;  %s274_s24 = smov 32  }
  0x16   :  { %v5_v43 = vld [vmem:[%s412_s0] ss:$16 sm:%s4_s19]   ;;  %v244_v44 = vld [vmem:[%s412_s0 + $0x1] ss:$16 sm:%s182_s14]   ;;  %s275_s0 = smov 24   ;;  %s276_s27 = smov 16  }
  0x17   :  { %v7_v45 = vsel %vm6_vm0, %v5_v43, %v3_v40  ;;  %v185_v47 = vsel %vm6_vm0, %v244_v44, %v243_v42  ;;  %s277_s28 = smov 8   ;;  %vm188_vm0 = vcmask 130112  }
  0x18   :  { %138 = vrot.lane.b32.xlu0 %v137_v34, %s273_s16  ;;  %9 = vst.msk [vmem:[#allocation0] ss:$8 sm:$0xf] %vm8_vm1, %v7_v45  }
  0x19   :  { %150 = vrot.lane.b32.xlu1 %v149_v37, %s274_s24 }
  0x1c   :  { %162 = vrot.lane.b32.xlu0 %v161_v41, %s275_s0 }
  0x1d   :  { %174 = vrot.lane.b32.xlu1 %v173_v46, %s276_s27 }
  0x20   :  { %186 = vrot.lane.b32.xlu0 %v185_v47, %s277_s28 }
  0x76   :  { %v19_v48 = vpop.permute.xlu0 %18  }
  0x77   :  { %21 = vst.msk [vmem:[#allocation0] ss:$8 sm:$0xf] %vm20_vm2, %v19_v48   ;;  %v43_v49 = vpop.permute.xlu1 %42  }
  0x7a   :  { %v31_v50 = vpop.permute.xlu0 %30  }
  0x7b   :  { %33 = vst.msk [vmem:[#allocation0] ss:$8 sm:$0xf] %vm32_vm3, %v31_v50   ;;  %v55_v51 = vpop.permute.xlu1 %54  }
  0x7c   :  { %45 = vst.msk [vmem:[#allocation0] ss:$8 sm:$0xf] %vm44_vm4, %v43_v49  }
  0x7d   :  { %57 = vst.msk [vmem:[#allocation0] ss:$8 sm:$0xf] %vm56_vm5, %v55_v51  }
  0x7e   :  { %v67_v52 = vpop.permute.xlu0 %66  }
  0x7f   :  { %69 = vst.msk [vmem:[#allocation0] ss:$8 sm:$0xf] %vm68_vm6, %v67_v52   ;;  %v79_v53 = vpop.permute.xlu1 %78  }
  0x80   :  { %81 = vst.msk [vmem:[#allocation0] ss:$8 sm:$0xf] %vm80_vm7, %v79_v53  }
  0x82   :  { %v91_v54 = vpop.permute.xlu0 %90  }
  0x83   :  { %93 = vst.msk [vmem:[#allocation0] ss:$8 sm:$0xf] %vm92_vm8, %v91_v54   ;;  %v103_v55 = vpop.permute.xlu1 %102  }
  0x84   :  { %105 = vst.msk [vmem:[#allocation0] ss:$8 sm:$0xf] %vm104_vm9, %v103_v55  }
  0x86   :  { %v115_v56 = vpop.permute.xlu0 %114  }
  0x87   :  { %117 = vst.msk [vmem:[#allocation0] ss:$8 sm:$0xf] %vm116_vm10, %v115_v56   ;;  %v127_v57 = vpop.permute.xlu1 %126  }
  0x88   :  { %129 = vst.msk [vmem:[#allocation0] ss:$8 sm:$0xf] %vm128_vm11, %v127_v57  }
  0x8a   :  { %v139_v58 = vpop.permute.xlu0 %138  }
  0x8b   :  { %141 = vst.msk [vmem:[#allocation0] ss:$8 sm:$0xf] %vm140_vm12, %v139_v58   ;;  %v151_v59 = vpop.permute.xlu1 %150  }
  0x8c   :  { %153 = vst.msk [vmem:[#allocation0] ss:$8 sm:$0xf] %vm152_vm13, %v151_v59  }
  0x8e   :  { %v163_v60 = vpop.permute.xlu0 %162  }
  0x8f   :  { %165 = vst.msk [vmem:[#allocation0] ss:$8 sm:$0xf] %vm164_vm14, %v163_v60   ;;  %v175_v61 = vpop.permute.xlu1 %174  }
  0x90   :  { %177 = vst.msk [vmem:[#allocation0] ss:$8 sm:$0xf] %vm176_vm15, %v175_v61  }
  0x92   :  { %v187_v62 = vpop.permute.xlu0 %186  }
  0x93   :  { %189 = vst.msk [vmem:[#allocation0] ss:$8 sm:$0xf] %vm188_vm0, %v187_v62  }
  0x9a   :  { %v193_v63 = vld [vmem:[#allocation0] sm:$0x1]  ;;  %v197_v0 = vld [vmem:[#allocation0 + $0x8] sm:$0x1]  ;;  %v202_v1 = vld [vmem:[#allocation0 + $0x10] sm:$0x1] }
  0x9b   :  { %195 = vst [vmem:[%s413_s1] sm:$0x1] %v193_v63  ;;  %245 = vst [vmem:[%s413_s1 + $0x1] sm:$0x1] %v197_v0  ;;  %v208_v2 = vld [vmem:[#allocation0 + $0x18] sm:$0x1] }
  0x9c   :  { %246 = vst [vmem:[%s413_s1 + $0x2] sm:$0x1] %v202_v1  ;;  %247 = vst [vmem:[%s413_s1 + $0x3] sm:$0x1] %v208_v2 }

// kernel: tile.23
= control target key start
LH: loop header
LB: loop body
LE: loop exit
PB: predicated region body
PF: predicated region fallthrough
CT: control target
= control target key end

     0   :  { %s40_s0 = inlined_call_operand.vmem [shape: f32[16], index: 0, kind: input, shape index: {}]   ;;  %s41_s1 = inlined_call_operand.vmem [shape: f32[32,16], index: 1, kind: output, shape index: {}]  }
   0x1   :  { %v4_v0 = vld [vmem:[%s40_s0] ss:$0 sm:$0xff] }
   0x2   :  { %5 = vst [vmem:[%s41_s1] sm:$0xff] %v4_v0  ;;  %12 = vst [vmem:[%s41_s1 + $0x8] sm:$0xff] %v4_v0 }
   0x3   :  { %13 = vst [vmem:[%s41_s1 + $0x10] sm:$0xff] %v4_v0  ;;  %14 = vst [vmem:[%s41_s1 + $0x18] sm:$0xff] %v4_v0 }

// kernel: tile.24
= control target key start
LH: loop header
LB: loop body
LE: loop exit
PB: predicated region body
PF: predicated region fallthrough
CT: control target
= control target key end

     0   :  { %s89_s8 = smov 112   ;;  %s90_s11 = smov 80   ;;  %vm3_vm0 = vcmask 130048   ;;  %vm9_vm1 = vcmask 1048448   ;;  %vm15_vm2 = vcmask 917248   ;;  %vm21_vm3 = vcmask 786048   ;;  %s142_s0 = inlined_call_operand.vmem [shape: f32[32,16], index: 0, kind: input, shape index: {}]   ;;  %s143_s1 = inlined_call_operand.vmem [shape: f32[1,512], index: 1, kind: output, shape index: {}]  }
   0x1   :  { %v72_v0 = vld [vmem:[%s142_s0 + $0x7] ss:$8 sm:$0xf]   ;;  %v74_v1 = vld [vmem:[%s142_s0 + $0x5] ss:$8 sm:$0xf]  }
   0x2   :  { %7 = vrot.lane.b32.xlu0 %v72_v0, %s89_s8  ;;  %19 = vrot.lane.b32.xlu1 %v74_v1, %s90_s11  ;;  %v73_v2 = vld [vmem:[%s142_s0 + $0x6] ss:$8 sm:$0xf]   ;;  %v75_v3 = vld [vmem:[%s142_s0 + $0x4] ss:$8 sm:$0xf]  }
   0x3   :  { %s91_s16 = smov 96   ;;  %v2_v4 = vld [vmem:[%s142_s0] ss:$8 sm:$0xf]   ;;  %s92_s19 = smov 64   ;;  %vm27_vm4 = vcmask 654848  }
   0x4   :  { %v76_v5 = vld [vmem:[%s142_s0 + $0x3] ss:$8 sm:$0xf]   ;;  %4 = vst.msk [vmem:[#allocation0] ss:$8 sm:$0xf] %vm3_vm0, %v2_v4  }
   0x5   :  { %v77_v6 = vld [vmem:[%s142_s0 + $0x2] ss:$8 sm:$0xf]   ;;  %s93_s24 = smov 48   ;;  %s94_s25 = smov 32   ;;  %vm33_vm5 = vcmask 523648  }
   0x6   :  { %13 = vrot.lane.b32.xlu0 %v73_v2, %s91_s16  ;;  %25 = vrot.lane.b32.xlu1 %v75_v3, %s92_s19  ;;  %v78_v7 = vld [vmem:[%s142_s0 + $0x1] ss:$8 sm:$0xf]   ;;  %s95_s0 = smov 16   ;;  %vm39_vm6 = vcmask 392448   ;;  %vm45_vm7 = vcmask 261248  }
   0xa   :  { %31 = vrot.lane.b32.xlu0 %v76_v5, %s93_s24  ;;  %37 = vrot.lane.b32.xlu1 %v77_v6, %s94_s25 }
   0xe   :  { %43 = vrot.lane.b32.xlu0 %v78_v7, %s95_s0 }
  0x74   :  { %v8_v8 = vpop.permute.xlu0 %7   ;;  %v20_v9 = vpop.permute.xlu1 %19  }
  0x75   :  { %10 = vst.msk [vmem:[#allocation0] ss:$8 sm:$0xf] %vm9_vm1, %v8_v8  }
  0x78   :  { %v14_v10 = vpop.permute.xlu0 %13   ;;  %v26_v11 = vpop.permute.xlu1 %25  }
  0x79   :  { %16 = vst.msk [vmem:[#allocation0] ss:$8 sm:$0xf] %vm15_vm2, %v14_v10  }
  0x7a   :  { %22 = vst.msk [vmem:[#allocation0] ss:$8 sm:$0xf] %vm21_vm3, %v20_v9  }
  0x7b   :  { %28 = vst.msk [vmem:[#allocation0] ss:$8 sm:$0xf] %vm27_vm4, %v26_v11  }
  0x7c   :  { %v32_v12 = vpop.permute.xlu0 %31   ;;  %v38_v13 = vpop.permute.xlu1 %37  }
  0x7d   :  { %34 = vst.msk [vmem:[#allocation0] ss:$8 sm:$0xf] %vm33_vm5, %v32_v12  }
  0x7e   :  { %40 = vst.msk [vmem:[#allocation0] ss:$8 sm:$0xf] %vm39_vm6, %v38_v13  }
  0x80   :  { %v44_v14 = vpop.permute.xlu0 %43  }
  0x81   :  { %46 = vst.msk [vmem:[#allocation0] ss:$8 sm:$0xf] %vm45_vm7, %v44_v14  }
  0x88   :  { %v50_v15 = vld [vmem:[#allocation0] sm:$0x1]  ;;  %v54_v16 = vld [vmem:[#allocation0 + $0x8] sm:$0x1]  ;;  %v59_v17 = vld [vmem:[#allocation0 + $0x10] sm:$0x1] }
  0x89   :  { %52 = vst [vmem:[%s143_s1] sm:$0x1] %v50_v15  ;;  %79 = vst [vmem:[%s143_s1 + $0x1] sm:$0x1] %v54_v16  ;;  %v65_v18 = vld [vmem:[#allocation0 + $0x18] sm:$0x1] }
  0x8a   :  { %80 = vst [vmem:[%s143_s1 + $0x2] sm:$0x1] %v59_v17  ;;  %81 = vst [vmem:[%s143_s1 + $0x3] sm:$0x1] %v65_v18 }

// kernel: tile.28
= control target key start
LH: loop header
LB: loop body
LE: loop exit
PB: predicated region body
PF: predicated region fallthrough
CT: control target
= control target key end

     0   :  { %s28_s0 = inlined_call_operand.vmem [shape: f32[32], index: 0, kind: input, shape index: {}]   ;;  %s29_s1 = inlined_call_operand.vmem [shape: f32[16,32], index: 1, kind: output, shape index: {}]  }
   0x1   :  { %v4_v0 = vld [vmem:[%s28_s0] ss:$0 sm:$0xff] }
   0x2   :  { %5 = vst [vmem:[%s29_s1] sm:$0xff] %v4_v0  ;;  %8 = vst [vmem:[%s29_s1 + $0x8] sm:$0xff] %v4_v0 }

// kernel: tile.29
= control target key start
LH: loop header
LB: loop body
LE: loop exit
PB: predicated region body
PF: predicated region fallthrough
CT: control target
= control target key end

     0   :  { %s57_s8 = smov 96   ;;  %vm3_vm0 = vcmask 261120   ;;  %s59_s15 = smov 64   ;;  %vm9_vm1 = vcmask 1048320   ;;  %vm15_vm2 = vcmask 785920   ;;  %vm21_vm3 = vcmask 523520   ;;  %s94_s0 = inlined_call_operand.vmem [shape: f32[16,32], index: 0, kind: input, shape index: {}]   ;;  %s95_s1 = inlined_call_operand.vmem [shape: f32[1,512], index: 1, kind: output, shape index: {}]  }
   0x1   :  { %v48_v0 = vld [vmem:[%s94_s0 + $0x3] ss:$4 sm:$0xf]   ;;  %v49_v1 = vld [vmem:[%s94_s0 + $0x2] ss:$4 sm:$0xf]  }
   0x2   :  { %7 = vrot.lane.b32.xlu0 %v48_v0, %s57_s8  ;;  %v50_v2 = vld [vmem:[%s94_s0 + $0x1] ss:$4 sm:$0xf]   ;;  %v2_v3 = vld [vmem:[%s94_s0] ss:$4 sm:$0xf]  }
   0x3   :  { %s58_s0 = smov 32   ;;  %4 = vst.msk [vmem:[#allocation0] ss:$8 sm:$0xf] %vm3_vm0, %v2_v3  }
   0x4   :  { %19 = vrot.lane.b32.xlu1 %v50_v2, %s58_s0 }
   0x6   :  { %13 = vrot.lane.b32.xlu0 %v49_v1, %s59_s15 }
  0x74   :  { %v8_v4 = vpop.permute.xlu0 %7  }
  0x75   :  { %10 = vst.msk [vmem:[#allocation0] ss:$8 sm:$0xf] %vm9_vm1, %v8_v4  }
  0x76   :  { %v20_v5 = vpop.permute.xlu1 %19  }
  0x78   :  { %v14_v6 = vpop.permute.xlu0 %13  }
  0x79   :  { %16 = vst.msk [vmem:[#allocation0] ss:$8 sm:$0xf] %vm15_vm2, %v14_v6  }
  0x7a   :  { %22 = vst.msk [vmem:[#allocation0] ss:$8 sm:$0xf] %vm21_vm3, %v20_v5  }
  0x81   :  { %v26_v7 = vld [vmem:[#allocation0] sm:$0x1]  ;;  %v30_v8 = vld [vmem:[#allocation0 + $0x8] sm:$0x1]  ;;  %v35_v9 = vld [vmem:[#allocation0 + $0x10] sm:$0x1] }
  0x82   :  { %28 = vst [vmem:[%s95_s1] sm:$0x1] %v26_v7  ;;  %51 = vst [vmem:[%s95_s1 + $0x1] sm:$0x1] %v30_v8  ;;  %v41_v10 = vld [vmem:[#allocation0 + $0x18] sm:$0x1] }
  0x83   :  { %52 = vst [vmem:[%s95_s1 + $0x2] sm:$0x1] %v35_v9  ;;  %53 = vst [vmem:[%s95_s1 + $0x3] sm:$0x1] %v41_v10 }

// kernel: _lambda_.1
= control target key start
LH: loop header
LB: loop body
LE: loop exit
PB: predicated region body
PF: predicated region fallthrough
CT: control target
= control target key end

     0   :  { %s27110_s0 = inlined_call_operand.vmem [shape: f32[2,64,192], index: 0, kind: input, shape index: {}]   ;;  %s27111_s1 = inlined_call_operand.vmem [shape: bf16[576,512], index: 1, kind: input, shape index: {}]   ;;  %s27112_s2 = inlined_call_operand.vmem [shape: f32[1,512], index: 2, kind: input, shape index: {}]   ;;  %s27113_s3 = inlined_call_operand.vmem [shape: bf16[768,512], index: 3, kind: input, shape index: {}]   ;;  %s27114_s4 = inlined_call_operand.vmem [shape: f32[1,512], index: 4, kind: input, shape index: {}]   ;;  %s27115_s5 = inlined_call_operand.vmem [shape: bf16[768,512], index: 5, kind: input, shape index: {}]   ;;  %s27116_s6 = inlined_call_operand.vmem [shape: f32[1,512], index: 6, kind: input, shape index: {}]   ;;  %s27117_s7 = inlined_call_operand.vmem [shape: f32[1,32,256], index: 7, kind: input, shape index: {}]   ;;  %s27118_s8 = inlined_call_operand.<no memory space> [shape: f32[1,1], index: 8, kind: input, shape index: {}]   ;;  %s27119_s9 = inlined_call_operand.vmem [shape: f32[1,16,256], index: 9, kind: input, shape index: {}]   ;;  %s27120_s11 = inlined_call_operand.vmem [shape: f32[1,8,256], index: 11, kind: input, shape index: {}]   ;;  %s27121_s13 = inlined_call_operand.vmem [shape: bf16[2048,64], index: 13, kind: input, shape index: {}]   ;;  %s27122_s14 = inlined_call_operand.vmem [shape: f32[1,64], index: 14, kind: input, shape index: {}]   ;;  %s27123_s15 = inlined_call_operand.vmem [shape: f32[64,17], index: 15, kind: input, shape index: {}]   ;;  %s27124_s17 = inlined_call_operand.vmem [shape: f32[1,16], index: 17, kind: input, shape index: {}]   ;;  %s27125_s18 = inlined_call_operand.vmem [shape: f32[16,4], index: 18, kind: input, shape index: {}]   ;;  %s27126_s20 = inlined_call_operand.vmem [shape: f32[5,3], index: 20, kind: input, shape index: {}]   ;;  %s27127_s21 = inlined_call_operand.vmem [shape: f32[1,3], index: 21, kind: input, shape index: {}]   ;;  %s27128_s22 = inlined_call_operand.hbm [shape: f32[2,1,3], index: 22, kind: output, shape index: {0}]   ;;  %s27129_s23 = inlined_call_operand.hbm [shape: f32[2,1,5], index: 23, kind: output, shape index: {1}]   ;;  %s27130_s10 = inlined_call_operand.<no memory space> [shape: f32[1,1], index: 10, kind: input, shape index: {}]   ;;  %s27131_s12 = inlined_call_operand.<no memory space> [shape: f32[1,1], index: 12, kind: input, shape index: {}]   ;;  %s27132_s16 = inlined_call_operand.<no memory space> [shape: f32[1,1], index: 16, kind: input, shape index: {}]   ;;  %s27133_s19 = inlined_call_operand.<no memory space> [shape: f32[1,1], index: 19, kind: input, shape index: {}]  }
   0x1   :  { %27762 = sst [smem:[#allocation86_spill]] %s27110_s0  ;;  %v29_v0 = vstv %s27118_s8  ;;  %v31_v1 = vstv %s27130_s10  ;;  %v33_v2 = vstv %s27131_s12  ;;  %v35_v3 = vstv %s27132_s16 }
   0x2   :  { %27763 = sst [smem:[#allocation87_spill]] %s27111_s1  ;;  %30 = vst [vmem:[#allocation2] sm:$0x1] %v29_v0  ;;  %32 = vst [vmem:[#allocation3] sm:$0x1] %v31_v1  ;;  %v37_v4 = vstv %s27133_s19 }
   0x3   :  { %27764 = sst [smem:[#allocation88_spill]] %s27112_s2  ;;  %34 = vst [vmem:[#allocation4] sm:$0x1] %v33_v2  ;;  %36 = vst [vmem:[#allocation5] sm:$0x1] %v35_v3 }
   0x4   :  { %27765 = sst [smem:[#allocation89_spill]] %s27113_s3  ;;  %38 = vst [vmem:[#allocation6] sm:$0x1] %v37_v4 }
   0x5   :  { %27766 = sst [smem:[#allocation90_spill]] %s27114_s4 }
   0x6   :  { %27767 = sst [smem:[#allocation91_spill]] %s27115_s5 }
   0x7   :  { %27768 = sst [smem:[#allocation92_spill]] %s27116_s6 }
   0x8   :  { %27769 = sst [smem:[#allocation93_spill]] %s27117_s7 }
   0x9   :  { %39 = vsyncpa [#allocation8], 0 }
   0xa   :  { %41 = vsyncpa [#allocation8 + $0x1], 0 }
   0xb   :  { %42 = vsyncpa [#allocation10], 0 }
   0xc   :  { %44 = vsyncpa [#allocation10 + $0x1], 0  ;;  %s15147_s8 = smov 0   ;;  %s15149_s10 = smov 0  }
   0xd   :  { %s15151_s12 = smov 0   ;;  %s15153_s16 = smov 0  }
   0xe LB: > { %27770 = sst [smem:[#allocation13_spill]] %s14989_s12  ;;  %s15168_s19 = sadd.s32 4294967295, %s14993_s16   ;;  %s14993_s16 = sphi %s15153_s16, %s30800_s16   ;;  %s14989_s12 = sphi %s15151_s12, %s30797_s12   ;;  %s14985_s10 = sphi %s15149_s10, %s30799_s10   ;;  %s14981_s8 = sphi %s15147_s8, %s30798_s8  }
   0xf   : > { %s11375_s7 = sadd.s32 4294967294, %s14993_s16   ;;  %s15172_s28 = sadd.s32 1, %s14993_s16  }
  0x10   : > { %s524_s29 = sadd.s32 1, %s14989_s12  ;;  %s521_s3 = ssub.s32 %s14993_s16, %s15172_s28 }
  0x11   : > { %p534_p0 = scmp.ne.s32.totalorder %s14989_s12, %s14985_s10  ;;  %p522_p1 = scmp.eq.s32.totalorder %s521_s3, 0 }
  0x12   : > { %p535_p2 = scmp.eq.s32.totalorder %s15168_s19, 1  ;;  %p540_p3 = scmp.ne.s32.totalorder %s14985_s10, %s14981_s8 }
  0x13   : > { %p541_p4 = scmp.eq.s32.totalorder %s11375_s7, 1  ;;  %p11378_p7 = scmp.ge.s32.totalorder %s14993_s16, 1 }
  0x14   : > { %s15183_s0 = scalar_select %p522_p1, %s14989_s12, %s524_s29  }
  0x15   : > { %p15185_p5 = por %p535_p2, %p534_p0  ;;  %p15189_p6 = por %p541_p4, %p540_p3 }
  0x16   : > { %27771 = sst [smem:[#allocation14_spill]] %s15183_s0  ;;  %p656_p8 = scmp.lt.s32.totalorder %s14993_s16, 3 }
  0x18   : > { %p657_p9 = pnand %p11378_p7, %p656_p8 }
  0x1a   : > { %660 = sbr.rel (%p657_p9) target bundleno = 4768 (0x12a0), region = 108 }
  0x21   : > { %p723_p10 = scmp.lt.s32.totalorder %s15168_s19, 1  ;;  %s27774_s5 = sld [smem:[#allocation87_spill]]  ;;  %vm27199_vm0 = vcmask 1040384   ;;  %vm27197_vm1 = vcmask 1046528   ;;  %vm27190_vm2 = vcmask 1045504   ;;  %vm14996_vm4 = vmmov 1  }
  0x22   : > { %s27775_s6 = sld [smem:[#allocation86_spill]]  ;;  %vm11525_vm3 = vmneg %vm27199_vm0  ;;  %vm27200_vm6 = vcmask 523264   ;;  %s27782_s26 = sld [smem:[#allocation88_spill]]  ;;  %vm27201_vm7 = vcmask 982016  }
  0x23   : > { %s724_s1 = scalar_select %p723_p10, %s15168_s19, 1  ;;  %vm15569_vm5 = vmpackc.low %vm14996_vm4, %vm11525_vm3 }
  0x24   : > { %s14998_s2 = smov 120   ;;  %s28436_s0 = sld [smem:[#allocation89_spill]] }
  0x25   : > { %s12881_s24 = sshll.u32 %s724_s1, 7  ;;  %s14995_s1 = smov 64  }
  0x26   : > { %s28872_s7 = sld [smem:[#allocation93_spill]]  ;;  %s29413_s3 = sld [smem:[#allocation91_spill]] }
  0x27   : > { %v13979_v5 = vld [vmem:[%s27774_s5 + $0x4] ss:$16 sps:$4 sm:$0xff]   ;;  %v13981_v6 = vld [vmem:[%s27774_s5 + $0xc] ss:$16 sps:$4 sm:$0xff]   ;;  %v13983_v7 = vld [vmem:[%s27774_s5] ss:$16 sps:$4 sm:$0xff]  }
  0x28   : > { %1887 = vmatprep.subr.bf16.mxu0 %v13979_v5  ;;  %v13984_v8 = vld [vmem:[%s27774_s5 + $0x8] ss:$16 sps:$4 sm:$0xff]   ;;  %v13985_v9 = vld [vmem:[%s27774_s5 + $0x24] ss:$16 sps:$4 sm:$0xff]   ;;  %2106 = vmatprep.subr.bf16.mxu1 %v13981_v6  ;;  %v13987_v10 = vld [vmem:[%s27774_s5 + $0x2c] ss:$16 sps:$4 sm:$0xff]   ;;  %s15218_s27 = scalar_lea.vmem %s27775_s6, %s12881_s24 }
  0x29   : > { %1888 = vmatpush1.bf16.msra.mxu0 %v13983_v7  ;;  %2107 = vmatpush1.bf16.msra.mxu1 %v13984_v8  ;;  %v13989_v11 = vld [vmem:[%s27774_s5 + $0x20] ss:$16 sps:$4 sm:$0xff]   ;;  %v13990_v12 = vld [vmem:[%s27774_s5 + $0x28] ss:$16 sps:$4 sm:$0xff]   ;;  %v13991_v47 = vld [vmem:[%s27774_s5 + $0x44] ss:$16 sps:$4 sm:$0xff]  }
  0x2a   : > { %1889 = vmatprep.subr.bf16.mxu0 %v13985_v9  ;;  %v729_v13 = vld [vmem:[%s15218_s27] sm:$0xff]  ;;  %v731_v14 = vld [vmem:[%s15218_s27 + $0x10] sm:$0xff]  ;;  %2108 = vmatprep.subr.bf16.mxu1 %v13987_v10  ;;  %v730_v21 = vld [vmem:[%s15218_s27 + $0x8] sm:$0xff]  ;;  %s15001_s6 = smov 112   ;;  %s29867_s25 = sld [smem:[#allocation92_spill]] }
  0x2b   : > { %v733_v15 = vld [vmem:[%s15218_s27 + $0x20] sm:$0xff]  ;;  %v15229_v16 = vrot.slane %v729_v13, 7  ;;  %v764_v17 = vrot.slane %v731_v14, 7  ;;  %v735_v19 = vld [vmem:[%s15218_s27 + $0x30] sm:$0xff]  ;;  %v732_v24 = vld [vmem:[%s15218_s27 + $0x18] sm:$0xff]  ;;  %v763_v26 = vrot.slane %v730_v21, 7 }
  0x2c   : > { %v768_v18 = vrot.slane %v733_v15, 7  ;;  %v15233_v20 = vld [vmem:[%s15218_s27 + $0x40] sm:$0xff]  ;;  %v772_v22 = vrot.slane %v735_v19, 7  ;;  %v15239_v25 = vld [vmem:[%s15218_s27 + $0x28] sm:$0xff]  ;;  %v766_v30 = vrot.slane %v732_v24, 7  ;;  %v739_v38 = vld [vmem:[%s15218_s27 + $0x50] sm:$0xff] }
  0x2d   : > { %v776_v23 = vrot.slane %v15233_v20, 7  ;;  %1890 = vmatpush1.bf16.msra.mxu0 %v13989_v11  ;;  %v15243_v27 = vsel %vm27199_vm0, %v15229_v16, %v764_v17  ;;  %v15250_v29 = vsel %vm27199_vm0, 0.0, %v15229_v16  ;;  %2109 = vmatpush1.bf16.msra.mxu1 %v13990_v12  ;;  %v770_v37 = vrot.slane %v15239_v25, 7  ;;  %v741_v39 = vld [vmem:[%s15218_s27 + $0x60] sm:$0xff]  ;;  %v743_v44 = vld [vmem:[%s15218_s27 + $0x70] sm:$0xff]  ;;  %v736_v45 = vld [vmem:[%s15218_s27 + $0x38] sm:$0xff] }
  0x2e   : > { %v15246_v28 = vsel %vm27199_vm0, %v764_v17, %v768_v18  ;;  %v819_v31 = vrot.slane %v15250_v29, 1  ;;  %v820_v32 = vrot.slane %v15243_v27, 1  ;;  %v15256_v34 = vsel %vm27199_vm0, %v768_v18, %v772_v22  ;;  %v15274_v46 = vld [vmem:[%s15218_s27 + $0x48] sm:$0xff]  ;;  %v15287_v52 = vld [vmem:[%s15218_s27 + $0x58] sm:$0xff]  ;;  %v13995_v54 = vld [vmem:[%s27774_s5 + $0x40] ss:$16 sps:$4 sm:$0xff]   ;;  %1891 = vmatprep.subr.bf16.mxu0 %v13991_v47 }
  0x2f   : > { %v825_v33 = vrot.slane %v15246_v28, 1  ;;  %v15259_v35 = vsel %vm27199_vm0, %v772_v22, %v776_v23  ;;  %v15262_v36 = vsel %vm27199_vm0, %v763_v26, %v766_v30  ;;  %v829_v42 = vrot.slane %v15256_v34, 1  ;;  %v13993_v53 = vld [vmem:[%s27774_s5 + $0x4c] ss:$16 sps:$4 sm:$0xff]   ;;  %v13996_v59 = vld [vmem:[%s27774_s5 + $0x48] ss:$16 sps:$4 sm:$0xff]  }
  0x30   : > { %v821_v40 = vsel %vm27197_vm1, %v819_v31, %v820_v32  ;;  %v833_v43 = vrot.slane %v15259_v35, 1  ;;  %v15280_v49 = vsel %vm27199_vm0, %v766_v30, %v770_v37  ;;  %v15283_v50 = vsel %vm27199_vm0, 0.0, %v763_v26  ;;  %v15304_v61 = vld [vmem:[%s15218_s27 + $0x68] sm:$0xff]  ;;  %2110 = vmatprep.subr.bf16.mxu1 %v13993_v53  ;;  %v13997_v62 = vld [vmem:[%s27774_s5 + $0x64] ss:$16 sps:$4 sm:$0xff]   ;;  %v744_v20 = vld [vmem:[%s15218_s27 + $0x78] sm:$0xff] }
  0x31   : > { %v826_v41 = vsel %vm27197_vm1, %v820_v32, %v825_v33  ;;  %v823_v51 = vrot.slane %v15262_v36, 1  ;;  %v830_v55 = vsel %vm27197_vm1, %v825_v33, %v829_v42  ;;  %v822_v57 = vrot.slane %v15283_v50, 1  ;;  %1892 = vmatpush1.bf16.msra.mxu0 %v13995_v54  ;;  %2111 = vmatpush1.bf16.msra.mxu1 %v13996_v59  ;;  %v13999_v3 = vld [vmem:[%s27774_s5 + $0x6c] ss:$16 sps:$4 sm:$0xff]   ;;  %v14001_v8 = vld [vmem:[%s27774_s5 + $0x60] ss:$16 sps:$4 sm:$0xff]  }
  0x32   : > { %v13799_v48 = vpack.i.bf16 %v826_v41, %v821_v40  ;;  %v834_v56 = vsel %vm27197_vm1, %v829_v42, %v833_v43  ;;  %v827_v58 = vrot.slane %v15280_v49, 1  ;;  %v780_v1 = vrot.slane %v739_v38, 7  ;;  %1893 = vmatprep.subr.bf16.mxu0 %v13997_v62  ;;  %2112 = vmatprep.subr.bf16.mxu1 %v13999_v3  ;;  %v14002_v13 = vld [vmem:[%s27774_s5 + $0x68] ss:$16 sps:$4 sm:$0xff]   ;;  %v14003_v14 = vld [vmem:[%s27774_s5 + $0x84] ss:$16 sps:$4 sm:$0xff]  }
  0x33   : > { %v13804_v60 = vpack.i.bf16 %v834_v56, %v830_v55  ;;  %v824_v63 = vsel %vm27197_vm1, %v822_v57, %v823_v51  ;;  %v784_v2 = vrot.slane %v741_v39, 7  ;;  %v788_v5 = vrot.slane %v743_v44, 7  ;;  %v14005_v25 = vld [vmem:[%s27774_s5 + $0x8c] ss:$16 sps:$4 sm:$0xff]   ;;  %v14007_v26 = vld [vmem:[%s27774_s5 + $0x80] ss:$16 sps:$4 sm:$0xff]  }
  0x34   : > { %13800 = vrot.lane.b32.xlu0 %v13799_v48, %s14995_s1  ;;  %v828_v0 = vsel %vm27197_vm1, %v823_v51, %v827_v58  ;;  %v774_v6 = vrot.slane %v736_v45, 7  ;;  %v778_v7 = vrot.slane %v15274_v46, 7  ;;  %v15321_v9 = vsel %vm27199_vm0, %v776_v23, %v780_v1  ;;  %v14009_v42 = vld [vmem:[%s27774_s5 + $0xa4] ss:$16 sps:$4 sm:$0xff]   ;;  %v14013_v51 = vld [vmem:[%s27774_s5 + $0xa0] ss:$16 sps:$4 sm:$0xff]  }
  0x35   : > { %v13819_v4 = vpack.i.bf16 %v828_v0, %v824_v63  ;;  %v15324_v10 = vsel %vm27199_vm0, %v780_v1, %v784_v2  ;;  %v782_v11 = vrot.slane %v15287_v52, 7  ;;  %v786_v12 = vrot.slane %v15304_v61, 7  ;;  %1894 = vmatpush1.bf16.msra.mxu0 %v14001_v8  ;;  %2113 = vmatpush1.bf16.msra.mxu1 %v14002_v13  ;;  %v14014_v54 = vld [vmem:[%s27774_s5 + $0xa8] ss:$16 sps:$4 sm:$0xff]   ;;  %v14019_v1 = vld [vmem:[%s27774_s5 + $0xc0] ss:$16 sps:$4 sm:$0xff]  }
  0x36   : > { %v837_v15 = vrot.slane %v15321_v9, 1  ;;  %v841_v17 = vrot.slane %v15324_v10, 1  ;;  %v15338_v18 = vsel %vm27199_vm0, %v784_v2, %v788_v5  ;;  %v15341_v19 = vsel %vm27199_vm0, %v788_v5, 0.0  ;;  %1895 = vmatprep.subr.bf16.mxu0 %v14003_v14  ;;  %2114 = vmatprep.subr.bf16.mxu1 %v14005_v25  ;;  %v14021_v5 = vld [vmem:[%s27774_s5 + $0xe4] ss:$16 sps:$4 sm:$0xff]   ;;  %s27758_s29 = smov 127  }
  0x37   : > { %v845_v21 = vrot.slane %v15338_v18, 1  ;;  %v849_v22 = vrot.slane %v15341_v19, 1  ;;  %v15347_v23 = vsel %vm27199_vm0, %v770_v37, %v774_v6  ;;  %v15350_v24 = vsel %vm27199_vm0, %v774_v6, %v778_v7  ;;  %v14008_v37 = vld [vmem:[%s27774_s5 + $0x88] ss:$16 sps:$4 sm:$0xff]   ;;  %v14023_v6 = vld [vmem:[%s27774_s5 + $0xec] ss:$16 sps:$4 sm:$0xff]  }
  0x38   : > { %13805 = vrot.lane.b32.xlu0 %v13804_v60, %s14995_s1  ;;  %v838_v30 = vsel %vm27197_vm1, %v833_v43, %v837_v15  ;;  %v842_v31 = vsel %vm27197_vm1, %v837_v15, %v841_v17  ;;  %v831_v32 = vrot.slane %v15347_v23, 1  ;;  %v835_v33 = vrot.slane %v15350_v24, 1  ;;  %v14011_v43 = vld [vmem:[%s27774_s5 + $0xac] ss:$16 sps:$4 sm:$0xff]   ;;  %v14015_v60 = vld [vmem:[%s27774_s5 + $0xc4] ss:$16 sps:$4 sm:$0xff]  }
  0x39   : > { %v13809_v38 = vpack.i.bf16 %v842_v31, %v838_v30  ;;  %v846_v39 = vsel %vm27197_vm1, %v841_v17, %v845_v21  ;;  %v850_v40 = vsel %vm27197_vm1, %v845_v21, %v849_v22  ;;  %v15368_v41 = vsel %vm27199_vm0, %v778_v7, %v782_v11  ;;  %1896 = vmatpush1.bf16.msra.mxu0 %v14007_v26  ;;  %v14025_v7 = vld [vmem:[%s27774_s5 + $0xe0] ss:$16 sps:$4 sm:$0xff]   ;;  %v14029_v13 = vld [vmem:[%s27774_s5 + $0x10c] ss:$16 sps:$4 sm:$0xff]   ;;  %v14032_v15 = vld [vmem:[%s27774_s5 + $0x108] ss:$16 sps:$4 sm:$0xff]  }
  0x3a   : > { %v15378_v44 = vsel %vm27199_vm0, %v782_v11, %v786_v12  ;;  %v13814_v45 = vpack.i.bf16 %v850_v40, %v846_v39  ;;  %v839_v46 = vrot.slane %v15368_v41, 1  ;;  %v790_v48 = vrot.slane %v744_v20, 7  ;;  %2115 = vmatpush1.bf16.msra.mxu1 %v14008_v37  ;;  %1897 = vmatprep.subr.bf16.mxu0 %v14009_v42  ;;  %v14026_v11 = vld [vmem:[%s27774_s5 + $0xe8] ss:$16 sps:$4 sm:$0xff]   ;;  %v14031_v14 = vld [vmem:[%s27774_s5 + $0x100] ss:$16 sps:$4 sm:$0xff]  }
  0x3b   : > { %13810 = vrot.lane.b32.xlu1 %v13809_v38, %s14995_s1  ;;  %v843_v47 = vrot.slane %v15378_v44, 1  ;;  %v832_v52 = vsel %vm27197_vm1, %v827_v58, %v831_v32  ;;  %v836_v53 = vsel %vm27197_vm1, %v831_v32, %v835_v33  ;;  %v15395_v55 = vpack.c.bf16 %v15243_v27, %v15229_v16  ;;  %2116 = vmatprep.subr.bf16.mxu1 %v14011_v43  ;;  %v14017_v16 = vld [vmem:[%s27774_s5 + $0xcc] ss:$16 sps:$4 sm:$0xff]   ;;  %v14033_v17 = vld [vmem:[%s27774_s5 + $0x124] ss:$16 sps:$4 sm:$0xff]   ;;  %s15007_s27 = smov 2  }
  0x3c   : > { %13820 = vrot.lane.b32.xlu0 %v13819_v4, %s14995_s1  ;;  %v840_v56 = vsel %vm27197_vm1, %v835_v33, %v839_v46  ;;  %v15400_v59 = vsel %vm27199_vm0, %v786_v12, %v790_v48  ;;  %v15403_v58 = vsel %vm27199_vm0, %v790_v48, 0.0  ;;  %v13824_v0 = vpack.i.bf16 %v836_v53, %v832_v52  ;;  %v14020_v4 = vld [vmem:[%s27774_s5 + $0xc8] ss:$16 sps:$4 sm:$0xff]   ;;  %v14027_v12 = vld [vmem:[%s27774_s5 + $0x104] ss:$16 sps:$4 sm:$0xff]   ;;  %s15008_s24 = smov 3  }
  0x3d   : > { %v844_v57 = vsel %vm27197_vm1, %v839_v46, %v843_v47  ;;  %v847_v62 = vrot.slane %v15400_v59, 1  ;;  %v851_v63 = vrot.slane %v15403_v58, 1  ;;  %1898 = vmatpush1.bf16.msra.mxu0 %v14013_v51  ;;  %v14035_v20 = vld [vmem:[%s27774_s5 + $0x12c] ss:$16 sps:$4 sm:$0xff]   ;;  %v14037_v21 = vld [vmem:[%s27774_s5 + $0x120] ss:$16 sps:$4 sm:$0xff]   ;;  %v15478_v33 = vpack.c.bf16 %v15256_v34, %v15246_v28 }
  0x3e   : > { %v13829_v61 = vpack.i.bf16 %v844_v57, %v840_v56  ;;  %2117 = vmatpush1.bf16.msra.mxu1 %v14014_v54  ;;  %1899 = vmatprep.subr.bf16.mxu0 %v14015_v60  ;;  %v14038_v22 = vld [vmem:[%s27774_s5 + $0x128] ss:$16 sps:$4 sm:$0xff]   ;;  %v14039_v25 = vld [vmem:[%s27774_s5 + $0x144] ss:$16 sps:$4 sm:$0xff]   ;;  %v14041_v26 = vld [vmem:[%s27774_s5 + $0x14c] ss:$16 sps:$4 sm:$0xff]  }
  0x3f   : > { %13815 = vrot.lane.b32.xlu1 %v13814_v45, %s14995_s1  ;;  %v848_v2 = vsel %vm27197_vm1, %v843_v47, %v847_v62  ;;  %v852_v3 = vsel %vm27197_vm1, %v847_v62, %v851_v63  ;;  %2118 = vmatprep.subr.bf16.mxu1 %v14017_v16  ;;  %v14043_v30 = vld [vmem:[%s27774_s5 + $0x140] ss:$16 sps:$4 sm:$0xff]   ;;  %v14044_v31 = vld [vmem:[%s27774_s5 + $0x148] ss:$16 sps:$4 sm:$0xff]   ;;  %v14045_v32 = vld [vmem:[%s27774_s5 + $0x164] ss:$16 sps:$4 sm:$0xff]   ;;  %v15506_v47 = vpack.c.bf16 %v15321_v9, %v15259_v35 }
  0x40   : > { %13830 = vrot.lane.b32.xlu0 %v13829_v61, %s14995_s1  ;;  %v13834_v8 = vpack.i.bf16 %v852_v3, %v848_v2  ;;  %v14047_v37 = vld [vmem:[%s27774_s5 + $0x16c] ss:$16 sps:$4 sm:$0xff]   ;;  %v14049_v38 = vld [vmem:[%s27774_s5 + $0x160] ss:$16 sps:$4 sm:$0xff]   ;;  %v14050_v39 = vld [vmem:[%s27774_s5 + $0x168] ss:$16 sps:$4 sm:$0xff]  }
  0x41   : > { %1900 = vmatpush1.bf16.msra.mxu0 %v14019_v1  ;;  %v14051_v40 = vld [vmem:[%s27774_s5 + $0x184] ss:$16 sps:$4 sm:$0xff]   ;;  %v14053_v42 = vld [vmem:[%s27774_s5 + $0x18c] ss:$16 sps:$4 sm:$0xff]   ;;  %v14055_v43 = vld [vmem:[%s27774_s5 + $0x180] ss:$16 sps:$4 sm:$0xff]  }
  0x42   : > { %2119 = vmatpush1.bf16.msra.mxu1 %v14020_v4  ;;  %1901 = vmatprep.subr.bf16.mxu0 %v14021_v5  ;;  %v14056_v45 = vld [vmem:[%s27774_s5 + $0x188] ss:$16 sps:$4 sm:$0xff]   ;;  %v14057_v46 = vld [vmem:[%s27774_s5 + $0x1a4] ss:$16 sps:$4 sm:$0xff]   ;;  %v14059_v48 = vld [vmem:[%s27774_s5 + $0x1ac] ss:$16 sps:$4 sm:$0xff]  }
  0x43   : > { %13825 = vrot.lane.b32.xlu1 %v13824_v0, %s14995_s1  ;;  %2120 = vmatprep.subr.bf16.mxu1 %v14023_v6  ;;  %v14061_v51 = vld [vmem:[%s27774_s5 + $0x1a0] ss:$16 sps:$4 sm:$0xff]   ;;  %v14062_v52 = vld [vmem:[%s27774_s5 + $0x1a8] ss:$16 sps:$4 sm:$0xff]   ;;  %v14063_v53 = vld [vmem:[%s27774_s5 + $0x1c4] ss:$16 sps:$4 sm:$0xff]  }
  0x44   : > { %v14065_v54 = vld [vmem:[%s27774_s5 + $0x1cc] ss:$16 sps:$4 sm:$0xff]   ;;  %v14067_v56 = vld [vmem:[%s27774_s5 + $0x1c0] ss:$16 sps:$4 sm:$0xff]   ;;  %v14068_v57 = vld [vmem:[%s27774_s5 + $0x1c8] ss:$16 sps:$4 sm:$0xff]  }
  0x45   : > { %1902 = vmatpush1.bf16.msra.mxu0 %v14025_v7  ;;  %v14069_v60 = vld [vmem:[%s27774_s5 + $0x1e4] ss:$16 sps:$4 sm:$0xff]   ;;  %v14071_v16 = vld [vmem:[%s27774_s5 + $0x1ec] ss:$16 sps:$4 sm:$0xff]   ;;  %v911_v61 = vrot.slane %v15250_v29, 2  ;;  %v912_v1 = vrot.slane %v15243_v27, 2 }
  0x46   : > { %2121 = vmatpush1.bf16.msra.mxu1 %v14026_v11  ;;  %1903 = vmatprep.subr.bf16.mxu0 %v14027_v12  ;;  %v14073_v62 = vld [vmem:[%s27774_s5 + $0x1e0] ss:$16 sps:$4 sm:$0xff]   ;;  %v14074_v63 = vld [vmem:[%s27774_s5 + $0x1e8] ss:$16 sps:$4 sm:$0xff]   ;;  %v14077_v0 = vld [vmem:[%s27774_s5 + $0x204] ss:$16 sps:$4 sm:$0xff]  }
  0x47   : > { %13835 = vrot.lane.b32.xlu1 %v13834_v8, %s14995_s1  ;;  %2122 = vmatprep.subr.bf16.mxu1 %v14029_v13  ;;  %v14080_v29 = vld [vmem:[%s27774_s5 + $0x20c] ss:$16 sps:$4 sm:$0xff]   ;;  %v917_v2 = vrot.slane %v15246_v28, 2  ;;  %v913_v3 = vsel %vm27190_vm2, %v911_v61, %v912_v1  ;;  %v921_v6 = vrot.slane %v15256_v34, 2  ;;  %v925_v7 = vrot.slane %v15259_v35, 2  ;;  %s28907_s1 = sld [smem:[#allocation90_spill]] }
  0x48   : > { %v929_v28 = vrot.slane %v15321_v9, 2  ;;  %v933_v12 = vrot.slane %v15324_v10, 2  ;;  %v27776_v34 = vmov 0  ;;  %s15010_s12 = smov [#allocation9]  }
  0x49   : > { %1904 = vmatpush1.bf16.msra.mxu0 %v14031_v14  ;;  %v918_v4 = vsel %vm27190_vm2, %v912_v1, %v917_v2  ;;  %v922_v8 = vsel %vm27190_vm2, %v917_v2, %v921_v6  ;;  %v926_v27 = vsel %vm27190_vm2, %v921_v6, %v925_v7  ;;  %v27777_v34 = vsel %vm15569_vm5, 4294967295, %v27776_v34 }
  0x4a   : > { %2123 = vmatpush1.bf16.msra.mxu1 %v14032_v15  ;;  %1905 = vmatprep.subr.bf16.mxu0 %v14033_v17  ;;  %v15552_v5 = vpack.c.bf16 %v918_v4, %v913_v3  ;;  %v15558_v11 = vpack.c.bf16 %v926_v27, %v922_v8  ;;  %v930_v13 = vsel %vm27190_vm2, %v925_v7, %v929_v28  ;;  %v14093_v3 = vld [vmem:[%s27774_s5 + $0x260] ss:$16 sps:$4 sm:$0xff]   ;;  %v14096_v4 = vld [vmem:[%s27774_s5 + $0x268] ss:$16 sps:$4 sm:$0xff]   ;;  %v14101_v8 = vld [vmem:[%s27774_s5 + $0x284] ss:$16 sps:$4 sm:$0xff]  }
  0x4b   : > { %2124 = vmatprep.subr.bf16.mxu1 %v14035_v20  ;;  %v934_v14 = vsel %vm27190_vm2, %v929_v28, %v933_v12  ;;  %27778 = vst [vmem:[#allocation15_spill] sm:$0xff] %v27777_v34  ;;  %v14075_v20 = vld [vmem:[%s27774_s5 + $0x200] ss:$16 sps:$4 sm:$0xff]   ;;  %v14104_v27 = vld [vmem:[%s27774_s5 + $0x28c] ss:$16 sps:$4 sm:$0xff]  }
  0x4c   : > { %v15566_v15 = vpack.c.bf16 %v934_v14, %v930_v13 }
  0x4d   : > { %1906 = vmatpush1.bf16.msra.mxu0 %v14037_v21  ;;  %v14078_v21 = vld [vmem:[%s27774_s5 + $0x208] ss:$16 sps:$4 sm:$0xff]  }
  0x4e   : > { %2125 = vmatpush1.bf16.msra.mxu1 %v14038_v22  ;;  %1907 = vmatprep.subr.bf16.mxu0 %v14039_v25 }
  0x4f   : > { %2126 = vmatprep.subr.bf16.mxu1 %v14041_v26  ;;  %v14083_v26 = vld [vmem:[%s27774_s5 + $0x224] ss:$16 sps:$4 sm:$0xff]  }
  0x51   : > { %1908 = vmatpush1.bf16.msra.mxu0 %v14043_v30  ;;  %v14086_v30 = vld [vmem:[%s27774_s5 + $0x22c] ss:$16 sps:$4 sm:$0xff]  }
  0x52   : > { %2127 = vmatpush1.bf16.msra.mxu1 %v14044_v31  ;;  %1909 = vmatprep.subr.bf16.mxu0 %v14045_v32 }
  0x53   : > { %2128 = vmatprep.subr.bf16.mxu1 %v14047_v37 }
  0x55   : > { %1910 = vmatpush1.bf16.msra.mxu0 %v14049_v38 }
  0x56   : > { %2129 = vmatpush1.bf16.msra.mxu1 %v14050_v39  ;;  %1911 = vmatprep.subr.bf16.mxu0 %v14051_v40  ;;  %v14081_v39 = vld [vmem:[%s27774_s5 + $0x220] ss:$16 sps:$4 sm:$0xff]   ;;  %v14084_v40 = vld [vmem:[%s27774_s5 + $0x228] ss:$16 sps:$4 sm:$0xff]  }
  0x57   : > { %2130 = vmatprep.subr.bf16.mxu1 %v14053_v42  ;;  %v14089_v42 = vld [vmem:[%s27774_s5 + $0x244] ss:$16 sps:$4 sm:$0xff]  }
  0x59   : > { %1912 = vmatpush1.bf16.msra.mxu0 %v14055_v43  ;;  %v14092_v43 = vld [vmem:[%s27774_s5 + $0x24c] ss:$16 sps:$4 sm:$0xff]  }
  0x5a   : > { %2131 = vmatpush1.bf16.msra.mxu1 %v14056_v45  ;;  %1913 = vmatprep.subr.bf16.mxu0 %v14057_v46 }
  0x5b   : > { %2132 = vmatprep.subr.bf16.mxu1 %v14059_v48 }
  0x5d   : > { %1914 = vmatpush1.bf16.msra.mxu0 %v14061_v51 }
  0x5e   : > { %2133 = vmatpush1.bf16.msra.mxu1 %v14062_v52  ;;  %1915 = vmatprep.subr.bf16.mxu0 %v14063_v53 }
  0x5f   : > { %2134 = vmatprep.subr.bf16.mxu1 %v14065_v54  ;;  %v14087_v54 = vld [vmem:[%s27774_s5 + $0x240] ss:$16 sps:$4 sm:$0xff]  }
  0x61   : > { %1916 = vmatpush1.bf16.msra.mxu0 %v14067_v56  ;;  %v14090_v56 = vld [vmem:[%s27774_s5 + $0x248] ss:$16 sps:$4 sm:$0xff]  }
  0x62   : > { %2135 = vmatpush1.bf16.msra.mxu1 %v14068_v57  ;;  %1917 = vmatprep.subr.bf16.mxu0 %v14069_v60 }
  0x63   : > { %2136 = vmatprep.subr.bf16.mxu1 %v14071_v16 }
  0x65   : > { %1918 = vmatpush1.bf16.msra.mxu0 %v14073_v62  ;;  %v14095_v62 = vld [vmem:[%s27774_s5 + $0x264] ss:$16 sps:$4 sm:$0xff]  }
  0x66   : > { %2137 = vmatpush1.bf16.msra.mxu1 %v14074_v63  ;;  %1960 = vmatprep.subr.bf16.mxu0 %v14077_v0  ;;  %v14098_v63 = vld [vmem:[%s27774_s5 + $0x26c] ss:$16 sps:$4 sm:$0xff]  }
  0x67   : > { %2179 = vmatprep.subr.bf16.mxu1 %v14080_v29 }
  0xa6   : > { %v13801_v35 = vpop.permute.xlu0 %13800 }
  0xa7   : > { %v13803_v9 = vunpack.i.h.bf16 %v13801_v35  ;;  %v13802_v17 = vunpack.i.l.bf16 %v13801_v35 }
  0xa9   : > { %v961_v22 = vsel %vm27200_vm6, %v15283_v50, %v13802_v17  ;;  %v962_v25 = vsel %vm27200_vm6, %v15262_v36, %v13803_v9 }
  0xaa   : > { %v15589_v31 = vpop.permute.xlu0 %13805  ;;  %v970_v32 = vpack.c.bf16 %v962_v25, %v961_v22  ;;  %v14102_v22 = vld [vmem:[%s27774_s5 + $0x288] ss:$16 sps:$4 sm:$0xff]  }
  0xab   : > { %v13808_v37 = vunpack.i.h.bf16 %v15589_v31  ;;  %v13807_v38 = vunpack.i.l.bf16 %v15589_v31  ;;  %v14113_v31 = vld [vmem:[%s27774_s5 + $0x2c4] ss:$16 sps:$4 sm:$0xff]  }
  0xac   : > { %1919 = vmatprep.mubr.bf16.mxu0 %v970_v32  ;;  %2138 = vmatprep.mubr.bf16.mxu1 %v970_v32  ;;  %v14110_v32 = vld [vmem:[%s27774_s5 + $0x2ac] ss:$16 sps:$4 sm:$0xff]  }
  0xad   : > { %11528 = vmatmul.mubr.msk.bf16.vlgmr.msra.gmra.mrb[0].mxu0 %vm15569_vm5, %v15395_v55  ;;  %11536 = vmatmul.mubr.msk.bf16.vlgmr.msra.gmra.mrb[0].mxu1 %vm15569_vm5, %v15395_v55  ;;  %v963_v45 = vsel %vm27200_vm6, %v15280_v49, %v13807_v38  ;;  %v964_v46 = vsel %vm27200_vm6, %v15347_v23, %v13808_v37  ;;  %v13811_v53 = vpop.permute.xlu1 %13810 }
  0xae   : > { %1961 = vmatpush1.bf16.msra.mxu0 %v14075_v20  ;;  %2180 = vmatpush1.bf16.msra.mxu1 %v14078_v21  ;;  %v13821_v55 = vpop.permute.xlu0 %13820  ;;  %v975_v48 = vpack.c.bf16 %v964_v46, %v963_v45  ;;  %v13813_v57 = vunpack.i.h.bf16 %v13811_v53  ;;  %v13812_v60 = vunpack.i.l.bf16 %v13811_v53  ;;  %v14099_v21 = vld [vmem:[%s27774_s5 + $0x280] ss:$16 sps:$4 sm:$0xff]  }
  0xaf   : > { %v13823_v51 = vunpack.i.h.bf16 %v13821_v55  ;;  %v13822_v52 = vunpack.i.l.bf16 %v13821_v55  ;;  %1962 = vmatprep.subr.bf16.mxu0 %v14083_v26  ;;  %2181 = vmatprep.subr.bf16.mxu1 %v14086_v30  ;;  %v14107_v30 = vld [vmem:[%s27774_s5 + $0x2a4] ss:$16 sps:$4 sm:$0xff]   ;;  %v14105_v55 = vld [vmem:[%s27774_s5 + $0x2a0] ss:$16 sps:$4 sm:$0xff]  }
  0xb0   : > { %1929 = vmatprep.mubr.bf16.mxu0 %v975_v48  ;;  %2148 = vmatprep.mubr.bf16.mxu1 %v975_v48  ;;  %v965_v29 = vsel %vm27200_vm6, %v15350_v24, %v13812_v60  ;;  %v966_v1 = vsel %vm27200_vm6, %v15368_v41, %v13813_v57  ;;  %v14108_v48 = vld [vmem:[%s27774_s5 + $0x2a8] ss:$16 sps:$4 sm:$0xff]  }
  0xb1   : > { %v886_v16 = vsel %vm27200_vm6, %v13802_v17, %v13822_v52  ;;  %v887_v61 = vsel %vm27200_vm6, %v13803_v9, %v13823_v51  ;;  %v13816_v2 = vpop.permute.xlu1 %13815  ;;  %v980_v7 = vpack.c.bf16 %v966_v1, %v965_v29  ;;  %v14125_v29 = vld [vmem:[%s27774_s5 + $0x304] ss:$16 sps:$4 sm:$0xff]   ;;  %v14128_v1 = vld [vmem:[%s27774_s5 + $0x30c] ss:$16 sps:$4 sm:$0xff]  }
  0xb2   : > { %v15633_v0 = vpack.c.bf16 %v887_v61, %v886_v16  ;;  %1963 = vmatpush1.bf16.msra.mxu0 %v14081_v39  ;;  %2182 = vmatpush1.bf16.msra.mxu1 %v14084_v40  ;;  %v13831_v6 = vpop.permute.xlu0 %13830  ;;  %v13818_v28 = vunpack.i.h.bf16 %v13816_v2  ;;  %v13817_v13 = vunpack.i.l.bf16 %v13816_v2  ;;  %v14122_v16 = vld [vmem:[%s27774_s5 + $0x2ec] ss:$16 sps:$4 sm:$0xff]   ;;  %v984_v61 = vpack.c.bf16 %v15338_v18, %v15324_v10  ;;  %v14123_v2 = vld [vmem:[%s27774_s5 + $0x300] ss:$16 sps:$4 sm:$0xff]  }
  0xb3   : > { %1964 = vmatprep.subr.bf16.mxu0 %v14089_v42  ;;  %2183 = vmatprep.subr.bf16.mxu1 %v14092_v43  ;;  %v13833_v14 = vunpack.i.h.bf16 %v13831_v6  ;;  %v13832_v35 = vunpack.i.l.bf16 %v13831_v6  ;;  %v14134_v6 = vld [vmem:[%s27774_s5 + $0x32c] ss:$16 sps:$4 sm:$0xff]   ;;  %v915_v10 = vrot.slane %v15262_v36, 2  ;;  %v943_v36 = vrot.slane %v15403_v58, 2 }
  0xb4   : > { %v967_v39 = vsel %vm27200_vm6, %v15378_v44, %v13817_v13  ;;  %v968_v40 = vsel %vm27200_vm6, %v15400_v59, %v13818_v28 }
  0xb5   : > { %1930 = vmatmul.mubr.bf16.gmra.mrb[4].mxu0 %v15478_v33  ;;  %2149 = vmatmul.mubr.bf16.gmra.mrb[4].mxu1 %v15478_v33  ;;  %v13826_v9 = vpop.permute.xlu1 %13825  ;;  %v890_v17 = vsel %vm27200_vm6, %v13812_v60, %v13832_v35  ;;  %v891_v20 = vsel %vm27200_vm6, %v13813_v57, %v13833_v14  ;;  %v14111_v57 = vld [vmem:[%s27774_s5 + $0x2c0] ss:$16 sps:$4 sm:$0xff]   ;;  %v14114_v60 = vld [vmem:[%s27774_s5 + $0x2c8] ss:$16 sps:$4 sm:$0xff]   ;;  %v14143_v14 = vld [vmem:[%s27774_s5 + $0x364] ss:$16 sps:$4 sm:$0xff]  }
  0xb6   : > { %1965 = vmatpush1.bf16.msra.mxu0 %v14087_v54  ;;  %2184 = vmatpush1.bf16.msra.mxu1 %v14090_v56  ;;  %v13828_v33 = vunpack.i.h.bf16 %v13826_v9  ;;  %v13827_v25 = vunpack.i.l.bf16 %v13826_v9  ;;  %v15661_v26 = vpack.c.bf16 %v891_v20, %v890_v17  ;;  %v14146_v35 = vld [vmem:[%s27774_s5 + $0x36c] ss:$16 sps:$4 sm:$0xff]   ;;  %v14141_v9 = vld [vmem:[%s27774_s5 + $0x360] ss:$16 sps:$4 sm:$0xff]   ;;  %v14144_v17 = vld [vmem:[%s27774_s5 + $0x368] ss:$16 sps:$4 sm:$0xff]  }
  0xb7   : > { %1966 = vmatprep.subr.bf16.mxu0 %v14095_v62  ;;  %2185 = vmatprep.subr.bf16.mxu1 %v14098_v63  ;;  %v14117_v62 = vld [vmem:[%s27774_s5 + $0x2e0] ss:$16 sps:$4 sm:$0xff]   ;;  %v14120_v63 = vld [vmem:[%s27774_s5 + $0x2e8] ss:$16 sps:$4 sm:$0xff]   ;;  %v14149_v20 = vld [vmem:[%s27774_s5 + $0x384] ss:$16 sps:$4 sm:$0xff]  }
  0xb8   : > { %1939 = vmatprep.mubr.bf16.mxu0 %v980_v7  ;;  %2158 = vmatprep.mubr.bf16.mxu1 %v980_v7  ;;  %v888_v42 = vsel %vm27200_vm6, %v13807_v38, %v13827_v25  ;;  %v889_v43 = vsel %vm27200_vm6, %v13808_v37, %v13828_v33  ;;  %v985_v38 = vpack.c.bf16 %v968_v40, %v967_v39  ;;  %v14116_v37 = vld [vmem:[%s27774_s5 + $0x2cc] ss:$16 sps:$4 sm:$0xff]   ;;  %v14129_v7 = vld [vmem:[%s27774_s5 + $0x320] ss:$16 sps:$4 sm:$0xff]   ;;  %v14150_v33 = vld [vmem:[%s27774_s5 + $0x388] ss:$16 sps:$4 sm:$0xff]  }
  0xb9   : > { %v13836_v45 = vpop.permute.xlu1 %13835  ;;  %v15679_v46 = vpack.c.bf16 %v889_v43, %v888_v42  ;;  %v14155_v25 = vld [vmem:[%s27774_s5 + $0x3a4] ss:$16 sps:$4 sm:$0xff]   ;;  %v14156_v39 = vld [vmem:[%s27774_s5 + $0x3a8] ss:$16 sps:$4 sm:$0xff]   ;;  %v14164_v42 = vld [vmem:[%s27774_s5 + $0x3cc] ss:$16 sps:$4 sm:$0xff]  }
  0xba   : > { %1967 = vmatpush1.bf16.msra.mxu0 %v14093_v3  ;;  %2186 = vmatpush1.bf16.msra.mxu1 %v14096_v4  ;;  %v13838_v51 = vunpack.i.h.bf16 %v13836_v45  ;;  %v13837_v52 = vunpack.i.l.bf16 %v13836_v45  ;;  %v14126_v3 = vld [vmem:[%s27774_s5 + $0x308] ss:$16 sps:$4 sm:$0xff]   ;;  %v14131_v4 = vld [vmem:[%s27774_s5 + $0x324] ss:$16 sps:$4 sm:$0xff]   ;;  %v14159_v43 = vld [vmem:[%s27774_s5 + $0x3c0] ss:$16 sps:$4 sm:$0xff]  }
  0xbb   : > { %1968 = vmatprep.subr.bf16.mxu0 %v14101_v8  ;;  %2187 = vmatprep.subr.bf16.mxu1 %v14104_v27  ;;  %v14137_v8 = vld [vmem:[%s27774_s5 + $0x344] ss:$16 sps:$4 sm:$0xff]   ;;  %v14140_v27 = vld [vmem:[%s27774_s5 + $0x34c] ss:$16 sps:$4 sm:$0xff]   ;;  %v14162_v45 = vld [vmem:[%s27774_s5 + $0x3c8] ss:$16 sps:$4 sm:$0xff]  }
  0xbc   : > { %v892_v53 = vsel %vm27200_vm6, %v13817_v13, %v13837_v52  ;;  %v893_v54 = vsel %vm27200_vm6, %v13818_v28, %v13838_v51  ;;  %v14135_v28 = vld [vmem:[%s27774_s5 + $0x340] ss:$16 sps:$4 sm:$0xff]   ;;  %v14138_v13 = vld [vmem:[%s27774_s5 + $0x348] ss:$16 sps:$4 sm:$0xff]   ;;  %v14161_v40 = vld [vmem:[%s27774_s5 + $0x3c4] ss:$16 sps:$4 sm:$0xff]  }
  0xbd   : > { %1940 = vmatmul.mubr.bf16.gmra.mrb[8].mxu0 %v15506_v47  ;;  %2159 = vmatmul.mubr.bf16.gmra.mrb[8].mxu1 %v15506_v47  ;;  %v15697_v56 = vpack.c.bf16 %v893_v54, %v892_v53  ;;  %v14119_v47 = vld [vmem:[%s27774_s5 + $0x2e4] ss:$16 sps:$4 sm:$0xff]   ;;  %v14165_v51 = vld [vmem:[%s27774_s5 + $0x3e0] ss:$16 sps:$4 sm:$0xff]   ;;  %v14168_v52 = vld [vmem:[%s27774_s5 + $0x3e8] ss:$16 sps:$4 sm:$0xff]  }
  0xbe   : > { %1969 = vmatpush1.bf16.msra.mxu0 %v14099_v21  ;;  %2188 = vmatpush1.bf16.msra.mxu1 %v14102_v22  ;;  %v14152_v21 = vld [vmem:[%s27774_s5 + $0x38c] ss:$16 sps:$4 sm:$0xff]   ;;  %v14147_v22 = vld [vmem:[%s27774_s5 + $0x380] ss:$16 sps:$4 sm:$0xff]   ;;  %v14174_v53 = vld [vmem:[%s27774_s5 + $0x408] ss:$16 sps:$4 sm:$0xff]  }
  0xbf   : > { %1970 = vmatprep.subr.bf16.mxu0 %v14107_v30  ;;  %2189 = vmatprep.subr.bf16.mxu1 %v14110_v32  ;;  %v14158_v30 = vld [vmem:[%s27774_s5 + $0x3ac] ss:$16 sps:$4 sm:$0xff]   ;;  %v14153_v32 = vld [vmem:[%s27774_s5 + $0x3a0] ss:$16 sps:$4 sm:$0xff]   ;;  %v14179_v54 = vld [vmem:[%s27774_s5 + $0x424] ss:$16 sps:$4 sm:$0xff]  }
  0xc0   : > { %1949 = vmatprep.mubr.bf16.mxu0 %v985_v38  ;;  %2168 = vmatprep.mubr.bf16.mxu1 %v985_v38  ;;  %v14173_v38 = vld [vmem:[%s27774_s5 + $0x404] ss:$16 sps:$4 sm:$0xff]  }
  0xc2   : > { %1971 = vmatpush1.bf16.msra.mxu0 %v14105_v55  ;;  %2190 = vmatpush1.bf16.msra.mxu1 %v14108_v48  ;;  %v14167_v55 = vld [vmem:[%s27774_s5 + $0x3e4] ss:$16 sps:$4 sm:$0xff]   ;;  %v14170_v48 = vld [vmem:[%s27774_s5 + $0x3ec] ss:$16 sps:$4 sm:$0xff]  }
  0xc3   : > { %1972 = vmatprep.subr.bf16.mxu0 %v14113_v31  ;;  %2191 = vmatprep.subr.bf16.mxu1 %v14116_v37  ;;  %v14176_v31 = vld [vmem:[%s27774_s5 + $0x40c] ss:$16 sps:$4 sm:$0xff]   ;;  %v14171_v37 = vld [vmem:[%s27774_s5 + $0x400] ss:$16 sps:$4 sm:$0xff]  }
  0xc5   : > { %1950 = vmatmul.mubr.bf16.gmra.mrb[12].mxu0 %v984_v61  ;;  %2169 = vmatmul.mubr.bf16.gmra.mrb[12].mxu1 %v984_v61  ;;  %v14188_v61 = vld [vmem:[%s27774_s5 + $0x44c] ss:$16 sps:$4 sm:$0xff]  }
  0xc6   : > { %1973 = vmatpush1.bf16.msra.mxu0 %v14111_v57  ;;  %2192 = vmatpush1.bf16.msra.mxu1 %v14114_v60  ;;  %v14182_v57 = vld [vmem:[%s27774_s5 + $0x42c] ss:$16 sps:$4 sm:$0xff]   ;;  %v14177_v60 = vld [vmem:[%s27774_s5 + $0x420] ss:$16 sps:$4 sm:$0xff]  }
  0xc7   : > { %1974 = vmatprep.subr.bf16.mxu0 %v14119_v47  ;;  %2193 = vmatprep.subr.bf16.mxu1 %v14122_v16  ;;  %v14180_v47 = vld [vmem:[%s27774_s5 + $0x428] ss:$16 sps:$4 sm:$0xff]   ;;  %v14185_v16 = vld [vmem:[%s27774_s5 + $0x444] ss:$16 sps:$4 sm:$0xff]  }
  0xc8   : > { %1992 = vmatprep.mubr.bf16.mxu0 %v15552_v5  ;;  %2211 = vmatprep.mubr.bf16.mxu1 %v15552_v5  ;;  %v14132_v5 = vld [vmem:[%s27774_s5 + $0x328] ss:$16 sps:$4 sm:$0xff]  }
  0xca   : > { %1975 = vmatpush1.bf16.msra.mxu0 %v14117_v62  ;;  %2194 = vmatpush1.bf16.msra.mxu1 %v14120_v63  ;;  %v14186_v62 = vld [vmem:[%s27774_s5 + $0x448] ss:$16 sps:$4 sm:$0xff]   ;;  %v14191_v63 = vld [vmem:[%s27774_s5 + $0x464] ss:$16 sps:$4 sm:$0xff]  }
  0xcb   : > { %1976 = vmatprep.subr.bf16.mxu0 %v14125_v29  ;;  %2195 = vmatprep.subr.bf16.mxu1 %v14128_v1  ;;  %v937_v29 = vrot.slane %v15338_v18, 2  ;;  %v941_v1 = vrot.slane %v15341_v19, 2 }
  0xcd   : > { %v938_v18 = vsel %vm27190_vm2, %v933_v12, %v937_v29  ;;  %v942_v19 = vsel %vm27190_vm2, %v937_v29, %v941_v1  ;;  %v919_v12 = vrot.slane %v15280_v49, 2  ;;  %v931_v49 = vrot.slane %v15368_v41, 2 }
  0xce   : > { %1977 = vmatpush1.bf16.msra.mxu0 %v14123_v2  ;;  %2196 = vmatpush1.bf16.msra.mxu1 %v14126_v3  ;;  %v14189_v2 = vld [vmem:[%s27774_s5 + $0x460] ss:$16 sps:$4 sm:$0xff]   ;;  %v14192_v3 = vld [vmem:[%s27774_s5 + $0x468] ss:$16 sps:$4 sm:$0xff]  }
  0xcf   : > { %1978 = vmatprep.subr.bf16.mxu0 %v14131_v4  ;;  %2197 = vmatprep.subr.bf16.mxu1 %v14134_v6  ;;  %v14997_v4 = vmov 0  }
  0xd2   : > { %1979 = vmatpush1.bf16.msra.mxu0 %v14129_v7  ;;  %2198 = vmatpush1.bf16.msra.mxu1 %v14132_v5  ;;  %v920_v7 = vsel %vm27190_vm2, %v915_v10, %v919_v12  ;;  %v923_v5 = vrot.slane %v15347_v23, 2 }
  0xd3   : > { %1980 = vmatprep.subr.bf16.mxu0 %v14137_v8  ;;  %2199 = vmatprep.subr.bf16.mxu1 %v14140_v27  ;;  %v939_v8 = vrot.slane %v15400_v59, 2 }
  0xd4   : > { %v924_v27 = vsel %vm27190_vm2, %v919_v12, %v923_v5 }
  0xd5   : > { %v944_v58 = vsel %vm27190_vm2, %v939_v8, %v943_v36 }
  0xd6   : > { %1981 = vmatpush1.bf16.msra.mxu0 %v14135_v28  ;;  %2200 = vmatpush1.bf16.msra.mxu1 %v14138_v13 }
  0xd7   : > { %1982 = vmatprep.subr.bf16.mxu0 %v14143_v14  ;;  %2201 = vmatprep.subr.bf16.mxu1 %v14146_v35  ;;  %v27139_v14 = vlaneseq }
  0xd9   : > { %v15909_v35 = vshrl.u32 %v27139_v14, 7 }
  0xda   : > { %1983 = vmatpush1.bf16.msra.mxu0 %v14141_v9  ;;  %2202 = vmatpush1.bf16.msra.mxu1 %v14144_v17 }
  0xdb   : > { %1984 = vmatprep.subr.bf16.mxu0 %v14149_v20  ;;  %2203 = vmatprep.subr.bf16.mxu1 %v14152_v21  ;;  %27779 = vst [vmem:[#allocation16_spill] sm:$0xff] %v15909_v35  ;;  %v15912_v9 = vsub.s32 0, %v15909_v35  ;;  %v15915_v17 = vsub.s32 2, %v15909_v35  ;;  %v1133_v20 = vld [vmem:[%s27782_s26] sm:$0xf]  ;;  %v15921_v21 = vsub.s32 1, %v15909_v35 }
  0xdc   : > { %s15002_s26 = smov 96  }
  0xdd   : > { %27780 = vst [vmem:[#allocation17_spill] sm:$0xff] %v15912_v9  ;;  %27781 = vst [vmem:[#allocation18_spill] sm:$0xff] %v15915_v17 }
  0xde   : > { %1985 = vmatpush1.bf16.msra.mxu0 %v14147_v22  ;;  %2204 = vmatpush1.bf16.msra.mxu1 %v14150_v33  ;;  %27783 = vst [vmem:[#allocation19_spill] sm:$0xff] %v15921_v21  ;;  %v15924_v22 = vsub.s32 3, %v15909_v35  ;;  %v15927_v33 = vrot.slane %v1133_v20, %v15912_v9 }
  0xdf   : > { %1986 = vmatprep.subr.bf16.mxu0 %v14155_v25  ;;  %2205 = vmatprep.subr.bf16.mxu1 %v14158_v30  ;;  %v15930_v25 = vrot.slane %v1133_v20, %v15915_v17  ;;  %v15933_v30 = vrot.slane %v1133_v20, %v15921_v21 }
  0xe0   : > { %27784 = vst [vmem:[#allocation20_spill] sm:$0xff] %v15924_v22 }
  0xe2   : > { %1987 = vmatpush1.bf16.msra.mxu0 %v14153_v32  ;;  %2206 = vmatpush1.bf16.msra.mxu1 %v14156_v39 }
  0xe3   : > { %1988 = vmatprep.subr.bf16.mxu0 %v14161_v40  ;;  %2207 = vmatprep.subr.bf16.mxu1 %v14164_v42  ;;  %v15936_v40 = vrot.slane %v1133_v20, %v15924_v22 }
  0xe6   : > { %1989 = vmatpush1.bf16.msra.mxu0 %v14159_v43  ;;  %2208 = vmatpush1.bf16.msra.mxu1 %v14162_v45 }
  0xe7   : > { %1990 = vmatprep.subr.bf16.mxu0 %v14167_v55  ;;  %2209 = vmatprep.subr.bf16.mxu1 %v14170_v48 }
  0xea   : > { %1991 = vmatpush1.bf16.msra.mxu0 %v14165_v51  ;;  %2210 = vmatpush1.bf16.msra.mxu1 %v14168_v52 }
  0xeb   : > { %2033 = vmatprep.subr.bf16.mxu0 %v14173_v38  ;;  %2252 = vmatprep.subr.bf16.mxu1 %v14176_v31 }
  0xed   : > { %1993 = vmatmul.mubr.bf16.vlgmr.msra.gmra.mrb[0].mxu0 %v15633_v0  ;;  %2212 = vmatmul.mubr.bf16.vlgmr.msra.gmra.mrb[0].mxu1 %v15633_v0  ;;  %v14183_v0 = vld [vmem:[%s27774_s5 + $0x440] ss:$16 sps:$4 sm:$0xff]  }
  0xee   : > { %2034 = vmatpush1.bf16.msra.mxu0 %v14171_v37  ;;  %2002 = vmatprep.mubr.bf16.mxu0 %v15558_v11 }
  0xef   : > { %2221 = vmatprep.mubr.bf16.mxu1 %v15558_v11  ;;  %2253 = vmatpush1.bf16.msra.mxu1 %v14174_v53  ;;  %v14194_v11 = vld [vmem:[%s27774_s5 + $0x46c] ss:$16 sps:$4 sm:$0xff]  }
  0xf0   : > { %2035 = vmatprep.subr.bf16.mxu0 %v14179_v54  ;;  %2254 = vmatprep.subr.bf16.mxu1 %v14182_v57 }
  0xf2   : > { %2036 = vmatpush1.bf16.msra.mxu0 %v14177_v60 }
  0xf3   : > { %2255 = vmatpush1.bf16.msra.mxu1 %v14180_v47  ;;  %2037 = vmatprep.subr.bf16.mxu0 %v14185_v16 }
  0xf4   : > { %2256 = vmatprep.subr.bf16.mxu1 %v14188_v61 }
  0xf5   : > { %2003 = vmatmul.mubr.bf16.gmra.mrb[4].mxu0 %v15679_v46  ;;  %2222 = vmatmul.mubr.bf16.gmra.mrb[4].mxu1 %v15679_v46  ;;  %v987_v46 = vpack.c.bf16 %v942_v19, %v938_v18 }
  0xf6   : > { %2012 = vmatprep.mubr.bf16.mxu0 %v15566_v15  ;;  %2231 = vmatprep.mubr.bf16.mxu1 %v15566_v15  ;;  %v914_v15 = vrot.slane %v15283_v50, 2  ;;  %v927_v50 = vrot.slane %v15350_v24, 2 }
  0xf7   : > { %2038 = vmatpush1.bf16.msra.mxu0 %v14183_v0  ;;  %2257 = vmatpush1.bf16.msra.mxu1 %v14186_v62 }
  0xf8   : > { %2039 = vmatprep.subr.bf16.mxu0 %v14191_v63  ;;  %2258 = vmatprep.subr.bf16.mxu1 %v14194_v11  ;;  %v916_v6 = vsel %vm27190_vm2, %v914_v15, %v915_v10  ;;  %v928_v23 = vsel %vm27190_vm2, %v923_v5, %v927_v50  ;;  %v932_v24 = vsel %vm27190_vm2, %v927_v50, %v931_v49 }
  0xf9   : > { %v978_v28 = vpack.c.bf16 %v928_v23, %v924_v27 }
  0xfb   : > { %2040 = vmatpush1.bf16.msra.mxu0 %v14189_v2  ;;  %2259 = vmatpush1.bf16.msra.mxu1 %v14192_v3 }
  0xfd   : > { %2013 = vmatmul.mubr.bf16.gmra.mrb[8].mxu0 %v15661_v26  ;;  %2232 = vmatmul.mubr.bf16.gmra.mrb[8].mxu1 %v15661_v26  ;;  %v973_v26 = vpack.c.bf16 %v920_v7, %v916_v6 }
  0xfe   : > { %2022 = vmatprep.mubr.bf16.mxu0 %v987_v46  ;;  %2241 = vmatprep.mubr.bf16.mxu1 %v987_v46 }
 0x105   : > { %2023 = vmatmul.mubr.bf16.gmra.mrb[12].mxu0 %v15697_v56  ;;  %2242 = vmatmul.mubr.bf16.gmra.mrb[12].mxu1 %v15697_v56  ;;  %v935_v56 = vrot.slane %v15378_v44, 2 }
 0x106   : > { %2065 = vmatprep.mubr.bf16.mxu0 %v14997_v4  ;;  %2284 = vmatprep.mubr.bf16.mxu1 %v14997_v4 }
 0x107   : > { %v936_v41 = vsel %vm27190_vm2, %v931_v49, %v935_v56  ;;  %v940_v59 = vsel %vm27190_vm2, %v935_v56, %v939_v8 }
 0x108   : > { %v983_v44 = vpack.c.bf16 %v936_v41, %v932_v24  ;;  %v988_v13 = vpack.c.bf16 %v944_v58, %v940_v59 }
 0x10d   : > { %11529 = vmatmul.mubr.msk.bf16.vlgmr.msra.gmra.mrb[0].mxu0 %vm27200_vm6, %v973_v26  ;;  %11537 = vmatmul.mubr.msk.bf16.vlgmr.msra.gmra.mrb[0].mxu1 %vm27200_vm6, %v973_v26 }
 0x10e   : > { %2075 = vmatprep.mubr.bf16.mxu0 %v14997_v4  ;;  %2294 = vmatprep.mubr.bf16.mxu1 %v14997_v4 }
 0x115   : > { %11530 = vmatmul.mubr.msk.bf16.gmra.mrb[4].mxu0 %vm27200_vm6, %v978_v28  ;;  %11538 = vmatmul.mubr.msk.bf16.gmra.mrb[4].mxu1 %vm27200_vm6, %v978_v28 }
 0x116   : > { %2085 = vmatprep.mubr.bf16.mxu0 %v14997_v4  ;;  %2304 = vmatprep.mubr.bf16.mxu1 %v14997_v4 }
 0x11d   : > { %11531 = vmatmul.mubr.msk.bf16.gmra.mrb[8].mxu0 %vm27200_vm6, %v983_v44  ;;  %11539 = vmatmul.mubr.msk.bf16.gmra.mrb[8].mxu1 %vm27200_vm6, %v983_v44 }
 0x11e   : > { %2095 = vmatprep.mubr.bf16.mxu0 %v14997_v4  ;;  %2314 = vmatprep.mubr.bf16.mxu1 %v14997_v4 }
 0x125   : > { %11532 = vmatmul.mubr.msk.bf16.gmra.mrb[12].mxu0 %vm27200_vm6, %v988_v13  ;;  %11540 = vmatmul.mubr.msk.bf16.gmra.mrb[12].mxu1 %vm27200_vm6, %v988_v13 }
 0x1e0   : > { %v2067_v32 = vpop.f32.mrb[0].mxu0  ;;  %v2286_v39 = vpop.f32.mrb[0].mxu1 }
 0x1e1   : > { %v15939_v42 = vadd.f32 %v2067_v32, %v15927_v33  ;;  %v13574_v43 = vadd.f32 %v2286_v39, %v15930_v25  ;;  %v2069_v45 = vpop.f32.mrb[1].mxu0  ;;  %v2288_v55 = vpop.f32.mrb[1].mxu1 }
 0x1e2   : > { %v13559_v48 = vadd.f32 %v2069_v45, %v15933_v30  ;;  %v2071_v51 = vpop.f32.mrb[2].mxu0  ;;  %v2290_v52 = vpop.f32.mrb[2].mxu1  ;;  %v15949_v47 = vadd.f32 %v2288_v55, %v15936_v40 }
 0x1e3   : > { %v2325_v38 = vmax.f32 %v15939_v42, 0.0  ;;  %v2327_v31 = vmax.f32 %v13574_v43, 0.0  ;;  %v13560_v37 = vadd.f32 %v2071_v51, %v15927_v33  ;;  %v15946_v53 = vadd.f32 %v2290_v52, %v15930_v25  ;;  %v2073_v54 = vpop.f32.mrb[3].mxu0  ;;  %v2292_v57 = vpop.f32.mrb[3].mxu1 }
 0x1e4   : > { %v2326_v60 = vmax.f32 %v13559_v48, 0.0  ;;  %v15952_v16 = vadd.f32 %v2073_v54, %v15933_v30  ;;  %v15955_v61 = vadd.f32 %v2292_v57, %v15936_v40  ;;  %v27142_v18 = vmax.f32 %v15949_v47, 0.0 }
 0x1e5   : > { %v2329_v0 = vmax.f32 %v13560_v37, 0.0  ;;  %v2331_v62 = vmax.f32 %v15946_v53, 0.0  ;;  %v15959_v11 = vrot.slane %v2325_v38, 1  ;;  %v15961_v29 = vrot.slane %v2327_v31, 1 }
 0x1e6   : > { %v2330_v63 = vmax.f32 %v15952_v16, 0.0  ;;  %v15965_v3 = vrot.slane %v2326_v60, 1  ;;  %v27141_v46 = vmax.f32 %v15955_v61, 0.0  ;;  %v16009_v39 = vrot.slane %v27142_v18, 1 }
 0x1e7   : > { %v2390_v1 = vrot.slane %v2329_v0, 1  ;;  %v2396_v2 = vrot.slane %v2331_v62, 1 }
 0x1e8   : > { %v2393_v19 = vrot.slane %v2330_v63, 1  ;;  %v2077_v15 = vpop.f32.mrb[4].mxu0  ;;  %v2296_v10 = vpop.f32.mrb[4].mxu1  ;;  %v16013_v42 = vrot.slane %v27141_v46, 1 }
 0x1e9   : > { %v15972_v12 = vadd.f32 %v2077_v15, %v15927_v33  ;;  %v15975_v4 = vadd.f32 %v2296_v10, %v15930_v25  ;;  %v2079_v6 = vpop.f32.mrb[5].mxu0  ;;  %v2298_v7 = vpop.f32.mrb[5].mxu1  ;;  %v2397_v26 = vsel %vm27197_vm1, %v15961_v29, %v2396_v2  ;;  %v2391_v5 = vsel %vm27197_vm1, %v15959_v11, %v2390_v1 }
 0x1ea   : > { %v15982_v50 = vadd.f32 %v2079_v6, %v15933_v30  ;;  %v15985_v36 = vadd.f32 %v2298_v7, %v15936_v40  ;;  %v2081_v49 = vpop.f32.mrb[6].mxu0  ;;  %v2300_v56 = vpop.f32.mrb[6].mxu1  ;;  %v2394_v8 = vsel %vm27197_vm1, %v15965_v3, %v2393_v19  ;;  %v15989_v27 = vmax.f32 %v2327_v31, %v2397_v26 }
 0x1eb   : > { %v27145_v23 = vmax.f32 %v15972_v12, 0.0  ;;  %v27146_v28 = vmax.f32 %v15975_v4, 0.0  ;;  %v15994_v24 = vadd.f32 %v2081_v49, %v15927_v33  ;;  %v15997_v41 = vadd.f32 %v2300_v56, %v15930_v25  ;;  %v2083_v44 = vpop.f32.mrb[7].mxu0  ;;  %v2302_v59 = vpop.f32.mrb[7].mxu1 }
 0x1ec   : > { %27785 = vst [vmem:[#allocation21_spill] sm:$0xff] %v15989_v27  ;;  %v27149_v58 = vmax.f32 %v15982_v50, 0.0  ;;  %v27140_v13 = vmax.f32 %v15985_v36, 0.0  ;;  %v16002_v20 = vadd.f32 %v2083_v44, %v15933_v30  ;;  %v16005_v32 = vadd.f32 %v2302_v59, %v15936_v40 }
 0x1ed   : > { %v16017_v43 = vrot.slane %v27145_v23, 1  ;;  %v27143_v45 = vmax.f32 %v15997_v41, 0.0  ;;  %v2405_v55 = vrot.slane %v27146_v28, 1  ;;  %v27148_v51 = vmax.f32 %v15994_v24, 0.0 }
 0x1ee   : > { %v2403_v48 = vrot.slane %v27149_v58, 1  ;;  %v27144_v52 = vmax.f32 %v16002_v20, 0.0  ;;  %v16028_v31 = vrot.slane %v27140_v13, 1  ;;  %v27147_v37 = vmax.f32 %v16005_v32, 0.0 }
 0x1ef   : > { %v16031_v54 = vmax.f32 %v2326_v60, %v2394_v8  ;;  %v2402_v57 = vsel %vm27197_vm1, %v2390_v1, %v16017_v43  ;;  %v16037_v15 = vrot.slane %v27143_v45, 1  ;;  %v16043_v26 = vmax.f32 %v2325_v38, %v2391_v5 }
 0x1f0   : > { %v16041_v10 = vrot.slane %v27144_v52, 1  ;;  %v2087_v6 = vpop.f32.mrb[8].mxu0  ;;  %v2306_v7 = vpop.f32.mrb[8].mxu1  ;;  %v16045_v49 = vmax.f32 %v2329_v0, %v2402_v57  ;;  %v2404_v59 = vsel %vm27197_vm1, %v2393_v19, %v2403_v48  ;;  %v2409_v52 = vrot.slane %v27148_v51, 1 }
 0x1f1   : > { %v13839_v60 = vpack.i.bf16 %v15989_v27, %v16031_v54  ;;  %v16050_v56 = vadd.f32 %v2087_v6, %v15927_v33  ;;  %v16053_v1 = vadd.f32 %v2306_v7, %v15930_v25  ;;  %v2089_v8 = vpop.f32.mrb[9].mxu0  ;;  %v2308_v44 = vpop.f32.mrb[9].mxu1  ;;  %v2406_v6 = vsel %vm27197_vm1, %v2396_v2, %v2405_v55 }
 0x1f2   : > { %v16057_v14 = vadd.f32 %v2089_v8, %v15933_v30  ;;  %v16060_v38 = vadd.f32 %v2308_v44, %v15936_v40  ;;  %v2091_v0 = vpop.f32.mrb[10].mxu0  ;;  %v2310_v5 = vpop.f32.mrb[10].mxu1  ;;  %v13844_v57 = vpack.i.bf16 %v16045_v49, %v16043_v26  ;;  %v2414_v16 = vsel %vm27197_vm1, %v2405_v55, %v16037_v15 }
 0x1f3   : > { %13840 = vrot.lane.b32.xlu0 %v13839_v60, %s14998_s2  ;;  %v27150_v7 = vmax.f32 %v16050_v56, 0.0  ;;  %v27151_v19 = vmax.f32 %v16053_v1, 0.0  ;;  %v16069_v8 = vadd.f32 %v2091_v0, %v15927_v33  ;;  %v16072_v44 = vadd.f32 %v2310_v5, %v15930_v25  ;;  %v2093_v13 = vpop.f32.mrb[11].mxu0  ;;  %v2312_v46 = vpop.f32.mrb[11].mxu1 }
 0x1f4   : > { %v27152_v18 = vmax.f32 %v16057_v14, 0.0  ;;  %v27153_v45 = vmax.f32 %v16060_v38, 0.0  ;;  %v16077_v2 = vadd.f32 %v2093_v13, %v15933_v30  ;;  %v16080_v60 = vadd.f32 %v2312_v46, %v15936_v40 }
 0x1f5   : > { %v16086_v0 = vrot.slane %v27147_v37, 1  ;;  %v27154_v5 = vmax.f32 %v16069_v8, 0.0  ;;  %v27155_v23 = vmax.f32 %v16072_v44, 0.0  ;;  %v16092_v28 = vrot.slane %v27150_v7, 1 }
 0x1f6   : > { %v16096_v13 = vrot.slane %v27151_v19, 1  ;;  %v16100_v46 = vrot.slane %v27152_v18, 1  ;;  %v16104_v37 = vrot.slane %v27153_v45, 1  ;;  %v16111_v7 = vmax.f32 %v2330_v63, %v2404_v59 }
 0x1f7   : > { %13845 = vrot.lane.b32.xlu0 %v13844_v57, %s14998_s2  ;;  %v16115_v19 = vmax.f32 %v2331_v62, %v2406_v6  ;;  %v16119_v18 = vrot.slane %v27154_v5, 1  ;;  %v16123_v45 = vrot.slane %v27155_v23, 1  ;;  %v2412_v57 = vsel %vm27197_vm1, %v2403_v48, %v16041_v10 }
 0x1f8   : > { %v2097_v51 = vpop.f32.mrb[12].mxu0  ;;  %v2316_v58 = vpop.f32.mrb[12].mxu1  ;;  %v27787_v5 = vmax.f32 %v15982_v50, 0.0  ;;  %v27788_v22 = vmax.f32 %v15975_v4, 0.0 }
 0x1f9   : > { %27786 = vst [vmem:[#allocation22_spill] sm:$0xff] %v16115_v19  ;;  %v13849_v53 = vpack.i.bf16 %v16115_v19, %v16111_v7  ;;  %v16132_v62 = vadd.f32 %v2097_v51, %v15927_v33  ;;  %v16135_v63 = vadd.f32 %v2316_v58, %v15930_v25  ;;  %v2099_v59 = vpop.f32.mrb[13].mxu0  ;;  %v2318_v6 = vpop.f32.mrb[13].mxu1  ;;  %v2410_v58 = vsel %vm27197_vm1, %v16017_v43, %v2409_v52 }
 0x1fa   : > { %v16139_v23 = vmax.f32 %v27787_v5, %v2412_v57  ;;  %v16142_v48 = vadd.f32 %v2099_v59, %v15933_v30  ;;  %v16145_v55 = vadd.f32 %v2318_v6, %v15936_v40  ;;  %v16149_v21 = vmax.f32 %v27788_v22, %v2414_v16  ;;  %v2101_v51 = vpop.f32.mrb[14].mxu0  ;;  %v2320_v17 = vpop.f32.mrb[14].mxu1 }
 0x1fb   : > { %13850 = vrot.lane.b32.xlu1 %v13849_v53, %s14998_s2  ;;  %v27168_v50 = vmax.f32 %v16132_v62, 0.0  ;;  %v2351_v5 = vmax.f32 %v16135_v63, 0.0  ;;  %v13572_v57 = vadd.f32 %v2101_v51, %v15927_v33  ;;  %v13588_v59 = vadd.f32 %v2320_v17, %v15930_v25  ;;  %v2103_v6 = vpop.f32.mrb[15].mxu0  ;;  %v2322_v9 = vpop.f32.mrb[15].mxu1 }
 0x1fc   : > { %27789 = vst [vmem:[#allocation23_spill] sm:$0xff] %v16149_v21  ;;  %v27790_v22 = vmax.f32 %v16077_v2, 0.0  ;;  %v2350_v16 = vmax.f32 %v16142_v48, 0.0  ;;  %v13573_v43 = vadd.f32 %v2103_v6, %v15933_v30  ;;  %v13854_v63 = vpack.i.bf16 %v16149_v21, %v16139_v23 }
 0x1fd   : > { %v2433_v53 = vrot.slane %v27168_v50, 1  ;;  %v2353_v33 = vmax.f32 %v13572_v57, 0.0  ;;  %v2355_v51 = vmax.f32 %v13588_v59, 0.0  ;;  %v2437_v17 = vrot.slane %v2351_v5, 1 }
 0x1fe   : > { %v2427_v4 = vrot.slane %v27790_v22, 1  ;;  %v2435_v25 = vrot.slane %v2350_v16, 1  ;;  %v2354_v27 = vmax.f32 %v13573_v43, 0.0  ;;  %v13589_v19 = vadd.f32 %v2322_v9, %v15936_v40 }
 0x1ff   : > { %13855 = vrot.lane.b32.xlu1 %v13854_v63, %s14998_s2  ;;  %v2441_v48 = vrot.slane %v2353_v33, 1  ;;  %v2445_v22 = vrot.slane %v2355_v51, 1  ;;  %v2418_v30 = vsel %vm27197_vm1, %v2409_v52, %v16092_v28  ;;  %v27791_v6 = vmax.f32 %v15972_v12, 0.0 }
 0x200   : > { %v2443_v34 = vrot.slane %v2354_v27, 1  ;;  %v2356_v21 = vmax.f32 %v13589_v19, 0.0  ;;  %v27792_v57 = vmax.f32 %v15994_v24, 0.0  ;;  %v2420_v9 = vsel %vm27197_vm1, %v16041_v10, %v16100_v46 }
 0x201   : > { %v16173_v50 = vmax.f32 %v27791_v6, %v2410_v58  ;;  %v2485_v40 = vsel %vm27197_vm1, %v2441_v48, %v15959_v11  ;;  %v2487_v52 = vsel %vm27197_vm1, %v2445_v22, %v15961_v29  ;;  %v2422_v12 = vsel %vm27197_vm1, %v16037_v15, %v16096_v13 }
 0x202   : > { %v16177_v59 = vmax.f32 %v27792_v57, %v2418_v30  ;;  %v27793_v19 = vmax.f32 %v16002_v20, 0.0  ;;  %v16193_v24 = vmax.f32 %v2353_v33, %v2485_v40  ;;  %v16195_v43 = vmax.f32 %v2355_v51, %v2487_v52 }
 0x203   : > { %v2486_v10 = vsel %vm27197_vm1, %v2443_v34, %v15965_v3  ;;  %v2447_v63 = vrot.slane %v2356_v21, 1  ;;  %v27795_v30 = vmax.f32 %v15997_v41, 0.0  ;;  %v2428_v20 = vsel %vm27197_vm1, %v16100_v46, %v2427_v4 }
 0x204   : > { %v16191_v58 = vmax.f32 %v27793_v19, %v2420_v9  ;;  %27794 = vst [vmem:[#allocation24_spill] sm:$0xff] %v16195_v43  ;;  %v16199_v11 = vmax.f32 %v2354_v27, %v2486_v10  ;;  %v13859_v29 = vpack.i.bf16 %v16177_v59, %v16173_v50  ;;  %v2430_v3 = vsel %vm27197_vm1, %v16096_v13, %v16123_v45 }
 0x205   : > { %v16205_v15 = vmax.f32 %v27795_v30, %v2422_v12  ;;  %v2488_v33 = vsel %vm27197_vm1, %v2447_v63, %v16009_v39  ;;  %v27797_v27 = vmax.f32 %v16057_v14, 0.0  ;;  %v2436_v6 = vsel %vm27197_vm1, %v2427_v4, %v2435_v25 }
 0x206   : > { %v16219_v57 = vmax.f32 %v2356_v21, %v2488_v33  ;;  %13860 = vrot.lane.b32.xlu1 %v13859_v29, %s14998_s2  ;;  %v27799_v46 = vmax.f32 %v16053_v1, 0.0  ;;  %v2438_v13 = vsel %vm27197_vm1, %v16123_v45, %v2437_v17  ;;  %v27801_v14 = vmax.f32 %v16077_v2, 0.0 }
 0x207   : > { %27796 = vst [vmem:[#allocation25_spill] sm:$0xff] %v16205_v15  ;;  %v16216_v51 = vmax.f32 %v27797_v27, %v2428_v20  ;;  %v13864_v41 = vpack.i.bf16 %v16205_v15, %v16191_v58  ;;  %v27802_v4 = vmax.f32 %v16072_v44, 0.0  ;;  %v2426_v52 = vsel %vm27197_vm1, %v16092_v28, %v16119_v18 }
 0x208   : > { %27798 = vst [vmem:[#allocation26_spill] sm:$0xff] %v16219_v57  ;;  %v16226_v9 = vmax.f32 %v27799_v46, %v2430_v3  ;;  %v16232_v40 = vmax.f32 %v27801_v14, %v2436_v6  ;;  %v2434_v1 = vsel %vm27197_vm1, %v16119_v18, %v2433_v53  ;;  %v27804_v12 = vmax.f32 %v16080_v60, 0.0 }
 0x209   : > { %v16236_v21 = vmax.f32 %v27802_v4, %v2438_v13  ;;  %13865 = vrot.lane.b32.xlu0 %v13864_v41, %s14998_s2  ;;  %v27805_v45 = vmax.f32 %v16050_v56, 0.0  ;;  %v27806_v44 = vmax.f32 %v16069_v8, 0.0  ;;  %v2444_v29 = vsel %vm27197_vm1, %v2435_v25, %v2443_v34 }
 0x20a   : > { %27800 = vst [vmem:[#allocation27_spill] sm:$0xff] %v16226_v9  ;;  %v2431_v19 = vrot.slane %v27804_v12, 1  ;;  %v27807_v28 = vmax.f32 %v16145_v55, 0.0  ;;  %v2446_v20 = vsel %vm27197_vm1, %v2437_v17, %v2445_v22  ;;  %v16260_v33 = vmax.f32 %v2350_v16, %v2444_v29 }
 0x20b   : > { %27803 = vst [vmem:[#allocation28_spill] sm:$0xff] %v16236_v21  ;;  %v16248_v2 = vmax.f32 %v27805_v45, %v2426_v52  ;;  %v16252_v10 = vmax.f32 %v27806_v44, %v2434_v1  ;;  %v13879_v18 = vpack.i.bf16 %v16236_v21, %v16232_v40  ;;  %v13869_v56 = vpack.i.bf16 %v16226_v9, %v16216_v51 }
 0x20c   : > { %v2439_v30 = vrot.slane %v27807_v28, 1  ;;  %v16264_v3 = vmax.f32 %v2351_v5, %v2446_v20  ;;  %v2442_v8 = vsel %vm27197_vm1, %v2433_v53, %v2441_v48  ;;  %v2400_v34 = vsel %vm27197_vm1, %v16009_v39, %v16013_v42 }
 0x20d   : > { %13880 = vrot.lane.b32.xlu1 %v13879_v18, %s14998_s2  ;;  %v27809_v25 = vmax.f32 %v16132_v62, 0.0  ;;  %v2408_v16 = vsel %vm27197_vm1, %v16013_v42, %v16028_v31  ;;  %v27810_v17 = vmax.f32 %v15949_v47, 0.0  ;;  %v2416_v53 = vsel %vm27197_vm1, %v16028_v31, %v16086_v0  ;;  %13870 = vrot.lane.b32.xlu0 %v13869_v56, %s14998_s2 }
 0x20e   : > { %27808 = vst [vmem:[#allocation29_spill] sm:$0xff] %v16264_v3  ;;  %v13874_v39 = vpack.i.bf16 %v16252_v10, %v16248_v2  ;;  %v27811_v62 = vmax.f32 %v15955_v61, 0.0  ;;  %v2424_v42 = vsel %vm27197_vm1, %v16086_v0, %v16104_v37  ;;  %v27812_v47 = vmax.f32 %v15985_v36, 0.0 }
 0x20f   : > { %v16273_v27 = vmax.f32 %v27809_v25, %v2442_v8  ;;  %v16280_v5 = vmax.f32 %v27810_v17, %v2400_v34  ;;  %v13884_v31 = vpack.i.bf16 %v16264_v3, %v16260_v33  ;;  %v27814_v6 = vmax.f32 %v16005_v32, 0.0 }
 0x210   : > { %v16290_v48 = vmax.f32 %v27811_v62, %v2408_v16  ;;  %v16297_v22 = vmax.f32 %v27812_v47, %v2416_v53  ;;  %v2432_v61 = vsel %vm27197_vm1, %v16104_v37, %v2431_v19  ;;  %v2440_v46 = vsel %vm27197_vm1, %v2431_v19, %v2439_v30 }
 0x211   : > { %v16303_v41 = vmax.f32 %v27814_v6, %v2424_v42  ;;  %v27816_v13 = vmax.f32 %v16060_v38, 0.0  ;;  %v27818_v36 = vmov %v27804_v12  ;;  %v2448_v4 = vsel %vm27197_vm1, %v2439_v30, %v2447_v63  ;;  %13885 = vrot.lane.b32.xlu1 %v13884_v31, %s14998_s2  ;;  %13875 = vrot.lane.b32.xlu0 %v13874_v39, %s14998_s2 }
 0x212   : > { %27813 = vst [vmem:[#allocation30_spill] sm:$0xff] %v16297_v22  ;;  %v16314_v0 = vmax.f32 %v27818_v36, %v2440_v46  ;;  %v27820_v32 = vmov %v27807_v28  ;;  %v13894_v37 = vpack.i.bf16 %v16193_v24, %v16273_v27  ;;  %v13889_v38 = vpack.i.bf16 %v16195_v43, %v16199_v11 }
 0x213   : > { %27815 = vst [vmem:[#allocation31_spill] sm:$0xff] %v16303_v41  ;;  %v16310_v14 = vmax.f32 %v27816_v13, %v2432_v61  ;;  %v16320_v52 = vmax.f32 %v27820_v32, %v2448_v4  ;;  %v13904_v60 = vpack.i.bf16 %v16303_v41, %v16297_v22  ;;  %v13899_v55 = vpack.i.bf16 %v16290_v48, %v16280_v5 }
 0x214   : > { %27819 = vst [vmem:[#allocation33_spill] sm:$0xff] %v16314_v0  ;;  %v27170_v63 = vmov 0.0   ;;  %v27822_v30 = vlaneseq  ;;  %v16354_v20 = vadd.s32 8, %v15909_v35  ;;  %v2729_v39 = vmul.u32 2, %v15909_v35 }
 0x215   : > { %27817 = vst [vmem:[#allocation32_spill] sm:$0xff] %v16310_v14  ;;  %27821 = vst [vmem:[#allocation34_spill] sm:$0xff] %v16320_v52  ;;  %13895 = vrot.lane.b32.xlu1 %v13894_v37, %s14998_s2  ;;  %13890 = vrot.lane.b32.xlu0 %v13889_v38, %s14998_s2  ;;  %v13914_v1 = vpack.i.bf16 %v16219_v57, %v16320_v52  ;;  %v13909_v12 = vpack.i.bf16 %v16314_v0, %v16310_v14  ;;  %v16395_v37 = vadd.s32 16, %v15909_v35  ;;  %v27860_v9 = vmov 0 }
 0x216   : > { %2821 = vmatprep.mubr.f32.mxu0 %v27170_v63  ;;  %2910 = vmatprep.mubr.f32.mxu1 %v27170_v63  ;;  %v16351_v18 = vand.u32 127, %v27822_v30  ;;  %27824 = vst [vmem:[#allocation36_spill] sm:$0xff] %v16354_v20  ;;  %v2730_v42 = vmul.u32 2, %v16354_v20  ;;  %v16398_v38 = vadd.s32 24, %v15909_v35  ;;  %v27890_v15 = vmov 0 }
 0x217   : > { %27828 = vst [vmem:[#allocation38_spill] sm:$0xff] %v16395_v37  ;;  %v3192_v4 = vshra.s32 %v16395_v37, 3 }
 0x218   : > { %27823 = vst [vmem:[#allocation35_spill] sm:$0xff] %v16351_v18  ;;  %v16361_v34 = vadd.s32 128, %v16351_v18  ;;  %v3254_v6 = vshra.s32 %v16351_v18, 3  ;;  %vm16387_vm8 = vcmp.eq.s32.totalorder %v16351_v18, %v2729_v39  ;;  %v16392_v32 = vand.u32 7, %v16351_v18  ;;  %27829 = vst [vmem:[#allocation39_spill] sm:$0xff] %v16398_v38 }
 0x219   : > { %13905 = vrot.lane.b32.xlu1 %v13904_v60, %s14998_s2  ;;  %13900 = vrot.lane.b32.xlu0 %v13899_v55, %s14998_s2  ;;  %vm2734_vm9 = vcmp.eq.s32.totalorder %v16351_v18, %v2730_v42  ;;  %v16695_v42 = vadd.s32 88, %v15909_v35 }
 0x21a   : > { %27825 = vst [vmem:[#allocation37_spill] sm:$0xff] %v16361_v34  ;;  %v3255_v61 = vshra.s32 %v16361_v34, 3  ;;  %v16420_v39 = vsel %vm2734_vm9, 1.0, %v27170_v63 }
 0x21b   : > { %27831 = vst [vmem:[#allocation41_spill] sm:$0xff] %v16420_v39  ;;  %27917 = vst [vmem:[#allocation59_spill] sm:$0xff] %v16695_v42 }
 0x21c   : > { %v16406_v55 = vmul.u32 2, %v3255_v61  ;;  %v16429_v61 = vadd.s32 32, %v15909_v35 }
 0x21d   : > { %13915 = vrot.lane.b32.xlu1 %v13914_v1, %s14998_s2  ;;  %13910 = vrot.lane.b32.xlu0 %v13909_v12, %s14998_s2  ;;  %v2996_v1 = vand.u32 7, %v15909_v35  ;;  %v2997_v12 = vand.u32 7, %v16354_v20 }
 0x21e   : > { %27833 = vst [vmem:[#allocation43_spill] sm:$0xff] %v16429_v61  ;;  %vm16517_vm9 = vcmp.eq.s32.totalorder %v3192_v4, %v16406_v55 }
 0x21f   : > { %vm16483_vm14 = vcmp.eq.s32.totalorder %v2996_v1, %v16392_v32  ;;  %vm16500_vm3 = vcmp.eq.s32.totalorder %v2997_v12, %v16392_v32 }
 0x265   : > { %v16343_v19 = vpop.permute.xlu0 %13840 }
 0x266   : > { %v27175_v44 = vunpack.i.h.bf16 %v16343_v19  ;;  %v13842_v29 = vunpack.i.l.bf16 %v16343_v19 }
 0x268   : > { %v2619_v16 = vsel %vm27201_vm7, %v13842_v29, %v27175_v44  ;;  %v16465_v44 = vadd.s32 40, %v15909_v35 }
 0x269   : > { %v16345_v45 = vpop.permute.xlu0 %13845 }
 0x26a   : > { %v27174_v28 = vunpack.i.l.bf16 %v16345_v45  ;;  %v27173_v56 = vunpack.i.h.bf16 %v16345_v45  ;;  %27842 = vst [vmem:[#allocation44_spill] sm:$0xff] %v16465_v44  ;;  %v3195_v21 = vshra.s32 %v16465_v44, 3 }
 0x26c   : > { %v2618_v8 = vsel %vm27201_vm7, %v27174_v28, %v13842_v29 }
 0x26d   : > { %v16363_v25 = vpop.permute.xlu1 %13850  ;;  %v2690_v62 = vmax.f32 %v16043_v26, %v2618_v8  ;;  %v2691_v26 = vmax.f32 %v16031_v54, %v2619_v16  ;;  %v16401_v54 = vand.u32 7, %v16361_v34  ;;  %v3190_v8 = vshra.s32 %v15909_v35, 3 }
 0x26e   : > { %v27176_v17 = vunpack.i.h.bf16 %v16363_v25  ;;  %v13852_v53 = vunpack.i.l.bf16 %v16363_v25  ;;  %v3191_v16 = vshra.s32 %v16354_v20, 3  ;;  %v3000_v20 = vand.u32 7, %v16429_v61 }
 0x26f   : > { %vm16434_vm10 = vcmp.eq.s32.totalorder %v2996_v1, %v16401_v54  ;;  %vm16445_vm11 = vcmp.eq.s32.totalorder %v2997_v12, %v16401_v54  ;;  %vm16450_vm12 = vcmp.eq.s32.totalorder %v3190_v8, %v16406_v55  ;;  %v16471_v34 = vadd.s32 48, %v15909_v35 }
 0x270   : > { %v2621_v47 = vsel %vm27201_vm7, %v27173_v56, %v13852_v53  ;;  %v2622_v31 = vsel %vm27201_vm7, %v13852_v53, %v27176_v17  ;;  %v16417_v53 = vsel %vm16387_vm8, 1.0, %v27170_v63  ;;  %vm16455_vm13 = vcmp.eq.s32.totalorder %v3191_v16, %v16406_v55 }
 0x271   : > { %v2694_v46 = vmax.f32 %v16045_v49, %v2621_v47  ;;  %v16382_v13 = vpop.permute.xlu1 %13855  ;;  %v2695_v36 = vmax.f32 %v16111_v7, %v2622_v31  ;;  %v16404_v7 = vmul.u32 2, %v3254_v6  ;;  %27830 = vst [vmem:[#allocation40_spill] sm:$0xff] %v16417_v53  ;;  %v2998_v31 = vand.u32 7, %v16395_v37  ;;  %27843 = vst [vmem:[#allocation45_spill] sm:$0xff] %v16471_v34 }
 0x272   : > { %v27172_v29 = vunpack.i.h.bf16 %v16382_v13  ;;  %v13857_v30 = vunpack.i.l.bf16 %v16382_v13  ;;  %v2999_v6 = vand.u32 7, %v16398_v38  ;;  %v3001_v12 = vand.u32 7, %v16465_v44 }
 0x273   : > { %v13103_v49 = vpack.c.bf16 %v2695_v36, %v2691_v26  ;;  %v13105_v60 = vpack.c.bf16 %v2694_v46, %v2690_v62  ;;  %v3193_v46 = vshra.s32 %v16398_v38, 3  ;;  %vm16488_vm15 = vcmp.eq.s32.totalorder %v3190_v8, %v16404_v7 }
 0x274   : > { %vm16505_vm4 = vcmp.eq.s32.totalorder %v3191_v16, %v16404_v7  ;;  %vm16512_vm8 = vcmp.eq.s32.totalorder %v2998_v31, %v16401_v54  ;;  %v16523_v16 = vadd.s32 56, %v15909_v35  ;;  %vm16529_vm2 = vcmp.eq.s32.totalorder %v2999_v6, %v16401_v54 }
 0x275   : > { %13104 = vmatprep.subr.bf16.mxu0 %v13103_v49  ;;  %v2625_v49 = vsel %vm27201_vm7, %v13857_v30, %v27172_v29  ;;  %v27861_v9 = vsel %vm16529_vm2, 4294967295, %v27860_v9  ;;  %vm16541_vm1 = vcmp.eq.s32.totalorder %v3193_v46, %v16406_v55  ;;  %vm16546_vm0 = vcmp.eq.s32.totalorder %v2998_v31, %v16392_v32 }
 0x276   : > { %13106 = vmatpush1.bf16.msra.mxu0 %v13105_v60  ;;  %v2699_v57 = vmax.f32 %v16139_v23, %v2625_v49  ;;  %27859 = vst [vmem:[#allocation48_spill] sm:$0xff] %v16523_v16  ;;  %vm16551_vm6 = vcmp.eq.s32.totalorder %v3192_v4, %v16404_v7  ;;  %vm16567_vm5 = vcmp.eq.s32.totalorder %v3193_v46, %v16404_v7  ;;  %v27874_v31 = vmov 0 }
 0x277   : > { %v27875_v31 = vsel %vm16567_vm5, 4294967295, %v27874_v31  ;;  %v3002_v4 = vand.u32 7, %v16471_v34  ;;  %v16587_v46 = vadd.s32 72, %v15909_v35  ;;  %vm16596_vm5 = vcmp.eq.s32.totalorder %v3001_v12, %v16401_v54 }
 0x278   : > { %v16424_v47 = vpop.permute.xlu1 %13860  ;;  %v3197_v44 = vshra.s32 %v16523_v16, 3  ;;  %v27912_v36 = vmov 0  ;;  %v27915_v63 = vmov 0 }
 0x279   : > { %27832 = vst [vmem:[#allocation42_spill] sm:$0xff] %v16424_v47  ;;  %v27182_v26 = vunpack.i.l.bf16 %v16424_v47  ;;  %v27844_v43 = vunpack.i.h.bf16 %v16424_v47  ;;  %27880 = vst [vmem:[#allocation52_spill] sm:$0xff] %v16587_v46  ;;  %v3199_v62 = vshra.s32 %v16587_v46, 3 }
 0x27b   : > { %v16442_v60 = vpop.permute.xlu0 %13865  ;;  %v2624_v29 = vsel %vm27201_vm7, %v27182_v26, %v13857_v30 }
 0x27c   : > { %v27187_v56 = vunpack.i.h.bf16 %v16442_v60  ;;  %v13867_v28 = vunpack.i.l.bf16 %v16442_v60  ;;  %v2698_v17 = vmax.f32 %v16173_v50, %v2624_v29  ;;  %v27973_v29 = vunpack.i.h.bf16 %v16442_v60 }
 0x27d   : > { %v16863_v60 = vadd.s32 104, %v15909_v35 }
 0x27e   : > { %v2627_v30 = vsel %vm27201_vm7, %v27844_v43, %v13867_v28  ;;  %v2628_v26 = vsel %vm27201_vm7, %v13867_v28, %v27187_v56  ;;  %v3194_v43 = vshra.s32 %v16429_v61, 3  ;;  %v27981_v56 = vmov 0 }
 0x27f   : > { %v16479_v3 = vpop.permute.xlu1 %13880  ;;  %v2702_v52 = vmax.f32 %v16177_v59, %v2627_v30  ;;  %v16494_v39 = vpop.permute.xlu0 %13870  ;;  %v2703_v1 = vmax.f32 %v16191_v58, %v2628_v26  ;;  %v27985_v58 = vld [vmem:[#allocation22_spill] sm:$0xff] }
 0x280   : > { %27845 = vst [vmem:[#allocation46_spill] sm:$0xff] %v16479_v3  ;;  %27850 = vst [vmem:[#allocation47_spill] sm:$0xff] %v16494_v39  ;;  %v27198_v28 = vunpack.i.h.bf16 %v16479_v3  ;;  %v13882_v23 = vunpack.i.l.bf16 %v16479_v3  ;;  %v13872_v30 = vunpack.i.l.bf16 %v16494_v39  ;;  %v27862_v0 = vunpack.i.h.bf16 %v16494_v39 }
 0x281   : > { %v13107_v59 = vpack.c.bf16 %v2703_v1, %v2699_v57  ;;  %v13109_v61 = vpack.c.bf16 %v2702_v52, %v2698_v17  ;;  %v27866_v57 = vmov 0  ;;  %v27868_v52 = vmov 0 }
 0x282   : > { %v2634_v26 = vsel %vm27201_vm7, %v13882_v23, %v27198_v28  ;;  %v2631_v14 = vsel %vm27201_vm7, %v13872_v30, %v27862_v0  ;;  %v27867_v57 = vsel %vm16546_vm0, 4294967295, %v27866_v57  ;;  %v27869_v52 = vsel %vm16551_vm6, 4294967295, %v27868_v52 }
 0x283   : > { %v16537_v53 = vpop.permute.xlu1 %13885  ;;  %v2711_v41 = vmax.f32 %v16232_v40, %v2634_v26  ;;  %v16556_v0 = vadd.s32 64, %v15909_v35  ;;  %v16558_v17 = vpop.permute.xlu0 %13875  ;;  %13108 = vmatprep.subr.bf16.mxu0 %v13107_v59  ;;  %v2707_v40 = vmax.f32 %v16216_v51, %v2631_v14  ;;  %vm16562_vm7 = vcmp.eq.s32.totalorder %v2999_v6, %v16392_v32 }
 0x284   : > { %27863 = vst [vmem:[#allocation49_spill] sm:$0xff] %v16537_v53  ;;  %27871 = vst [vmem:[#allocation51_spill] sm:$0xff] %v16558_v17  ;;  %v27872_v1 = vmov 0  ;;  %v3196_v26 = vshra.s32 %v16471_v34, 3  ;;  %13110 = vmatpush1.bf16.msra.mxu0 %v13109_v61  ;;  %vm16576_vm0 = vcmp.eq.s32.totalorder %v3000_v20, %v16401_v54  ;;  %v27876_v51 = vmov 0 }
 0x285   : > { %27870 = vst [vmem:[#allocation50_spill] sm:$0xff] %v16556_v0  ;;  %v27873_v1 = vsel %vm16562_vm7, 4294967295, %v27872_v1  ;;  %v27877_v51 = vsel %vm16576_vm0, 4294967295, %v27876_v51  ;;  %vm16581_vm7 = vcmp.eq.s32.totalorder %v3194_v43, %v16406_v55  ;;  %v27878_v14 = vmov 0 }
 0x286   : > { %v27879_v14 = vsel %vm16581_vm7, 4294967295, %v27878_v14  ;;  %v3003_v6 = vand.u32 7, %v16523_v16  ;;  %v13887_v59 = vunpack.i.l.bf16 %v16537_v53  ;;  %v13111_v61 = vpack.c.bf16 %v2711_v41, %v2707_v40 }
 0x287   : > { %v27881_v34 = vmov 0  ;;  %vm16601_vm7 = vcmp.eq.s32.totalorder %v3195_v21, %v16406_v55  ;;  %v27883_v39 = vmov 0  ;;  %v27885_v3 = vunpack.i.h.bf16 %v16558_v17  ;;  %v16612_v38 = vpop.permute.xlu1 %13895 }
 0x288   : > { %v27882_v34 = vsel %vm16596_vm5, 4294967295, %v27881_v34  ;;  %v27884_v39 = vsel %vm16601_vm7, 4294967295, %v27883_v39  ;;  %vm27886_vm6 = vcmask 982016   ;;  %v27887_v40 = vunpack.i.l.bf16 %v16558_v17  ;;  %27889 = vst [vmem:[#allocation53_spill] sm:$0xff] %v16612_v38  ;;  %v16634_v17 = vpop.permute.xlu0 %13890  ;;  %13112 = vmatprep.subr.bf16.mxu0 %v13111_v61 }
 0x289   : > { %v2633_v41 = vsel %vm27886_vm6, %v27885_v3, %v13882_v23  ;;  %vm27888_vm2 = vmmov %vm27886_vm6  ;;  %vm16619_vm5 = vcmp.eq.s32.totalorder %v3000_v20, %v16392_v32  ;;  %vm16624_vm7 = vcmp.eq.s32.totalorder %v3194_v43, %v16404_v7  ;;  %v27893_v16 = vmov 0  ;;  %27896 = vst [vmem:[#allocation56_spill] sm:$0xff] %v16634_v17 }
 0x28a   : > { %v2630_v22 = vsel %vm27888_vm2, %v27887_v40, %v13872_v30  ;;  %v27891_v15 = vsel %vm16619_vm5, 4294967295, %v27890_v15  ;;  %v27894_v16 = vsel %vm16624_vm7, 4294967295, %v27893_v16  ;;  %v3004_v3 = vand.u32 7, %v16556_v0 }
 0x28b   : > { %27892 = vst [vmem:[#allocation54_spill] sm:$0xff] %v27891_v15  ;;  %v16630_v23 = vadd.s32 80, %v15909_v35  ;;  %v2710_v30 = vmax.f32 %v16252_v10, %v2633_v41  ;;  %v2706_v40 = vmax.f32 %v16248_v2, %v2630_v22  ;;  %vm16639_vm2 = vcmp.eq.s32.totalorder %v3001_v12, %v16392_v32 }
 0x28c   : > { %v27897_v43 = vmov 0  ;;  %vm16644_vm6 = vcmp.eq.s32.totalorder %v3195_v21, %v16404_v7  ;;  %v27899_v15 = vmov 0  ;;  %v13892_v2 = vunpack.i.l.bf16 %v16634_v17 }
 0x28d   : > { %27895 = vst [vmem:[#allocation55_spill] sm:$0xff] %v16630_v23  ;;  %v27898_v43 = vsel %vm16639_vm2, 4294967295, %v27897_v43  ;;  %v27900_v15 = vsel %vm16644_vm6, 4294967295, %v27899_v15  ;;  %vm16651_vm0 = vcmp.eq.s32.totalorder %v3002_v4, %v16401_v54  ;;  %v27901_v22 = vmov 0  ;;  %vm27907_vm6 = vmand %vm16434_vm10, %vm16450_vm12 }
 0x28e   : > { %v27902_v22 = vsel %vm16651_vm0, 4294967295, %v27901_v22  ;;  %vm16656_vm5 = vcmp.eq.s32.totalorder %v3196_v26, %v16406_v55  ;;  %v27903_v12 = vmov 0  ;;  %v3005_v61 = vand.u32 7, %v16587_v46  ;;  %vm27908_vm0 = vmand %vm16445_vm11, %vm16455_vm13 }
 0x28f   : > { %v27904_v12 = vsel %vm16656_vm5, 4294967295, %v27903_v12  ;;  %v3198_v21 = vshra.s32 %v16556_v0, 3  ;;  %v27905_v41 = vunpack.i.h.bf16 %v16537_v53  ;;  %vm27906_vm2 = vcmask 982016   ;;  %vm16675_vm5 = vmpackc.low %vm27908_vm0, %vm27907_vm6 }
 0x290   : > { %v13113_v47 = vpack.c.bf16 %v2710_v30, %v2706_v40  ;;  %v27909_v10 = vmov 0  ;;  %vm16684_vm7 = vcmp.eq.s32.totalorder %v3003_v6, %v16401_v54  ;;  %vm16689_vm10 = vcmp.eq.s32.totalorder %v3197_v44, %v16406_v55  ;;  %vm27919_vm0 = vmmov %vm27906_vm2 }
 0x291   : > { %v2637_v20 = vsel %vm27906_vm2, %v13887_v59, %v27905_v41  ;;  %v27910_v10 = vsel %vm16675_vm5, 4294967295, %v27909_v10  ;;  %v27913_v36 = vsel %vm16684_vm7, 4294967295, %v27912_v36  ;;  %v27916_v63 = vsel %vm16689_vm10, 4294967295, %v27915_v63  ;;  %vm27921_vm11 = vmmov %vm27919_vm0 }
 0x292   : > { %27911 = vst [vmem:[#allocation57_spill] sm:$0xff] %v27910_v10  ;;  %27914 = vst [vmem:[#allocation58_spill] sm:$0xff] %v27913_v36  ;;  %v27918_v30 = vunpack.i.h.bf16 %v16634_v17  ;;  %v27920_v41 = vunpack.i.l.bf16 %v16612_v38  ;;  %v27922_v53 = vunpack.i.h.bf16 %v16612_v38  ;;  %v16706_v10 = vpop.permute.xlu1 %13905  ;;  %vm16713_vm6 = vcmp.eq.s32.totalorder %v3002_v4, %v16392_v32  ;;  %13114 = vmatpush1.bf16.msra.mxu0 %v13113_v47 }
 0x293   : > { %vm27923_vm12 = vmmov %vm27919_vm0  ;;  %v27924_v46 = vmov 0  ;;  %v27930_v4 = vmov 0  ;;  %vm16737_vm13 = vcmp.eq.s32.totalorder %v3197_v44, %v16404_v7  ;;  %v3006_v47 = vand.u32 7, %v16630_v23 }
 0x294   : > { %v2640_v40 = vsel %vm27919_vm0, %v13892_v2, %v27918_v30  ;;  %v2636_v0 = vsel %vm27921_vm11, %v27920_v41, %v13887_v59  ;;  %v2639_v36 = vsel %vm27923_vm12, %v27922_v53, %v13892_v2  ;;  %v27925_v46 = vsel %vm16713_vm6, 4294967295, %v27924_v46  ;;  %v13901_v53 = vpop.permute.xlu0 %13900 }
 0x295   : > { %27926 = vst [vmem:[#allocation60_spill] sm:$0xff] %v27925_v46  ;;  %vm16718_vm0 = vcmp.eq.s32.totalorder %v3196_v26, %v16404_v7  ;;  %v27927_v30 = vmov 0  ;;  %v16723_v59 = vadd.s32 96, %v15909_v35  ;;  %v13908_v2 = vunpack.i.h.bf16 %v16706_v10 }
 0x296   : > { %v27928_v30 = vsel %vm16718_vm0, 4294967295, %v27927_v30  ;;  %v13907_v41 = vunpack.i.l.bf16 %v16706_v10  ;;  %vm16732_vm12 = vcmp.eq.s32.totalorder %v3003_v6, %v16392_v32  ;;  %v27933_v26 = vmov 0 }
 0x297   : > { %27929 = vst [vmem:[#allocation61_spill] sm:$0xff] %v27928_v30  ;;  %v27931_v4 = vsel %vm16732_vm12, 4294967295, %v27930_v4  ;;  %v27934_v26 = vsel %vm16737_vm13, 4294967295, %v27933_v26  ;;  %v3200_v17 = vshra.s32 %v16630_v23, 3  ;;  %v13903_v10 = vunpack.i.h.bf16 %v13901_v53 }
 0x298   : > { %27932 = vst [vmem:[#allocation62_spill] sm:$0xff] %v27931_v4  ;;  %v13902_v38 = vunpack.i.l.bf16 %v13901_v53  ;;  %v2715_v46 = vmax.f32 %v16260_v33, %v2637_v20  ;;  %v2719_v30 = vmax.f32 %v16199_v11, %v2640_v40  ;;  %vm27935_vm11 = vnez %v27861_v9  ;;  %v13911_v8 = vpop.permute.xlu0 %13910 }
 0x299   : > { %vm16750_vm12 = vcmp.eq.s32.totalorder %v3004_v3, %v16401_v54  ;;  %v27936_v44 = vmov 0  ;;  %vm16755_vm13 = vcmp.eq.s32.totalorder %v3198_v21, %v16406_v55  ;;  %v27939_v6 = vmov 0 }
 0x29a   : > { %v27937_v44 = vsel %vm16750_vm12, 4294967295, %v27936_v44  ;;  %v27940_v6 = vsel %vm16755_vm13, 4294967295, %v27939_v6  ;;  %v2714_v53 = vmax.f32 %v16273_v27, %v2636_v0  ;;  %v2718_v33 = vmax.f32 %v16193_v24, %v2639_v36 }
 0x29b   : > { %27938 = vst [vmem:[#allocation63_spill] sm:$0xff] %v27937_v44  ;;  %27941 = vst [vmem:[#allocation64_spill] sm:$0xff] %v27940_v6  ;;  %vm27943_vm0 = vnez %v27867_v57  ;;  %vm16766_vm2 = vcmp.eq.s32.totalorder %v3005_v61, %v16401_v54  ;;  %v27944_v11 = vmov 0  ;;  %vm16771_vm12 = vcmp.eq.s32.totalorder %v3199_v62, %v16406_v55 }
 0x29c   : > { %v27945_v11 = vsel %vm16766_vm2, 4294967295, %v27944_v11  ;;  %v27947_v20 = vmov 0  ;;  %v3007_v40 = vand.u32 7, %v16695_v42  ;;  %v3201_v27 = vshra.s32 %v16695_v42, 3 }
 0x29d   : > { %27946 = vst [vmem:[#allocation65_spill] sm:$0xff] %v27945_v11  ;;  %v27948_v20 = vsel %vm16771_vm12, 4294967295, %v27947_v20  ;;  %v27950_v24 = vunpack.i.h.bf16 %v16363_v25  ;;  %vm27951_vm13 = vcmask 982016   ;;  %v27952_v36 = vunpack.i.h.bf16 %v16343_v19 }
 0x29e   : > { %27949 = vst [vmem:[#allocation66_spill] sm:$0xff] %v27948_v20  ;;  %vm27953_vm7 = vmmov %vm27951_vm13  ;;  %v27954_v44 = vunpack.i.l.bf16 %v16345_v45  ;;  %v27956_v6 = vunpack.i.h.bf16 %v16345_v45  ;;  %v27958_v4 = vmul.u32 2, %v16395_v37  ;;  %v27959_v42 = vmov 0 }
 0x29f   : > { %v2623_v0 = vsel %vm27951_vm13, %v27950_v24, %v13903_v10  ;;  %v2620_v23 = vsel %vm27953_vm7, %v27952_v36, %v13902_v38  ;;  %vm27955_vm2 = vmmov %vm27953_vm7  ;;  %v27963_v19 = vmov 0  ;;  %vm27966_vm5 = vnez %v27873_v1  ;;  %v16882_v24 = vpop.permute.xlu1 %13915  ;;  %v27994_v36 = vld [vmem:[#allocation54_spill] sm:$0xff] }
 0x2a0   : > { %v2682_v11 = vsel %vm27955_vm2, %v13902_v38, %v27954_v44  ;;  %vm27957_vm10 = vmmov %vm27955_vm2  ;;  %vm16792_vm12 = vcmp.eq.s32.totalorder %v16351_v18, %v27958_v4  ;;  %v27967_v45 = vmov 0  ;;  %v27969_v25 = vmov 0  ;;  %v27992_v44 = vld [vmem:[#allocation21_spill] sm:$0xff] }
 0x2a1   : > { %v2683_v20 = vsel %vm27957_vm10, %v13903_v10, %v27956_v6  ;;  %v27960_v42 = vsel %vm16792_vm12, 4294967295, %v27959_v42  ;;  %vm27961_vm7 = vmand %vm16483_vm14, %vm16488_vm15  ;;  %vm27965_vm10 = vnez %v27875_v31  ;;  %vm16815_vm12 = vcmp.eq.s32.totalorder %v3004_v3, %v16392_v32  ;;  %v28016_v31 = vld [vmem:[#allocation23_spill] sm:$0xff] }
 0x2a2   : > { %vm27962_vm2 = vmand %vm16500_vm3, %vm16505_vm4  ;;  %v27968_v45 = vsel %vm16815_vm12, 4294967295, %v27967_v45  ;;  %vm16820_vm14 = vcmp.eq.s32.totalorder %v3198_v21, %v16404_v7  ;;  %v27971_v38 = vunpack.i.h.bf16 %v16382_v13  ;;  %vm27972_vm15 = vcmask 982016  }
 0x2a3   : > { %vm16806_vm13 = vmpackc.low %vm27962_vm2, %vm27961_vm7  ;;  %v27970_v25 = vsel %vm16820_vm14, 4294967295, %v27969_v25  ;;  %v27977_v13 = vmov 0  ;;  %vm16853_vm12 = vcmp.eq.s32.totalorder %v3005_v61, %v16392_v32  ;;  %v27983_v9 = vmov 0 }
 0x2a4   : > { %v27964_v19 = vsel %vm16806_vm13, 4294967295, %v27963_v19  ;;  %v16827_v50 = vsel %vm27972_vm15, %v27971_v38, %v13907_v41  ;;  %vm27974_vm3 = vmmov %vm27972_vm15  ;;  %vm27979_vm15 = vnez %v27879_v14  ;;  %v27982_v56 = vsel %vm16853_vm12, 4294967295, %v27981_v56  ;;  %v28046_v14 = vld [vmem:[#allocation60_spill] sm:$0xff] }
 0x2a5   : > { %v16832_v49 = vsel %vm27974_vm3, %v27973_v29, %v13908_v2  ;;  %vm27975_vm4 = vmand %vm16512_vm8, %vm16517_vm9  ;;  %vm27980_vm3 = vnez %v27877_v51  ;;  %vm16858_vm8 = vcmp.eq.s32.totalorder %v3199_v62, %v16404_v7  ;;  %v3008_v28 = vand.u32 7, %v16723_v59  ;;  %v27998_v29 = vld [vmem:[#allocation42_spill] sm:$0xff] }
 0x2a6   : > { %vm27976_vm7 = vmand %vm27935_vm11, %vm16541_vm1  ;;  %v27984_v9 = vsel %vm16858_vm8, 4294967295, %v27983_v9  ;;  %v2696_v3 = vmax.f32 %v27985_v58, %v2623_v0  ;;  %v13913_v21 = vunpack.i.h.bf16 %v13911_v8  ;;  %v13912_v4 = vunpack.i.l.bf16 %v13911_v8 }
 0x2a7   : > { %vm16844_vm2 = vmpackc.low %vm27976_vm7, %vm27975_vm4  ;;  %v13115_v10 = vpack.c.bf16 %v2719_v30, %v2715_v46  ;;  %vm27986_vm1 = vnez %v27884_v39  ;;  %vm27987_vm9 = vnez %v27882_v34  ;;  %vm16872_vm4 = vcmp.eq.s32.totalorder %v3006_v47, %v16401_v54 }
 0x2a8   : > { %v27978_v13 = vsel %vm16844_vm2, 4294967295, %v27977_v13  ;;  %v27988_v61 = vmov 0  ;;  %vm16877_vm7 = vcmp.eq.s32.totalorder %v3200_v17, %v16406_v55  ;;  %v27990_v62 = vmov 0  ;;  %vm28005_vm12 = vmand %vm27966_vm5, %vm27965_vm10 }
 0x2a9   : > { %v27989_v61 = vsel %vm16872_vm4, 4294967295, %v27988_v61  ;;  %v27991_v62 = vsel %vm16877_vm7, 4294967295, %v27990_v62  ;;  %v2692_v6 = vmax.f32 %v27992_v44, %v2620_v23  ;;  %v13117_v46 = vpack.c.bf16 %v2718_v33, %v2714_v53  ;;  %13116 = vmatprep.subr.bf16.mxu0 %v13115_v10  ;;  %vm28022_vm10 = vmand %vm27980_vm3, %vm27979_vm15 }
 0x2aa   : > { %v2693_v30 = vmax.f32 %v16280_v5, %v2682_v11  ;;  %v2697_v0 = vmax.f32 %v16290_v48, %v2683_v20  ;;  %vm27995_vm6 = vnez %v27994_v36  ;;  %vm16891_vm4 = vcmp.eq.s32.totalorder %v3007_v40, %v16401_v54  ;;  %v28018_v11 = vld [vmem:[#allocation39_spill] sm:$0xff] }
 0x2ab   : > { %v27996_v38 = vmov 0  ;;  %v27999_v8 = vunpack.i.h.bf16 %v27998_v29  ;;  %vm28000_vm7 = vcmask 982016   ;;  %v28001_v53 = vunpack.i.l.bf16 %v27998_v29  ;;  %13118 = vmatpush1.bf16.msra.mxu0 %v13117_v46  ;;  %v28037_v29 = vld [vmem:[#allocation57_spill] sm:$0xff] }
 0x2ac   : > { %v27997_v38 = vsel %vm16891_vm4, 4294967295, %v27996_v38  ;;  %vm28002_vm8 = vmmov %vm28000_vm7  ;;  %vm28003_vm2 = vnez %v27869_v52  ;;  %v28006_v48 = vmov 0  ;;  %vm28009_vm13 = vnez %v27898_v43 }
 0x2ad   : > { %v2685_v23 = vsel %vm28000_vm7, %v13908_v2, %v27999_v8  ;;  %v2684_v5 = vsel %vm28002_vm8, %v13907_v41, %v28001_v53  ;;  %vm28004_vm14 = vmand %vm27943_vm0, %vm28003_vm2  ;;  %vm28008_vm7 = vnez %v27900_v15  ;;  %vm16920_vm11 = vcmp.eq.s32.totalorder %v3201_v27, %v16406_v55  ;;  %v28017_v41 = vld [vmem:[#allocation25_spill] sm:$0xff]  ;;  %v28040_v8 = vld [vmem:[#allocation58_spill] sm:$0xff] }
 0x2ae   : > { %vm16911_vm4 = vmpackc.low %vm28005_vm12, %vm28004_vm14  ;;  %v28010_v57 = vmov 0  ;;  %vm16925_vm0 = vcmp.eq.s32.totalorder %v3006_v47, %v16392_v32  ;;  %v28012_v52 = vmov 0  ;;  %vm16930_vm5 = vcmp.eq.s32.totalorder %v3200_v17, %v16404_v7 }
 0x2af   : > { %v28007_v48 = vsel %vm16911_vm4, 4294967295, %v28006_v48  ;;  %v28011_v57 = vsel %vm16920_vm11, 4294967295, %v28010_v57  ;;  %v28013_v52 = vsel %vm16925_vm0, 4294967295, %v28012_v52  ;;  %v28014_v1 = vmov 0  ;;  %vm28023_vm14 = vmand %vm27987_vm9, %vm27986_vm1 }
 0x2b0   : > { %v28015_v1 = vsel %vm16930_vm5, 4294967295, %v28014_v1  ;;  %v2700_v2 = vmax.f32 %v28016_v31, %v16827_v50  ;;  %v2704_v33 = vmax.f32 %v28017_v41, %v16832_v49  ;;  %v28019_v20 = vmul.u32 2, %v28018_v11  ;;  %vm16955_vm2 = vmpackc.low %vm28023_vm14, %vm28022_vm10  ;;  %v28032_v50 = vld [vmem:[#allocation51_spill] sm:$0xff]  ;;  %v28042_v41 = vld [vmem:[#allocation30_spill] sm:$0xff] }
 0x2b1   : > { %v28020_v47 = vmov 0  ;;  %v28024_v17 = vmov 0  ;;  %vm28026_vm8 = vnez %v27904_v12  ;;  %vm28027_vm0 = vnez %v27902_v22  ;;  %vm28055_vm4 = vmand %vm28009_vm13, %vm28008_vm7  ;;  %v28103_v11 = vld [vmem:[#allocation41_spill] sm:$0xff] }
 0x2b2   : > { %vm16941_vm12 = vcmp.eq.s32.totalorder %v16351_v18, %v28019_v20  ;;  %v28025_v17 = vsel %vm16955_vm2, 4294967295, %v28024_v17  ;;  %v28028_v51 = vmov 0  ;;  %vm16969_vm15 = vcmp.eq.s32.totalorder %v3201_v27, %v16404_v7  ;;  %vm28068_vm13 = vmand %vm28027_vm0, %vm28026_vm8 }
 0x2b3   : > { %v28021_v47 = vsel %vm16941_vm12, 4294967295, %v28020_v47  ;;  %vm16964_vm12 = vcmp.eq.s32.totalorder %v3007_v40, %v16392_v32  ;;  %v28030_v34 = vmov 0  ;;  %v28033_v49 = vunpack.i.l.bf16 %v28032_v50 }
 0x2b4   : > { %v28029_v51 = vsel %vm16964_vm12, 4294967295, %v28028_v51  ;;  %v28031_v34 = vsel %vm16969_vm15, 4294967295, %v28030_v34  ;;  %vm28034_vm3 = vcmask 982016   ;;  %v28035_v10 = vunpack.i.h.bf16 %v28032_v50  ;;  %v28043_v50 = vld [vmem:[#allocation31_spill] sm:$0xff] }
 0x2b5   : > { %v2686_v58 = vsel %vm28034_vm3, %v13912_v4, %v28033_v49  ;;  %vm28036_vm1 = vmmov %vm28034_vm3  ;;  %v13918_v44 = vunpack.i.h.bf16 %v16882_v24  ;;  %v13917_v46 = vunpack.i.l.bf16 %v16882_v24  ;;  %v27287_v27 = vmov 1.0|1.0   ;;  %v28048_v24 = vld [vmem:[#allocation46_spill] sm:$0xff] }
 0x2b6   : > { %v2687_v40 = vsel %vm28036_vm1, %v13913_v21, %v28035_v10  ;;  %vm28038_vm9 = vnez %v28037_v29  ;;  %vm28039_vm10 = vnez %v27916_v63  ;;  %vm28041_vm14 = vnez %v28040_v8  ;;  %v28044_v10 = vld [vmem:[#allocation61_spill] sm:$0xff] }
 0x2b7   : > { %13136 = vmatprep.subr.msk.bf16.mxu0 %vm28038_vm9, %v27287_v27  ;;  %v13119_v53 = vpack.c.bf16 %v2697_v0, %v2693_v30  ;;  %v13121_v31 = vpack.c.bf16 %v2696_v3, %v2692_v6  ;;  %v2701_v20 = vmax.f32 %v28042_v41, %v2684_v5  ;;  %v2705_v49 = vmax.f32 %v28043_v50, %v2685_v23  ;;  %v28051_v27 = vld [vmem:[#allocation40_spill] sm:$0xff]  ;;  %v28063_v6 = vld [vmem:[#allocation47_spill] sm:$0xff] }
 0x2b8   : > { %vm28047_vm1 = vnez %v28046_v14  ;;  %v28049_v39 = vunpack.i.h.bf16 %v28048_v24  ;;  %vm28050_vm15 = vcmask 982016   ;;  %vm28052_vm9 = vcmask 523264   ;;  %v28066_v23 = vld [vmem:[#allocation32_spill] sm:$0xff]  ;;  %v28084_v24 = vld [vmem:[#allocation65_spill] sm:$0xff] }
 0x2b9   : > { %11545 = vmatmul.mubr.msk.f32.vlgmr.msra.gmra.mrb[16].mxu0 %vm28052_vm9, %v28051_v27  ;;  %vm28053_vm5 = vnez %v27894_v16  ;;  %v28056_v3 = vmov 0  ;;  %vm28058_vm12 = vnez %v27934_v26  ;;  %vm17022_vm9 = vcmp.eq.s32.totalorder %v3008_v28, %v16401_v54  ;;  %13120 = vmatprep.subr.bf16.mxu1 %v13119_v53  ;;  %v28074_v53 = vld [vmem:[#allocation63_spill] sm:$0xff]  ;;  %v28114_v14 = vld [vmem:[#allocation56_spill] sm:$0xff] }
 0x2ba   : > { %v2635_v29 = vsel %vm28050_vm15, %v28049_v39, %v13913_v21  ;;  %vm28054_vm2 = vmand %vm27995_vm6, %vm28053_vm5  ;;  %v28059_v21 = vld [vmem:[#allocation62_spill] sm:$0xff]  ;;  %v28061_v16 = vmov 0  ;;  %v17028_v15 = vadd.s32 112, %v15909_v35  ;;  %v28064_v30 = vunpack.i.h.bf16 %v28063_v6  ;;  %v28067_v39 = vld [vmem:[#allocation33_spill] sm:$0xff]  ;;  %13122 = vmatpush1.bf16.msra.mxu1 %v13121_v31 }
 0x2bb   : > { %vm17011_vm11 = vmpackc.low %vm28055_vm4, %vm28054_vm2  ;;  %vm28060_vm15 = vnez %v28059_v21  ;;  %v28062_v16 = vsel %vm17022_vm9, 4294967295, %v28061_v16  ;;  %vm28065_vm6 = vcmask 982016   ;;  %v13123_v36 = vpack.c.bf16 %v2705_v49, %v2701_v20  ;;  %v28082_v49 = vld [vmem:[#allocation66_spill] sm:$0xff] }
 0x2bc   : > { %v28057_v3 = vsel %vm17011_vm11, 4294967295, %v28056_v3  ;;  %v2632_v0 = vsel %vm28065_vm6, %v28064_v30, %v13912_v4  ;;  %v2709_v5 = vmax.f32 %v28066_v23, %v2686_v58  ;;  %v2713_v41 = vmax.f32 %v28067_v39, %v2687_v40  ;;  %vm28069_vm4 = vmand %vm28041_vm14, %vm28039_vm10  ;;  %v28072_v4 = vld [vmem:[#allocation64_spill] sm:$0xff]  ;;  %v28076_v58 = vld [vmem:[#allocation53_spill] sm:$0xff] }
 0x2bd   : > { %vm17045_vm7 = vmpackc.low %vm28069_vm4, %vm28068_vm13  ;;  %v28070_v50 = vmov 0  ;;  %vm28073_vm5 = vnez %v28072_v4  ;;  %vm28075_vm2 = vnez %v28074_v53  ;;  %v28077_v40 = vunpack.i.l.bf16 %v28076_v58  ;;  %13124 = vmatprep.subr.bf16.mxu1 %v13123_v36  ;;  %v28099_v36 = vld [vmem:[#allocation28_spill] sm:$0xff]  ;;  %v28117_v21 = vld [vmem:[#allocation34_spill] sm:$0xff] }
 0x2be   : > { %v28071_v50 = vsel %vm17045_vm7, 4294967295, %v28070_v50  ;;  %vm28078_vm3 = vmmov %vm28065_vm6  ;;  %v28079_v12 = vunpack.i.h.bf16 %v28076_v58  ;;  %v13125_v63 = vpack.c.bf16 %v2704_v33, %v2700_v2  ;;  %v28081_v20 = vmov 0.0   ;;  %v28100_v58 = vld [vmem:[#allocation27_spill] sm:$0xff] }
 0x2bf   : > { %v2688_v22 = vsel %vm28078_vm3, %v13917_v46, %v28077_v40  ;;  %vm28080_vm8 = vmmov %vm28078_vm3  ;;  %2827 = vmatprep.mubr.f32.mxu0 %v28081_v20  ;;  %vm28083_vm0 = vnez %v28082_v49  ;;  %vm28085_vm10 = vnez %v28084_v24  ;;  %v17065_v6 = vadd.s32 120, %v15909_v35 }
 0x2c0   : > { %v2689_v8 = vsel %vm28080_vm8, %v13918_v44, %v28079_v12  ;;  %vm28086_vm3 = vnez %v27960_v42  ;;  %v28087_v23 = vmov 1.0|1.0   ;;  %vm28088_vm13 = vnez %v27964_v19  ;;  %v28101_v12 = vld [vmem:[#allocation49_spill] sm:$0xff]  ;;  %vm28108_vm9 = vmand %vm28060_vm15, %vm28058_vm12  ;;  %13126 = vmatpush1.bf16.msra.mxu1 %v13125_v63 }
 0x2c1   : > { %v17070_v30 = vsel %vm28086_vm3, 1.0, %v28081_v20  ;;  %13138 = vmatpush1.bf16.msk.msra.mxu0 %vm28088_vm13, %v28087_v23  ;;  %vm28090_vm8 = vnez %v27968_v45  ;;  %v28091_v2 = vand.u32 7, %v16863_v60  ;;  %v28092_v33 = vmov 0  ;;  %vm28119_vm12 = vmand %vm28075_vm2, %vm28073_vm5 }
 0x2c2   : > { %v28094_v42 = vshra.s32 %v16723_v59, 3  ;;  %v28095_v31 = vmov 0  ;;  %vm17096_vm13 = vcmp.eq.s32.totalorder %v3008_v28, %v16392_v32  ;;  %v28097_v19 = vmov 0 }
 0x2c3   : > { %vm17082_vm14 = vcmp.eq.s32.totalorder %v28091_v2, %v16401_v54  ;;  %v28098_v19 = vsel %vm17096_vm13, 4294967295, %v28097_v19  ;;  %v2712_v39 = vmax.f32 %v28099_v36, %v2635_v29  ;;  %v2708_v40 = vmax.f32 %v28100_v58, %v2632_v0  ;;  %v28118_v0 = vld [vmem:[#allocation26_spill] sm:$0xff]  ;;  %v28140_v58 = vld [vmem:[#allocation29_spill] sm:$0xff] }
 0x2c4   : > { %v28093_v33 = vsel %vm17082_vm14, 4294967295, %v28092_v33  ;;  %vm17089_vm3 = vcmp.eq.s32.totalorder %v28094_v42, %v16406_v55  ;;  %v28102_v2 = vunpack.i.h.bf16 %v28101_v12  ;;  %vm28104_vm7 = vcmask 523264  }
 0x2c5   : > { %v28096_v31 = vsel %vm17089_vm3, 4294967295, %v28095_v31  ;;  %11546 = vmatmul.mubr.msk.f32.gmra.mrb[18].mxu0 %vm28104_vm7, %v28103_v11  ;;  %vm28105_vm11 = vnez %v27978_v13  ;;  %vm28106_vm14 = vnez %v28044_v10  ;;  %v28109_v28 = vmov 0 }
 0x2c6   : > { %v2638_v43 = vsel %vm28065_vm6, %v28102_v2, %v13917_v46  ;;  %13140 = vmatprep.subr.msk.bf16.mxu0 %vm28105_vm11, %v28087_v23  ;;  %vm28107_vm13 = vmand %vm28047_vm1, %vm28106_vm14  ;;  %vm28111_vm7 = vnez %v27984_v9  ;;  %vm28112_vm6 = vnez %v27982_v56  ;;  %v17129_v13 = vadd.s32 128, %v15909_v35  ;;  %2833 = vmatprep.mubr.f32.mxu0 %v28081_v20  ;;  %v28141_v2 = vld [vmem:[#allocation24_spill] sm:$0xff] }
 0x2c7   : > { %vm17120_vm3 = vmpackc.low %vm28108_vm9, %vm28107_vm13  ;;  %v28115_v46 = vunpack.i.h.bf16 %v28114_v14  ;;  %vm28116_vm11 = vcmask 982016   ;;  %v13127_v29 = vpack.c.bf16 %v2713_v41, %v2709_v5  ;;  %v2717_v26 = vmax.f32 %v28117_v21, %v2688_v22 }
 0x2c8   : > { %v28110_v28 = vsel %vm17120_vm3, 4294967295, %v28109_v28  ;;  %28113 = vst [vmem:[#allocation22_spill] sm:$0xff] %v17129_v13  ;;  %v2721_v42 = vmax.f32 %v28118_v0, %v2689_v8  ;;  %vm28120_vm1 = vmand %vm28085_vm10, %vm28083_vm0  ;;  %v28121_v36 = vmov 0  ;;  %vm28123_vm9 = vnez %v27991_v62 }
 0x2c9   : > { %v2641_v10 = vsel %vm28116_vm11, %v28115_v46, %v13918_v44  ;;  %vm17147_vm15 = vmpackc.low %vm28120_vm1, %vm28119_vm12  ;;  %vm28124_vm14 = vnez %v27989_v61  ;;  %vm28125_vm11 = vnez %v28011_v57  ;;  %vm28126_vm4 = vnez %v27997_v38  ;;  %13128 = vmatprep.subr.bf16.mxu1 %v13127_v29 }
 0x2ca   : > { %v28122_v36 = vsel %vm17147_vm15, 4294967295, %v28121_v36  ;;  %v28127_v44 = vshra.s32 %v16863_v60, 3  ;;  %v3010_v41 = vand.u32 7, %v17028_v15  ;;  %v3011_v4 = vand.u32 7, %v17065_v6  ;;  %vm28147_vm10 = vmand %vm28112_vm6, %vm28111_vm7 }
 0x2cb   : > { %v3204_v53 = vshra.s32 %v17028_v15, 3  ;;  %vm28130_vm0 = vnez %v28007_v48  ;;  %v28133_v22 = vand.u32 7, %v16863_v60  ;;  %v28134_v8 = vmov 0 }
 0x2cc   : > { %vm17162_vm2 = vcmp.eq.s32.totalorder %v28127_v44, %v16406_v55  ;;  %13142 = vmatpush1.bf16.msk.msra.mxu0 %vm28130_vm0, %v28087_v23  ;;  %v28136_v63 = vshra.s32 %v16723_v59, 3  ;;  %v28137_v49 = vmov 0  ;;  %v3205_v48 = vshra.s32 %v17065_v6, 3 }
 0x2cd   : > { %vm17179_vm5 = vcmp.eq.s32.totalorder %v28133_v22, %v16392_v32  ;;  %v17192_v24 = vadd.s32 136, %v15909_v35  ;;  %v2716_v12 = vmax.f32 %v28140_v58, %v2638_v43  ;;  %v2720_v14 = vmax.f32 %v28141_v2, %v2641_v10 }
 0x2ce   : > { %v28135_v8 = vsel %vm17179_vm5, 4294967295, %v28134_v8  ;;  %vm17186_vm13 = vcmp.eq.s32.totalorder %v28136_v63, %v16404_v7  ;;  %v13129_v46 = vpack.c.bf16 %v2712_v39, %v2708_v40  ;;  %vm28142_vm0 = vcmask 523264  }
 0x2cf   : > { %v28138_v49 = vsel %vm17186_vm13, 4294967295, %v28137_v49  ;;  %28139 = vst [vmem:[#allocation21_spill] sm:$0xff] %v17192_v24  ;;  %11547 = vmatmul.mubr.msk.f32.gmra.mrb[20].mxu0 %vm28142_vm0, %v17070_v30  ;;  %vm28143_vm1 = vnez %v28021_v47  ;;  %vm28144_vm15 = vnez %v28025_v17  ;;  %vm28145_vm3 = vnez %v27970_v25 }
 0x2d0   : > { %v17201_v29 = vsel %vm28143_vm1, 1.0, %v28081_v20  ;;  %13144 = vmatprep.subr.msk.bf16.mxu0 %vm28144_vm15, %v28087_v23  ;;  %vm28146_vm5 = vmand %vm28090_vm8, %vm28145_vm3  ;;  %v28148_v43 = vmov 0  ;;  %vm28150_vm1 = vnez %v28031_v34  ;;  %vm28151_vm12 = vnez %v28029_v51  ;;  %2839 = vmatprep.mubr.f32.mxu0 %v28081_v20 }
 0x2d1   : > { %vm17216_vm0 = vmpackc.low %vm28147_vm10, %vm28146_vm5  ;;  %v13131_v47 = vpack.c.bf16 %v2721_v42, %v2717_v26  ;;  %v28154_v45 = vmov 0  ;;  %vm28156_vm6 = vnez %v28096_v31  ;;  %vm28157_vm15 = vnez %v28062_v16  ;;  %13130 = vmatpush1.bf16.msra.mxu1 %v13129_v46 }
 0x2d2   : > { %v28149_v43 = vsel %vm17216_vm0, 4294967295, %v28148_v43  ;;  %vm28152_vm8 = vmand %vm28124_vm14, %vm28123_vm9  ;;  %v28158_v25 = vmov %v28127_v44  ;;  %v3012_v9 = vand.u32 7, %v17129_v13  ;;  %v17252_v61 = vadd.s32 144, %v15909_v35 }
 0x2d3   : > { %vm28153_vm3 = vmand %vm28126_vm4, %vm28125_vm11  ;;  %vm17246_vm10 = vcmp.eq.s32.totalorder %v28158_v25, %v16404_v7  ;;  %vm28162_vm4 = vnez %v28093_v33  ;;  %vm17259_vm14 = vcmp.eq.s32.totalorder %v3010_v41, %v16401_v54  ;;  %vm17264_vm11 = vcmp.eq.s32.totalorder %v3011_v4, %v16401_v54  ;;  %13132 = vmatprep.subr.bf16.mxu1 %v13131_v47 }
 0x2d4   : > { %vm17235_vm7 = vmpackc.low %vm28153_vm3, %vm28152_vm8  ;;  %28161 = vst [vmem:[#allocation54_spill] sm:$0xff] %v17252_v61  ;;  %v28165_v38 = vmov 0  ;;  %vm17269_vm8 = vcmp.eq.s32.totalorder %v3204_v53, %v16406_v55  ;;  %v3206_v17 = vshra.s32 %v17129_v13, 3  ;;  %vm28169_vm3 = vnez %v28057_v3 }
 0x2d5   : > { %v28155_v45 = vsel %vm17235_vm7, 4294967295, %v28154_v45  ;;  %v28166_v38 = vsel %vm17264_vm11, 4294967295, %v28165_v38  ;;  %13146 = vmatpush1.bf16.msk.msra.mxu0 %vm28169_vm3, %v28087_v23  ;;  %vm17282_vm7 = vcmp.eq.s32.totalorder %v3205_v48, %v16406_v55  ;;  %v28172_v39 = vmov 0  ;;  %vm28180_vm11 = vmand %vm28151_vm12, %vm28150_vm1 }
 0x2d6   : > { %v28173_v39 = vsel %vm17282_vm7, 4294967295, %v28172_v39  ;;  %v3013_v40 = vand.u32 7, %v17192_v24  ;;  %v3207_v10 = vshra.s32 %v17192_v24, 3  ;;  %v17289_v21 = vadd.s32 152, %v15909_v35  ;;  %vm28188_vm12 = vmand %vm28157_vm15, %vm28156_vm6 }
 0x2d7   : > { %v13133_v26 = vpack.c.bf16 %v2720_v14, %v2716_v12  ;;  %vm28175_vm3 = vcmask 523264   ;;  %vm28176_vm0 = vnez %v28071_v50  ;;  %vm28177_vm13 = vnez %v28013_v52  ;;  %vm28189_vm1 = vmand %vm28162_vm4, %vm17162_vm2 }
 0x2d8   : > { %28174 = vst [vmem:[#allocation42_spill] sm:$0xff] %v17289_v21  ;;  %11548 = vmatmul.mubr.msk.f32.gmra.mrb[22].mxu0 %vm28175_vm3, %v17201_v29  ;;  %13148 = vmatprep.subr.msk.bf16.mxu0 %vm28176_vm0, %v28087_v23  ;;  %vm28178_vm9 = vnez %v28015_v1  ;;  %v28181_v3 = vmov 0  ;;  %vm28183_vm3 = vnez %v28135_v8  ;;  %vm17315_vm0 = vcmp.eq.s32.totalorder %v3010_v41, %v16392_v32 }
 0x2d9   : > { %vm28179_vm5 = vmand %vm28177_vm13, %vm28178_vm9  ;;  %v28184_v52 = vmov 0  ;;  %vm17320_vm13 = vcmp.eq.s32.totalorder %v3204_v53, %v16404_v7  ;;  %v28186_v1 = vmov 0  ;;  %v28190_v51 = vmov 0  ;;  %13134 = vmatpush1.bf16.msra.mxu1 %v13133_v26 }
 0x2da   : > { %vm17306_vm7 = vmpackc.low %vm28180_vm11, %vm28179_vm5  ;;  %v28185_v52 = vsel %vm17315_vm0, 4294967295, %v28184_v52  ;;  %v28187_v1 = vsel %vm17320_vm13, 4294967295, %v28186_v1  ;;  %vm17348_vm6 = vcmp.eq.s32.totalorder %v3205_v48, %v16404_v7  ;;  %v3014_v50 = vand.u32 7, %v17252_v61 }
 0x2db   : > { %v28182_v3 = vsel %vm17306_vm7, 4294967295, %v28181_v3  ;;  %vm17334_vm5 = vmpackc.low %vm28189_vm1, %vm28188_vm12  ;;  %v17354_v33 = vadd.s32 160, %v15909_v35  ;;  %vm28198_vm2 = vnez %v28173_v39  ;;  %vm28199_vm15 = vnez %v28166_v38 }
 0x2dc   : > { %v28191_v51 = vsel %vm17334_vm5, 4294967295, %v28190_v51  ;;  %vm28192_vm9 = vmmov %vm17259_vm14  ;;  %vm17343_vm14 = vcmp.eq.s32.totalorder %v3011_v4, %v16392_v32  ;;  %vm17361_vm12 = vcmp.eq.s32.totalorder %v3012_v9, %v16401_v54  ;;  %v28200_v31 = vmov 0 }
 0x2dd   : > { %28197 = vst [vmem:[#allocation23_spill] sm:$0xff] %v17354_v33  ;;  %v28201_v31 = vsel %vm17361_vm12, 4294967295, %v28200_v31  ;;  %vm17366_vm1 = vcmp.eq.s32.totalorder %v3206_v17, %v16406_v55  ;;  %v3208_v42 = vshra.s32 %v17252_v61, 3  ;;  %v17372_v44 = vadd.s32 168, %v15909_v35 }
 0x2de   : > { %vm28205_vm11 = vnez %v28110_v28  ;;  %vm17382_vm5 = vcmp.eq.s32.totalorder %v3013_v40, %v16401_v54  ;;  %v28206_v5 = vmov 0  ;;  %vm17387_vm7 = vcmp.eq.s32.totalorder %v3207_v10, %v16406_v55 }
 0x2df   : > { %28204 = vst [vmem:[#allocation25_spill] sm:$0xff] %v17372_v44  ;;  %13150 = vmatpush1.bf16.msk.msra.mxu0 %vm28205_vm11, %v28087_v23  ;;  %v28207_v5 = vsel %vm17382_vm5, 4294967295, %v28206_v5  ;;  %v3015_v4 = vand.u32 7, %v17289_v21  ;;  %v3209_v28 = vshra.s32 %v17289_v21, 3  ;;  %vm28210_vm11 = vnez %v28122_v36  ;;  %vm28214_vm5 = vmand %vm28183_vm3, %vm17246_vm10 }
 0x2e0   : > { %13152 = vmatprep.subr.msk.bf16.mxu0 %vm28210_vm11, %v28087_v23  ;;  %vm28211_vm4 = vnez %v28098_v19  ;;  %vm28212_vm13 = vnez %v28138_v49  ;;  %v28215_v53 = vmov 0  ;;  %vm17415_vm11 = vcmp.eq.s32.totalorder %v3012_v9, %v16392_v32  ;;  %vm28222_vm3 = vmand %vm28192_vm9, %vm17269_vm8 }
 0x2e1   : > { %vm28213_vm0 = vmand %vm28211_vm4, %vm28212_vm13  ;;  %v28217_v19 = vmov 0  ;;  %vm17420_vm13 = vcmp.eq.s32.totalorder %v3206_v17, %v16404_v7  ;;  %v28219_v36 = vmov 0  ;;  %vm28221_vm10 = vcmask 523264  }
 0x2e2   : > { %vm17406_vm12 = vmpackc.low %vm28214_vm5, %vm28213_vm0  ;;  %v28218_v19 = vsel %vm17415_vm11, 4294967295, %v28217_v19  ;;  %v28220_v36 = vsel %vm17420_vm13, 4294967295, %v28219_v36  ;;  %11549 = vmatmul.mubr.msk.f32.vlgmr.msra.gmra.mrb[16].mxu1 %vm28221_vm10, %v28051_v27  ;;  %v28224_v22 = vmov 0  ;;  %vm28226_vm4 = vnez %v28201_v31 }
 0x2e3   : > { %v28216_v53 = vsel %vm17406_vm12, 4294967295, %v28215_v53  ;;  %vm28223_vm0 = vmand %vm28199_vm15, %vm28198_vm2  ;;  %vm17445_vm10 = vcmp.eq.s32.totalorder %v3013_v40, %v16392_v32  ;;  %vm17450_vm8 = vcmp.eq.s32.totalorder %v3207_v10, %v16404_v7  ;;  %vm17455_vm9 = vcmp.eq.s32.totalorder %v3014_v50, %v16401_v54  ;;  %2916 = vmatprep.mubr.f32.mxu1 %v28081_v20  ;;  %v14251_v10 = vld [vmem:[%s28436_s0 + $0x124] ss:$16 sps:$4 sm:$0xff]  }
 0x2e4   : > { %vm17436_vm5 = vmpackc.low %vm28223_vm0, %vm28222_vm3  ;;  %v3016_v48 = vand.u32 7, %v17354_v33  ;;  %vm28234_vm15 = vnez %v28207_v5  ;;  %vm17466_vm0 = vcmp.eq.s32.totalorder %v3208_v42, %v16406_v55  ;;  %v3017_v12 = vand.u32 7, %v17372_v44 }
 0x2e5   : > { %v28225_v22 = vsel %vm17436_vm5, 4294967295, %v28224_v22  ;;  %vm28233_vm2 = vmmov %vm17387_vm7  ;;  %v3210_v2 = vshra.s32 %v17354_v33, 3  ;;  %v17473_v14 = vadd.s32 176, %v15909_v35  ;;  %vm28238_vm7 = vnez %v28149_v43 }
 0x2e6   : > { %13154 = vmatpush1.bf16.msk.msra.mxu0 %vm28238_vm7, %v28087_v23  ;;  %vm17483_vm5 = vcmp.eq.s32.totalorder %v3015_v4, %v16401_v54  ;;  %v28239_v46 = vmov 0  ;;  %vm17488_vm12 = vcmp.eq.s32.totalorder %v3209_v28, %v16406_v55  ;;  %v28241_v47 = vmov 0 }
 0x2e7   : > { %28237 = vst [vmem:[#allocation51_spill] sm:$0xff] %v17473_v14  ;;  %v28240_v46 = vsel %vm17483_vm5, 4294967295, %v28239_v46  ;;  %v28242_v47 = vsel %vm17488_vm12, 4294967295, %v28241_v47  ;;  %v3211_v25 = vshra.s32 %v17372_v44, 3  ;;  %v17494_v43 = vadd.s32 184, %v15909_v35  ;;  %vm28248_vm5 = vmand %vm17343_vm14, %vm17348_vm6 }
 0x2e8   : > { %vm28244_vm7 = vnez %v28155_v45  ;;  %vm28245_vm3 = vnez %v28185_v52  ;;  %vm28246_vm13 = vnez %v28187_v1  ;;  %v28249_v56 = vmov 0  ;;  %vm28256_vm6 = vmand %vm28226_vm4, %vm17366_vm1 }
 0x2e9   : > { %28243 = vst [vmem:[#allocation57_spill] sm:$0xff] %v17494_v43  ;;  %13156 = vmatprep.subr.msk.bf16.mxu0 %vm28244_vm7, %v28087_v23  ;;  %vm28247_vm11 = vmand %vm28245_vm3, %vm28246_vm13  ;;  %vm17518_vm7 = vcmp.eq.s32.totalorder %v3014_v50, %v16392_v32  ;;  %v28251_v45 = vmov 0  ;;  %vm17523_vm13 = vcmp.eq.s32.totalorder %v3208_v42, %v16404_v7  ;;  %v28253_v9 = vmov 0  ;;  %v14195_v42 = vld [vmem:[%s28436_s0] ss:$16 sps:$4 sm:$0xff]  }
 0x2ea   : > { %vm17509_vm12 = vmpackc.low %vm28248_vm5, %vm28247_vm11  ;;  %v28252_v45 = vsel %vm17518_vm7, 4294967295, %v28251_v45  ;;  %v28254_v9 = vsel %vm17523_vm13, 4294967295, %v28253_v9  ;;  %vm28255_vm14 = vcmask 523264   ;;  %v28258_v62 = vmov 0 }
 0x2eb   : > { %v28250_v56 = vsel %vm17509_vm12, 4294967295, %v28249_v56  ;;  %11550 = vmatmul.mubr.msk.f32.gmra.mrb[18].mxu1 %vm28255_vm14, %v28103_v11  ;;  %vm28257_vm11 = vmand %vm28234_vm15, %vm28233_vm2  ;;  %vm17548_vm14 = vcmp.eq.s32.totalorder %v3015_v4, %v16392_v32  ;;  %vm17553_vm1 = vcmp.eq.s32.totalorder %v3209_v28, %v16404_v7  ;;  %vm17558_vm4 = vcmp.eq.s32.totalorder %v3016_v48, %v16401_v54 }
 0x2ec   : > { %vm17539_vm5 = vmpackc.low %vm28257_vm11, %vm28256_vm6  ;;  %v17563_v39 = vadd.s32 192, %v15909_v35  ;;  %2922 = vmatprep.mubr.f32.mxu1 %v28081_v20  ;;  %vm28268_vm2 = vnez %v28242_v47  ;;  %vm28269_vm15 = vnez %v28240_v46  ;;  %vm17571_vm11 = vcmp.eq.s32.totalorder %v3017_v12, %v16401_v54  ;;  %v14239_v46 = vld [vmem:[%s28436_s0 + $0xe4] ss:$16 sps:$4 sm:$0xff]  }
 0x2ed   : > { %v28259_v62 = vsel %vm17539_vm5, 4294967295, %v28258_v62  ;;  %vm28260_vm3 = vmmov %vm17455_vm9  ;;  %v28270_v40 = vmov 0  ;;  %vm17576_vm9 = vcmp.eq.s32.totalorder %v3210_v2, %v16406_v55  ;;  %v3018_v26 = vand.u32 7, %v17473_v14 }
 0x2ee   : > { %28267 = vst [vmem:[#allocation58_spill] sm:$0xff] %v17563_v39  ;;  %v28271_v40 = vsel %vm17571_vm11, 4294967295, %v28270_v40  ;;  %v3212_v52 = vshra.s32 %v17473_v14, 3  ;;  %vm28274_vm5 = vnez %v28182_v3  ;;  %vm17590_vm12 = vcmp.eq.s32.totalorder %v3211_v25, %v16406_v55  ;;  %vm28282_vm7 = vmand %vm17445_vm10, %vm17450_vm8 }
 0x2ef   : > { %13158 = vmatpush1.bf16.msk.msra.mxu0 %vm28274_vm5, %v28087_v23  ;;  %v28275_v1 = vmov 0  ;;  %v3019_v34 = vand.u32 7, %v17494_v43  ;;  %v3213_v16 = vshra.s32 %v17494_v43, 3  ;;  %v17597_v50 = vadd.s32 200, %v15909_v35  ;;  %vm28290_vm8 = vmand %vm28260_vm3, %vm17466_vm0 }
 0x2f0   : > { %v28276_v1 = vsel %vm17590_vm12, 4294967295, %v28275_v1  ;;  %vm28278_vm5 = vnez %v28191_v51  ;;  %vm28279_vm11 = vnez %v28218_v19  ;;  %vm28280_vm6 = vnez %v28220_v36 }
 0x2f1   : > { %28277 = vst [vmem:[#allocation30_spill] sm:$0xff] %v17597_v50  ;;  %13160 = vmatprep.subr.msk.bf16.mxu0 %vm28278_vm5, %v28087_v23  ;;  %vm28281_vm13 = vmand %vm28279_vm11, %vm28280_vm6  ;;  %v28283_v3 = vmov 0  ;;  %vm17621_vm5 = vcmp.eq.s32.totalorder %v3016_v48, %v16392_v32  ;;  %v28285_v51 = vmov 0  ;;  %vm17626_vm6 = vcmp.eq.s32.totalorder %v3210_v2, %v16404_v7  ;;  %v14231_v2 = vld [vmem:[%s28436_s0 + $0xc0] ss:$16 sps:$4 sm:$0xff]  }
 0x2f2   : > { %vm17612_vm12 = vmpackc.low %vm28282_vm7, %vm28281_vm13  ;;  %v28286_v51 = vsel %vm17621_vm5, 4294967295, %v28285_v51  ;;  %v28287_v31 = vmov 0  ;;  %vm28289_vm10 = vcmask 523264   ;;  %v28292_v0 = vmov 0 }
 0x2f3   : > { %v28284_v3 = vsel %vm17612_vm12, 4294967295, %v28283_v3  ;;  %v28288_v31 = vsel %vm17626_vm6, 4294967295, %v28287_v31  ;;  %11551 = vmatmul.mubr.msk.f32.gmra.mrb[20].mxu1 %vm28289_vm10, %v17070_v30  ;;  %vm28291_vm7 = vmand %vm28269_vm15, %vm28268_vm2  ;;  %vm17651_vm10 = vcmp.eq.s32.totalorder %v3017_v12, %v16392_v32  ;;  %vm17656_vm0 = vcmp.eq.s32.totalorder %v3211_v25, %v16404_v7 }
 0x2f4   : > { %vm17642_vm13 = vmpackc.low %vm28291_vm7, %vm28290_vm8  ;;  %2928 = vmatprep.mubr.f32.mxu1 %v28081_v20  ;;  %vm28299_vm3 = vnez %v28276_v1  ;;  %vm28300_vm2 = vnez %v28271_v40  ;;  %vm17666_vm8 = vcmp.eq.s32.totalorder %v3018_v26, %v16401_v54  ;;  %v28301_v5 = vmov 0 }
 0x2f5   : > { %v28293_v0 = vsel %vm17642_vm13, 4294967295, %v28292_v0  ;;  %vm28294_vm11 = vmmov %vm17558_vm4  ;;  %v28302_v5 = vsel %vm17666_vm8, 4294967295, %v28301_v5  ;;  %vm17671_vm7 = vcmp.eq.s32.totalorder %v3212_v52, %v16406_v55  ;;  %v28303_v41 = vmov 0 }
 0x2f6   : > { %v28304_v41 = vsel %vm17671_vm7, 4294967295, %v28303_v41  ;;  %v3020_v4 = vand.u32 7, %v17563_v39  ;;  %v3214_v28 = vshra.s32 %v17563_v39, 3  ;;  %vm28305_vm4 = vnez %v28216_v53 }
 0x2f7   : > { %13162 = vmatpush1.bf16.msk.msra.mxu0 %vm28305_vm4, %v28087_v23  ;;  %vm17685_vm13 = vcmp.eq.s32.totalorder %v3019_v34, %v16401_v54  ;;  %v28306_v19 = vmov 0  ;;  %vm17690_vm12 = vcmp.eq.s32.totalorder %v3213_v16, %v16406_v55  ;;  %v28308_v36 = vmov 0 }
 0x2f8   : > { %v28307_v19 = vsel %vm17685_vm13, 4294967295, %v28306_v19  ;;  %v28309_v36 = vsel %vm17690_vm12, 4294967295, %v28308_v36  ;;  %v3021_v8 = vand.u32 7, %v17597_v50  ;;  %v3215_v53 = vshra.s32 %v17597_v50, 3  ;;  %vm28314_vm13 = vmand %vm17548_vm14, %vm17553_vm1 }
 0x2f9   : > { %vm28310_vm4 = vnez %v28225_v22  ;;  %vm28311_vm15 = vnez %v28252_v45  ;;  %vm28312_vm6 = vnez %v28254_v9  ;;  %v28315_v63 = vmov 0  ;;  %vm28322_vm1 = vmand %vm28294_vm11, %vm17576_vm9 }
 0x2fa   : > { %13164 = vmatprep.subr.msk.bf16.mxu0 %vm28310_vm4, %v28087_v23  ;;  %vm28313_vm5 = vmand %vm28311_vm15, %vm28312_vm6  ;;  %vm17718_vm4 = vcmp.eq.s32.totalorder %v3018_v26, %v16392_v32  ;;  %v28317_v22 = vmov 0  ;;  %vm17723_vm6 = vcmp.eq.s32.totalorder %v3212_v52, %v16404_v7  ;;  %v28319_v49 = vmov 0 }
 0x2fb   : > { %vm17709_vm8 = vmpackc.low %vm28314_vm13, %vm28313_vm5  ;;  %v28318_v22 = vsel %vm17718_vm4, 4294967295, %v28317_v22  ;;  %v28320_v49 = vsel %vm17723_vm6, 4294967295, %v28319_v49  ;;  %vm28321_vm14 = vcmask 523264   ;;  %v28324_v48 = vmov 0 }
 0x2fc   : > { %v28316_v63 = vsel %vm17709_vm8, 4294967295, %v28315_v63  ;;  %11552 = vmatmul.mubr.msk.f32.gmra.mrb[22].mxu1 %vm28321_vm14, %v17201_v29  ;;  %vm28323_vm5 = vmand %vm28300_vm2, %vm28299_vm3  ;;  %vm28326_vm15 = vnez %v28302_v5  ;;  %vm17748_vm14 = vcmp.eq.s32.totalorder %v3019_v34, %v16392_v32  ;;  %vm17753_vm9 = vcmp.eq.s32.totalorder %v3213_v16, %v16404_v7  ;;  %v14197_v5 = vld [vmem:[%s28436_s0 + $0x4] ss:$16 sps:$4 sm:$0xff]  }
 0x2fd   : > { %vm17739_vm13 = vmpackc.low %vm28323_vm5, %vm28322_vm1  ;;  %v17758_v12 = vadd.s32 208, %v15909_v35  ;;  %vm17765_vm1 = vcmp.eq.s32.totalorder %v3020_v4, %v16401_v54  ;;  %vm17770_vm5 = vcmp.eq.s32.totalorder %v3214_v28, %v16406_v55  ;;  %v17775_v47 = vadd.s32 216, %v15909_v35  ;;  %5226 = vmatprep.subr.bf16.mxu1 %v14197_v5 }
 0x2fe   : > { %v28325_v48 = vsel %vm17739_vm13, 4294967295, %v28324_v48  ;;  %vm28339_vm12 = vnez %v28250_v56  ;;  %vm17785_vm13 = vcmp.eq.s32.totalorder %v3021_v8, %v16401_v54  ;;  %vm17790_vm8 = vcmp.eq.s32.totalorder %v3215_v53, %v16406_v55  ;;  %vm28348_vm2 = vmand %vm17651_vm10, %vm17656_vm0  ;;  %5227 = vmatpush1.bf16.msra.mxu1 %v14195_v42 }
 0x2ff   : > { %28331 = vst [vmem:[#allocation31_spill] sm:$0xff] %v17758_v12  ;;  %28338 = vst [vmem:[#allocation61_spill] sm:$0xff] %v17775_v47  ;;  %13166 = vmatpush1.bf16.msk.msra.mxu0 %vm28339_vm12, %v28087_v23  ;;  %vm28344_vm11 = vnez %v28259_v62  ;;  %vm28345_vm12 = vnez %v28286_v51  ;;  %vm28346_vm3 = vnez %v28288_v31  ;;  %v3022_v9 = vand.u32 7, %v17758_v12 }
 0x300   : > { %13168 = vmatprep.subr.msk.bf16.mxu0 %vm28344_vm11, %v28087_v23  ;;  %vm28347_vm7 = vmand %vm28345_vm12, %vm28346_vm3  ;;  %v3216_v62 = vshra.s32 %v17758_v12, 3  ;;  %v3023_v38 = vand.u32 7, %v17775_v47  ;;  %v3217_v57 = vshra.s32 %v17775_v47, 3  ;;  %vm28351_vm0 = vnez %v28284_v3 }
 0x301   : > { %vm17807_vm6 = vmpackc.low %vm28348_vm2, %vm28347_vm7  ;;  %vm28352_vm7 = vnez %v28304_v41  ;;  %vm28355_vm3 = vnez %v28309_v36  ;;  %v17855_v26 = vadd.s32 224, %v15909_v35  ;;  %v28368_v52 = vmov 0 }
 0x302   : > { %vm3432_vm4 = vmand %vm17748_vm14, %vm17753_vm9  ;;  %vm28354_vm9 = vnez %v28307_v19  ;;  %v28374_v16 = vmov 0  ;;  %v17899_v31 = vadd.s32 232, %v15909_v35  ;;  %v17952_v36 = vadd.s32 240, %v15909_v35 }
 0x303   : > { %vm3435_vm11 = vmand %vm17765_vm1, %vm17770_vm5  ;;  %13170 = vmatpush1.bf16.msk.msra.mxu0 %vm28351_vm0, %v28087_v23  ;;  %28363 = vst [vmem:[#allocation60_spill] sm:$0xff] %v17855_v26  ;;  %vm28365_vm0 = vnez %v28318_v22  ;;  %vm17906_vm5 = vcmp.eq.s32.totalorder %v3023_v38, %v16401_v54  ;;  %vm17928_vm1 = vcmp.eq.s32.totalorder %v3216_v62, %v16404_v7  ;;  %v3024_v41 = vand.u32 7, %v17855_v26  ;;  %v14221_v22 = vld [vmem:[%s28436_s0 + $0x84] ss:$16 sps:$4 sm:$0xff]  }
 0x304   : > { %vm3437_vm10 = vmand %vm17785_vm13, %vm17790_vm8  ;;  %vm17845_vm8 = vcmp.eq.s32.totalorder %v3020_v4, %v16392_v32  ;;  %vm17850_vm13 = vcmp.eq.s32.totalorder %v3214_v28, %v16404_v7  ;;  %28380 = vst [vmem:[#allocation46_spill] sm:$0xff] %v17899_v31  ;;  %v3218_v19 = vshra.s32 %v17855_v26, 3  ;;  %v3026_v29 = vand.u32 7, %v17952_v36  ;;  %v14201_v4 = vld [vmem:[%s28436_s0 + $0x20] ss:$16 sps:$4 sm:$0xff]  }
 0x305   : > { %vm28353_vm14 = vmand %vm28326_vm15, %vm28352_vm7  ;;  %vm28364_vm15 = vnez %v28293_v0  ;;  %vm28366_vm7 = vnez %v28320_v49  ;;  %28395 = vst [vmem:[#allocation40_spill] sm:$0xff] %v17952_v36  ;;  %v3220_v58 = vshra.s32 %v17952_v36, 3  ;;  %v18115_v1 = vadd.s32 256, %v15909_v35  ;;  %v14209_v28 = vld [vmem:[%s28436_s0 + $0x44] ss:$16 sps:$4 sm:$0xff]  }
 0x306   : > { %vm28356_vm2 = vmand %vm28354_vm9, %vm28355_vm3  ;;  %13172 = vmatprep.subr.msk.bf16.mxu0 %vm28364_vm15, %v28087_v23  ;;  %vm17870_vm3 = vcmp.eq.s32.totalorder %v3021_v8, %v16392_v32  ;;  %v3025_v8 = vand.u32 7, %v17899_v31  ;;  %v18118_v34 = vadd.s32 264, %v15909_v35  ;;  %v28434_v30 = vmov 0  ;;  %v14219_v49 = vld [vmem:[%s28436_s0 + $0x80] ss:$16 sps:$4 sm:$0xff]  }
 0x307   : > { %vm17840_vm12 = vmpackc.low %vm28356_vm2, %vm28353_vm14  ;;  %vm17875_vm2 = vcmp.eq.s32.totalorder %v3215_v53, %v16404_v7  ;;  %v3219_v53 = vshra.s32 %v17899_v31, 3  ;;  %28432 = vst [vmem:[#allocation47_spill] sm:$0xff] %v18115_v1  ;;  %v3222_v51 = vshra.s32 %v18115_v1, 3  ;;  %v18183_v25 = vadd.s32 272, %v15909_v35 }
 0x308   : > { %vm28367_vm14 = vmand %vm28365_vm0, %vm28366_vm7  ;;  %vm17894_vm0 = vcmp.eq.s32.totalorder %v3216_v62, %v16406_v55  ;;  %28433 = vst [vmem:[#allocation32_spill] sm:$0xff] %v18118_v34  ;;  %v3029_v3 = vand.u32 7, %v18118_v34  ;;  %v3223_v0 = vshra.s32 %v18118_v34, 3  ;;  %v18201_v40 = vadd.s32 288, %v15909_v35 }
 0x309   : > { %vm17865_vm9 = vmpackc.low %vm3432_vm4, %vm28367_vm14  ;;  %vm17889_vm4 = vcmp.eq.s32.totalorder %v3022_v9, %v16401_v54  ;;  %vm17923_vm14 = vcmp.eq.s32.totalorder %v3022_v9, %v16392_v32  ;;  %v28412_v9 = vmov 0  ;;  %28437 = vst [vmem:[#allocation33_spill] sm:$0xff] %v18183_v25  ;;  %v3030_v62 = vand.u32 7, %v18183_v25 }
 0x30a   : > { %v28369_v52 = vsel %vm17865_vm9, 4294967295, %v28368_v52  ;;  %vm17884_vm15 = vmpackc.low %vm3437_vm10, %vm3435_vm11  ;;  %vm17911_vm11 = vcmp.eq.s32.totalorder %v3217_v57, %v16406_v55  ;;  %vm28385_vm10 = vnez %v28316_v63  ;;  %vm17946_vm9 = vcmp.eq.s32.totalorder %v3217_v57, %v16404_v7  ;;  %v14243_v57 = vld [vmem:[%s28436_s0 + $0x100] ss:$16 sps:$4 sm:$0xff]   ;;  %28439 = vst [vmem:[#allocation63_spill] sm:$0xff] %v18201_v40 }
 0x30b   : > { %v28375_v16 = vsel %vm17884_vm15, 4294967295, %v28374_v16  ;;  %13174 = vmatpush1.bf16.msk.msra.mxu0 %vm28385_vm10, %v28087_v23  ;;  %vm28390_vm10 = vnez %v28325_v48  ;;  %vm17941_vm15 = vcmp.eq.s32.totalorder %v3023_v38, %v16392_v32  ;;  %v17961_v63 = vadd.s32 248, %v15909_v35  ;;  %vm3438_vm7 = vmand %vm17923_vm14, %vm17928_vm1  ;;  %v14227_v48 = vld [vmem:[%s28436_s0 + $0xa4] ss:$16 sps:$4 sm:$0xff]  }
 0x30c   : > { %13176 = vmatprep.subr.msk.bf16.mxu0 %vm28390_vm10, %v28087_v23  ;;  %vm3441_vm10 = vmand %vm17906_vm5, %vm17911_vm11  ;;  %vm28418_vm14 = vnez %v28369_v52  ;;  %v3224_v17 = vshra.s32 %v18183_v25, 3  ;;  %v3032_v5 = vand.u32 7, %v18201_v40  ;;  %v18398_v25 = vadd.s32 344, %v15909_v35 }
 0x30d   : > { %28396 = vst [vmem:[#allocation62_spill] sm:$0xff] %v17961_v63  ;;  %vm3440_vm5 = vmand %vm17941_vm15, %vm17946_vm9  ;;  %vm17992_vm9 = vcmp.eq.s32.totalorder %v3024_v41, %v16401_v54  ;;  %v3027_v45 = vand.u32 7, %v17961_v63  ;;  %v3221_v56 = vshra.s32 %v17961_v63, 3  ;;  %v28496_v34 = vmov 0 }
 0x30e   : > { %vm28397_vm11 = vmand %vm17845_vm8, %vm17850_vm13  ;;  %28490 = vst [vmem:[#allocation41_spill] sm:$0xff] %v18398_v25  ;;  %v3233_v63 = vshra.s32 %v18398_v25, 3  ;;  %v28527_v31 = vmov 0 }
 0x30f   : > { %13178 = vmatpush1.bf16.msk.msra.mxu0 %vm17807_vm6, %v28087_v23  ;;  %vm28398_vm1 = vmand %vm17870_vm3, %vm17875_vm2  ;;  %vm18013_vm3 = vcmp.eq.s32.totalorder %v3025_v8, %v16401_v54  ;;  %vm18018_vm2 = vcmp.eq.s32.totalorder %v3219_v53, %v16406_v55 }
 0x310   : > { %13180 = vmatprep.subr.msk.bf16.mxu0 %vm17840_vm12, %v28087_v23  ;;  %vm17987_vm6 = vmpackc.low %vm28398_vm1, %vm28397_vm11  ;;  %vm17997_vm12 = vcmp.eq.s32.totalorder %v3218_v19, %v16406_v55  ;;  %vm28423_vm11 = vnez %v28375_v16  ;;  %v3028_v16 = vand.u32 7, %v18115_v1  ;;  %v28520_v1 = vmov 0 }
 0x311   : > { %vm28405_vm8 = vmand %vm17889_vm4, %vm17894_vm0  ;;  %vm18029_vm4 = vcmp.eq.s32.totalorder %v3024_v41, %v16392_v32  ;;  %vm18034_vm0 = vcmp.eq.s32.totalorder %v3218_v19, %v16404_v7  ;;  %v14203_v41 = vld [vmem:[%s28436_s0 + $0x24] ss:$16 sps:$4 sm:$0xff]   ;;  %v14207_v19 = vld [vmem:[%s28436_s0 + $0x40] ss:$16 sps:$4 sm:$0xff]  }
 0x312   : > { %vm18008_vm13 = vmpackc.low %vm3441_vm10, %vm28405_vm8  ;;  %vm18046_vm10 = vcmp.eq.s32.totalorder %v3025_v8, %v16392_v32  ;;  %vm18063_vm8 = vcmp.eq.s32.totalorder %v3026_v29, %v16401_v54  ;;  %5228 = vmatprep.subr.bf16.mxu1 %v14203_v41  ;;  %v14215_v8 = vld [vmem:[%s28436_s0 + $0x64] ss:$16 sps:$4 sm:$0xff]   ;;  %v3226_v41 = vshra.s32 %v18201_v40, 3 }
 0x313   : > { %vm18024_vm15 = vmpackc.low %vm3440_vm5, %vm3438_vm7  ;;  %13182 = vmatpush1.bf16.msk.msra.mxu0 %vm28418_vm14, %v28087_v23  ;;  %vm18051_vm5 = vcmp.eq.s32.totalorder %v3219_v53, %v16404_v7  ;;  %vm18068_vm14 = vcmp.eq.s32.totalorder %v3220_v58, %v16406_v55  ;;  %vm18077_vm7 = vcmp.eq.s32.totalorder %v3027_v45, %v16401_v54  ;;  %5229 = vmatpush1.bf16.msra.mxu1 %v14201_v4  ;;  %v14213_v53 = vld [vmem:[%s28436_s0 + $0x60] ss:$16 sps:$4 sm:$0xff]   ;;  %v18231_v4 = vadd.s32 304, %v15909_v35  ;;  %v14269_v40 = vld [vmem:[%s28436_s0 + $0x184] ss:$16 sps:$4 sm:$0xff]  }
 0x314   : > { %v28413_v9 = vsel %vm18024_vm15, 4294967295, %v28412_v9  ;;  %13184 = vmatprep.subr.msk.bf16.mxu0 %vm28423_vm11, %v28087_v23  ;;  %vm3445_vm1 = vmand %vm18013_vm3, %vm18018_vm2  ;;  %vm3321_vm3 = vcmp.eq.s32.totalorder %v3221_v56, %v16406_v55  ;;  %vm3318_vm15 = vcmp.eq.s32.totalorder %v3220_v58, %v16404_v7  ;;  %5230 = vmatprep.subr.bf16.mxu1 %v14209_v28  ;;  %v14233_v58 = vld [vmem:[%s28436_s0 + $0xc4] ss:$16 sps:$4 sm:$0xff]  }
 0x315   : > { %vm3442_vm11 = vmand %vm18029_vm4, %vm18034_vm0  ;;  %28447 = vst [vmem:[#allocation66_spill] sm:$0xff] %v18231_v4  ;;  %v14257_v28 = vld [vmem:[%s28436_s0 + $0x144] ss:$16 sps:$4 sm:$0xff]  }
 0x316   : > { %vm3444_vm2 = vmand %vm18046_vm10, %vm18051_vm5 }
 0x317   : > { %13186 = vmatpush1.bf16.msk.msra.mxu0 %vm17987_vm6, %v28087_v23  ;;  %vm3447_vm4 = vmand %vm18063_vm8, %vm18068_vm14  ;;  %vm3122_vm6 = vcmp.eq.s32.totalorder %v3026_v29, %v16392_v32  ;;  %vm3124_vm14 = vcmp.eq.s32.totalorder %v3027_v45, %v16392_v32  ;;  %5231 = vmatpush1.bf16.msra.mxu1 %v14207_v19  ;;  %v14225_v29 = vld [vmem:[%s28436_s0 + $0xa0] ss:$16 sps:$4 sm:$0xff]   ;;  %v18186_v45 = vadd.s32 280, %v15909_v35 }
 0x318   : > { %13188 = vmatprep.subr.msk.bf16.mxu0 %vm18008_vm13, %v28087_v23  ;;  %vm3449_vm0 = vmand %vm18077_vm7, %vm3321_vm3  ;;  %vm3320_vm13 = vcmp.eq.s32.totalorder %v3221_v56, %v16404_v7  ;;  %vm28431_vm3 = vnez %v28413_v9  ;;  %5232 = vmatprep.subr.bf16.mxu1 %v14215_v8  ;;  %v14237_v56 = vld [vmem:[%s28436_s0 + $0xe0] ss:$16 sps:$4 sm:$0xff]   ;;  %v14245_v9 = vld [vmem:[%s28436_s0 + $0x104] ss:$16 sps:$4 sm:$0xff]  }
 0x319   : > { %vm28430_vm10 = vmand %vm17992_vm9, %vm17997_vm12  ;;  %28438 = vst [vmem:[#allocation64_spill] sm:$0xff] %v18186_v45  ;;  %v3031_v38 = vand.u32 7, %v18186_v45  ;;  %v3225_v52 = vshra.s32 %v18186_v45, 3  ;;  %v14261_v19 = vld [vmem:[%s28436_s0 + $0x160] ss:$16 sps:$4 sm:$0xff]   ;;  %v28486_v45 = vmov 0 }
 0x31a   : > { %vm13191_vm5 = vmpackc.low %vm3445_vm1, %vm28430_vm10  ;;  %vm3126_vm10 = vcmp.eq.s32.totalorder %v3028_v16, %v16392_v32 }
 0x31b   : > { %vm13193_vm8 = vmpackc.low %vm3444_vm2, %vm3442_vm11  ;;  %13190 = vmatpush1.bf16.msk.msra.mxu0 %vm28431_vm3, %v28087_v23  ;;  %vm3129_vm11 = vcmp.eq.s32.totalorder %v3029_v3, %v16401_v54  ;;  %vm3323_vm2 = vcmp.eq.s32.totalorder %v3222_v51, %v16406_v55  ;;  %5233 = vmatpush1.bf16.msra.mxu1 %v14213_v53 }
 0x31c   : > { %vm13195_vm7 = vmpackc.low %vm3449_vm0, %vm3447_vm4  ;;  %13192 = vmatprep.subr.msk.bf16.mxu0 %vm13191_vm5, %v28087_v23  ;;  %vm3325_vm4 = vcmp.eq.s32.totalorder %v3223_v0, %v16406_v55  ;;  %vm3322_vm5 = vcmp.eq.s32.totalorder %v3222_v51, %v16404_v7  ;;  %5234 = vmatprep.subr.bf16.mxu1 %v14221_v22  ;;  %v18244_v22 = vadd.s32 312, %v15909_v35  ;;  %v18560_v51 = vadd.s32 376, %v15909_v35 }
 0x31d   : > { %vm3446_vm9 = vmand %vm3122_vm6, %vm3318_vm15  ;;  %vm3127_vm15 = vcmp.eq.s32.totalorder %v3028_v16, %v16401_v54  ;;  %v18208_v16 = vadd.s32 296, %v15909_v35 }
 0x31e   : > { %vm3448_vm12 = vmand %vm3124_vm14, %vm3320_vm13  ;;  %vm3324_vm14 = vcmp.eq.s32.totalorder %v3223_v0, %v16404_v7  ;;  %v14249_v0 = vld [vmem:[%s28436_s0 + $0x120] ss:$16 sps:$4 sm:$0xff]   ;;  %28450 = vst [vmem:[#allocation65_spill] sm:$0xff] %v18244_v22 }
 0x31f   : > { %13194 = vmatpush1.bf16.msk.msra.mxu0 %vm13193_vm8, %v28087_v23  ;;  %vm13197_vm1 = vmpackc.low %vm3448_vm12, %vm3446_vm9  ;;  %vm3128_vm8 = vcmp.eq.s32.totalorder %v3029_v3, %v16392_v32  ;;  %5235 = vmatpush1.bf16.msra.mxu1 %v14219_v49  ;;  %28440 = vst [vmem:[#allocation53_spill] sm:$0xff] %v18208_v16  ;;  %vm18211_vm12 = vcmp.eq.s32.totalorder %v3030_v62, %v16401_v54  ;;  %v3033_v8 = vand.u32 7, %v18208_v16  ;;  %v3227_v53 = vshra.s32 %v18208_v16, 3 }
 0x320   : > { %13196 = vmatprep.subr.msk.bf16.mxu0 %vm13195_vm7, %v28087_v23  ;;  %vm3451_vm0 = vmand %vm3127_vm15, %vm3323_vm2  ;;  %5236 = vmatprep.subr.bf16.mxu1 %v14227_v48  ;;  %vm18224_vm15 = vcmp.eq.s32.totalorder %v3224_v17, %v16406_v55  ;;  %vm18247_vm2 = vcmp.eq.s32.totalorder %v3030_v62, %v16392_v32  ;;  %v28453_v48 = vmov 0  ;;  %v28471_v16 = vmov 0  ;;  %28543 = vst [vmem:[#allocation29_spill] sm:$0xff] %v18560_v51 }
 0x321   : > { %vm3453_vm6 = vmand %vm3129_vm11, %vm3325_vm4  ;;  %vm18237_vm11 = vcmp.eq.s32.totalorder %v3225_v52, %v16406_v55  ;;  %vm18252_vm4 = vcmp.eq.s32.totalorder %v3224_v17, %v16404_v7  ;;  %v14263_v17 = vld [vmem:[%s28436_s0 + $0x164] ss:$16 sps:$4 sm:$0xff]   ;;  %v28498_v49 = vmov 0  ;;  %v28511_v62 = vmov 0 }
 0x322   : > { %vm13199_vm13 = vmpackc.low %vm3453_vm6, %vm3451_vm0  ;;  %v28454_v48 = vsel %vm18252_vm4, 4294967295, %v28453_v48  ;;  %vm18324_vm0 = vcmp.eq.s32.totalorder %v3226_v41, %v16404_v7  ;;  %vm18347_vm4 = vcmp.eq.s32.totalorder %v3033_v8, %v16392_v32  ;;  %v28535_v3 = vmov 0 }
 0x323   : > { %13198 = vmatpush1.bf16.msk.msra.mxu0 %vm13197_vm1, %v28087_v23  ;;  %vm3450_vm3 = vmand %vm3126_vm10, %vm3322_vm5  ;;  %5237 = vmatpush1.bf16.msra.mxu1 %v14225_v29  ;;  %vm18216_vm1 = vcmp.eq.s32.totalorder %v3031_v38, %v16401_v54  ;;  %vm18261_vm10 = vcmp.eq.s32.totalorder %v3031_v38, %v16392_v32  ;;  %v28455_v29 = vmov 0  ;;  %vm18266_vm5 = vcmp.eq.s32.totalorder %v3225_v52, %v16404_v7 }
 0x324   : > { %13200 = vmatprep.subr.msk.bf16.mxu0 %vm13199_vm13, %v28087_v23  ;;  %vm3452_vm7 = vmand %vm3128_vm8, %vm3324_vm14  ;;  %5238 = vmatprep.subr.bf16.mxu1 %v14233_v58  ;;  %v28456_v29 = vsel %vm18261_vm10, 4294967295, %v28455_v29  ;;  %v28457_v58 = vmov 0  ;;  %vm18284_vm8 = vcmp.eq.s32.totalorder %v3032_v5, %v16401_v54  ;;  %vm18289_vm14 = vcmp.eq.s32.totalorder %v3226_v41, %v16406_v55 }
 0x325   : > { %vm18133_vm9 = vmpackc.low %vm3452_vm7, %vm3450_vm3  ;;  %v28458_v58 = vsel %vm18266_vm5, 4294967295, %v28457_v58  ;;  %v3034_v38 = vand.u32 7, %v18231_v4  ;;  %vm18303_vm3 = vcmp.eq.s32.totalorder %v3033_v8, %v16401_v54  ;;  %vm18308_vm7 = vcmp.eq.s32.totalorder %v3227_v53, %v16406_v55 }
 0x326   : > { %v28435_v30 = vsel %vm18133_vm9, 4294967295, %v28434_v30  ;;  %vm18319_vm13 = vcmp.eq.s32.totalorder %v3032_v5, %v16392_v32  ;;  %v28472_v16 = vsel %vm18324_vm0, 4294967295, %v28471_v16  ;;  %vm28473_vm9 = vmand %vm18211_vm12, %vm18224_vm15  ;;  %v28475_v5 = vmov 0 }
 0x327   : > { %5239 = vmatpush1.bf16.msra.mxu1 %v14231_v2  ;;  %v18271_v2 = vadd.s32 320, %v15909_v35  ;;  %vm28474_vm6 = vmand %vm18216_vm1, %vm18237_vm11  ;;  %vm18352_vm12 = vcmp.eq.s32.totalorder %v3227_v53, %v16404_v7  ;;  %vm18366_vm1 = vcmp.eq.s32.totalorder %v3034_v38, %v16401_v54  ;;  %v28481_v8 = vmov 0 }
 0x328   : > { %5240 = vmatprep.subr.bf16.mxu1 %v14239_v46  ;;  %v18274_v46 = vadd.s32 328, %v15909_v35  ;;  %vm18338_vm5 = vmpackc.low %vm28474_vm6, %vm28473_vm9  ;;  %v28482_v8 = vsel %vm18366_vm1, 4294967295, %v28481_v8  ;;  %vm28491_vm10 = vnez %v28454_v48  ;;  %vm28494_vm0 = vnez %v28458_v58 }
 0x329   : > { %28459 = vst [vmem:[#allocation28_spill] sm:$0xff] %v18271_v2  ;;  %v28476_v5 = vsel %vm18338_vm5, 4294967295, %v28475_v5  ;;  %v3036_v42 = vand.u32 7, %v18271_v2  ;;  %vm28492_vm11 = vmand %vm18247_vm2, %vm28491_vm10  ;;  %vm28493_vm5 = vnez %v28456_v29  ;;  %vm18419_vm1 = vcmp.eq.s32.totalorder %v3034_v38, %v16392_v32 }
 0x32a   : > { %28460 = vst [vmem:[#allocation27_spill] sm:$0xff] %v18274_v46  ;;  %v3037_v41 = vand.u32 7, %v18274_v46  ;;  %v28499_v49 = vsel %vm18419_vm1, 4294967295, %v28498_v49  ;;  %v28500_v48 = vmov 0  ;;  %vm28503_vm10 = vmand %vm18303_vm3, %vm18308_vm7  ;;  %v28504_v29 = vmov 0 }
 0x32b   : > { %5241 = vmatpush1.bf16.msra.mxu1 %v14237_v56  ;;  %v14255_v56 = vld [vmem:[%s28436_s0 + $0x140] ss:$16 sps:$4 sm:$0xff]   ;;  %v28513_v38 = vmov 0  ;;  %v28568_v58 = vmov 0 }
 0x32c   : > { %5242 = vmatprep.subr.bf16.mxu1 %v14245_v9  ;;  %vm18462_vm3 = vcmp.eq.s32.totalorder %v3037_v41, %v16401_v54  ;;  %vm18547_vm1 = vcmp.eq.s32.totalorder %v3037_v41, %v16392_v32  ;;  %v28634_v9 = vmov 0  ;;  %v28733_v41 = vmov 0 }
 0x32d   : > { %v28514_v38 = vsel %vm18462_vm3, 4294967295, %v28513_v38  ;;  %vm28524_vm3 = vnez %v28472_v16  ;;  %v28531_v16 = vmov 0 }
 0x32f   : > { %5243 = vmatpush1.bf16.msra.mxu1 %v14243_v57  ;;  %v3228_v57 = vshra.s32 %v18231_v4, 3  ;;  %v28469_v4 = vmov 0 }
 0x330   : > { %5244 = vmatprep.subr.bf16.mxu1 %v14251_v10  ;;  %v28470_v4 = vsel %vm18319_vm13, 4294967295, %v28469_v4  ;;  %vm28495_vm13 = vmand %vm28493_vm5, %vm28494_vm0 }
 0x331   : > { %vm18371_vm15 = vcmp.eq.s32.totalorder %v3228_v57, %v16406_v55  ;;  %vm18424_vm2 = vcmp.eq.s32.totalorder %v3228_v57, %v16404_v7  ;;  %vm28502_vm0 = vmand %vm18284_vm8, %vm18289_vm14  ;;  %vm18457_vm14 = vcmp.eq.s32.totalorder %v3036_v42, %v16401_v54  ;;  %v14267_v57 = vld [vmem:[%s28436_s0 + $0x180] ss:$16 sps:$4 sm:$0xff]  }
 0x332   : > { %v28501_v48 = vsel %vm18424_vm2, 4294967295, %v28500_v48  ;;  %vm18438_vm5 = vmpackc.low %vm28503_vm10, %vm28502_vm0  ;;  %v28512_v62 = vsel %vm18457_vm14, 4294967295, %v28511_v62 }
 0x333   : > { %5245 = vmatpush1.bf16.msra.mxu1 %v14249_v0  ;;  %v3035_v0 = vand.u32 7, %v18244_v22  ;;  %v28505_v29 = vsel %vm18438_vm5, 4294967295, %v28504_v29  ;;  %vm28526_vm10 = vmand %vm18347_vm4, %vm18352_vm12 }
 0x334   : > { %5246 = vmatprep.subr.bf16.mxu1 %v14257_v28  ;;  %v3229_v28 = vshra.s32 %v18244_v22, 3  ;;  %v18377_v22 = vadd.s32 336, %v15909_v35 }
 0x335   : > { %vm18387_vm6 = vcmp.eq.s32.totalorder %v3035_v0, %v16401_v54 }
 0x336   : > { %28485 = vst [vmem:[#allocation49_spill] sm:$0xff] %v18377_v22  ;;  %v28487_v45 = vsel %vm18387_vm6, 4294967295, %v28486_v45  ;;  %vm18392_vm9 = vcmp.eq.s32.totalorder %v3229_v28, %v16406_v55  ;;  %vm18410_vm6 = vmpackc.low %vm28495_vm13, %vm28492_vm11  ;;  %vm28506_vm13 = vnez %v28482_v8  ;;  %vm18452_vm8 = vcmp.eq.s32.totalorder %v3229_v28, %v16404_v7 }
 0x337   : > { %5247 = vmatpush1.bf16.msra.mxu1 %v14255_v56  ;;  %v3230_v56 = vshra.s32 %v18271_v2, 3  ;;  %v28488_v2 = vmov 0  ;;  %v28497_v34 = vsel %vm18410_vm6, 4294967295, %v28496_v34  ;;  %vm28516_vm0 = vnez %v28487_v45  ;;  %vm28533_vm4 = vmand %vm28506_vm13, %vm18371_vm15 }
 0x338   : > { %5248 = vmatprep.subr.bf16.mxu1 %v14263_v17  ;;  %v28489_v2 = vsel %vm18392_vm9, 4294967295, %v28488_v2  ;;  %v3231_v17 = vshra.s32 %v18274_v46, 3  ;;  %vm18447_vm9 = vcmp.eq.s32.totalorder %v3035_v0, %v16392_v32  ;;  %v3038_v52 = vand.u32 7, %v18377_v22 }
 0x339   : > { %vm28515_vm7 = vnez %v28489_v2  ;;  %vm18474_vm11 = vcmp.eq.s32.totalorder %v3230_v56, %v16406_v55  ;;  %v3232_v0 = vshra.s32 %v18377_v22, 3  ;;  %v18481_v28 = vadd.s32 352, %v15909_v35 }
 0x33a   : > { %vm18491_vm5 = vcmp.eq.s32.totalorder %v3231_v17, %v16406_v55  ;;  %v3039_v22 = vand.u32 7, %v18398_v25  ;;  %vm28523_vm6 = vnez %v28470_v4  ;;  %v28529_v4 = vmov 0  ;;  %vm28534_vm12 = vmand %vm28516_vm0, %vm28515_vm7 }
 0x33b   : > { %5249 = vmatpush1.bf16.msra.mxu1 %v14261_v19  ;;  %28519 = vst [vmem:[#allocation56_spill] sm:$0xff] %v18481_v28  ;;  %v14275_v19 = vld [vmem:[%s28436_s0 + $0x1a4] ss:$16 sps:$4 sm:$0xff]   ;;  %v28521_v1 = vsel %vm18491_vm5, 4294967295, %v28520_v1  ;;  %vm28525_vm14 = vmand %vm28523_vm6, %vm28524_vm3  ;;  %vm18519_vm5 = vcmp.eq.s32.totalorder %v3036_v42, %v16392_v32  ;;  %vm18524_vm6 = vcmp.eq.s32.totalorder %v3230_v56, %v16404_v7  ;;  %vm28537_vm3 = vnez %v28512_v62  ;;  %v14273_v42 = vld [vmem:[%s28436_s0 + $0x1a0] ss:$16 sps:$4 sm:$0xff]  }
 0x33c   : > { %5250 = vmatprep.subr.bf16.mxu1 %v14269_v40  ;;  %v18498_v40 = vadd.s32 360, %v15909_v35  ;;  %vm18510_vm2 = vmpackc.low %vm28526_vm10, %vm28525_vm14  ;;  %v28530_v4 = vsel %vm18519_vm5, 4294967295, %v28529_v4  ;;  %v28532_v16 = vsel %vm18524_vm6, 4294967295, %v28531_v16  ;;  %vm18552_vm15 = vcmp.eq.s32.totalorder %v3231_v17, %v16404_v7 }
 0x33d   : > { %v28528_v31 = vsel %vm18510_vm2, 4294967295, %v28527_v31  ;;  %vm18538_vm14 = vmpackc.low %vm28534_vm12, %vm28533_vm4  ;;  %v18557_v2 = vadd.s32 368, %v15909_v35  ;;  %vm28544_vm13 = vnez %v28521_v1  ;;  %vm28545_vm7 = vnez %v28514_v38 }
 0x33e   : > { %28522 = vst [vmem:[#allocation34_spill] sm:$0xff] %v18498_v40  ;;  %v28536_v3 = vsel %vm18538_vm14, 4294967295, %v28535_v3  ;;  %vm18570_vm4 = vcmp.eq.s32.totalorder %v3038_v52, %v16401_v54  ;;  %vm18575_vm12 = vcmp.eq.s32.totalorder %v3232_v0, %v16406_v55  ;;  %v3040_v53 = vand.u32 7, %v18481_v28 }
 0x33f   : > { %28542 = vst [vmem:[#allocation26_spill] sm:$0xff] %v18557_v2  ;;  %5251 = vmatpush1.bf16.msra.mxu1 %v14267_v57  ;;  %v3234_v56 = vshra.s32 %v18481_v28, 3  ;;  %vm28550_vm10 = vnez %v28435_v30  ;;  %vm18589_vm14 = vcmp.eq.s32.totalorder %v3039_v22, %v16401_v54  ;;  %vm18594_vm2 = vcmp.eq.s32.totalorder %v3233_v63, %v16406_v55 }
 0x340   : > { %5252 = vmatprep.subr.bf16.mxu1 %v14275_v19  ;;  %v28553_v17 = vmov 0  ;;  %v3041_v57 = vand.u32 7, %v18498_v40  ;;  %v3235_v30 = vshra.s32 %v18498_v40, 3  ;;  %vm28556_vm0 = vnez %v28499_v49 }
 0x341   : > { %v28554_v17 = vsel %vm18594_vm2, 4294967295, %v28553_v17  ;;  %vm28557_vm6 = vnez %v28501_v48  ;;  %v28560_v28 = vmov 0  ;;  %v28564_v49 = vmov 0 }
 0x342   : > { %vm28558_vm5 = vmand %vm28556_vm0, %vm28557_vm6  ;;  %vm18627_vm6 = vcmp.eq.s32.totalorder %v3232_v0, %v16404_v7  ;;  %v3042_v1 = vand.u32 7, %v18557_v2  ;;  %v3043_v38 = vand.u32 7, %v18560_v51  ;;  %v3236_v10 = vshra.s32 %v18557_v2, 3 }
 0x343   : > { %v28565_v49 = vsel %vm18627_vm6, 4294967295, %v28564_v49  ;;  %5253 = vmatpush1.bf16.msra.mxu1 %v14273_v42  ;;  %vm28582_vm0 = vnez %v28497_v34  ;;  %v28583_v0 = vmov 0  ;;  %v28585_v42 = vmov 0 }
 0x344   : > { %v18698_v34 = vadd.s32 392, %v15909_v35  ;;  %vm28590_vm6 = vnez %v28532_v16  ;;  %v28667_v45 = vmov 0  ;;  %v28700_v62 = vmov 0 }
 0x345   : > { %v19104_v25 = vadd.s32 456, %v15909_v35 }
 0x346   : > { %28587 = vst [vmem:[#allocation67_spill] sm:$0xff] %v18698_v34 }
 0x347   : > { %28719 = vst [vmem:[#allocation75_spill] sm:$0xff] %v19104_v25 }
 0x38c   : > { %v2823_v46 = vpop.f32.mrb[16].mxu0 }
 0x38d   : > { %v2825_v36 = vpop.f32.mrb[17].mxu0 }
 0x38e   : > { %3834 = vmatprep.mubr.f32.mxu0 %v2825_v36  ;;  %v28601_v36 = vmov 0 }
 0x38f   : > { %3835 = vmatmul.mubr.f32.vlgmr.msra.gmra.mrb[24].mxu0 %v2823_v46  ;;  %v28551_v46 = vmov 0 }
 0x390   : > { %13202 = vmatpush1.bf16.msk.msra.mxu0 %vm28550_vm10, %v28087_v23  ;;  %v28552_v46 = vsel %vm18589_vm14, 4294967295, %v28551_v46  ;;  %vm28555_vm10 = vnez %v28476_v5  ;;  %vm28559_vm14 = vmand %vm18447_vm9, %vm18452_vm8  ;;  %v28562_v5 = vmov 0 }
 0x391   : > { %13204 = vmatprep.subr.msk.bf16.mxu0 %vm28555_vm10, %v28087_v23  ;;  %vm18613_vm2 = vmpackc.low %vm28559_vm14, %vm28558_vm5  ;;  %vm18622_vm10 = vcmp.eq.s32.totalorder %v3038_v52, %v16392_v32  ;;  %v18677_v52 = vadd.s32 384, %v15909_v35 }
 0x392   : > { %v28561_v28 = vsel %vm18613_vm2, 4294967295, %v28560_v28  ;;  %v28563_v5 = vsel %vm18622_vm10, 4294967295, %v28562_v5  ;;  %vm28566_vm9 = vmand %vm28537_vm3, %vm18474_vm11  ;;  %vm18655_vm11 = vcmp.eq.s32.totalorder %v3233_v63, %v16404_v7  ;;  %vm28575_vm3 = vnez %v28554_v17 }
 0x393   : > { %vm28567_vm5 = vmand %vm28545_vm7, %vm28544_vm13  ;;  %vm28576_vm13 = vnez %v28552_v46  ;;  %28581 = vst [vmem:[#allocation24_spill] sm:$0xff] %v18677_v52  ;;  %vm18692_vm2 = vcmp.eq.s32.totalorder %v3235_v30, %v16406_v55  ;;  %vm28589_vm7 = vnez %v28530_v4  ;;  %v28597_v4 = vmov 0 }
 0x394   : > { %vm18641_vm8 = vmpackc.low %vm28567_vm5, %vm28566_vm9  ;;  %vm18666_vm9 = vcmp.eq.s32.totalorder %v3040_v53, %v16401_v54  ;;  %vm18671_vm5 = vcmp.eq.s32.totalorder %v3234_v56, %v16406_v55  ;;  %13206 = vmatpush1.bf16.msk.msra.mxu0 %vm28582_vm0, %v28087_v23  ;;  %v28586_v42 = vsel %vm18692_vm2, 4294967295, %v28585_v42  ;;  %vm28588_vm0 = vnez %v28505_v29 }
 0x395   : > { %v28569_v58 = vsel %vm18641_vm8, 4294967295, %v28568_v58  ;;  %vm28570_vm14 = vmmov %vm18570_vm4  ;;  %vm18650_vm4 = vcmp.eq.s32.totalorder %v3039_v22, %v16392_v32  ;;  %vm18687_vm8 = vcmp.eq.s32.totalorder %v3041_v57, %v16401_v54  ;;  %13208 = vmatprep.subr.msk.bf16.mxu0 %vm28588_vm0, %v28087_v23  ;;  %vm18722_vm0 = vcmp.eq.s32.totalorder %v3040_v53, %v16392_v32 }
 0x396   : > { %v28584_v0 = vsel %vm18687_vm8, 4294967295, %v28583_v0  ;;  %vm28591_vm10 = vmand %vm28589_vm7, %vm28590_vm6  ;;  %v28595_v29 = vmov 0  ;;  %vm18727_vm6 = vcmp.eq.s32.totalorder %v3234_v56, %v16404_v7  ;;  %v28610_v53 = vmov 0 }
 0x397   : > { %vm28592_vm8 = vmand %vm18547_vm1, %vm18552_vm15  ;;  %v28596_v29 = vsel %vm18722_vm0, 4294967295, %v28595_v29  ;;  %v28598_v4 = vsel %vm18727_vm6, 4294967295, %v28597_v4  ;;  %vm18774_vm7 = vcmp.eq.s32.totalorder %v3236_v10, %v16406_v55  ;;  %v3044_v46 = vand.u32 7, %v18677_v52 }
 0x398   : > { %v2829_v19 = vpop.f32.mrb[18].mxu0  ;;  %vm18713_vm2 = vmpackc.low %vm28592_vm8, %vm28591_vm10  ;;  %v3238_v17 = vshra.s32 %v18677_v52, 3  ;;  %v3239_v52 = vshra.s32 %v18698_v34, 3  ;;  %v18860_v22 = vadd.s32 416, %v15909_v35  ;;  %v18863_v63 = vadd.s32 424, %v15909_v35 }
 0x399   : > { %v2831_v48 = vpop.f32.mrb[19].mxu0  ;;  %vm28599_vm1 = vmand %vm28570_vm14, %vm18575_vm12  ;;  %vm18755_vm12 = vcmp.eq.s32.totalorder %v3235_v30, %v16404_v7  ;;  %vm18760_vm14 = vcmp.eq.s32.totalorder %v3042_v1, %v16401_v54  ;;  %v28618_v30 = vmov 0 }
 0x39a   : > { %3840 = vmatprep.mubr.f32.mxu0 %v2831_v48  ;;  %vm28600_vm15 = vmand %vm28576_vm13, %vm28575_vm3  ;;  %vm18765_vm3 = vcmp.eq.s32.totalorder %v3043_v38, %v16401_v54  ;;  %vm28612_vm13 = vnez %v28586_v42  ;;  %28641 = vst [vmem:[#allocation70_spill] sm:$0xff] %v18860_v22  ;;  %v3049_v56 = vand.u32 7, %v18863_v63 }
 0x39b   : > { %3841 = vmatmul.mubr.f32.gmra.mrb[26].mxu0 %v2829_v19  ;;  %v3237_v19 = vshra.s32 %v18560_v51, 3  ;;  %v28593_v51 = vmov 0  ;;  %vm18741_vm10 = vmpackc.low %vm28600_vm15, %vm28599_vm1  ;;  %v28611_v53 = vsel %vm18765_vm3, 4294967295, %v28610_v53  ;;  %vm28613_vm1 = vnez %v28584_v0  ;;  %28642 = vst [vmem:[#allocation71_spill] sm:$0xff] %v18863_v63 }
 0x39c   : > { %v28594_v51 = vsel %vm18713_vm2, 4294967295, %v28593_v51  ;;  %v28602_v36 = vsel %vm18741_vm10, 4294967295, %v28601_v36  ;;  %vm28603_vm8 = vmmov %vm18666_vm9  ;;  %vm18750_vm9 = vcmp.eq.s32.totalorder %v3041_v57, %v16392_v32  ;;  %v18781_v57 = vadd.s32 400, %v15909_v35 }
 0x39d   : > { %vm28617_vm10 = vnez %v28528_v31  ;;  %vm18791_vm2 = vcmp.eq.s32.totalorder %v3237_v19, %v16406_v55  ;;  %vm28622_vm3 = vnez %v28563_v5  ;;  %vm28623_vm15 = vnez %v28565_v49  ;;  %vm28625_vm0 = vmand %vm18650_vm4, %vm18655_vm11 }
 0x39e   : > { %28616 = vst [vmem:[#allocation68_spill] sm:$0xff] %v18781_v57  ;;  %13210 = vmatpush1.bf16.msk.msra.mxu0 %vm28617_vm10, %v28087_v23  ;;  %v28619_v30 = vsel %vm18791_vm2, 4294967295, %v28618_v30  ;;  %vm28621_vm10 = vnez %v28536_v3  ;;  %vm28624_vm6 = vmand %vm28622_vm3, %vm28623_vm15  ;;  %v28626_v31 = vmov 0  ;;  %v28628_v3 = vmov 0 }
 0x39f   : > { %13212 = vmatprep.subr.msk.bf16.mxu0 %vm28621_vm10, %v28087_v23  ;;  %vm18813_vm2 = vmpackc.low %vm28625_vm0, %vm28624_vm6  ;;  %vm18822_vm10 = vcmp.eq.s32.totalorder %v3042_v1, %v16392_v32  ;;  %vm18827_vm3 = vcmp.eq.s32.totalorder %v3236_v10, %v16404_v7  ;;  %v28630_v5 = vmov 0  ;;  %v3046_v0 = vand.u32 7, %v18781_v57  ;;  %v14279_v10 = vld [vmem:[%s28436_s0 + $0x1c0] ss:$16 sps:$4 sm:$0xff]  }
 0x3a0   : > { %v28627_v31 = vsel %vm18813_vm2, 4294967295, %v28626_v31  ;;  %v28629_v3 = vsel %vm18822_vm10, 4294967295, %v28628_v3  ;;  %v28631_v5 = vsel %vm18827_vm3, 4294967295, %v28630_v5  ;;  %vm28632_vm4 = vmand %vm28603_vm8, %vm18671_vm5  ;;  %vm18855_vm5 = vcmp.eq.s32.totalorder %v3237_v19, %v16404_v7 }
 0x3a1   : > { %vm28633_vm11 = vmand %vm28613_vm1, %vm28612_vm13  ;;  %vm28643_vm8 = vnez %v28619_v30  ;;  %vm28644_vm13 = vnez %v28611_v53  ;;  %v3240_v42 = vshra.s32 %v18781_v57, 3  ;;  %vm28649_vm15 = vnez %v28561_v28 }
 0x3a2   : > { %v2835_v48 = vpop.f32.mrb[20].mxu0  ;;  %vm18841_vm0 = vmpackc.low %vm28633_vm11, %vm28632_vm4  ;;  %vm18870_vm4 = vcmp.eq.s32.totalorder %v3044_v46, %v16401_v54  ;;  %vm18875_vm11 = vcmp.eq.s32.totalorder %v3238_v17, %v16406_v55  ;;  %13214 = vmatpush1.bf16.msk.msra.mxu0 %vm28649_vm15, %v28087_v23  ;;  %v28650_v19 = vmov 0  ;;  %vm18894_vm2 = vcmp.eq.s32.totalorder %v3239_v52, %v16406_v55 }
 0x3a3   : > { %v2837_v16 = vpop.f32.mrb[21].mxu0  ;;  %v28635_v9 = vsel %vm18841_vm0, 4294967295, %v28634_v9  ;;  %vm28636_vm6 = vmmov %vm18760_vm14  ;;  %vm18850_vm14 = vcmp.eq.s32.totalorder %v3043_v38, %v16392_v32  ;;  %v28645_v38 = vmov 0  ;;  %vm28654_vm15 = vnez %v28569_v58 }
 0x3a4   : > { %3846 = vmatprep.mubr.f32.mxu0 %v2837_v16  ;;  %v3045_v16 = vand.u32 7, %v18698_v34  ;;  %v28646_v38 = vsel %vm18870_vm4, 4294967295, %v28645_v38  ;;  %13216 = vmatprep.subr.msk.bf16.mxu0 %vm28654_vm15, %v28087_v23  ;;  %vm28655_vm1 = vnez %v28596_v29  ;;  %vm28656_vm3 = vnez %v28598_v4 }
 0x3a5   : > { %3847 = vmatmul.mubr.f32.gmra.mrb[28].mxu0 %v2835_v48  ;;  %v18798_v48 = vadd.s32 408, %v15909_v35  ;;  %vm28657_vm10 = vmand %vm28655_vm1, %vm28656_vm3  ;;  %v28659_v57 = vmov 0  ;;  %vm18922_vm15 = vcmp.eq.s32.totalorder %v3044_v46, %v16392_v32  ;;  %v28661_v58 = vmov 0 }
 0x3a6   : > { %vm18889_vm0 = vcmp.eq.s32.totalorder %v3045_v16, %v16401_v54  ;;  %v28662_v58 = vsel %vm18922_vm15, 4294967295, %v28661_v58  ;;  %vm18927_vm3 = vcmp.eq.s32.totalorder %v3238_v17, %v16404_v7  ;;  %v28663_v29 = vmov 0 }
 0x3a7   : > { %28620 = vst [vmem:[#allocation69_spill] sm:$0xff] %v18798_v48  ;;  %v28651_v19 = vsel %vm18889_vm0, 4294967295, %v28650_v19  ;;  %v3241_v28 = vshra.s32 %v18798_v48, 3  ;;  %vm28658_vm0 = vmand %vm18750_vm9, %vm18755_vm12  ;;  %v28664_v29 = vsel %vm18927_vm3, 4294967295, %v28663_v29  ;;  %v3048_v53 = vand.u32 7, %v18860_v22 }
 0x3a8   : > { %vm18913_vm4 = vmpackc.low %vm28658_vm0, %vm28657_vm10  ;;  %vm28669_vm0 = vnez %v28646_v38  ;;  %v3242_v30 = vshra.s32 %v18860_v22, 3  ;;  %vm28681_vm1 = vnez %v28594_v51  ;;  %v28684_v22 = vmov 0 }
 0x3a9   : > { %v28660_v57 = vsel %vm18913_vm4, 4294967295, %v28659_v57  ;;  %vm28665_vm9 = vmand %vm28636_vm6, %vm18774_vm7  ;;  %vm18957_vm7 = vcmp.eq.s32.totalorder %v3239_v52, %v16404_v7  ;;  %13218 = vmatpush1.bf16.msk.msra.mxu0 %vm28681_vm1, %v28087_v23  ;;  %vm18994_vm4 = vcmp.eq.s32.totalorder %v3241_v28, %v16406_v55  ;;  %v19000_v51 = vadd.s32 440, %v15909_v35 }
 0x3aa   : > { %vm28666_vm12 = vmand %vm28644_vm13, %vm28643_vm8  ;;  %vm28675_vm8 = vnez %v28651_v19  ;;  %v28685_v22 = vsel %vm18994_vm4, 4294967295, %v28684_v22  ;;  %vm28687_vm1 = vnez %v28602_v36  ;;  %vm28688_vm13 = vnez %v28629_v3 }
 0x3ab   : > { %v2841_v2 = vpop.f32.mrb[22].mxu0  ;;  %vm18943_vm10 = vmpackc.low %vm28666_vm12, %vm28665_vm9  ;;  %vm18968_vm9 = vcmp.eq.s32.totalorder %v3046_v0, %v16401_v54  ;;  %vm18973_vm12 = vcmp.eq.s32.totalorder %v3240_v42, %v16406_v55  ;;  %28686 = vst [vmem:[#allocation73_spill] sm:$0xff] %v19000_v51  ;;  %13220 = vmatprep.subr.msk.bf16.mxu0 %vm28687_vm1, %v28087_v23  ;;  %vm28689_vm3 = vnez %v28631_v5  ;;  %v28692_v34 = vmov 0 }
 0x3ac   : > { %v2843_v49 = vpop.f32.mrb[23].mxu0  ;;  %v28668_v45 = vsel %vm18943_vm10, 4294967295, %v28667_v45  ;;  %vm28690_vm15 = vmand %vm28688_vm13, %vm28689_vm3  ;;  %vm19024_vm1 = vcmp.eq.s32.totalorder %v3046_v0, %v16392_v32  ;;  %v28694_v36 = vmov 0  ;;  %vm19029_vm3 = vcmp.eq.s32.totalorder %v3240_v42, %v16404_v7 }
 0x3ad   : > { %3852 = vmatprep.mubr.f32.mxu0 %v2843_v49  ;;  %v28652_v49 = vmov 0  ;;  %v28695_v36 = vsel %vm19024_vm1, 4294967295, %v28694_v36  ;;  %v28696_v3 = vmov 0  ;;  %v28709_v0 = vmov 0 }
 0x3ae   : > { %3853 = vmatmul.mubr.f32.gmra.mrb[30].mxu0 %v2841_v2  ;;  %v28653_v49 = vsel %vm18894_vm2, 4294967295, %v28652_v49  ;;  %v3047_v2 = vand.u32 7, %v18798_v48  ;;  %vm18952_vm2 = vcmp.eq.s32.totalorder %v3045_v16, %v16392_v32  ;;  %v18979_v16 = vadd.s32 432, %v15909_v35 }
 0x3af   : > { %vm28674_vm6 = vnez %v28653_v49  ;;  %v28682_v48 = vmov 0  ;;  %v28697_v3 = vsel %vm19029_vm3, 4294967295, %v28696_v3  ;;  %vm19080_vm13 = vcmp.eq.s32.totalorder %v3242_v30, %v16406_v55  ;;  %vm28724_vm1 = vmand %vm18952_vm2, %vm18957_vm7 }
 0x3b0   : > { %28680 = vst [vmem:[#allocation72_spill] sm:$0xff] %v18979_v16  ;;  %vm18989_vm10 = vcmp.eq.s32.totalorder %v3047_v2, %v16401_v54  ;;  %v3050_v49 = vand.u32 7, %v18979_v16  ;;  %v3051_v40 = vand.u32 7, %v19000_v51  ;;  %v28764_v1 = vmov 0 }
 0x3b1   : > { %v28683_v48 = vsel %vm18989_vm10, 4294967295, %v28682_v48  ;;  %vm28691_vm10 = vmand %vm18850_vm14, %vm18855_vm5  ;;  %v19285_v19 = vadd.s32 472, %v15909_v35 }
 0x3b2   : > { %vm19015_vm4 = vmpackc.low %vm28691_vm10, %vm28690_vm15 }
 0x3b3   : > { %v28693_v34 = vsel %vm19015_vm4, 4294967295, %v28692_v34  ;;  %vm28698_vm14 = vmand %vm28669_vm0, %vm18875_vm11  ;;  %vm19059_vm11 = vcmp.eq.s32.totalorder %v3241_v28, %v16404_v7  ;;  %vm19064_vm0 = vcmp.eq.s32.totalorder %v3048_v53, %v16401_v54  ;;  %v19087_v28 = vadd.s32 448, %v15909_v35  ;;  %28778 = vst [vmem:[#allocation77_spill] sm:$0xff] %v19285_v19 }
 0x3b4   : > { %vm28699_vm5 = vmand %vm28675_vm8, %vm28674_vm6  ;;  %vm19069_vm6 = vcmp.eq.s32.totalorder %v3049_v56, %v16401_v54  ;;  %vm28711_vm8 = vnez %v28685_v22  ;;  %v3249_v8 = vshra.s32 %v19285_v19, 3 }
 0x3b5   : > { %v18931_v4 = vpop.f32.mrb[16].mxu1  ;;  %vm19045_vm15 = vmpackc.low %vm28699_vm5, %vm28698_vm14  ;;  %v28710_v0 = vsel %vm19069_vm6, 4294967295, %v28709_v0  ;;  %vm28712_vm14 = vnez %v28683_v48  ;;  %28715 = vst [vmem:[#allocation74_spill] sm:$0xff] %v19087_v28  ;;  %vm28721_vm6 = vnez %v28662_v58  ;;  %vm28722_vm5 = vnez %v28664_v29 }
 0x3b6   : > { %v2914_v46 = vpop.f32.mrb[17].mxu1  ;;  %v28701_v62 = vsel %vm19045_vm15, 4294967295, %v28700_v62  ;;  %vm28702_vm10 = vmmov %vm18968_vm9  ;;  %vm19054_vm9 = vcmp.eq.s32.totalorder %v3047_v2, %v16392_v32  ;;  %v3244_v2 = vshra.s32 %v18979_v16, 3  ;;  %vm28716_vm15 = vnez %v28627_v31 }
 0x3b7   : > { %3923 = vmatprep.mubr.f32.mxu0 %v2914_v46  ;;  %v3243_v46 = vshra.s32 %v18863_v63, 3  ;;  %13222 = vmatpush1.bf16.msk.msra.mxu0 %vm28716_vm15, %v28087_v23  ;;  %v28717_v63 = vmov 0  ;;  %v3245_v16 = vshra.s32 %v19000_v51, 3  ;;  %vm28720_vm15 = vnez %v28635_v9  ;;  %vm28723_vm3 = vmand %vm28721_vm6, %vm28722_vm5 }
 0x3b8   : > { %13224 = vmatprep.subr.msk.bf16.mxu0 %vm28720_vm15, %v28087_v23  ;;  %v28725_v31 = vmov 0  ;;  %vm19128_vm15 = vcmp.eq.s32.totalorder %v3048_v53, %v16392_v32  ;;  %v28727_v9 = vmov 0  ;;  %vm19133_vm6 = vcmp.eq.s32.totalorder %v3242_v30, %v16404_v7  ;;  %vm28731_vm2 = vmand %vm28702_vm10, %vm18973_vm12 }
 0x3b9   : > { %vm19097_vm4 = vcmp.eq.s32.totalorder %v3243_v46, %v16406_v55  ;;  %v28728_v9 = vsel %vm19128_vm15, 4294967295, %v28727_v9  ;;  %v28729_v58 = vmov 0  ;;  %vm28732_vm7 = vmand %vm28712_vm14, %vm28711_vm8  ;;  %vm19163_vm12 = vcmp.eq.s32.totalorder %v3243_v46, %v16404_v7 }
 0x3ba   : > { %v28718_v63 = vsel %vm19097_vm4, 4294967295, %v28717_v63  ;;  %vm19119_vm4 = vmpackc.low %vm28724_vm1, %vm28723_vm3  ;;  %v28730_v58 = vsel %vm19133_vm6, 4294967295, %v28729_v58  ;;  %vm28741_vm8 = vnez %v28710_v0  ;;  %v28742_v53 = vmov 0 }
 0x3bb   : > { %v28726_v31 = vsel %vm19119_vm4, 4294967295, %v28725_v31  ;;  %vm19149_vm1 = vmpackc.low %vm28732_vm7, %vm28731_vm2  ;;  %vm28740_vm10 = vnez %v28718_v63  ;;  %vm19174_vm2 = vcmp.eq.s32.totalorder %v3050_v49, %v16401_v54  ;;  %vm19179_vm7 = vcmp.eq.s32.totalorder %v3244_v2, %v16406_v55 }
 0x3bc   : > { %v28734_v41 = vsel %vm19149_vm1, 4294967295, %v28733_v41  ;;  %vm28735_vm3 = vmmov %vm19064_vm0  ;;  %vm19158_vm0 = vcmp.eq.s32.totalorder %v3049_v56, %v16392_v32  ;;  %v28743_v53 = vsel %vm19174_vm2, 4294967295, %v28742_v53  ;;  %v28744_v56 = vmov 0 }
 0x3bd   : > { %v28745_v56 = vsel %vm19179_vm7, 4294967295, %v28744_v56  ;;  %v3052_v17 = vand.u32 7, %v19087_v28  ;;  %v3246_v52 = vshra.s32 %v19087_v28, 3  ;;  %vm28746_vm5 = vnez %v28660_v57 }
 0x3be   : > { %v19033_v5 = vpop.f32.mrb[18].mxu1  ;;  %13226 = vmatpush1.bf16.msk.msra.mxu0 %vm28746_vm5, %v28087_v23  ;;  %vm19193_vm1 = vcmp.eq.s32.totalorder %v3051_v40, %v16401_v54  ;;  %v28747_v30 = vmov 0  ;;  %vm19198_vm4 = vcmp.eq.s32.totalorder %v3245_v16, %v16406_v55  ;;  %v28749_v46 = vmov 0 }
 0x3bf   : > { %v19073_v42 = vpop.f32.mrb[19].mxu1  ;;  %v28748_v30 = vsel %vm19193_vm1, 4294967295, %v28747_v30  ;;  %v28750_v46 = vsel %vm19198_vm4, 4294967295, %v28749_v46  ;;  %v3053_v28 = vand.u32 7, %v19104_v25  ;;  %v3247_v57 = vshra.s32 %v19104_v25, 3  ;;  %vm28755_vm1 = vmand %vm19054_vm9, %vm19059_vm11 }
 0x3c0   : > { %vm28751_vm5 = vnez %v28668_v45  ;;  %vm28752_vm14 = vnez %v28695_v36  ;;  %vm28753_vm6 = vnez %v28697_v3  ;;  %v28756_v51 = vmov 0  ;;  %vm28762_vm9 = vmand %vm28735_vm3, %vm19080_vm13 }
 0x3c1   : > { %13228 = vmatprep.subr.msk.bf16.mxu0 %vm28751_vm5, %v28087_v23  ;;  %vm28754_vm15 = vmand %vm28752_vm14, %vm28753_vm6  ;;  %vm19226_vm5 = vcmp.eq.s32.totalorder %v3050_v49, %v16392_v32  ;;  %v28758_v45 = vmov 0  ;;  %vm19231_vm6 = vcmp.eq.s32.totalorder %v3244_v2, %v16404_v7  ;;  %v28760_v36 = vmov 0 }
 0x3c2   : > { %vm19217_vm2 = vmpackc.low %vm28755_vm1, %vm28754_vm15  ;;  %v28759_v45 = vsel %vm19226_vm5, 4294967295, %v28758_v45  ;;  %v28761_v36 = vsel %vm19231_vm6, 4294967295, %v28760_v36  ;;  %vm28766_vm1 = vnez %v28743_v53  ;;  %vm19256_vm4 = vcmp.eq.s32.totalorder %v3051_v40, %v16392_v32  ;;  %v14281_v40 = vld [vmem:[%s28436_s0 + $0x1c4] ss:$16 sps:$4 sm:$0xff]  }
 0x3c3   : > { %v28757_v51 = vsel %vm19217_vm2, 4294967295, %v28756_v51  ;;  %vm28763_vm11 = vmand %vm28741_vm8, %vm28740_vm10  ;;  %vm19261_vm13 = vcmp.eq.s32.totalorder %v3245_v16, %v16404_v7  ;;  %v19266_v63 = vadd.s32 464, %v15909_v35  ;;  %vm28779_vm14 = vnez %v28693_v34  ;;  %v14240_v34 = vld [vmem:[%s28436_s0 + $0xe8] ss:$16 sps:$4 sm:$0xff]   ;;  %5254 = vmatprep.subr.bf16.mxu1 %v14281_v40 }
 0x3c4   : > { %vm19247_vm15 = vmpackc.low %vm28763_vm11, %vm28762_vm9  ;;  %vm19275_vm9 = vcmp.eq.s32.totalorder %v3052_v17, %v16401_v54  ;;  %vm19280_vm11 = vcmp.eq.s32.totalorder %v3246_v52, %v16406_v55  ;;  %13230 = vmatpush1.bf16.msk.msra.mxu0 %vm28779_vm14, %v28087_v23  ;;  %vm19300_vm2 = vcmp.eq.s32.totalorder %v3247_v57, %v16406_v55  ;;  %vm28784_vm3 = vnez %v28701_v62 }
 0x3c5   : > { %v28765_v1 = vsel %vm19247_vm15, 4294967295, %v28764_v1  ;;  %28771 = vst [vmem:[#allocation76_spill] sm:$0xff] %v19266_v63  ;;  %vm19295_vm15 = vcmp.eq.s32.totalorder %v3053_v28, %v16401_v54  ;;  %13232 = vmatprep.subr.msk.bf16.mxu0 %vm28784_vm3, %v28087_v23  ;;  %vm28785_vm14 = vnez %v28728_v9  ;;  %vm28786_vm10 = vnez %v28730_v58  ;;  %vm28788_vm8 = vmand %vm19158_vm0, %vm19163_vm12  ;;  %5255 = vmatpush1.bf16.msra.mxu1 %v14279_v10  ;;  %v9491_v10 = vld [vmem:[%s28872_s7 + $0x28] sm:$0xff] }
 0x3c6   : > { %v19137_v29 = vpop.f32.mrb[20].mxu1  ;;  %vm28787_vm7 = vmand %vm28785_vm14, %vm28786_vm10  ;;  %v3054_v62 = vand.u32 7, %v19266_v63  ;;  %v3248_v9 = vshra.s32 %v19266_v63, 3  ;;  %v3055_v58 = vand.u32 7, %v19285_v19  ;;  %vm28792_vm12 = vnez %v28745_v56  ;;  %v14258_v56 = vld [vmem:[%s28436_s0 + $0x148] ss:$16 sps:$4 sm:$0xff]  }
 0x3c7   : > { %v19167_v22 = vpop.f32.mrb[21].mxu1  ;;  %vm19317_vm6 = vmpackc.low %vm28788_vm8, %vm28787_vm7  ;;  %vm28795_vm10 = vnez %v28750_v46  ;;  %v28807_v53 = vmov 0  ;;  %v19409_v46 = vadd.s32 488, %v15909_v35  ;;  %v19462_v2 = vadd.s32 496, %v15909_v35 }
 0x3c8   : > { %vm3496_vm5 = vmand %vm19256_vm4, %vm19261_vm13  ;;  %vm28791_vm4 = vnez %v28726_v31  ;;  %vm28794_vm13 = vnez %v28748_v30  ;;  %v28852_v30 = vmov 0  ;;  %v14260_v31 = vld [vmem:[%s28436_s0 + $0x14c] ss:$16 sps:$4 sm:$0xff]  }
 0x3c9   : > { %vm3499_vm3 = vmand %vm19275_vm9, %vm19280_vm11  ;;  %13234 = vmatpush1.bf16.msk.msra.mxu0 %vm28791_vm4, %v28087_v23  ;;  %vm28804_vm4 = vnez %v28759_v45  ;;  %28820 = vst [vmem:[#allocation79_spill] sm:$0xff] %v19409_v46  ;;  %vm19416_vm11 = vcmp.eq.s32.totalorder %v3055_v58, %v16401_v54  ;;  %vm19438_vm9 = vcmp.eq.s32.totalorder %v3055_v58, %v16392_v32  ;;  %v3058_v48 = vand.u32 7, %v19462_v2  ;;  %v14248_v58 = vld [vmem:[%s28436_s0 + $0x10c] ss:$16 sps:$4 sm:$0xff]  }
 0x3ca   : > { %vm3501_vm0 = vmand %vm19295_vm15, %vm19300_vm2  ;;  %vm19355_vm2 = vcmp.eq.s32.totalorder %v3052_v17, %v16392_v32  ;;  %vm19360_vm15 = vcmp.eq.s32.totalorder %v3246_v52, %v16404_v7  ;;  %v28814_v52 = vmov 0  ;;  %28835 = vst [vmem:[#allocation80_spill] sm:$0xff] %v19462_v2  ;;  %v3252_v38 = vshra.s32 %v19462_v2, 3  ;;  %v14266_v17 = vld [vmem:[%s28436_s0 + $0x16c] ss:$16 sps:$4 sm:$0xff]  }
 0x3cb   : > { %vm28793_vm7 = vmand %vm28766_vm1, %vm28792_vm12  ;;  %vm28803_vm1 = vnez %v28734_v41  ;;  %vm28805_vm12 = vnez %v28761_v36  ;;  %v19387_v41 = vadd.s32 480, %v15909_v35  ;;  %v14278_v45 = vld [vmem:[%s28436_s0 + $0x1ac] ss:$16 sps:$4 sm:$0xff]   ;;  %v14276_v36 = vld [vmem:[%s28436_s0 + $0x1a8] ss:$16 sps:$4 sm:$0xff]  }
 0x3cc   : > { %vm28796_vm8 = vmand %vm28794_vm13, %vm28795_vm10  ;;  %13236 = vmatprep.subr.msk.bf16.mxu0 %vm28803_vm1, %v28087_v23  ;;  %vm19377_vm10 = vcmp.eq.s32.totalorder %v3053_v28, %v16392_v32  ;;  %vm19399_vm1 = vcmp.eq.s32.totalorder %v3054_v62, %v16401_v54 }
 0x3cd   : > { %vm19350_vm14 = vmpackc.low %vm28796_vm8, %vm28793_vm7  ;;  %vm19382_vm8 = vcmp.eq.s32.totalorder %v3247_v57, %v16404_v7  ;;  %28813 = vst [vmem:[#allocation78_spill] sm:$0xff] %v19387_v41  ;;  %v3056_v16 = vand.u32 7, %v19387_v41  ;;  %v3250_v49 = vshra.s32 %v19387_v41, 3 }
 0x3ce   : > { %vm28806_vm7 = vmand %vm28804_vm4, %vm28805_vm12  ;;  %vm19404_vm4 = vcmp.eq.s32.totalorder %v3248_v9, %v16406_v55 }
 0x3cf   : > { %v19235_v3 = vpop.f32.mrb[22].mxu1  ;;  %vm19372_vm13 = vmpackc.low %vm3496_vm5, %vm28806_vm7  ;;  %vm19433_vm7 = vcmp.eq.s32.totalorder %v3054_v62, %v16392_v32  ;;  %v3251_v62 = vshra.s32 %v19409_v46, 3 }
 0x3d0   : > { %v19268_v0 = vpop.f32.mrb[23].mxu1  ;;  %v28808_v53 = vsel %vm19372_vm13, 4294967295, %v28807_v53  ;;  %vm19394_vm5 = vmpackc.low %vm3501_vm0, %vm3499_vm3  ;;  %vm19421_vm3 = vcmp.eq.s32.totalorder %v3249_v8, %v16406_v55  ;;  %vm28825_vm0 = vnez %v28757_v51  ;;  %vm19455_vm13 = vcmp.eq.s32.totalorder %v3249_v8, %v16404_v7  ;;  %v14246_v8 = vld [vmem:[%s28436_s0 + $0x108] ss:$16 sps:$4 sm:$0xff]   ;;  %v14284_v51 = vld [vmem:[%s28436_s0 + $0x1cc] ss:$16 sps:$4 sm:$0xff]  }
 0x3d1   : > { %v28815_v52 = vsel %vm19394_vm5, 4294967295, %v28814_v52  ;;  %13238 = vmatpush1.bf16.msk.msra.mxu0 %vm28825_vm0, %v28087_v23  ;;  %vm19443_vm5 = vcmp.eq.s32.totalorder %v3248_v9, %v16404_v7  ;;  %vm28832_vm0 = vnez %v28765_v1  ;;  %v3057_v1 = vand.u32 7, %v19409_v46 }
 0x3d2   : > { %13240 = vmatprep.subr.msk.bf16.mxu0 %vm28832_vm0, %v28087_v23  ;;  %vm3505_vm0 = vmand %vm19416_vm11, %vm19421_vm3  ;;  %v19471_v9 = vadd.s32 504, %v15909_v35 }
 0x3d3   : > { %vm3502_vm12 = vmand %vm19433_vm7, %vm19443_vm5  ;;  %vm28858_vm7 = vnez %v28808_v53  ;;  %v14282_v53 = vld [vmem:[%s28436_s0 + $0x1c8] ss:$16 sps:$4 sm:$0xff]  }
 0x3d4   : > { %28836 = vst [vmem:[#allocation81_spill] sm:$0xff] %v19471_v9  ;;  %vm3504_vm11 = vmand %vm19438_vm9, %vm19455_vm13  ;;  %vm19502_vm13 = vcmp.eq.s32.totalorder %v3056_v16, %v16401_v54  ;;  %v3059_v57 = vand.u32 7, %v19471_v9  ;;  %v3253_v28 = vshra.s32 %v19471_v9, 3 }
 0x3d5   : > { %13242 = vmatpush1.bf16.msk.msra.mxu0 %vm19317_vm6, %v28087_v23  ;;  %vm28837_vm3 = vmand %vm19355_vm2, %vm19360_vm15 }
 0x3d6   : > { %13244 = vmatprep.subr.msk.bf16.mxu0 %vm19350_vm14, %v28087_v23  ;;  %vm28838_vm5 = vmand %vm19377_vm10, %vm19382_vm8  ;;  %vm19507_vm14 = vcmp.eq.s32.totalorder %v3250_v49, %v16406_v55  ;;  %vm19523_vm10 = vcmp.eq.s32.totalorder %v3057_v1, %v16401_v54  ;;  %vm19528_vm8 = vcmp.eq.s32.totalorder %v3251_v62, %v16406_v55 }
 0x3d7   : > { %vm19497_vm6 = vmpackc.low %vm28838_vm5, %vm28837_vm3  ;;  %vm28863_vm3 = vnez %v28815_v52  ;;  %v14285_v52 = vld [vmem:[%s28436_s0 + $0x1e0] ss:$16 sps:$4 sm:$0xff]  }
 0x3d8   : > { %vm28845_vm2 = vmand %vm19399_vm1, %vm19404_vm4  ;;  %vm19539_vm1 = vcmp.eq.s32.totalorder %v3056_v16, %v16392_v32  ;;  %vm19544_vm4 = vcmp.eq.s32.totalorder %v3250_v49, %v16404_v7  ;;  %v14212_v16 = vld [vmem:[%s28436_s0 + $0x4c] ss:$16 sps:$4 sm:$0xff]   ;;  %v14222_v49 = vld [vmem:[%s28436_s0 + $0x88] ss:$16 sps:$4 sm:$0xff]  }
 0x3d9   : > { %vm19518_vm15 = vmpackc.low %vm3505_vm0, %vm28845_vm2  ;;  %13246 = vmatpush1.bf16.msk.msra.mxu0 %vm28858_vm7, %v28087_v23  ;;  %vm19556_vm0 = vcmp.eq.s32.totalorder %v3057_v1, %v16392_v32  ;;  %vm19573_vm2 = vcmp.eq.s32.totalorder %v3058_v48, %v16401_v54  ;;  %vm19578_vm7 = vcmp.eq.s32.totalorder %v3252_v38, %v16406_v55  ;;  %v14234_v1 = vld [vmem:[%s28436_s0 + $0xc8] ss:$16 sps:$4 sm:$0xff]  }
 0x3da   : > { %vm19534_vm9 = vmpackc.low %vm3504_vm11, %vm3502_vm12  ;;  %vm19561_vm11 = vcmp.eq.s32.totalorder %v3251_v62, %v16404_v7  ;;  %13248 = vmatprep.subr.msk.bf16.mxu0 %vm28863_vm3, %v28087_v23  ;;  %vm19587_vm12 = vcmp.eq.s32.totalorder %v3059_v57, %v16401_v54  ;;  %v14198_v54 = vld [vmem:[%s28436_s0 + $0x8] ss:$16 sps:$4 sm:$0xff]   ;;  %v14242_v62 = vld [vmem:[%s28436_s0 + $0xec] ss:$16 sps:$4 sm:$0xff]  }
 0x3db   : > { %v28853_v30 = vsel %vm19534_vm9, 4294967295, %v28852_v30  ;;  %vm3509_vm5 = vmand %vm19523_vm10, %vm19528_vm8  ;;  %vm3385_vm10 = vcmp.eq.s32.totalorder %v3253_v28, %v16406_v55  ;;  %vm3382_vm9 = vcmp.eq.s32.totalorder %v3252_v38, %v16404_v7  ;;  %v14204_v55 = vld [vmem:[%s28436_s0 + $0x28] ss:$16 sps:$4 sm:$0xff]  }
 0x3dc   : > { %vm3506_vm3 = vmand %vm19539_vm1, %vm19544_vm4  ;;  %v14252_v38 = vld [vmem:[%s28436_s0 + $0x128] ss:$16 sps:$4 sm:$0xff]  }
 0x3dd   : > { %vm3508_vm8 = vmand %vm19556_vm0, %vm19561_vm11  ;;  %13250 = vmatpush1.bf16.msk.msra.mxu0 %vm19497_vm6, %v28087_v23  ;;  %vm3186_vm6 = vcmp.eq.s32.totalorder %v3058_v48, %v16392_v32  ;;  %v14254_v48 = vld [vmem:[%s28436_s0 + $0x12c] ss:$16 sps:$4 sm:$0xff]  }
 0x3de   : > { %vm3511_vm1 = vmand %vm19573_vm2, %vm19578_vm7  ;;  %13252 = vmatprep.subr.msk.bf16.mxu0 %vm19518_vm15, %v28087_v23  ;;  %vm3188_vm7 = vcmp.eq.s32.totalorder %v3059_v57, %v16392_v32  ;;  %vm3384_vm15 = vcmp.eq.s32.totalorder %v3253_v28, %v16404_v7  ;;  %v14200_v32 = vld [vmem:[%s28436_s0 + $0xc] ss:$16 sps:$4 sm:$0xff]   ;;  %v14264_v57 = vld [vmem:[%s28436_s0 + $0x168] ss:$16 sps:$4 sm:$0xff]  }
 0x3df   : > { %vm3513_vm4 = vmand %vm19587_vm12, %vm3385_vm10  ;;  %vm28871_vm10 = vnez %v28853_v30  ;;  %v14206_v7 = vld [vmem:[%s28436_s0 + $0x2c] ss:$16 sps:$4 sm:$0xff]   ;;  %v14270_v30 = vld [vmem:[%s28436_s0 + $0x188] ss:$16 sps:$4 sm:$0xff]  }
 0x3e0   : > { %vm28870_vm0 = vmand %vm19502_vm13, %vm19507_vm14  ;;  %v14272_v28 = vld [vmem:[%s28436_s0 + $0x18c] ss:$16 sps:$4 sm:$0xff]  }
 0x3e1   : > { %vm13255_vm11 = vmpackc.low %vm3509_vm5, %vm28870_vm0  ;;  %13254 = vmatpush1.bf16.msk.msra.mxu0 %vm28871_vm10, %v28087_v23 }
 0x3e2   : > { %vm13257_vm2 = vmpackc.low %vm3508_vm8, %vm3506_vm3  ;;  %13256 = vmatprep.subr.msk.bf16.mxu0 %vm13255_vm11, %v28087_v23 }
 0x3e3   : > { %vm13259_vm12 = vmpackc.low %vm3513_vm4, %vm3511_vm1  ;;  %vm28878_vm4 = vcmask 1046528  }
 0x3e4   : > { %vm3510_vm13 = vmand %vm3186_vm6, %vm3382_vm9  ;;  %vm28873_vm9 = vcmask 1040384   ;;  %vm28881_vm6 = vcmask 1045504  }
 0x3e5   : > { %vm3512_vm14 = vmand %vm3188_vm7, %vm3384_vm15  ;;  %13258 = vmatpush1.bf16.msk.msra.mxu0 %vm13257_vm2, %v28087_v23 }
 0x3e6   : > { %13260 = vmatprep.subr.msk.bf16.mxu0 %vm13259_vm12, %v28087_v23  ;;  %vm13261_vm5 = vmpackc.low %vm3512_vm14, %vm3510_vm13 }
 0x3e7   : > { %vm28874_vm3 = vmmov %vm28873_vm9 }
 0x3e8   : > { %vm28876_vm8 = vmmov %vm28874_vm3 }
 0x3e9   : > { %13262 = vmatpush1.bf16.msk.msra.mxu0 %vm13261_vm5, %v28087_v23  ;;  %vm28877_vm1 = vmmov %vm28874_vm3 }
 0x3ea   : > { %5385 = vmatprep.subr.bf16.mxu0 %v14200_v32  ;;  %v14287_v32 = vld [vmem:[%s28436_s0 + $0x1e4] ss:$16 sps:$4 sm:$0xff]   ;;  %vm28879_vm0 = vmmov %vm28877_vm1 }
 0x3eb   : > { %5256 = vmatprep.subr.bf16.mxu1 %v14287_v32  ;;  %vm28880_vm11 = vmmov %vm28878_vm4 }
 0x3ec   : > { %3924 = vmatmul.mubr.f32.vlgmr.msra.gmra.mrb[24].mxu0 %v18931_v4  ;;  %v14210_v4 = vld [vmem:[%s28436_s0 + $0x48] ss:$16 sps:$4 sm:$0xff]   ;;  %5257 = vmatpush1.bf16.msra.mxu1 %v14285_v52  ;;  %vm28882_vm2 = vmmov %vm28881_vm6 }
 0x3ed   : > { %3929 = vmatprep.mubr.f32.mxu0 %v19073_v42  ;;  %5386 = vmatpush1.bf16.msra.mxu0 %v14198_v54  ;;  %v14218_v42 = vld [vmem:[%s28436_s0 + $0x6c] ss:$16 sps:$4 sm:$0xff]   ;;  %v14288_v54 = vld [vmem:[%s28436_s0 + $0x1e8] ss:$16 sps:$4 sm:$0xff]   ;;  %vm28885_vm15 = vmmov %vm28879_vm0 }
 0x3ee   : > { %5387 = vmatprep.subr.bf16.mxu0 %v14206_v7  ;;  %v14290_v7 = vld [vmem:[%s28436_s0 + $0x1ec] ss:$16 sps:$4 sm:$0xff]   ;;  %vm28887_vm10 = vmmov %vm28878_vm4 }
 0x3ef   : > { %vm28889_vm12 = vmmov %vm28882_vm2 }
 0x3f0   : > { %3930 = vmatmul.mubr.f32.gmra.mrb[26].mxu0 %v19033_v5  ;;  %v14216_v5 = vld [vmem:[%s28436_s0 + $0x68] ss:$16 sps:$4 sm:$0xff]   ;;  %vm28890_vm13 = vmmov %vm28879_vm0 }
 0x3f1   : > { %3935 = vmatprep.mubr.f32.mxu0 %v19167_v22  ;;  %5388 = vmatpush1.bf16.msra.mxu0 %v14204_v55  ;;  %v14224_v22 = vld [vmem:[%s28436_s0 + $0x8c] ss:$16 sps:$4 sm:$0xff]   ;;  %v14293_v55 = vld [vmem:[%s28436_s0 + $0x204] ss:$16 sps:$4 sm:$0xff]   ;;  %vm28891_vm14 = vmmov %vm28879_vm0 }
 0x3f2   : > { %5389 = vmatprep.subr.bf16.mxu0 %v14212_v16  ;;  %v14296_v16 = vld [vmem:[%s28436_s0 + $0x20c] ss:$16 sps:$4 sm:$0xff]   ;;  %5279 = vmatprep.subr.bf16.mxu1 %v14293_v55  ;;  %vm28892_vm5 = vmmov %vm28878_vm4 }
 0x3f3   : > { %v9489_v55 = vld [vmem:[%s28872_s7 + $0x18] sm:$0xff] }
 0x3f4   : > { %3936 = vmatmul.mubr.f32.gmra.mrb[28].mxu0 %v19137_v29  ;;  %v14230_v29 = vld [vmem:[%s28436_s0 + $0xac] ss:$16 sps:$4 sm:$0xff]  }
 0x3f5   : > { %3941 = vmatprep.mubr.f32.mxu0 %v19268_v0  ;;  %5390 = vmatpush1.bf16.msra.mxu0 %v14210_v4  ;;  %v14228_v0 = vld [vmem:[%s28436_s0 + $0xa8] ss:$16 sps:$4 sm:$0xff]   ;;  %v9486_v4 = vld [vmem:[%s28872_s7] sm:$0xff] }
 0x3f6   : > { %5391 = vmatprep.subr.bf16.mxu0 %v14218_v42  ;;  %v9487_v42 = vld [vmem:[%s28872_s7 + $0x8] sm:$0xff] }
 0x3f8   : > { %3942 = vmatmul.mubr.f32.gmra.mrb[30].mxu0 %v19235_v3  ;;  %v14236_v3 = vld [vmem:[%s28436_s0 + $0xcc] ss:$16 sps:$4 sm:$0xff]  }
 0x3f9   : > { %5392 = vmatpush1.bf16.msra.mxu0 %v14216_v5 }
 0x3fa   : > { %5393 = vmatprep.subr.bf16.mxu0 %v14224_v22 }
 0x3fd   : > { %5394 = vmatpush1.bf16.msra.mxu0 %v14222_v49 }
 0x3fe   : > { %5395 = vmatprep.subr.bf16.mxu0 %v14230_v29 }
 0x401   : > { %5396 = vmatpush1.bf16.msra.mxu0 %v14228_v0 }
 0x402   : > { %5397 = vmatprep.subr.bf16.mxu0 %v14236_v3 }
 0x405   : > { %5398 = vmatpush1.bf16.msra.mxu0 %v14234_v1 }
 0x406   : > { %5399 = vmatprep.subr.bf16.mxu0 %v14242_v62 }
 0x409   : > { %5400 = vmatpush1.bf16.msra.mxu0 %v14240_v34 }
 0x40a   : > { %5401 = vmatprep.subr.bf16.mxu0 %v14248_v58  ;;  %v9488_v58 = vld [vmem:[%s28872_s7 + $0x10] sm:$0xff] }
 0x40d   : > { %5402 = vmatpush1.bf16.msra.mxu0 %v14246_v8 }
 0x40e   : > { %5403 = vmatprep.subr.bf16.mxu0 %v14254_v48 }
 0x411   : > { %5404 = vmatpush1.bf16.msra.mxu0 %v14252_v38 }
 0x412   : > { %5405 = vmatprep.subr.bf16.mxu0 %v14260_v31 }
 0x415   : > { %5406 = vmatpush1.bf16.msra.mxu0 %v14258_v56 }
 0x416   : > { %5407 = vmatprep.subr.bf16.mxu0 %v14266_v17 }
 0x419   : > { %5408 = vmatpush1.bf16.msra.mxu0 %v14264_v57  ;;  %v9490_v57 = vld [vmem:[%s28872_s7 + $0x20] sm:$0xff] }
 0x41a   : > { %5409 = vmatprep.subr.bf16.mxu0 %v14272_v28 }
 0x41d   : > { %5410 = vmatpush1.bf16.msra.mxu0 %v14270_v30 }
 0x41e   : > { %5411 = vmatprep.subr.bf16.mxu0 %v14278_v45 }
 0x421   : > { %5412 = vmatpush1.bf16.msra.mxu0 %v14276_v36 }
 0x422   : > { %5413 = vmatprep.subr.bf16.mxu0 %v14284_v51 }
 0x425   : > { %5414 = vmatpush1.bf16.msra.mxu0 %v14282_v53 }
 0x426   : > { %5415 = vmatprep.subr.bf16.mxu0 %v14290_v7 }
 0x429   : > { %5416 = vmatpush1.bf16.msra.mxu0 %v14288_v54 }
 0x42a   : > { %5438 = vmatprep.subr.bf16.mxu0 %v14296_v16 }
 0x4bf   : > { %v3925_v5 = vpop.f32.mrb[24].mxu0 }
 0x4c0   : > { %v3956_v22 = vrot.slane %v3925_v5, 7  ;;  %v9494_v49 = vmul.f32 %v9486_v4, %v3925_v5  ;;  %v3927_v29 = vpop.f32.mrb[25].mxu0 }
 0x4c1   : > { %v3957_v0 = vrot.slane %v3927_v29, 7  ;;  %v9495_v3 = vmul.f32 %v9487_v42, %v3927_v29 }
 0x4c2   : > { %v3980_v1 = vsel %vm28873_vm9, 0.0, %v3956_v22  ;;  %vm28893_vm9 = vmmov %vm28879_vm0 }
 0x4c3   : > { %v3981_v62 = vsel %vm28874_vm3, 0.0, %v3957_v0  ;;  %v3931_v34 = vpop.f32.mrb[26].mxu0  ;;  %v19756_v8 = vadd.f32 %v9495_v3, %v9494_v49  ;;  %v3988_v31 = vrot.slane %v3980_v1, 1  ;;  %v4014_v56 = vrot.slane %v3980_v1, 2  ;;  %v14294_v3 = vld [vmem:[%s28436_s0 + $0x208] ss:$16 sps:$4 sm:$0xff]   ;;  %vm28894_vm3 = vmmov %vm28879_vm0 }
 0x4c4   : > { %v3958_v48 = vrot.slane %v3931_v34, 7  ;;  %v3933_v38 = vpop.f32.mrb[27].mxu0  ;;  %v3991_v28 = vrot.slane %v3981_v62, 1  ;;  %v4017_v30 = vrot.slane %v3981_v62, 2  ;;  %v19762_v36 = vmul.f32 %v9488_v58, %v3931_v34  ;;  %v9492_v1 = vld [vmem:[%s28872_s7 + $0x30] sm:$0xff] }
 0x4c5   : > { %28875 = vst [vmem:[#allocation82_spill] sm:$0xff] %v19756_v8  ;;  %v3960_v17 = vrot.slane %v3933_v38, 7  ;;  %v14299_v34 = vld [vmem:[%s28436_s0 + $0x224] ss:$16 sps:$4 sm:$0xff]  }
 0x4c6   : > { %v3959_v45 = vsel %vm28876_vm8, %v3956_v22, %v3958_v48  ;;  %vm28895_vm8 = vmmov %vm28878_vm4 }
 0x4c7   : > { %v3989_v40 = vrot.slane %v3959_v45, 1  ;;  %v4015_v53 = vrot.slane %v3959_v45, 2  ;;  %v12007_v51 = vpack.c.bf16 %v3959_v45, %v3956_v22  ;;  %v19768_v52 = vsel %vm28877_vm1, %v3957_v0, %v3960_v17  ;;  %v3937_v32 = vpop.f32.mrb[28].mxu0  ;;  %v14291_v22 = vld [vmem:[%s28436_s0 + $0x200] ss:$16 sps:$4 sm:$0xff]   ;;  %vm28896_vm1 = vmmov %vm28878_vm4 }
 0x4c8   : > { %v3992_v54 = vrot.slane %v19768_v52, 1  ;;  %v27429_v7 = vrot.slane %v19768_v52, 2  ;;  %v3962_v16 = vrot.slane %v3937_v32, 7  ;;  %v9498_v4 = vmul.f32 %v9490_v57, %v3937_v32  ;;  %v3939_v42 = vpop.f32.mrb[29].mxu0 }
 0x4c9   : > { %v3964_v5 = vrot.slane %v3939_v42, 7  ;;  %v9499_v49 = vmul.f32 %v9491_v10, %v3939_v42  ;;  %v12003_v29 = vpack.c.bf16 %v19768_v52, %v3957_v0  ;;  %v3990_v62 = vsel %vm28878_vm4, %v3988_v31, %v3989_v40  ;;  %v14302_v0 = vld [vmem:[%s28436_s0 + $0x22c] ss:$16 sps:$4 sm:$0xff]   ;;  %vm28897_vm4 = vmmov %vm28896_vm1 }
 0x4ca   : > { %v19793_v58 = vsel %vm28879_vm0, %v3958_v48, %v3962_v16  ;;  %v3993_v57 = vsel %vm28880_vm11, %v3991_v28, %v3992_v54  ;;  %v19799_v45 = vsel %vm28881_vm6, %v4017_v30, %v27429_v7  ;;  %v19802_v31 = vsel %vm28882_vm2, %v4014_v56, %v4015_v53  ;;  %v28883_v10 = vld [vmem:[#allocation15_spill] sm:$0xff]  ;;  %vm28898_vm0 = vmmov %vm28896_vm1 }
 0x4cb   : > { %vm28884_vm7 = vnez %v28883_v10  ;;  %v3943_v32 = vpop.f32.mrb[30].mxu0  ;;  %v19809_v48 = vsel %vm28885_vm15, %v3960_v17, %v3964_v5  ;;  %v3994_v28 = vrot.slane %v19793_v58, 1  ;;  %v19813_v8 = vadd.f32 %v9499_v49, %v9498_v4  ;;  %v9493_v17 = vld [vmem:[%s28872_s7 + $0x38] sm:$0xff]  ;;  %vm28900_vm11 = vmmov %vm28882_vm2 }
 0x4cc   : > { %12004 = vmatprep.mubr.msk.bf16.mxu1 %vm28884_vm7, %v12003_v29  ;;  %12012 = vmatprep.mubr.msk.bf16.mxu0 %vm28884_vm7, %v12003_v29  ;;  %v19815_v30 = vmul.f32 %v9489_v55, %v3933_v38  ;;  %v3966_v56 = vrot.slane %v3943_v32, 7  ;;  %v19817_v7 = vmul.f32 %v9492_v1, %v3943_v32  ;;  %v3945_v29 = vpop.f32.mrb[31].mxu0  ;;  %v3996_v42 = vrot.slane %v19809_v48, 1  ;;  %v14297_v55 = vld [vmem:[%s28436_s0 + $0x220] ss:$16 sps:$4 sm:$0xff]   ;;  %vm28901_vm6 = vmmov %vm28882_vm2 }
 0x4cd   : > { %28886 = vst [vmem:[#allocation83_spill] sm:$0xff] %v19813_v8  ;;  %12008 = vmatmul.mubr.msk.bf16.vlgmr.msra.gmra.mrb[24].mxu1 %vm28884_vm7, %v12007_v51  ;;  %12016 = vmatmul.mubr.msk.bf16.vlgmr.msra.gmra.mrb[32].mxu0 %vm28884_vm7, %v12007_v51  ;;  %v3968_v38 = vrot.slane %v3945_v29, 7  ;;  %v14300_v4 = vld [vmem:[%s28436_s0 + $0x228] ss:$16 sps:$4 sm:$0xff]   ;;  %v4022_v51 = vrot.slane %v19809_v48, 2  ;;  %v3995_v49 = vsel %vm28887_vm10, %v3989_v40, %v3994_v28  ;;  %v28888_v1 = vrot.slane %v19793_v58, 2  ;;  %vm28903_vm15 = vmmov %vm28882_vm2 }
 0x4ce   : > { %5280 = vmatpush1.bf16.msra.mxu1 %v14291_v22  ;;  %5439 = vmatpush1.bf16.msra.mxu0 %v14294_v3  ;;  %v3982_v22 = vsel %vm28890_vm13, %v3966_v56, 0.0  ;;  %v14305_v3 = vld [vmem:[%s28436_s0 + $0x244] ss:$16 sps:$4 sm:$0xff]   ;;  %v14308_v8 = vld [vmem:[%s28436_s0 + $0x24c] ss:$16 sps:$4 sm:$0xff]   ;;  %v3967_v10 = vsel %vm28891_vm14, %v3962_v16, %v3966_v56  ;;  %v3997_v40 = vsel %vm28892_vm5, %v3992_v54, %v3996_v42  ;;  %v19847_v9 = vpack.c.bf16 %v3995_v49, %v3990_v62  ;;  %vm28904_vm10 = vmmov %vm28882_vm2 }
 0x4cf   : > { %v4021_v32 = vsel %vm28889_vm12, %v4015_v53, %v28888_v1  ;;  %5281 = vmatprep.subr.bf16.mxu1 %v14299_v34  ;;  %5440 = vmatprep.subr.bf16.mxu0 %v14302_v0  ;;  %v4002_v2 = vrot.slane %v3982_v22, 1  ;;  %v3983_v53 = vsel %vm28893_vm9, %v3968_v38, 0.0  ;;  %v9501_v1 = vmul.f32 %v9493_v17, %v3945_v29  ;;  %v14303_v54 = vld [vmem:[%s28436_s0 + $0x240] ss:$16 sps:$4 sm:$0xff]   ;;  %v14306_v16 = vld [vmem:[%s28436_s0 + $0x248] ss:$16 sps:$4 sm:$0xff]   ;;  %vm28912_vm12 = vmmov %vm28898_vm0 }
 0x4d0   : > { %v3969_v34 = vsel %vm28894_vm3, %v3964_v5, %v3968_v38  ;;  %v4028_v0 = vrot.slane %v3982_v22, 2  ;;  %v4004_v46 = vrot.slane %v3983_v53, 1  ;;  %v4030_v41 = vrot.slane %v3983_v53, 2  ;;  %v14318_v53 = vld [vmem:[%s28436_s0 + $0x288] ss:$16 sps:$4 sm:$0xff]   ;;  %vm28913_vm13 = vmmov %vm28898_vm0 }
 0x4d1   : > { %v4000_v19 = vrot.slane %v3969_v34, 1  ;;  %v4026_v63 = vrot.slane %v3969_v34, 2  ;;  %v4047_v25 = vpack.c.bf16 %v3969_v34, %v19809_v48  ;;  %v3998_v62 = vrot.slane %v3967_v10, 1  ;;  %v14311_v48 = vld [vmem:[%s28436_s0 + $0x264] ss:$16 sps:$4 sm:$0xff]   ;;  %vm28914_vm14 = vmmov %vm28898_vm0 }
 0x4d2   : > { %5282 = vmatpush1.bf16.msra.mxu1 %v14297_v55  ;;  %5441 = vmatpush1.bf16.msra.mxu0 %v14300_v4  ;;  %v4046_v5 = vpack.c.bf16 %v3967_v10, %v19793_v58  ;;  %v4024_v56 = vrot.slane %v3967_v10, 2  ;;  %v4043_v29 = vpack.c.bf16 %v3997_v40, %v3993_v57  ;;  %v14314_v55 = vld [vmem:[%s28436_s0 + $0x26c] ss:$16 sps:$4 sm:$0xff]   ;;  %v19909_v40 = vadd.f32 %v9501_v1, %v19817_v7  ;;  %v14324_v1 = vld [vmem:[%s28436_s0 + $0x2a8] ss:$16 sps:$4 sm:$0xff]   ;;  %vm28915_vm5 = vmmov %vm28898_vm0 }
 0x4d3   : > { %5283 = vmatprep.subr.bf16.mxu1 %v14305_v3  ;;  %5442 = vmatprep.subr.bf16.mxu0 %v14308_v8  ;;  %v4001_v17 = vsel %vm28895_vm8, %v3996_v42, %v4000_v19  ;;  %v4005_v38 = vsel %vm28896_vm1, %v4000_v19, %v4004_v46  ;;  %v3999_v8 = vsel %vm28897_vm4, %v3994_v28, %v3998_v62  ;;  %v14309_v42 = vld [vmem:[%s28436_s0 + $0x260] ss:$16 sps:$4 sm:$0xff]   ;;  %v28902_v3 = vrot.slane %v19793_v58, 2  ;;  %v14326_v7 = vld [vmem:[%s28436_s0 + $0x2ac] ss:$16 sps:$4 sm:$0xff]   ;;  %vm28916_vm9 = vmmov %vm28898_vm0 }
 0x4d4   : > { %5268 = vmatprep.mubr.bf16.mxu1 %v4047_v25  ;;  %5427 = vmatprep.mubr.bf16.mxu0 %v4047_v25  ;;  %v19867_v4 = vpack.c.bf16 %v4005_v38, %v4001_v17  ;;  %v4003_v57 = vsel %vm28898_vm0, %v3998_v62, %v4002_v2  ;;  %v28899_v25 = vrot.slane %v19768_v52, 2  ;;  %v19877_v46 = vpack.c.bf16 %v4021_v32, %v19802_v31  ;;  %v14312_v2 = vld [vmem:[%s28436_s0 + $0x268] ss:$16 sps:$4 sm:$0xff]   ;;  %v14317_v31 = vld [vmem:[%s28436_s0 + $0x284] ss:$16 sps:$4 sm:$0xff]   ;;  %vm28917_vm3 = vmmov %vm28898_vm0 }
 0x4d5   : > { %5269 = vmatmul.mubr.bf16.gmra.mrb[28].mxu1 %v4046_v5  ;;  %5428 = vmatmul.mubr.bf16.gmra.mrb[36].mxu0 %v4046_v5  ;;  %v19871_v10 = vpack.c.bf16 %v4003_v57, %v3999_v8  ;;  %v4027_v52 = vsel %vm28901_vm6, %v4022_v51, %v4026_v63  ;;  %v4031_v49 = vsel %vm28882_vm2, %v4026_v63, %v4030_v41  ;;  %v14320_v32 = vld [vmem:[%s28436_s0 + $0x28c] ss:$16 sps:$4 sm:$0xff]   ;;  %v14315_v58 = vld [vmem:[%s28436_s0 + $0x280] ss:$16 sps:$4 sm:$0xff]   ;;  %v14329_v34 = vld [vmem:[%s28436_s0 + $0x2c4] ss:$16 sps:$4 sm:$0xff]  }
 0x4d6   : > { %v4023_v19 = vsel %vm28900_vm11, %v28899_v25, %v4022_v51  ;;  %5284 = vmatpush1.bf16.msra.mxu1 %v14303_v54  ;;  %5443 = vmatpush1.bf16.msra.mxu0 %v14306_v16  ;;  %v19896_v22 = vpack.c.bf16 %v4031_v49, %v4027_v52  ;;  %v4029_v51 = vsel %vm28904_vm10, %v4024_v56, %v4028_v0  ;;  %v14332_v0 = vld [vmem:[%s28436_s0 + $0x2cc] ss:$16 sps:$4 sm:$0xff]   ;;  %v14327_v54 = vld [vmem:[%s28436_s0 + $0x2c0] ss:$16 sps:$4 sm:$0xff]   ;;  %v14330_v16 = vld [vmem:[%s28436_s0 + $0x2c8] ss:$16 sps:$4 sm:$0xff]  }
 0x4d7   : > { %v19886_v28 = vpack.c.bf16 %v4023_v19, %v19799_v45  ;;  %5311 = vmatprep.mubr.bf16.mxu1 %v4043_v29  ;;  %5470 = vmatprep.mubr.bf16.mxu0 %v4043_v29  ;;  %v4025_v45 = vsel %vm28903_vm15, %v28902_v3, %v4024_v56  ;;  %v19906_v41 = vadd.f32 %v19815_v30, %v19762_v36  ;;  %v14323_v36 = vld [vmem:[%s28436_s0 + $0x2a4] ss:$16 sps:$4 sm:$0xff]   ;;  %v14321_v30 = vld [vmem:[%s28436_s0 + $0x2a0] ss:$16 sps:$4 sm:$0xff]   ;;  %v14338_v5 = vld [vmem:[%s28436_s0 + $0x2ec] ss:$16 sps:$4 sm:$0xff]  }
 0x4d8   : > { %5285 = vmatprep.subr.bf16.mxu1 %v14311_v48  ;;  %5444 = vmatprep.subr.bf16.mxu0 %v14314_v55  ;;  %v19902_v63 = vpack.c.bf16 %v4029_v51, %v4025_v45  ;;  %28906 = vst [vmem:[#allocation85_spill] sm:$0xff] %v19909_v40  ;;  %v14335_v62 = vld [vmem:[%s28436_s0 + $0x2e4] ss:$16 sps:$4 sm:$0xff]   ;;  %v14333_v56 = vld [vmem:[%s28436_s0 + $0x2e0] ss:$16 sps:$4 sm:$0xff]   ;;  %vm28918_vm8 = vmmov %vm28898_vm0 }
 0x4d9   : > { %28905 = vst [vmem:[#allocation84_spill] sm:$0xff] %v19906_v41  ;;  %v14336_v29 = vld [vmem:[%s28436_s0 + $0x2e8] ss:$16 sps:$4 sm:$0xff]   ;;  %v14341_v17 = vld [vmem:[%s28436_s0 + $0x304] ss:$16 sps:$4 sm:$0xff]   ;;  %vm28919_vm1 = vmmov %vm28898_vm0 }
 0x4da   : > { %5286 = vmatpush1.bf16.msra.mxu1 %v14309_v42  ;;  %5445 = vmatpush1.bf16.msra.mxu0 %v14312_v2  ;;  %v14344_v38 = vld [vmem:[%s28436_s0 + $0x30c] ss:$16 sps:$4 sm:$0xff]   ;;  %v14339_v48 = vld [vmem:[%s28436_s0 + $0x300] ss:$16 sps:$4 sm:$0xff]   ;;  %v14342_v55 = vld [vmem:[%s28436_s0 + $0x308] ss:$16 sps:$4 sm:$0xff]  }
 0x4db   : > { %5287 = vmatprep.subr.bf16.mxu1 %v14317_v31  ;;  %5446 = vmatprep.subr.bf16.mxu0 %v14320_v32  ;;  %v14347_v8 = vld [vmem:[%s28436_s0 + $0x324] ss:$16 sps:$4 sm:$0xff]   ;;  %v14350_v57 = vld [vmem:[%s28436_s0 + $0x32c] ss:$16 sps:$4 sm:$0xff]   ;;  %v14345_v25 = vld [vmem:[%s28436_s0 + $0x320] ss:$16 sps:$4 sm:$0xff]  }
 0x4dc   : > { %v14348_v19 = vld [vmem:[%s28436_s0 + $0x328] ss:$16 sps:$4 sm:$0xff]   ;;  %v14353_v42 = vld [vmem:[%s28436_s0 + $0x344] ss:$16 sps:$4 sm:$0xff]   ;;  %v14356_v2 = vld [vmem:[%s28436_s0 + $0x34c] ss:$16 sps:$4 sm:$0xff]  }
 0x4dd   : > { %v14351_v52 = vld [vmem:[%s28436_s0 + $0x340] ss:$16 sps:$4 sm:$0xff]   ;;  %v14354_v49 = vld [vmem:[%s28436_s0 + $0x348] ss:$16 sps:$4 sm:$0xff]   ;;  %v14359_v31 = vld [vmem:[%s28436_s0 + $0x364] ss:$16 sps:$4 sm:$0xff]  }
 0x4de   : > { %5288 = vmatpush1.bf16.msra.mxu1 %v14315_v58  ;;  %5447 = vmatpush1.bf16.msra.mxu0 %v14318_v53  ;;  %v14362_v32 = vld [vmem:[%s28436_s0 + $0x36c] ss:$16 sps:$4 sm:$0xff]   ;;  %v14357_v3 = vld [vmem:[%s28436_s0 + $0x360] ss:$16 sps:$4 sm:$0xff]   ;;  %v14360_v45 = vld [vmem:[%s28436_s0 + $0x368] ss:$16 sps:$4 sm:$0xff]  }
 0x4df   : > { %5289 = vmatprep.subr.bf16.mxu1 %v14323_v36  ;;  %5448 = vmatprep.subr.bf16.mxu0 %v14326_v7  ;;  %v14365_v51 = vld [vmem:[%s28436_s0 + $0x384] ss:$16 sps:$4 sm:$0xff]   ;;  %v14368_v58 = vld [vmem:[%s28436_s0 + $0x38c] ss:$16 sps:$4 sm:$0xff]   ;;  %v14363_v53 = vld [vmem:[%s28436_s0 + $0x380] ss:$16 sps:$4 sm:$0xff]  }
 0x4e0   : > { %v14366_v36 = vld [vmem:[%s28436_s0 + $0x388] ss:$16 sps:$4 sm:$0xff]   ;;  %v14371_v7 = vld [vmem:[%s28436_s0 + $0x3a4] ss:$16 sps:$4 sm:$0xff]   ;;  %vm28920_vm4 = vmmov %vm28898_vm0 }
 0x4e1   : > { %vm28922_vm11 = vmmov %vm28898_vm0 }
 0x4e2   : > { %5290 = vmatpush1.bf16.msra.mxu1 %v14321_v30  ;;  %5449 = vmatpush1.bf16.msra.mxu0 %v14324_v1  ;;  %v14374_v30 = vld [vmem:[%s28436_s0 + $0x3ac] ss:$16 sps:$4 sm:$0xff]   ;;  %v14369_v1 = vld [vmem:[%s28436_s0 + $0x3a0] ss:$16 sps:$4 sm:$0xff]   ;;  %vm28924_vm6 = vmmov %vm28898_vm0 }
 0x4e3   : > { %5291 = vmatprep.subr.bf16.mxu1 %v14329_v34  ;;  %5450 = vmatprep.subr.bf16.mxu0 %v14332_v0  ;;  %v14372_v34 = vld [vmem:[%s28436_s0 + $0x3a8] ss:$16 sps:$4 sm:$0xff]   ;;  %v14377_v0 = vld [vmem:[%s28436_s0 + $0x3c4] ss:$16 sps:$4 sm:$0xff]   ;;  %vm28925_vm2 = vmmov %vm28898_vm0 }
 0x4e4   : > { %vm28926_vm15 = vmmov %vm28898_vm0 }
 0x4e5   : > { %vm28927_vm10 = vmmov %vm28898_vm0 }
 0x4e6   : > { %5292 = vmatpush1.bf16.msra.mxu1 %v14327_v54  ;;  %5451 = vmatpush1.bf16.msra.mxu0 %v14330_v16  ;;  %v14380_v54 = vld [vmem:[%s28436_s0 + $0x3cc] ss:$16 sps:$4 sm:$0xff]   ;;  %v14375_v16 = vld [vmem:[%s28436_s0 + $0x3c0] ss:$16 sps:$4 sm:$0xff]  }
 0x4e7   : > { %5293 = vmatprep.subr.bf16.mxu1 %v14335_v62  ;;  %5452 = vmatprep.subr.bf16.mxu0 %v14338_v5  ;;  %v14378_v62 = vld [vmem:[%s28436_s0 + $0x3c8] ss:$16 sps:$4 sm:$0xff]   ;;  %v14383_v5 = vld [vmem:[%s28436_s0 + $0x3e4] ss:$16 sps:$4 sm:$0xff]  }
 0x4ea   : > { %5294 = vmatpush1.bf16.msra.mxu1 %v14333_v56  ;;  %5453 = vmatpush1.bf16.msra.mxu0 %v14336_v29  ;;  %v14386_v56 = vld [vmem:[%s28436_s0 + $0x3ec] ss:$16 sps:$4 sm:$0xff]   ;;  %v14381_v29 = vld [vmem:[%s28436_s0 + $0x3e0] ss:$16 sps:$4 sm:$0xff]  }
 0x4eb   : > { %5295 = vmatprep.subr.bf16.mxu1 %v14341_v17  ;;  %5454 = vmatprep.subr.bf16.mxu0 %v14344_v38  ;;  %v14384_v17 = vld [vmem:[%s28436_s0 + $0x3e8] ss:$16 sps:$4 sm:$0xff]   ;;  %v14389_v38 = vld [vmem:[%s28436_s0 + $0x404] ss:$16 sps:$4 sm:$0xff]  }
 0x4ee   : > { %5296 = vmatpush1.bf16.msra.mxu1 %v14339_v48  ;;  %5455 = vmatpush1.bf16.msra.mxu0 %v14342_v55  ;;  %v14392_v48 = vld [vmem:[%s28436_s0 + $0x40c] ss:$16 sps:$4 sm:$0xff]   ;;  %v14387_v55 = vld [vmem:[%s28436_s0 + $0x400] ss:$16 sps:$4 sm:$0xff]  }
 0x4ef   : > { %5297 = vmatprep.subr.bf16.mxu1 %v14347_v8  ;;  %5456 = vmatprep.subr.bf16.mxu0 %v14350_v57  ;;  %v14390_v8 = vld [vmem:[%s28436_s0 + $0x408] ss:$16 sps:$4 sm:$0xff]   ;;  %v14395_v57 = vld [vmem:[%s28436_s0 + $0x424] ss:$16 sps:$4 sm:$0xff]  }
 0x4f2   : > { %5298 = vmatpush1.bf16.msra.mxu1 %v14345_v25  ;;  %5457 = vmatpush1.bf16.msra.mxu0 %v14348_v19  ;;  %v14398_v25 = vld [vmem:[%s28436_s0 + $0x42c] ss:$16 sps:$4 sm:$0xff]   ;;  %v14393_v19 = vld [vmem:[%s28436_s0 + $0x420] ss:$16 sps:$4 sm:$0xff]  }
 0x4f3   : > { %5299 = vmatprep.subr.bf16.mxu1 %v14353_v42  ;;  %5458 = vmatprep.subr.bf16.mxu0 %v14356_v2  ;;  %v14396_v42 = vld [vmem:[%s28436_s0 + $0x428] ss:$16 sps:$4 sm:$0xff]   ;;  %v14401_v2 = vld [vmem:[%s28436_s0 + $0x444] ss:$16 sps:$4 sm:$0xff]  }
 0x4f6   : > { %5300 = vmatpush1.bf16.msra.mxu1 %v14351_v52  ;;  %5459 = vmatpush1.bf16.msra.mxu0 %v14354_v49  ;;  %v14402_v52 = vld [vmem:[%s28436_s0 + $0x448] ss:$16 sps:$4 sm:$0xff]   ;;  %v14407_v49 = vld [vmem:[%s28436_s0 + $0x464] ss:$16 sps:$4 sm:$0xff]  }
 0x4f7   : > { %5301 = vmatprep.subr.bf16.mxu1 %v14359_v31  ;;  %5460 = vmatprep.subr.bf16.mxu0 %v14362_v32  ;;  %v14410_v31 = vld [vmem:[%s28436_s0 + $0x46c] ss:$16 sps:$4 sm:$0xff]   ;;  %v14405_v32 = vld [vmem:[%s28436_s0 + $0x460] ss:$16 sps:$4 sm:$0xff]  }
 0x4fa   : > { %5302 = vmatpush1.bf16.msra.mxu1 %v14357_v3  ;;  %5461 = vmatpush1.bf16.msra.mxu0 %v14360_v45  ;;  %v14408_v3 = vld [vmem:[%s28436_s0 + $0x468] ss:$16 sps:$4 sm:$0xff]   ;;  %v14413_v45 = vld [vmem:[%s28436_s0 + $0x484] ss:$16 sps:$4 sm:$0xff]  }
 0x4fb   : > { %5303 = vmatprep.subr.bf16.mxu1 %v14365_v51  ;;  %5462 = vmatprep.subr.bf16.mxu0 %v14368_v58  ;;  %v14411_v51 = vld [vmem:[%s28436_s0 + $0x480] ss:$16 sps:$4 sm:$0xff]   ;;  %v14419_v58 = vld [vmem:[%s28436_s0 + $0x4a4] ss:$16 sps:$4 sm:$0xff]  }
 0x4fe   : > { %5304 = vmatpush1.bf16.msra.mxu1 %v14363_v53  ;;  %5463 = vmatpush1.bf16.msra.mxu0 %v14366_v36  ;;  %v14422_v53 = vld [vmem:[%s28436_s0 + $0x4ac] ss:$16 sps:$4 sm:$0xff]   ;;  %v14417_v36 = vld [vmem:[%s28436_s0 + $0x4a0] ss:$16 sps:$4 sm:$0xff]  }
 0x4ff   : > { %5305 = vmatprep.subr.bf16.mxu1 %v14371_v7  ;;  %5464 = vmatprep.subr.bf16.mxu0 %v14374_v30  ;;  %v14420_v7 = vld [vmem:[%s28436_s0 + $0x4a8] ss:$16 sps:$4 sm:$0xff]   ;;  %v14425_v30 = vld [vmem:[%s28436_s0 + $0x4c4] ss:$16 sps:$4 sm:$0xff]  }
 0x502   : > { %5306 = vmatpush1.bf16.msra.mxu1 %v14369_v1  ;;  %5465 = vmatpush1.bf16.msra.mxu0 %v14372_v34  ;;  %v14428_v1 = vld [vmem:[%s28436_s0 + $0x4cc] ss:$16 sps:$4 sm:$0xff]   ;;  %v14423_v34 = vld [vmem:[%s28436_s0 + $0x4c0] ss:$16 sps:$4 sm:$0xff]  }
 0x503   : > { %5307 = vmatprep.subr.bf16.mxu1 %v14377_v0  ;;  %5466 = vmatprep.subr.bf16.mxu0 %v14380_v54  ;;  %v14426_v0 = vld [vmem:[%s28436_s0 + $0x4c8] ss:$16 sps:$4 sm:$0xff]   ;;  %v14431_v54 = vld [vmem:[%s28436_s0 + $0x4e4] ss:$16 sps:$4 sm:$0xff]  }
 0x506   : > { %5308 = vmatpush1.bf16.msra.mxu1 %v14375_v16  ;;  %5467 = vmatpush1.bf16.msra.mxu0 %v14378_v62  ;;  %v14434_v16 = vld [vmem:[%s28436_s0 + $0x4ec] ss:$16 sps:$4 sm:$0xff]   ;;  %v14429_v62 = vld [vmem:[%s28436_s0 + $0x4e0] ss:$16 sps:$4 sm:$0xff]  }
 0x507   : > { %5309 = vmatprep.subr.bf16.mxu1 %v14383_v5  ;;  %5468 = vmatprep.subr.bf16.mxu0 %v14386_v56  ;;  %v14432_v5 = vld [vmem:[%s28436_s0 + $0x4e8] ss:$16 sps:$4 sm:$0xff]   ;;  %v14437_v56 = vld [vmem:[%s28436_s0 + $0x504] ss:$16 sps:$4 sm:$0xff]  }
 0x50a   : > { %5310 = vmatpush1.bf16.msra.mxu1 %v14381_v29  ;;  %5469 = vmatpush1.bf16.msra.mxu0 %v14384_v17  ;;  %v14440_v29 = vld [vmem:[%s28436_s0 + $0x50c] ss:$16 sps:$4 sm:$0xff]   ;;  %v14435_v17 = vld [vmem:[%s28436_s0 + $0x500] ss:$16 sps:$4 sm:$0xff]  }
 0x50b   : > { %5332 = vmatprep.subr.bf16.mxu1 %v14389_v38  ;;  %5491 = vmatprep.subr.bf16.mxu0 %v14392_v48  ;;  %v14438_v38 = vld [vmem:[%s28436_s0 + $0x508] ss:$16 sps:$4 sm:$0xff]   ;;  %v14443_v48 = vld [vmem:[%s28436_s0 + $0x524] ss:$16 sps:$4 sm:$0xff]  }
 0x50d   : > { %5312 = vmatmul.mubr.bf16.vlgmr.msra.gmra.mrb[24].mxu1 %v19847_v9  ;;  %5471 = vmatmul.mubr.bf16.vlgmr.msra.gmra.mrb[32].mxu0 %v19847_v9  ;;  %v14404_v9 = vld [vmem:[%s28436_s0 + $0x44c] ss:$16 sps:$4 sm:$0xff]  }
 0x50e   : > { %5321 = vmatprep.mubr.bf16.mxu1 %v19867_v4  ;;  %5333 = vmatpush1.bf16.msra.mxu1 %v14387_v55  ;;  %v14446_v55 = vld [vmem:[%s28436_s0 + $0x52c] ss:$16 sps:$4 sm:$0xff]  }
 0x50f   : > { %5480 = vmatprep.mubr.bf16.mxu0 %v19867_v4  ;;  %5492 = vmatpush1.bf16.msra.mxu0 %v14390_v8  ;;  %v14399_v4 = vld [vmem:[%s28436_s0 + $0x440] ss:$16 sps:$4 sm:$0xff]  }
 0x510   : > { %5334 = vmatprep.subr.bf16.mxu1 %v14395_v57  ;;  %5493 = vmatprep.subr.bf16.mxu0 %v14398_v25  ;;  %v14441_v8 = vld [vmem:[%s28436_s0 + $0x520] ss:$16 sps:$4 sm:$0xff]   ;;  %v14444_v57 = vld [vmem:[%s28436_s0 + $0x528] ss:$16 sps:$4 sm:$0xff]   ;;  %v14449_v25 = vld [vmem:[%s28436_s0 + $0x544] ss:$16 sps:$4 sm:$0xff]  }
 0x512   : > { %5335 = vmatpush1.bf16.msra.mxu1 %v14393_v19  ;;  %v14452_v19 = vld [vmem:[%s28436_s0 + $0x54c] ss:$16 sps:$4 sm:$0xff]  }
 0x513   : > { %5494 = vmatpush1.bf16.msra.mxu0 %v14396_v42  ;;  %5336 = vmatprep.subr.bf16.mxu1 %v14401_v2  ;;  %v14447_v42 = vld [vmem:[%s28436_s0 + $0x540] ss:$16 sps:$4 sm:$0xff]   ;;  %v14450_v2 = vld [vmem:[%s28436_s0 + $0x548] ss:$16 sps:$4 sm:$0xff]  }
 0x514   : > { %5495 = vmatprep.subr.bf16.mxu0 %v14404_v9  ;;  %v14455_v9 = vld [vmem:[%s28436_s0 + $0x564] ss:$16 sps:$4 sm:$0xff]  }
 0x515   : > { %5322 = vmatmul.mubr.bf16.gmra.mrb[28].mxu1 %v19871_v10  ;;  %5481 = vmatmul.mubr.bf16.gmra.mrb[36].mxu0 %v19871_v10  ;;  %v14416_v10 = vld [vmem:[%s28436_s0 + $0x48c] ss:$16 sps:$4 sm:$0xff]  }
 0x516   : > { %5337 = vmatpush1.bf16.msra.mxu1 %v14399_v4  ;;  %5364 = vmatprep.mubr.bf16.mxu1 %v19886_v28  ;;  %v14458_v4 = vld [vmem:[%s28436_s0 + $0x56c] ss:$16 sps:$4 sm:$0xff]  }
 0x517   : > { %5496 = vmatpush1.bf16.msra.mxu0 %v14402_v52  ;;  %5523 = vmatprep.mubr.bf16.mxu0 %v19886_v28  ;;  %v14414_v28 = vld [vmem:[%s28436_s0 + $0x488] ss:$16 sps:$4 sm:$0xff]   ;;  %v14453_v52 = vld [vmem:[%s28436_s0 + $0x560] ss:$16 sps:$4 sm:$0xff]  }
 0x518   : > { %5338 = vmatprep.subr.bf16.mxu1 %v14407_v49  ;;  %5497 = vmatprep.subr.bf16.mxu0 %v14410_v31  ;;  %v14456_v49 = vld [vmem:[%s28436_s0 + $0x568] ss:$16 sps:$4 sm:$0xff]   ;;  %v14461_v31 = vld [vmem:[%s28436_s0 + $0x584] ss:$16 sps:$4 sm:$0xff]  }
 0x51a   : > { %5339 = vmatpush1.bf16.msra.mxu1 %v14405_v32  ;;  %v14464_v32 = vld [vmem:[%s28436_s0 + $0x58c] ss:$16 sps:$4 sm:$0xff]  }
 0x51b   : > { %5498 = vmatpush1.bf16.msra.mxu0 %v14408_v3  ;;  %5340 = vmatprep.subr.bf16.mxu1 %v14413_v45  ;;  %v14459_v3 = vld [vmem:[%s28436_s0 + $0x580] ss:$16 sps:$4 sm:$0xff]   ;;  %v14462_v45 = vld [vmem:[%s28436_s0 + $0x588] ss:$16 sps:$4 sm:$0xff]  }
 0x51c   : > { %5499 = vmatprep.subr.bf16.mxu0 %v14416_v10  ;;  %v14467_v10 = vld [vmem:[%s28436_s0 + $0x5a4] ss:$16 sps:$4 sm:$0xff]  }
 0x51e   : > { %5341 = vmatpush1.bf16.msra.mxu1 %v14411_v51  ;;  %v14470_v51 = vld [vmem:[%s28436_s0 + $0x5ac] ss:$16 sps:$4 sm:$0xff]  }
 0x51f   : > { %5500 = vmatpush1.bf16.msra.mxu0 %v14414_v28  ;;  %5342 = vmatprep.subr.bf16.mxu1 %v14419_v58  ;;  %v14465_v28 = vld [vmem:[%s28436_s0 + $0x5a0] ss:$16 sps:$4 sm:$0xff]   ;;  %v14468_v58 = vld [vmem:[%s28436_s0 + $0x5a8] ss:$16 sps:$4 sm:$0xff]  }
 0x520   : > { %5501 = vmatprep.subr.bf16.mxu0 %v14422_v53  ;;  %v14473_v53 = vld [vmem:[%s28436_s0 + $0x5c4] ss:$16 sps:$4 sm:$0xff]  }
 0x522   : > { %5343 = vmatpush1.bf16.msra.mxu1 %v14417_v36  ;;  %v14476_v36 = vld [vmem:[%s28436_s0 + $0x5cc] ss:$16 sps:$4 sm:$0xff]  }
 0x523   : > { %5502 = vmatpush1.bf16.msra.mxu0 %v14420_v7  ;;  %5344 = vmatprep.subr.bf16.mxu1 %v14425_v30  ;;  %v14471_v7 = vld [vmem:[%s28436_s0 + $0x5c0] ss:$16 sps:$4 sm:$0xff]   ;;  %v14474_v30 = vld [vmem:[%s28436_s0 + $0x5c8] ss:$16 sps:$4 sm:$0xff]  }
 0x524   : > { %5503 = vmatprep.subr.bf16.mxu0 %v14428_v1  ;;  %v14479_v1 = vld [vmem:[%s28436_s0 + $0x5e4] ss:$16 sps:$4 sm:$0xff]  }
 0x526   : > { %5345 = vmatpush1.bf16.msra.mxu1 %v14423_v34  ;;  %v14482_v34 = vld [vmem:[%s28436_s0 + $0x5ec] ss:$16 sps:$4 sm:$0xff]  }
 0x527   : > { %5504 = vmatpush1.bf16.msra.mxu0 %v14426_v0  ;;  %5346 = vmatprep.subr.bf16.mxu1 %v14431_v54  ;;  %v14477_v0 = vld [vmem:[%s28436_s0 + $0x5e0] ss:$16 sps:$4 sm:$0xff]   ;;  %v14480_v54 = vld [vmem:[%s28436_s0 + $0x5e8] ss:$16 sps:$4 sm:$0xff]   ;;  %s27706_s0 = smov 1  }
 0x528   : > { %5505 = vmatprep.subr.bf16.mxu0 %v14434_v16  ;;  %v4244_v16 = vld [vmem:[%s28907_s1] sm:$0xf]  ;;  %s27025_s1 = sand.u32 1, %s14985_s10  }
 0x52a   : > { %5347 = vmatpush1.bf16.msra.mxu1 %v14429_v62  ;;  %v28908_v62 = vld [vmem:[#allocation17_spill] sm:$0xff] }
 0x52b   : > { %5506 = vmatpush1.bf16.msra.mxu0 %v14432_v5  ;;  %5348 = vmatprep.subr.bf16.mxu1 %v14437_v56  ;;  %v4249_v5 = vrot.slane %v4244_v16, %v28908_v62  ;;  %v28909_v56 = vld [vmem:[#allocation18_spill] sm:$0xff] }
 0x52c   : > { %5507 = vmatprep.subr.bf16.mxu0 %v14440_v29  ;;  %v4257_v29 = vrot.slane %v4244_v16, %v28909_v56 }
 0x52e   : > { %5349 = vmatpush1.bf16.msra.mxu1 %v14435_v17  ;;  %v28910_v17 = vld [vmem:[#allocation19_spill] sm:$0xff] }
 0x52f   : > { %5508 = vmatpush1.bf16.msra.mxu0 %v14438_v38  ;;  %5350 = vmatprep.subr.bf16.mxu1 %v14443_v48  ;;  %v28911_v38 = vld [vmem:[#allocation20_spill] sm:$0xff] }
 0x530   : > { %5509 = vmatprep.subr.bf16.mxu0 %v14446_v55  ;;  %v4261_v48 = vrot.slane %v4244_v16, %v28911_v38 }
 0x532   : > { %5351 = vmatpush1.bf16.msra.mxu1 %v14441_v8 }
 0x533   : > { %5510 = vmatpush1.bf16.msra.mxu0 %v14444_v57  ;;  %5352 = vmatprep.subr.bf16.mxu1 %v14449_v25 }
 0x534   : > { %5511 = vmatprep.subr.bf16.mxu0 %v14452_v19 }
 0x536   : > { %5353 = vmatpush1.bf16.msra.mxu1 %v14447_v42 }
 0x537   : > { %5512 = vmatpush1.bf16.msra.mxu0 %v14450_v2  ;;  %5354 = vmatprep.subr.bf16.mxu1 %v14455_v9 }
 0x538   : > { %5513 = vmatprep.subr.bf16.mxu0 %v14458_v4 }
 0x53a   : > { %5355 = vmatpush1.bf16.msra.mxu1 %v14453_v52 }
 0x53b   : > { %5514 = vmatpush1.bf16.msra.mxu0 %v14456_v49  ;;  %5356 = vmatprep.subr.bf16.mxu1 %v14461_v31 }
 0x53c   : > { %5515 = vmatprep.subr.bf16.mxu0 %v14464_v32 }
 0x53e   : > { %5357 = vmatpush1.bf16.msra.mxu1 %v14459_v3 }
 0x53f   : > { %5516 = vmatpush1.bf16.msra.mxu0 %v14462_v45  ;;  %5358 = vmatprep.subr.bf16.mxu1 %v14467_v10 }
 0x540   : > { %5517 = vmatprep.subr.bf16.mxu0 %v14470_v51 }
 0x542   : > { %5359 = vmatpush1.bf16.msra.mxu1 %v14465_v28 }
 0x543   : > { %5518 = vmatpush1.bf16.msra.mxu0 %v14468_v58  ;;  %5360 = vmatprep.subr.bf16.mxu1 %v14473_v53 }
 0x544   : > { %5519 = vmatprep.subr.bf16.mxu0 %v14476_v36 }
 0x546   : > { %5361 = vmatpush1.bf16.msra.mxu1 %v14471_v7 }
 0x547   : > { %5520 = vmatpush1.bf16.msra.mxu0 %v14474_v30  ;;  %5362 = vmatprep.subr.bf16.mxu1 %v14479_v1 }
 0x548   : > { %5521 = vmatprep.subr.bf16.mxu0 %v14482_v34 }
 0x54a   : > { %5363 = vmatpush1.bf16.msra.mxu1 %v14477_v0 }
 0x54b   : > { %5522 = vmatpush1.bf16.msra.mxu0 %v14480_v54 }
 0x54d   : > { %5365 = vmatmul.mubr.bf16.vlgmr.msra.gmra.mrb[24].mxu1 %v19877_v46 }
 0x54e   : > { %5524 = vmatmul.mubr.bf16.vlgmr.msra.gmra.mrb[32].mxu0 %v19877_v46  ;;  %5374 = vmatprep.mubr.bf16.mxu1 %v19896_v22  ;;  %v4253_v46 = vrot.slane %v4244_v16, %v28910_v17 }
 0x54f   : > { %5533 = vmatprep.mubr.bf16.mxu0 %v19896_v22 }
 0x555   : > { %5375 = vmatmul.mubr.bf16.gmra.mrb[28].mxu1 %v19902_v63 }
 0x556   : > { %5534 = vmatmul.mubr.bf16.gmra.mrb[36].mxu0 %v19902_v63  ;;  %5814 = vmatprep.mubr.f32.mxu1 %v28081_v20 }
 0x620   : > { %v5366_v55 = vpop.f32.mrb[24].mxu1 }
 0x621   : > { %v20263_v22 = vadd.f32 %v5366_v55, %v4249_v5  ;;  %v5525_v8 = vpop.f32.mrb[32].mxu0  ;;  %v5368_v57 = vpop.f32.mrb[25].mxu1 }
 0x622   : > { %v13598_v63 = vadd.f32 %v5525_v8, %v4257_v29  ;;  %v13591_v25 = vadd.f32 %v5368_v57, %v4253_v46  ;;  %v5527_v19 = vpop.f32.mrb[33].mxu0  ;;  %v5370_v42 = vpop.f32.mrb[26].mxu1 }
 0x623   : > { %v5544_v2 = vmax.f32 %v20263_v22, 0.0  ;;  %v20266_v9 = vadd.f32 %v5527_v19, %v4261_v48  ;;  %v20268_v4 = vadd.f32 %v5370_v42, %v4249_v5  ;;  %v5529_v52 = vpop.f32.mrb[34].mxu0  ;;  %v5372_v49 = vpop.f32.mrb[27].mxu1 }
 0x624   : > { %v5546_v31 = vmax.f32 %v13598_v63, 0.0  ;;  %v5545_v32 = vmax.f32 %v13591_v25, 0.0  ;;  %v20270_v3 = vadd.f32 %v5529_v52, %v4257_v29  ;;  %v20272_v45 = vadd.f32 %v5372_v49, %v4253_v46  ;;  %v5531_v10 = vpop.f32.mrb[35].mxu0 }
 0x625   : > { %v27446_v51 = vmax.f32 %v20266_v9, 0.0  ;;  %v5548_v28 = vmax.f32 %v20268_v4, 0.0  ;;  %v20276_v58 = vadd.f32 %v5531_v10, %v4261_v48  ;;  %v5576_v7 = vrot.slane %v5544_v2, 1 }
 0x626   : > { %v27445_v53 = vmax.f32 %v20270_v3, 0.0  ;;  %v27447_v36 = vmax.f32 %v20272_v45, 0.0  ;;  %v5582_v34 = vrot.slane %v5546_v31, 1  ;;  %v5579_v0 = vrot.slane %v5545_v32, 1 }
 0x627   : > { %v5577_v30 = vrot.slane %v5548_v28, 1  ;;  %v27448_v1 = vmax.f32 %v20276_v58, 0.0  ;;  %v20287_v22 = vrot.slane %v27446_v51, 1 }
 0x628   : > { %v5583_v54 = vrot.slane %v27445_v53, 1  ;;  %v5580_v16 = vrot.slane %v27447_v36, 1  ;;  %v5376_v55 = vpop.f32.mrb[28].mxu1 }
 0x629   : > { %v20291_v8 = vrot.slane %v27448_v1, 1  ;;  %v20293_v57 = vadd.f32 %v5376_v55, %v4249_v5  ;;  %v5535_v63 = vpop.f32.mrb[36].mxu0  ;;  %v5378_v25 = vpop.f32.mrb[29].mxu1  ;;  %v5578_v19 = vsel %vm28912_vm12, %v5576_v7, %v5577_v30  ;;  %vm28930_vm12 = vmmov %vm28898_vm0 }
 0x62a   : > { %v13602_v42 = vadd.f32 %v5535_v63, %v4257_v29  ;;  %v13595_v4 = vadd.f32 %v5378_v25, %v4253_v46  ;;  %v5537_v52 = vpop.f32.mrb[37].mxu0  ;;  %v5380_v49 = vpop.f32.mrb[30].mxu1  ;;  %v5581_v10 = vsel %vm28913_vm13, %v5579_v0, %v5580_v16  ;;  %v5584_v53 = vsel %vm28914_vm14, %v5582_v34, %v5583_v54 }
 0x62b   : > { %v5552_v51 = vmax.f32 %v20293_v57, 0.0  ;;  %v13603_v36 = vadd.f32 %v5537_v52, %v4261_v48  ;;  %v13596_v40 = vadd.f32 %v5380_v49, %v4249_v5  ;;  %v5539_v1 = vpop.f32.mrb[38].mxu0  ;;  %v5382_v41 = vpop.f32.mrb[31].mxu1  ;;  %v20299_v55 = vmax.f32 %v5545_v32, %v5581_v10 }
 0x62c   : > { %v5554_v38 = vmax.f32 %v13602_v42, 0.0  ;;  %v5553_v17 = vmax.f32 %v13595_v4, 0.0  ;;  %v13604_v56 = vadd.f32 %v5539_v1, %v4257_v29  ;;  %v13597_v62 = vadd.f32 %v5382_v41, %v4253_v46  ;;  %v5541_v63 = vpop.f32.mrb[39].mxu0 }
 0x62d   : > { %v5588_v25 = vrot.slane %v5552_v51, 1  ;;  %v5555_v26 = vmax.f32 %v13603_v36, 0.0  ;;  %v5556_v47 = vmax.f32 %v13596_v40, 0.0  ;;  %v13605_v12 = vadd.f32 %v5541_v63, %v4261_v48 }
 0x62e   : > { %v5592_v50 = vrot.slane %v5554_v38, 1  ;;  %v5590_v39 = vrot.slane %v5553_v17, 1  ;;  %v5558_v43 = vmax.f32 %v13604_v56, 0.0  ;;  %v5557_v14 = vmax.f32 %v13597_v62, 0.0 }
 0x62f   : > { %v5594_v57 = vrot.slane %v5555_v26, 1  ;;  %v5596_v52 = vrot.slane %v5556_v47, 1  ;;  %v5559_v5 = vmax.f32 %v13605_v12, 0.0  ;;  %v20301_v49 = vmax.f32 %v5546_v31, %v5584_v53 }
 0x630   : > { %v5600_v32 = vrot.slane %v5558_v43, 1  ;;  %v5598_v10 = vrot.slane %v5557_v14, 1  ;;  %v5589_v42 = vsel %vm28915_vm5, %v5577_v30, %v5588_v25  ;;  %v20304_v29 = vmax.f32 %v5544_v2, %v5578_v19 }
 0x631   : > { %v5624_v41 = vsel %vm28916_vm9, %v5596_v52, %v5576_v7  ;;  %v5602_v46 = vrot.slane %v5559_v5, 1  ;;  %v13919_v40 = vpack.i.bf16 %v20301_v49, %v20299_v55  ;;  %v20309_v48 = vmax.f32 %v5548_v28, %v5589_v42 }
 0x632   : > { %v20311_v62 = vmax.f32 %v5556_v47, %v5624_v41  ;;  %v5626_v12 = vsel %vm28917_vm3, %v5600_v32, %v5582_v34  ;;  %v5625_v56 = vsel %vm28918_vm8, %v5598_v10, %v5579_v0  ;;  %v5591_v31 = vsel %vm28919_vm1, %v5580_v16, %v5590_v39 }
 0x633   : > { %v20316_v53 = vmax.f32 %v5558_v43, %v5626_v12  ;;  %v20318_v2 = vmax.f32 %v5557_v14, %v5625_v56  ;;  %v5627_v36 = vsel %vm28920_vm4, %v5602_v46, %v20287_v22  ;;  %13920 = vrot.lane.b32.xlu0 %v13919_v40, %s15001_s6  ;;  %v13924_v47 = vpack.i.bf16 %v20309_v48, %v20304_v29  ;;  %v28932_v56 = vld [vmem:[#allocation36_spill] sm:$0xff] }
 0x634   : > { %v20325_v28 = vmax.f32 %v5559_v5, %v5627_v36  ;;  %v5593_v7 = vsel %vm28898_vm0, %v5583_v54, %v5592_v50  ;;  %v28921_v30 = vmax.f32 %v20272_v45, 0.0  ;;  %v5599_v14 = vsel %vm28922_vm11, %v5590_v39, %v5598_v10 }
 0x635   : > { %v28923_v43 = vmax.f32 %v20270_v3, 0.0  ;;  %v13939_v0 = vpack.i.bf16 %v20316_v53, %v20318_v2  ;;  %v5601_v16 = vsel %vm28924_vm6, %v5592_v50, %v5600_v32  ;;  %v20340_v19 = vmax.f32 %v5553_v17, %v5599_v14 }
 0x636   : > { %v20330_v1 = vmax.f32 %v28921_v30, %v5591_v31  ;;  %v20342_v4 = vmax.f32 %v5554_v38, %v5601_v16  ;;  %v5587_v45 = vsel %vm28925_vm2, %v20287_v22, %v20291_v8  ;;  %v5595_v39 = vsel %vm28926_vm15, %v20291_v8, %v5594_v57 }
 0x637   : > { %v20335_v34 = vmax.f32 %v28923_v43, %v5593_v7  ;;  %v5597_v3 = vsel %vm28927_vm10, %v5588_v25, %v5596_v52  ;;  %13925 = vrot.lane.b32.xlu0 %v13924_v47, %s15001_s6  ;;  %v28928_v50 = vmax.f32 %v20266_v9, 0.0  ;;  %v28929_v38 = vmax.f32 %v20276_v58, 0.0  ;;  %v28931_v58 = vld [vmem:[#allocation37_spill] sm:$0xff] }
 0x638   : > { %v20361_v5 = vmax.f32 %v5552_v51, %v5597_v3  ;;  %v5603_v22 = vsel %vm28930_vm12, %v5594_v57, %v5602_v46  ;;  %v13934_v25 = vpack.i.bf16 %v20342_v4, %v20340_v19  ;;  %v6163_v57 = vshra.s32 %v28931_v58, 4 }
 0x639   : > { %v13929_v54 = vpack.i.bf16 %v20335_v34, %v20330_v1  ;;  %v20355_v17 = vmax.f32 %v28928_v50, %v5587_v45  ;;  %v20359_v63 = vmax.f32 %v28929_v38, %v5595_v39  ;;  %v20365_v8 = vmax.f32 %v5555_v26, %v5603_v22  ;;  %v28933_v45 = vld [vmem:[#allocation39_spill] sm:$0xff] }
 0x63a   : > { %v13944_v51 = vpack.i.bf16 %v20311_v62, %v20361_v5  ;;  %v6162_v32 = vshra.s32 %v16351_v18, 4  ;;  %v20385_v10 = vand.u32 15, %v28931_v58  ;;  %v20387_v42 = vmul.u32 2, %v6163_v57 }
 0x63b   : > { %13930 = vrot.lane.b32.xlu1 %v13929_v54, %s15001_s6  ;;  %13940 = vrot.lane.b32.xlu0 %v13939_v0, %s15001_s6  ;;  %v13949_v9 = vpack.i.bf16 %v20359_v63, %v20355_v17  ;;  %v13954_v26 = vpack.i.bf16 %v20325_v28, %v20365_v8  ;;  %v5904_v40 = vand.u32 15, %v15909_v35  ;;  %vm27488_vm13 = vcmask 916480  }
 0x63c   : > { %v5905_v31 = vand.u32 15, %v28932_v56  ;;  %v6098_v36 = vshra.s32 %v15909_v35, 4  ;;  %v6099_v47 = vshra.s32 %v28932_v56, 4  ;;  %v20396_v7 = vand.u32 15, %v16351_v18 }
 0x63d   : > { %v20398_v30 = vmul.u32 2, %v6162_v32  ;;  %v5906_v16 = vand.u32 15, %v16395_v37  ;;  %v5907_v39 = vand.u32 15, %v28933_v45  ;;  %v6100_v3 = vshra.s32 %v16395_v37, 4 }
 0x63e   : > { %v6101_v54 = vshra.s32 %v28933_v45, 4  ;;  %vm20409_vm14 = vcmp.eq.s32.totalorder %v5904_v40, %v20385_v10  ;;  %vm20417_vm5 = vcmp.eq.s32.totalorder %v5905_v31, %v20385_v10  ;;  %vm20422_vm9 = vcmp.eq.s32.totalorder %v6098_v36, %v20387_v42 }
 0x63f   : > { %13935 = vrot.lane.b32.xlu1 %v13934_v25, %s15001_s6  ;;  %13950 = vrot.lane.b32.xlu0 %v13949_v9, %s15001_s6  ;;  %vm20427_vm3 = vcmp.eq.s32.totalorder %v6099_v47, %v20387_v42  ;;  %vm20436_vm8 = vcmp.eq.s32.totalorder %v5904_v40, %v20396_v7  ;;  %vm20446_vm1 = vcmp.eq.s32.totalorder %v5905_v31, %v20396_v7  ;;  %v28987_v57 = vmov 0 }
 0x640   : > { %vm20451_vm4 = vcmp.eq.s32.totalorder %v6098_v36, %v20398_v30  ;;  %vm20461_vm0 = vcmp.eq.s32.totalorder %v6099_v47, %v20398_v30  ;;  %vm20466_vm11 = vcmp.eq.s32.totalorder %v5906_v16, %v20385_v10  ;;  %vm20471_vm6 = vcmp.eq.s32.totalorder %v5907_v39, %v20385_v10 }
 0x641   : > { %vm20479_vm2 = vcmp.eq.s32.totalorder %v6100_v3, %v20387_v42  ;;  %vm20484_vm15 = vcmp.eq.s32.totalorder %v6101_v54, %v20387_v42  ;;  %vm20489_vm10 = vcmp.eq.s32.totalorder %v5906_v16, %v20396_v7  ;;  %vm20496_vm12 = vcmp.eq.s32.totalorder %v5907_v39, %v20396_v7 }
 0x642   : > { %vm20501_vm7 = vcmp.eq.s32.totalorder %v6100_v3, %v20398_v30  ;;  %v5918_v36 = vand.u32 15, %v17028_v15 }
 0x643   : > { %13945 = vrot.lane.b32.xlu1 %v13944_v51, %s15001_s6 }
 0x647   : > { %13955 = vrot.lane.b32.xlu1 %v13954_v26, %s15001_s6  ;;  %s722_s6 = scalar_lea.vmem [#allocation9], %s27025_s1 }
 0x6a5   : > { %v20381_v52 = vpop.permute.xlu0 %13920 }
 0x6a6   : > { %v27463_v41 = vunpack.i.h.bf16 %v20381_v52  ;;  %v13922_v46 = vunpack.i.l.bf16 %v20381_v52 }
 0x6a8   : > { %v5694_v50 = vsel %vm27488_vm13, %v13922_v46, %v27463_v41  ;;  %v28999_v41 = vmov 0 }
 0x6a9   : > { %v13926_v12 = vpop.permute.xlu0 %13925  ;;  %v5730_v56 = vmax.f32 %v20299_v55, %v5694_v50 }
 0x6aa   : > { %v13928_v14 = vunpack.i.h.bf16 %v13926_v12  ;;  %v13927_v43 = vunpack.i.l.bf16 %v13926_v12 }
 0x6ac   : > { %v5693_v38 = vsel %vm27488_vm13, %v13927_v43, %v13922_v46 }
 0x6ad   : > { %v13931_v0 = vpop.permute.xlu1 %13930  ;;  %v5729_v51 = vmax.f32 %v20304_v29, %v5693_v38  ;;  %v20414_v26 = vpop.permute.xlu0 %13940 }
 0x6ae   : > { %v13933_v22 = vunpack.i.h.bf16 %v13931_v0  ;;  %v13932_v25 = vunpack.i.l.bf16 %v13931_v0  ;;  %v13942_v38 = vunpack.i.l.bf16 %v20414_v26  ;;  %v28948_v40 = vunpack.i.h.bf16 %v20414_v26 }
 0x6af   : > { %v29001_v0 = vmov 0 }
 0x6b0   : > { %v5696_v12 = vsel %vm27488_vm13, %v13928_v14, %v13932_v25  ;;  %v5697_v29 = vsel %vm27488_vm13, %v13932_v25, %v13933_v22  ;;  %v29003_v25 = vmov 0 }
 0x6b1   : > { %v5733_v45 = vmax.f32 %v20309_v48, %v5696_v12  ;;  %v20441_v37 = vpop.permute.xlu1 %13935  ;;  %v5734_v35 = vmax.f32 %v20330_v1, %v5697_v29  ;;  %v5703_v48 = vsel %vm27488_vm13, %v13942_v38, %v28948_v40  ;;  %v28949_v1 = vmov 0  ;;  %v13951_v31 = vpop.permute.xlu0 %13950 }
 0x6b2   : > { %v13938_v12 = vunpack.i.h.bf16 %v20441_v37  ;;  %v13937_v55 = vunpack.i.l.bf16 %v20441_v37  ;;  %v28950_v1 = vsel %vm20461_vm0, 4294967295, %v28949_v1  ;;  %v28953_v40 = vmov 0 }
 0x6b3   : > { %v13263_v50 = vpack.c.bf16 %v5734_v35, %v5730_v56  ;;  %v13265_v29 = vpack.c.bf16 %v5733_v45, %v5729_v51  ;;  %v28954_v40 = vsel %vm20471_vm6, 4294967295, %v28953_v40  ;;  %v13953_v18 = vunpack.i.h.bf16 %v13951_v31 }
 0x6b4   : > { %v5700_v37 = vsel %vm27488_vm13, %v13937_v55, %v13938_v12  ;;  %v13952_v47 = vunpack.i.l.bf16 %v13951_v31  ;;  %v5742_v58 = vmax.f32 %v20318_v2, %v5703_v48  ;;  %v28959_v51 = vmov 0 }
 0x6b5   : > { %13264 = vmatprep.subr.bf16.mxu1 %v13263_v50  ;;  %v13946_v44 = vpop.permute.xlu1 %13945  ;;  %v5738_v35 = vmax.f32 %v20340_v19, %v5700_v37  ;;  %v28960_v51 = vsel %vm20489_vm10, 4294967295, %v28959_v51  ;;  %v5726_v48 = vsel %vm27488_vm13, %v13953_v18, %v13928_v14  ;;  %v28961_v19 = vmov 0  ;;  %v28967_v14 = vld [vmem:[#allocation43_spill] sm:$0xff] }
 0x6b6   : > { %v5725_v2 = vsel %vm27488_vm13, %v13952_v47, %v13927_v43  ;;  %13266 = vmatpush1.bf16.msra.mxu1 %v13265_v29  ;;  %v28962_v19 = vsel %vm20496_vm12, 4294967295, %v28961_v19  ;;  %v28963_v31 = vmov 0  ;;  %v13948_v50 = vunpack.i.h.bf16 %v13946_v44 }
 0x6b7   : > { %v28964_v31 = vsel %vm20501_vm7, 4294967295, %v28963_v31  ;;  %v13947_v16 = vunpack.i.l.bf16 %v13946_v44  ;;  %vm20506_vm10 = vcmp.eq.s32.totalorder %v6101_v54, %v20398_v30  ;;  %v28965_v37 = vmov 0 }
 0x6b8   : > { %v28966_v37 = vsel %vm20506_vm10, 4294967295, %v28965_v37  ;;  %v5908_v43 = vand.u32 15, %v28967_v14  ;;  %v5698_v39 = vsel %vm27488_vm13, %v13933_v22, %v13953_v18  ;;  %v28968_v29 = vunpack.i.h.bf16 %v20381_v52 }
 0x6b9   : > { %v13267_v3 = vpack.c.bf16 %v5742_v58, %v5738_v35  ;;  %v6102_v21 = vshra.s32 %v28967_v14, 4  ;;  %v5699_v61 = vsel %vm27488_vm13, %v13947_v16, %v13937_v55  ;;  %v5702_v44 = vsel %vm27488_vm13, %v13948_v50, %v13942_v38  ;;  %v13956_v24 = vpop.permute.xlu1 %13955 }
 0x6ba   : > { %v5695_v33 = vsel %vm27488_vm13, %v28968_v29, %v13952_v47  ;;  %v5732_v54 = vmax.f32 %v20355_v17, %v5725_v2  ;;  %v5736_v13 = vmax.f32 %v20359_v63, %v5726_v48  ;;  %v5737_v18 = vmax.f32 %v20361_v5, %v5699_v61  ;;  %v28969_v17 = vld [vmem:[#allocation44_spill] sm:$0xff]  ;;  %v28970_v61 = vld [vmem:[#allocation45_spill] sm:$0xff] }
 0x6bb   : > { %v5741_v58 = vmax.f32 %v20311_v62, %v5702_v44  ;;  %v13958_v52 = vunpack.i.h.bf16 %v13956_v24  ;;  %v13957_v22 = vunpack.i.l.bf16 %v13956_v24  ;;  %13268 = vmatprep.subr.bf16.mxu1 %v13267_v3  ;;  %v5909_v63 = vand.u32 15, %v28969_v17 }
 0x6bc   : > { %v6103_v38 = vshra.s32 %v28969_v17, 4  ;;  %v5910_v5 = vand.u32 15, %v28970_v61  ;;  %v6104_v62 = vshra.s32 %v28970_v61, 4  ;;  %vm28971_vm6 = vcmask 916480  }
 0x6bd   : > { %v5727_v24 = vsel %vm28971_vm6, %v13957_v22, %v13947_v16  ;;  %vm28972_vm10 = vmmov %vm28971_vm6  ;;  %vm20545_vm7 = vcmp.eq.s32.totalorder %v5908_v43, %v20385_v10  ;;  %v28973_v47 = vmov 0  ;;  %vm20550_vm12 = vcmp.eq.s32.totalorder %v6102_v21, %v20387_v42 }
 0x6be   : > { %v5728_v55 = vsel %vm28972_vm10, %v13958_v52, %v13948_v50  ;;  %v28974_v47 = vsel %vm20545_vm7, 4294967295, %v28973_v47  ;;  %v28975_v35 = vmov 0  ;;  %v5735_v2 = vmax.f32 %v20335_v34, %v5698_v39  ;;  %vm28977_vm6 = vmand %vm20409_vm14, %vm20422_vm9 }
 0x6bf   : > { %v28976_v35 = vsel %vm20550_vm12, 4294967295, %v28975_v35  ;;  %v5731_v48 = vmax.f32 %v20301_v49, %v5695_v33  ;;  %v13269_v50 = vpack.c.bf16 %v5741_v58, %v5737_v18  ;;  %v5740_v16 = vmax.f32 %v20365_v8, %v5727_v24  ;;  %vm28978_vm10 = vmand %vm20417_vm5, %vm20427_vm3 }
 0x6c0   : > { %vm20567_vm13 = vmpackc.low %vm28978_vm10, %vm28977_vm6  ;;  %v28979_v29 = vmov 0  ;;  %vm28981_vm12 = vcmask 916480   ;;  %v28982_v49 = vunpack.i.h.bf16 %v20414_v26  ;;  %v13271_v8 = vpack.c.bf16 %v5736_v13, %v5732_v54  ;;  %v29024_v54 = vld [vmem:[#allocation52_spill] sm:$0xff] }
 0x6c1   : > { %v28980_v29 = vsel %vm20567_vm13, 4294967295, %v28979_v29  ;;  %v5701_v33 = vsel %vm28981_vm12, %v13938_v12, %v13957_v22  ;;  %vm28983_vm0 = vmmov %vm28981_vm12  ;;  %v5744_v9 = vmax.f32 %v20325_v28, %v5728_v55  ;;  %vm28984_vm14 = vnez %v28954_v40  ;;  %13270 = vmatpush1.bf16.msra.mxu1 %v13269_v50  ;;  %v28991_v28 = vld [vmem:[#allocation48_spill] sm:$0xff]  ;;  %v29019_v40 = vld [vmem:[#allocation50_spill] sm:$0xff] }
 0x6c2   : > { %v5704_v34 = vsel %vm28983_vm0, %v28982_v49, %v13958_v52  ;;  %vm20589_vm12 = vcmp.eq.s32.totalorder %v5909_v63, %v20385_v10  ;;  %vm20594_vm0 = vcmp.eq.s32.totalorder %v6103_v38, %v20387_v42  ;;  %v5911_v26 = vand.u32 15, %v28991_v28  ;;  %13272 = vmatprep.subr.bf16.mxu1 %v13271_v8  ;;  %vm28992_vm10 = vmand %vm20436_vm8, %vm20451_vm4  ;;  %v14507_v22 = vld [vmem:[%s29413_s3 + $0x80] ss:$16 sps:$4 sm:$0xff]  }
 0x6c3   : > { %v28988_v57 = vsel %vm20589_vm12, 4294967295, %v28987_v57  ;;  %v6105_v32 = vshra.s32 %v28991_v28, 4  ;;  %v13275_v46 = vpack.c.bf16 %v5744_v9, %v5740_v16  ;;  %vm28993_vm6 = vnez %v28950_v1  ;;  %vm29005_vm4 = vmand %vm20466_vm11, %vm20479_vm2 }
 0x6c4   : > { %vm28994_vm5 = vmand %vm20446_vm1, %vm28993_vm6  ;;  %v28995_v12 = vmov 0  ;;  %vm28997_vm13 = vnez %v28966_v37  ;;  %vm28998_vm9 = vnez %v28962_v19  ;;  %vm20619_vm12 = vcmp.eq.s32.totalorder %v5908_v43, %v20396_v7 }
 0x6c5   : > { %vm20610_vm7 = vmpackc.low %vm28994_vm5, %vm28992_vm10  ;;  %v29000_v41 = vsel %vm20619_vm12, 4294967295, %v28999_v41  ;;  %vm20624_vm8 = vcmp.eq.s32.totalorder %v5909_v63, %v20396_v7  ;;  %vm20629_vm1 = vcmp.eq.s32.totalorder %v6102_v21, %v20398_v30  ;;  %v5739_v1 = vmax.f32 %v20342_v4, %v5701_v33  ;;  %v29148_v63 = vld [vmem:[#allocation22_spill] sm:$0xff] }
 0x6c6   : > { %v28996_v12 = vsel %vm20610_vm7, 4294967295, %v28995_v12  ;;  %v29002_v0 = vsel %vm20624_vm8, 4294967295, %v29001_v0  ;;  %v29004_v25 = vsel %vm20629_vm1, 4294967295, %v29003_v25  ;;  %v5743_v39 = vmax.f32 %v20316_v53, %v5704_v34  ;;  %vm29006_vm5 = vmand %vm28984_vm14, %vm20484_vm15 }
 0x6c7   : > { %v13273_v3 = vpack.c.bf16 %v5735_v2, %v5731_v48  ;;  %vm20645_vm6 = vmpackc.low %vm29006_vm5, %vm29005_vm4  ;;  %v29007_v21 = vmov 0  ;;  %vm29009_vm10 = vnez %v28976_v35  ;;  %vm29010_vm3 = vnez %v28974_v47  ;;  %v29057_v2 = vld [vmem:[#allocation59_spill] sm:$0xff] }
 0x6c8   : > { %v29008_v21 = vsel %vm20645_vm6, 4294967295, %v29007_v21  ;;  %vm20654_vm8 = vcmp.eq.s32.totalorder %v6103_v38, %v20398_v30  ;;  %vm29013_vm11 = vcmask 261120   ;;  %vm29014_vm2 = vnez %v28988_v57  ;;  %vm29028_vm1 = vmand %vm28998_vm9, %vm28997_vm13  ;;  %v29181_v57 = vld [vmem:[#allocation54_spill] sm:$0xff] }
 0x6c9   : > { %12017 = vmatmul.mubr.msk.f32.vlgmr.msra.gmra.mrb[32].mxu1 %vm29013_vm11, %v28051_v27  ;;  %vm20665_vm14 = vcmp.eq.s32.totalorder %v5910_v5, %v20385_v10  ;;  %v29015_v4 = vmov 0  ;;  %vm20670_vm4 = vcmp.eq.s32.totalorder %v6104_v62, %v20387_v42  ;;  %v5912_v56 = vand.u32 15, %v29019_v40  ;;  %vm29036_vm13 = vmand %vm29010_vm3, %vm29009_vm10 }
 0x6ca   : > { %v29016_v4 = vsel %vm20665_vm14, 4294967295, %v29015_v4  ;;  %v6106_v45 = vshra.s32 %v29019_v40, 4  ;;  %13274 = vmatpush1.bf16.msra.mxu1 %v13273_v3  ;;  %5820 = vmatprep.mubr.f32.mxu1 %v28081_v20  ;;  %vm20682_vm11 = vcmp.eq.s32.totalorder %v5911_v26, %v20385_v10  ;;  %v29020_v43 = vmov 0  ;;  %vm29037_vm9 = vmand %vm29014_vm2, %vm20594_vm0 }
 0x6cb   : > { %v29021_v43 = vsel %vm20682_vm11, 4294967295, %v29020_v43  ;;  %vm20687_vm15 = vcmp.eq.s32.totalorder %v6105_v32, %v20387_v42  ;;  %v29022_v44 = vmov 0  ;;  %v5913_v18 = vand.u32 15, %v29024_v54  ;;  %13276 = vmatprep.subr.bf16.mxu1 %v13275_v46 }
 0x6cc   : > { %v29023_v44 = vsel %vm20687_vm15, 4294967295, %v29022_v44  ;;  %v6107_v58 = vshra.s32 %v29024_v54, 4  ;;  %vm29025_vm7 = vnez %v28960_v51  ;;  %vm29026_vm6 = vnez %v28964_v31 }
 0x6cd   : > { %vm29027_vm5 = vmand %vm29025_vm7, %vm29026_vm6  ;;  %v29029_v52 = vmov 0  ;;  %vm29031_vm11 = vnez %v29002_v0  ;;  %vm20712_vm14 = vcmp.eq.s32.totalorder %v5910_v5, %v20396_v7  ;;  %v29032_v51 = vmov 0 }
 0x6ce   : > { %vm20703_vm12 = vmpackc.low %vm29028_vm1, %vm29027_vm5  ;;  %v29033_v51 = vsel %vm20712_vm14, 4294967295, %v29032_v51  ;;  %vm20717_vm7 = vcmp.eq.s32.totalorder %v6104_v62, %v20398_v30  ;;  %v29034_v19 = vmov 0  ;;  %v13277_v31 = vpack.c.bf16 %v5743_v39, %v5739_v1  ;;  %v29052_v62 = vld [vmem:[#allocation55_spill] sm:$0xff] }
 0x6cf   : > { %v29030_v52 = vsel %vm20703_vm12, 4294967295, %v29029_v52  ;;  %v29035_v19 = vsel %vm20717_vm7, 4294967295, %v29034_v19  ;;  %vm20731_vm1 = vmpackc.low %vm29037_vm9, %vm29036_vm13  ;;  %v29038_v37 = vmov 0  ;;  %vm29040_vm6 = vnez %v29016_v4 }
 0x6d0   : > { %v29039_v37 = vsel %vm20731_vm1, 4294967295, %v29038_v37  ;;  %vm20740_vm15 = vcmp.eq.s32.totalorder %v5911_v26, %v20396_v7  ;;  %vm20745_vm3 = vcmp.eq.s32.totalorder %v6105_v32, %v20398_v30  ;;  %vm29045_vm0 = vcmask 261120   ;;  %13278 = vmatpush1.bf16.msra.mxu1 %v13277_v31 }
 0x6d1   : > { %12018 = vmatmul.mubr.msk.f32.gmra.mrb[34].mxu1 %vm29045_vm0, %v28103_v11  ;;  %vm29046_vm10 = vnez %v29023_v44  ;;  %vm29047_vm2 = vnez %v29021_v43  ;;  %vm20756_vm9 = vcmp.eq.s32.totalorder %v5912_v56, %v20385_v10  ;;  %v29048_v38 = vmov 0 }
 0x6d2   : > { %v29049_v38 = vsel %vm20756_vm9, 4294967295, %v29048_v38  ;;  %vm20761_vm5 = vcmp.eq.s32.totalorder %v6106_v45, %v20387_v42  ;;  %v5914_v24 = vand.u32 15, %v29052_v62  ;;  %v6108_v55 = vshra.s32 %v29052_v62, 4  ;;  %5891 = vmatprep.mubr.f32.mxu1 %v28081_v20 }
 0x6d3   : > { %vm20773_vm13 = vcmp.eq.s32.totalorder %v5913_v18, %v20385_v10  ;;  %v29053_v47 = vmov 0  ;;  %vm20778_vm1 = vcmp.eq.s32.totalorder %v6107_v58, %v20387_v42  ;;  %v29055_v35 = vmov 0 }
 0x6d4   : > { %v29054_v47 = vsel %vm20773_vm13, 4294967295, %v29053_v47  ;;  %v29056_v35 = vsel %vm20778_vm1, 4294967295, %v29055_v35  ;;  %v5915_v48 = vand.u32 15, %v29057_v2  ;;  %v6109_v50 = vshra.s32 %v29057_v2, 4  ;;  %vm29062_vm13 = vmand %vm29031_vm11, %vm20654_vm8 }
 0x6d5   : > { %vm29058_vm12 = vnez %v28980_v29  ;;  %vm29059_vm0 = vnez %v29000_v41  ;;  %vm29060_vm7 = vnez %v29004_v25  ;;  %v29063_v16 = vmov 0  ;;  %vm29069_vm8 = vmand %vm29040_vm6, %vm20670_vm4 }
 0x6d6   : > { %13280 = vmatprep.subr.msk.bf16.mxu1 %vm29058_vm12, %v28087_v23  ;;  %vm29061_vm14 = vmand %vm29059_vm0, %vm29060_vm7  ;;  %vm20806_vm12 = vcmp.eq.s32.totalorder %v5912_v56, %v20396_v7  ;;  %v29065_v29 = vmov 0  ;;  %vm20811_vm7 = vcmp.eq.s32.totalorder %v6106_v45, %v20398_v30  ;;  %v29067_v33 = vmov 0 }
 0x6d7   : > { %vm20797_vm9 = vmpackc.low %vm29062_vm13, %vm29061_vm14  ;;  %v29066_v29 = vsel %vm20806_vm12, 4294967295, %v29065_v29  ;;  %v29068_v33 = vsel %vm20811_vm7, 4294967295, %v29067_v33  ;;  %v29071_v49 = vmov 0  ;;  %vm29073_vm13 = vnez %v29049_v38 }
 0x6d8   : > { %v29064_v16 = vsel %vm20797_vm9, 4294967295, %v29063_v16  ;;  %vm29070_vm14 = vmand %vm29047_vm2, %vm29046_vm10  ;;  %vm20834_vm1 = vcmp.eq.s32.totalorder %v5913_v18, %v20396_v7  ;;  %vm20839_vm4 = vcmp.eq.s32.totalorder %v6107_v58, %v20398_v30  ;;  %vm29078_vm6 = vcmask 261120  }
 0x6d9   : > { %vm20825_vm11 = vmpackc.low %vm29070_vm14, %vm29069_vm8  ;;  %12019 = vmatmul.mubr.msk.f32.vlgmr.msra.gmra.mrb[36].mxu1 %vm29078_vm6, %v28051_v27  ;;  %vm29079_vm10 = vnez %v29056_v35  ;;  %vm29080_vm2 = vnez %v29054_v47  ;;  %vm20850_vm14 = vcmp.eq.s32.totalorder %v5914_v24, %v20385_v10  ;;  %v29081_v9 = vmov 0  ;;  %v29154_v47 = vld [vmem:[#allocation21_spill] sm:$0xff] }
 0x6da   : > { %v29072_v49 = vsel %vm20825_vm11, 4294967295, %v29071_v49  ;;  %v29082_v9 = vsel %vm20850_vm14, 4294967295, %v29081_v9  ;;  %vm20855_vm0 = vcmp.eq.s32.totalorder %v6108_v55, %v20387_v42  ;;  %v5916_v13 = vand.u32 15, %v16723_v59  ;;  %5897 = vmatprep.mubr.f32.mxu1 %v28081_v20 }
 0x6db   : > { %v6110_v26 = vshra.s32 %v16723_v59, 4  ;;  %vm29085_vm6 = vnez %v28996_v12  ;;  %vm20870_vm11 = vcmp.eq.s32.totalorder %v5915_v48, %v20385_v10  ;;  %v29086_v32 = vmov 0 }
 0x6dc   : > { %13282 = vmatpush1.bf16.msk.msra.mxu1 %vm29085_vm6, %v28087_v23  ;;  %v29087_v32 = vsel %vm20870_vm11, 4294967295, %v29086_v32  ;;  %vm20875_vm9 = vcmp.eq.s32.totalorder %v6109_v50, %v20387_v42  ;;  %v29088_v46 = vmov 0  ;;  %v5917_v41 = vand.u32 15, %v16863_v60  ;;  %vm29094_vm11 = vmand %vm20740_vm15, %vm20745_vm3 }
 0x6dd   : > { %v29089_v46 = vsel %vm20875_vm9, 4294967295, %v29088_v46  ;;  %v6111_v12 = vshra.s32 %v16863_v60, 4  ;;  %vm29090_vm6 = vnez %v29008_v21  ;;  %vm29091_vm8 = vnez %v29033_v51  ;;  %vm29101_vm15 = vmand %vm29073_vm13, %vm20761_vm5 }
 0x6de   : > { %13284 = vmatprep.subr.msk.bf16.mxu1 %vm29090_vm6, %v28087_v23  ;;  %vm29092_vm7 = vnez %v29035_v19  ;;  %v29095_v0 = vmov 0  ;;  %vm20903_vm6 = vcmp.eq.s32.totalorder %v5914_v24, %v20396_v7  ;;  %v29097_v25 = vmov 0  ;;  %vm29102_vm3 = vmand %vm29080_vm2, %vm29079_vm10 }
 0x6df   : > { %vm29093_vm12 = vmand %vm29091_vm8, %vm29092_vm7  ;;  %v29098_v25 = vsel %vm20903_vm6, 4294967295, %v29097_v25  ;;  %vm20908_vm7 = vcmp.eq.s32.totalorder %v6108_v55, %v20398_v30  ;;  %v29099_v1 = vmov 0  ;;  %v29103_v39 = vmov 0 }
 0x6e0   : > { %vm20894_vm14 = vmpackc.low %vm29094_vm11, %vm29093_vm12  ;;  %v29100_v1 = vsel %vm20908_vm7, 4294967295, %v29099_v1  ;;  %vm29105_vm11 = vnez %v29082_v9  ;;  %vm20931_vm9 = vcmp.eq.s32.totalorder %v5915_v48, %v20396_v7  ;;  %vm20936_vm5 = vcmp.eq.s32.totalorder %v6109_v50, %v20398_v30 }
 0x6e1   : > { %v29096_v0 = vsel %vm20894_vm14, 4294967295, %v29095_v0  ;;  %vm20922_vm12 = vmpackc.low %vm29102_vm3, %vm29101_vm15  ;;  %vm29110_vm13 = vcmask 261120   ;;  %vm29111_vm10 = vnez %v29089_v46  ;;  %vm29112_vm2 = vnez %v29087_v32 }
 0x6e2   : > { %v29104_v39 = vsel %vm20922_vm12, 4294967295, %v29103_v39  ;;  %12020 = vmatmul.mubr.msk.f32.gmra.mrb[38].mxu1 %vm29110_vm13, %v28103_v11  ;;  %vm20947_vm3 = vcmp.eq.s32.totalorder %v5916_v13, %v20385_v10  ;;  %v29113_v53 = vmov 0  ;;  %vm20952_vm8 = vcmp.eq.s32.totalorder %v6110_v26, %v20387_v42 }
 0x6e3   : > { %v29114_v53 = vsel %vm20947_vm3, 4294967295, %v29113_v53  ;;  %v6112_v56 = vshra.s32 %v17028_v15, 4  ;;  %vm29117_vm13 = vnez %v29030_v52  ;;  %vm20966_vm12 = vcmp.eq.s32.totalorder %v5917_v41, %v20385_v10 }
 0x6e4   : > { %13286 = vmatpush1.bf16.msk.msra.mxu1 %vm29117_vm13, %v28087_v23  ;;  %v29118_v11 = vmov 0  ;;  %vm20971_vm14 = vcmp.eq.s32.totalorder %v6111_v12, %v20387_v42  ;;  %v29120_v45 = vmov 0  ;;  %v5919_v43 = vand.u32 15, %v17065_v6 }
 0x6e5   : > { %v29119_v11 = vsel %vm20966_vm12, 4294967295, %v29118_v11  ;;  %v29121_v45 = vsel %vm20971_vm14, 4294967295, %v29120_v45  ;;  %v6113_v44 = vshra.s32 %v17065_v6, 4  ;;  %vm29122_vm13 = vnez %v29039_v37  ;;  %vm29126_vm12 = vmand %vm20834_vm1, %vm20839_vm4 }
 0x6e6   : > { %13288 = vmatprep.subr.msk.bf16.mxu1 %vm29122_vm13, %v28087_v23  ;;  %vm29123_vm15 = vnez %v29066_v29  ;;  %vm29124_vm7 = vnez %v29068_v33  ;;  %v29127_v18 = vmov 0  ;;  %vm20999_vm13 = vcmp.eq.s32.totalorder %v5916_v13, %v20396_v7  ;;  %vm29133_vm1 = vmand %vm29105_vm11, %vm20855_vm0 }
 0x6e7   : > { %vm29125_vm6 = vmand %vm29123_vm15, %vm29124_vm7  ;;  %v29129_v58 = vmov 0  ;;  %vm21004_vm7 = vcmp.eq.s32.totalorder %v6110_v26, %v20398_v30  ;;  %v29131_v52 = vmov 0  ;;  %v29135_v51 = vmov 0 }
 0x6e8   : > { %vm20990_vm3 = vmpackc.low %vm29126_vm12, %vm29125_vm6  ;;  %v29130_v58 = vsel %vm20999_vm13, 4294967295, %v29129_v58  ;;  %v29132_v52 = vsel %vm21004_vm7, 4294967295, %v29131_v52  ;;  %vm29137_vm12 = vnez %v29114_v53  ;;  %vm21027_vm14 = vcmp.eq.s32.totalorder %v5917_v41, %v20396_v7  ;;  %v29187_v41 = vld [vmem:[#allocation42_spill] sm:$0xff] }
 0x6e9   : > { %v29128_v18 = vsel %vm20990_vm3, 4294967295, %v29127_v18  ;;  %vm29134_vm4 = vmand %vm29112_vm2, %vm29111_vm10  ;;  %vm21032_vm0 = vcmp.eq.s32.totalorder %v6111_v12, %v20398_v30  ;;  %vm29142_vm11 = vnez %v29121_v45  ;;  %vm29143_vm10 = vnez %v29119_v11 }
 0x6ea   : > { %vm21018_vm6 = vmpackc.low %vm29134_vm4, %vm29133_vm1  ;;  %vm21041_vm1 = vcmp.eq.s32.totalorder %v5918_v36, %v20385_v10  ;;  %v29144_v37 = vmov 0  ;;  %vm21046_vm4 = vcmp.eq.s32.totalorder %v6112_v56, %v20387_v42  ;;  %v5920_v38 = vand.u32 15, %v29148_v63 }
 0x6eb   : > { %v29136_v51 = vsel %vm21018_vm6, 4294967295, %v29135_v51  ;;  %v29145_v37 = vsel %vm21041_vm1, 4294967295, %v29144_v37  ;;  %v6114_v5 = vshra.s32 %v29148_v63, 4  ;;  %vm29149_vm15 = vnez %v29064_v16 }
 0x6ec   : > { %13290 = vmatpush1.bf16.msk.msra.mxu1 %vm29149_vm15, %v28087_v23  ;;  %vm21060_vm6 = vcmp.eq.s32.totalorder %v5919_v43, %v20385_v10  ;;  %v29150_v24 = vmov 0  ;;  %vm21065_vm3 = vcmp.eq.s32.totalorder %v6113_v44, %v20387_v42  ;;  %v29152_v55 = vmov 0 }
 0x6ed   : > { %v29151_v24 = vsel %vm21060_vm6, 4294967295, %v29150_v24  ;;  %v29153_v55 = vsel %vm21065_vm3, 4294967295, %v29152_v55  ;;  %v5921_v35 = vand.u32 15, %v29154_v47  ;;  %v6115_v48 = vshra.s32 %v29154_v47, 4  ;;  %vm29159_vm6 = vmand %vm20931_vm9, %vm20936_vm5 }
 0x6ee   : > { %vm29155_vm15 = vnez %v29072_v49  ;;  %vm29156_vm2 = vnez %v29098_v25  ;;  %vm29157_vm7 = vnez %v29100_v1  ;;  %v29160_v50 = vmov 0  ;;  %vm29166_vm9 = vmand %vm29137_vm12, %vm20952_vm8  ;;  %v29253_v49 = vld [vmem:[#allocation57_spill] sm:$0xff] }
 0x6ef   : > { %13292 = vmatprep.subr.msk.bf16.mxu1 %vm29155_vm15, %v28087_v23  ;;  %vm29158_vm13 = vmand %vm29156_vm2, %vm29157_vm7  ;;  %vm21093_vm15 = vcmp.eq.s32.totalorder %v5918_v36, %v20396_v7  ;;  %v29162_v16 = vmov 0  ;;  %vm21098_vm7 = vcmp.eq.s32.totalorder %v6112_v56, %v20398_v30  ;;  %v29164_v29 = vmov 0  ;;  %v29214_v56 = vld [vmem:[#allocation23_spill] sm:$0xff] }
 0x6f0   : > { %vm21084_vm1 = vmpackc.low %vm29159_vm6, %vm29158_vm13  ;;  %v29163_v16 = vsel %vm21093_vm15, 4294967295, %v29162_v16  ;;  %v29165_v29 = vsel %vm21098_vm7, 4294967295, %v29164_v29  ;;  %v29168_v33 = vmov 0  ;;  %vm29170_vm6 = vnez %v29145_v37 }
 0x6f1   : > { %v29161_v50 = vsel %vm21084_vm1, 4294967295, %v29160_v50  ;;  %vm29167_vm5 = vmand %vm29143_vm10, %vm29142_vm11  ;;  %vm21121_vm3 = vcmp.eq.s32.totalorder %v5919_v43, %v20396_v7  ;;  %vm21126_vm8 = vcmp.eq.s32.totalorder %v6113_v44, %v20398_v30  ;;  %vm29175_vm12 = vnez %v29153_v55  ;;  %v29247_v55 = vld [vmem:[#allocation51_spill] sm:$0xff] }
 0x6f2   : > { %vm21112_vm13 = vmpackc.low %vm29167_vm5, %vm29166_vm9  ;;  %vm29176_vm11 = vnez %v29151_v24  ;;  %vm21135_vm9 = vcmp.eq.s32.totalorder %v5920_v38, %v20385_v10  ;;  %v29177_v8 = vmov 0  ;;  %vm21140_vm5 = vcmp.eq.s32.totalorder %v6114_v5, %v20387_v42  ;;  %v29326_v24 = vld [vmem:[#allocation61_spill] sm:$0xff] }
 0x6f3   : > { %v29169_v33 = vsel %vm21112_vm13, 4294967295, %v29168_v33  ;;  %v29178_v8 = vsel %vm21135_vm9, 4294967295, %v29177_v8  ;;  %v5922_v13 = vand.u32 15, %v29181_v57  ;;  %v6116_v26 = vshra.s32 %v29181_v57, 4 }
 0x6f4   : > { %vm29182_vm2 = vnez %v29096_v0  ;;  %vm21154_vm13 = vcmp.eq.s32.totalorder %v5921_v35, %v20385_v10  ;;  %v29183_v32 = vmov 0  ;;  %vm21159_vm1 = vcmp.eq.s32.totalorder %v6115_v48, %v20387_v42 }
 0x6f5   : > { %13294 = vmatpush1.bf16.msk.msra.mxu1 %vm29182_vm2, %v28087_v23  ;;  %v29184_v32 = vsel %vm21154_vm13, 4294967295, %v29183_v32  ;;  %v29185_v46 = vmov 0  ;;  %v5923_v12 = vand.u32 15, %v29187_v41  ;;  %v6117_v0 = vshra.s32 %v29187_v41, 4  ;;  %vm29192_vm13 = vmand %vm21027_vm14, %vm21032_vm0 }
 0x6f6   : > { %v29186_v46 = vsel %vm21159_vm1, 4294967295, %v29185_v46  ;;  %vm29188_vm2 = vnez %v29104_v39  ;;  %vm29189_vm10 = vnez %v29130_v58  ;;  %vm29190_vm7 = vnez %v29132_v52  ;;  %vm29199_vm14 = vmand %vm29170_vm6, %vm21046_vm4  ;;  %v29220_v58 = vld [vmem:[#allocation25_spill] sm:$0xff] }
 0x6f7   : > { %13296 = vmatprep.subr.msk.bf16.mxu1 %vm29188_vm2, %v28087_v23  ;;  %vm29191_vm15 = vmand %vm29189_vm10, %vm29190_vm7  ;;  %v29193_v25 = vmov 0  ;;  %vm21187_vm2 = vcmp.eq.s32.totalorder %v5920_v38, %v20396_v7  ;;  %v29195_v1 = vmov 0  ;;  %vm21192_vm7 = vcmp.eq.s32.totalorder %v6114_v5, %v20398_v30 }
 0x6f8   : > { %vm21178_vm9 = vmpackc.low %vm29192_vm13, %vm29191_vm15  ;;  %v29196_v1 = vsel %vm21187_vm2, 4294967295, %v29195_v1  ;;  %v29197_v39 = vmov 0  ;;  %v29201_v3 = vmov 0  ;;  %vm29203_vm13 = vnez %v29178_v8 }
 0x6f9   : > { %v29194_v25 = vsel %vm21178_vm9, 4294967295, %v29193_v25  ;;  %v29198_v39 = vsel %vm21192_vm7, 4294967295, %v29197_v39  ;;  %vm29200_vm0 = vmand %vm29176_vm11, %vm29175_vm12  ;;  %vm21215_vm1 = vcmp.eq.s32.totalorder %v5921_v35, %v20396_v7  ;;  %vm21220_vm4 = vcmp.eq.s32.totalorder %v6115_v48, %v20398_v30 }
 0x6fa   : > { %vm21206_vm15 = vmpackc.low %vm29200_vm0, %vm29199_vm14  ;;  %vm29208_vm6 = vnez %v29186_v46  ;;  %vm29209_vm12 = vnez %v29184_v32  ;;  %vm21229_vm14 = vcmp.eq.s32.totalorder %v5922_v13, %v20385_v10  ;;  %v29210_v4 = vmov 0 }
 0x6fb   : > { %v29202_v3 = vsel %vm21206_vm15, 4294967295, %v29201_v3  ;;  %v29211_v4 = vsel %vm21229_vm14, 4294967295, %v29210_v4  ;;  %vm21234_vm0 = vcmp.eq.s32.totalorder %v6116_v26, %v20387_v42  ;;  %v5924_v11 = vand.u32 15, %v29214_v56 }
 0x6fc   : > { %v6118_v45 = vshra.s32 %v29214_v56, 4  ;;  %vm29215_vm10 = vnez %v29128_v18  ;;  %vm21248_vm15 = vcmp.eq.s32.totalorder %v5923_v12, %v20385_v10  ;;  %v29216_v43 = vmov 0 }
 0x6fd   : > { %13298 = vmatpush1.bf16.msk.msra.mxu1 %vm29215_vm10, %v28087_v23  ;;  %v29217_v43 = vsel %vm21248_vm15, 4294967295, %v29216_v43  ;;  %vm21253_vm9 = vcmp.eq.s32.totalorder %v6117_v0, %v20387_v42  ;;  %v29218_v44 = vmov 0  ;;  %v5925_v52 = vand.u32 15, %v29220_v58  ;;  %vm29225_vm15 = vmand %vm21121_vm3, %vm21126_vm8 }
 0x6fe   : > { %v29219_v44 = vsel %vm21253_vm9, 4294967295, %v29218_v44  ;;  %v6119_v18 = vshra.s32 %v29220_v58, 4  ;;  %vm29221_vm10 = vnez %v29136_v51  ;;  %vm29222_vm11 = vnez %v29163_v16  ;;  %vm29232_vm3 = vmand %vm29203_vm13, %vm21140_vm5 }
 0x6ff   : > { %13300 = vmatprep.subr.msk.bf16.mxu1 %vm29221_vm10, %v28087_v23  ;;  %vm29223_vm7 = vnez %v29165_v29  ;;  %v29226_v19 = vmov 0  ;;  %vm21281_vm10 = vcmp.eq.s32.totalorder %v5922_v13, %v20396_v7  ;;  %v29228_v51 = vmov 0  ;;  %vm29233_vm8 = vmand %vm29209_vm12, %vm29208_vm6 }
 0x700   : > { %vm29224_vm2 = vmand %vm29222_vm11, %vm29223_vm7  ;;  %v29229_v51 = vsel %vm21281_vm10, 4294967295, %v29228_v51  ;;  %vm21286_vm7 = vcmp.eq.s32.totalorder %v6116_v26, %v20398_v30  ;;  %v29230_v31 = vmov 0  ;;  %v29234_v37 = vmov 0 }
 0x701   : > { %vm21272_vm14 = vmpackc.low %vm29225_vm15, %vm29224_vm2  ;;  %v29231_v31 = vsel %vm21286_vm7, 4294967295, %v29230_v31  ;;  %vm29236_vm15 = vnez %v29211_v4  ;;  %vm21309_vm9 = vcmp.eq.s32.totalorder %v5923_v12, %v20396_v7  ;;  %vm21314_vm5 = vcmp.eq.s32.totalorder %v6117_v0, %v20398_v30  ;;  %v29280_v0 = vld [vmem:[#allocation58_spill] sm:$0xff] }
 0x702   : > { %v29227_v19 = vsel %vm21272_vm14, 4294967295, %v29226_v19  ;;  %vm21300_vm2 = vmpackc.low %vm29233_vm8, %vm29232_vm3  ;;  %vm29241_vm13 = vnez %v29219_v44  ;;  %vm29242_vm6 = vnez %v29217_v43  ;;  %vm21323_vm3 = vcmp.eq.s32.totalorder %v5924_v11, %v20385_v10  ;;  %v29286_v4 = vld [vmem:[#allocation30_spill] sm:$0xff] }
 0x703   : > { %v29235_v37 = vsel %vm21300_vm2, 4294967295, %v29234_v37  ;;  %v29243_v5 = vmov 0  ;;  %vm21328_vm8 = vcmp.eq.s32.totalorder %v6118_v45, %v20387_v42  ;;  %v5926_v35 = vand.u32 15, %v29247_v55  ;;  %v14495_v44 = vld [vmem:[%s29413_s3 + $0x40] ss:$16 sps:$4 sm:$0xff]  }
 0x704   : > { %v29244_v5 = vsel %vm21323_vm3, 4294967295, %v29243_v5  ;;  %v6120_v48 = vshra.s32 %v29247_v55, 4  ;;  %vm29248_vm11 = vnez %v29161_v50  ;;  %vm21342_vm2 = vcmp.eq.s32.totalorder %v5925_v52, %v20385_v10 }
 0x705   : > { %13302 = vmatpush1.bf16.msk.msra.mxu1 %vm29248_vm11, %v28087_v23  ;;  %v29249_v16 = vmov 0  ;;  %vm21347_vm14 = vcmp.eq.s32.totalorder %v6119_v18, %v20387_v42  ;;  %v29251_v29 = vmov 0  ;;  %v5927_v34 = vand.u32 15, %v29253_v49 }
 0x706   : > { %v29250_v16 = vsel %vm21342_vm2, 4294967295, %v29249_v16  ;;  %v29252_v29 = vsel %vm21347_vm14, 4294967295, %v29251_v29  ;;  %v6121_v50 = vshra.s32 %v29253_v49, 4  ;;  %vm29254_vm11 = vnez %v29169_v33  ;;  %vm29258_vm2 = vmand %vm21215_vm1, %vm21220_vm4 }
 0x707   : > { %13304 = vmatprep.subr.msk.bf16.mxu1 %vm29254_vm11, %v28087_v23  ;;  %vm29255_vm12 = vnez %v29196_v1  ;;  %vm29256_vm7 = vnez %v29198_v39  ;;  %v29259_v8 = vmov 0  ;;  %vm21375_vm11 = vcmp.eq.s32.totalorder %v5924_v11, %v20396_v7  ;;  %vm29265_vm1 = vmand %vm29236_vm15, %vm21234_vm0 }
 0x708   : > { %vm29257_vm10 = vmand %vm29255_vm12, %vm29256_vm7  ;;  %v29261_v33 = vmov 0  ;;  %vm21380_vm7 = vcmp.eq.s32.totalorder %v6118_v45, %v20398_v30  ;;  %v29263_v9 = vmov 0  ;;  %v29267_v13 = vmov 0 }
 0x709   : > { %vm21366_vm3 = vmpackc.low %vm29258_vm2, %vm29257_vm10  ;;  %v29262_v33 = vsel %vm21375_vm11, 4294967295, %v29261_v33  ;;  %v29264_v9 = vsel %vm21380_vm7, 4294967295, %v29263_v9  ;;  %vm29269_vm2 = vnez %v29244_v5  ;;  %vm21403_vm14 = vcmp.eq.s32.totalorder %v5925_v52, %v20396_v7  ;;  %v14503_v52 = vld [vmem:[%s29413_s3 + $0x64] ss:$16 sps:$4 sm:$0xff]  }
 0x70a   : > { %v29260_v8 = vsel %vm21366_vm3, 4294967295, %v29259_v8  ;;  %vm29266_vm4 = vmand %vm29242_vm6, %vm29241_vm13  ;;  %vm21408_vm0 = vcmp.eq.s32.totalorder %v6119_v18, %v20398_v30  ;;  %vm29274_vm15 = vnez %v29252_v29  ;;  %vm29275_vm13 = vnez %v29250_v16  ;;  %v29379_v18 = vld [vmem:[#allocation40_spill] sm:$0xff] }
 0x70b   : > { %vm21394_vm10 = vmpackc.low %vm29266_vm4, %vm29265_vm1  ;;  %vm21417_vm1 = vcmp.eq.s32.totalorder %v5926_v35, %v20385_v10  ;;  %v29276_v46 = vmov 0  ;;  %vm21422_vm4 = vcmp.eq.s32.totalorder %v6120_v48, %v20387_v42  ;;  %v29278_v12 = vmov 0  ;;  %v14525_v29 = vld [vmem:[%s29413_s3 + $0xe0] ss:$16 sps:$4 sm:$0xff]  }
 0x70c   : > { %v29268_v13 = vsel %vm21394_vm10, 4294967295, %v29267_v13  ;;  %v29277_v46 = vsel %vm21417_vm1, 4294967295, %v29276_v46  ;;  %v29279_v12 = vsel %vm21422_vm4, 4294967295, %v29278_v12  ;;  %v5928_v1 = vand.u32 15, %v29280_v0 }
 0x70d   : > { %v6122_v39 = vshra.s32 %v29280_v0, 4  ;;  %vm29281_vm12 = vnez %v29194_v25  ;;  %vm21436_vm10 = vcmp.eq.s32.totalorder %v5927_v34, %v20385_v10  ;;  %v29282_v21 = vmov 0 }
 0x70e   : > { %13306 = vmatpush1.bf16.msk.msra.mxu1 %vm29281_vm12, %v28087_v23  ;;  %v29283_v21 = vsel %vm21436_vm10, 4294967295, %v29282_v21  ;;  %vm21441_vm3 = vcmp.eq.s32.totalorder %v6121_v50, %v20387_v42  ;;  %v29284_v53 = vmov 0  ;;  %v5929_v36 = vand.u32 15, %v29286_v4  ;;  %vm29291_vm10 = vmand %vm21309_vm9, %vm21314_vm5 }
 0x70f   : > { %v29285_v53 = vsel %vm21441_vm3, 4294967295, %v29284_v53  ;;  %v6123_v25 = vshra.s32 %v29286_v4, 4  ;;  %vm29287_vm12 = vnez %v29202_v3  ;;  %vm29288_vm6 = vnez %v29229_v51  ;;  %vm29298_vm9 = vmand %vm29269_vm2, %vm21328_vm8 }
 0x710   : > { %13308 = vmatprep.subr.msk.bf16.mxu1 %vm29287_vm12, %v28087_v23  ;;  %vm29289_vm7 = vnez %v29231_v31  ;;  %v29292_v11 = vmov 0  ;;  %vm21469_vm12 = vcmp.eq.s32.totalorder %v5926_v35, %v20396_v7  ;;  %v29294_v3 = vmov 0  ;;  %vm29299_vm5 = vmand %vm29275_vm13, %vm29274_vm15 }
 0x711   : > { %vm29290_vm11 = vmand %vm29288_vm6, %vm29289_vm7  ;;  %v29295_v3 = vsel %vm21469_vm12, 4294967295, %v29294_v3  ;;  %vm21474_vm7 = vcmp.eq.s32.totalorder %v6120_v48, %v20398_v30  ;;  %v29296_v45 = vmov 0  ;;  %v29300_v43 = vmov 0 }
 0x712   : > { %vm21460_vm1 = vmpackc.low %vm29291_vm10, %vm29290_vm11  ;;  %v29297_v45 = vsel %vm21474_vm7, 4294967295, %v29296_v45  ;;  %vm29302_vm10 = vnez %v29277_v46  ;;  %vm21497_vm3 = vcmp.eq.s32.totalorder %v5927_v34, %v20396_v7  ;;  %vm21502_vm8 = vcmp.eq.s32.totalorder %v6121_v50, %v20398_v30  ;;  %v29410_v46 = vld [vmem:[#allocation32_spill] sm:$0xff] }
 0x713   : > { %v29293_v11 = vsel %vm21460_vm1, 4294967295, %v29292_v11  ;;  %vm21488_vm11 = vmpackc.low %vm29299_vm5, %vm29298_vm9  ;;  %vm21511_vm9 = vcmp.eq.s32.totalorder %v5928_v1, %v20385_v10  ;;  %vm21516_vm5 = vcmp.eq.s32.totalorder %v6122_v39, %v20387_v42  ;;  %vm29313_vm6 = vnez %v29227_v19  ;;  %v14515_v19 = vld [vmem:[%s29413_s3 + $0xa4] ss:$16 sps:$4 sm:$0xff]  }
 0x714   : > { %v29301_v43 = vsel %vm21488_vm11, 4294967295, %v29300_v43  ;;  %13310 = vmatpush1.bf16.msk.msra.mxu1 %vm29313_vm6, %v28087_v23  ;;  %vm21528_vm13 = vcmp.eq.s32.totalorder %v5929_v36, %v20385_v10  ;;  %vm21533_vm1 = vcmp.eq.s32.totalorder %v6123_v25, %v20387_v42  ;;  %vm29318_vm2 = vnez %v29235_v37  ;;  %vm29322_vm11 = vmand %vm21403_vm14, %vm21408_vm0  ;;  %v29325_v37 = vld [vmem:[#allocation31_spill] sm:$0xff]  ;;  %v14533_v34 = vld [vmem:[%s29413_s3 + $0x104] ss:$16 sps:$4 sm:$0xff]  }
 0x715   : > { %13312 = vmatprep.subr.msk.bf16.mxu1 %vm29318_vm2, %v28087_v23  ;;  %vm29319_vm6 = vnez %v29262_v33  ;;  %vm29320_vm15 = vnez %v29264_v9  ;;  %vm6340_vm12 = vmand %vm21497_vm3, %vm21502_vm8  ;;  %v5930_v38 = vand.u32 15, %v29325_v37  ;;  %v6124_v5 = vshra.s32 %v29325_v37, 4  ;;  %v14539_v33 = vld [vmem:[%s29413_s3 + $0x124] ss:$16 sps:$4 sm:$0xff]  }
 0x716   : > { %vm29321_vm4 = vmand %vm29319_vm6, %vm29320_vm15  ;;  %v5931_v35 = vand.u32 15, %v29326_v24  ;;  %v6125_v48 = vshra.s32 %v29326_v24, 4  ;;  %vm29327_vm3 = vnez %v29260_v8  ;;  %vm29328_vm0 = vnez %v29279_v12  ;;  %v14531_v8 = vld [vmem:[%s29413_s3 + $0x100] ss:$16 sps:$4 sm:$0xff]  }
 0x717   : > { %vm21550_vm7 = vmpackc.low %vm29322_vm11, %vm29321_vm4  ;;  %vm29330_vm11 = vnez %v29283_v21  ;;  %vm29331_vm8 = vnez %v29285_v53  ;;  %vm29341_vm6 = vnez %v29297_v45  ;;  %v29343_v50 = vmov 0  ;;  %v29369_v53 = vld [vmem:[#allocation60_spill] sm:$0xff] }
 0x718   : > { %vm6343_vm2 = vmand %vm21511_vm9, %vm21516_vm5  ;;  %13314 = vmatpush1.bf16.msk.msra.mxu1 %vm29327_vm3, %v28087_v23  ;;  %vm29340_vm5 = vnez %v29295_v3  ;;  %v29349_v9 = vmov 0  ;;  %v29353_v26 = vmov 0  ;;  %v5934_v51 = vand.u32 15, %v29379_v18 }
 0x719   : > { %vm6345_vm14 = vmand %vm21528_vm13, %vm21533_vm1  ;;  %vm21588_vm1 = vcmp.eq.s32.totalorder %v5928_v1, %v20396_v7  ;;  %vm21593_vm13 = vcmp.eq.s32.totalorder %v6122_v39, %v20398_v30  ;;  %v6128_v31 = vshra.s32 %v29379_v18, 4  ;;  %v29389_v16 = vmov 0 }
 0x71a   : > { %vm29329_vm4 = vmand %vm29302_vm10, %vm29328_vm0  ;;  %vm29339_vm10 = vnez %v29268_v13  ;;  %v5937_v12 = vand.u32 15, %v29410_v46  ;;  %v6131_v39 = vshra.s32 %v29410_v46, 4  ;;  %v29411_v21 = vmov 0  ;;  %v14545_v13 = vld [vmem:[%s29413_s3 + $0x144] ss:$16 sps:$4 sm:$0xff]   ;;  %v29465_v46 = vld [vmem:[#allocation27_spill] sm:$0xff] }
 0x71b   : > { %vm29332_vm15 = vmand %vm29330_vm11, %vm29331_vm8  ;;  %13316 = vmatprep.subr.msk.bf16.mxu1 %vm29339_vm10, %v28087_v23  ;;  %vm21615_vm11 = vcmp.eq.s32.totalorder %v6123_v25, %v20398_v30  ;;  %vm21660_vm10 = vcmp.eq.s32.totalorder %v6124_v5, %v20398_v30  ;;  %v6126_v25 = vshra.s32 %v29369_v53, 4  ;;  %v29634_v24 = vmov 0 }
 0x71c   : > { %vm21583_vm9 = vmpackc.low %vm29332_vm15, %vm29329_vm4  ;;  %vm21610_vm4 = vcmp.eq.s32.totalorder %v5929_v36, %v20396_v7  ;;  %vm21624_vm15 = vcmp.eq.s32.totalorder %v5930_v38, %v20385_v10  ;;  %v5932_v36 = vand.u32 15, %v29369_v53  ;;  %v29601_v53 = vmov 0 }
 0x71d   : > { %vm29342_vm3 = vmand %vm29340_vm5, %vm29341_vm6  ;;  %vm29359_vm5 = vnez %v29293_v11  ;;  %vm21672_vm6 = vcmp.eq.s32.totalorder %v5931_v35, %v20396_v7  ;;  %v29370_v11 = vld [vmem:[#allocation46_spill] sm:$0xff]  ;;  %v8771_v56 = vshra.s32 %v28991_v28, 5 }
 0x71e   : > { %vm21605_vm0 = vmpackc.low %vm6340_vm12, %vm29342_vm3  ;;  %vm21629_vm12 = vcmp.eq.s32.totalorder %v6124_v5, %v20387_v42  ;;  %13318 = vmatpush1.bf16.msk.msra.mxu1 %vm29359_vm5, %v28087_v23  ;;  %vm21655_vm3 = vcmp.eq.s32.totalorder %v5930_v38, %v20396_v7  ;;  %v5933_v3 = vand.u32 15, %v29370_v11  ;;  %v6127_v45 = vshra.s32 %v29370_v11, 4  ;;  %v29388_v5 = vld [vmem:[#allocation62_spill] sm:$0xff] }
 0x71f   : > { %v29344_v50 = vsel %vm21605_vm0, 4294967295, %v29343_v50  ;;  %vm21619_vm8 = vmpackc.low %vm6345_vm14, %vm6343_vm2  ;;  %v29354_v26 = vsel %vm21629_vm12, 4294967295, %v29353_v26  ;;  %vm21638_vm2 = vcmp.eq.s32.totalorder %v5931_v35, %v20385_v10  ;;  %vm21643_vm14 = vcmp.eq.s32.totalorder %v6125_v48, %v20387_v42  ;;  %v14513_v38 = vld [vmem:[%s29413_s3 + $0xa0] ss:$16 sps:$4 sm:$0xff]  }
 0x720   : > { %v29350_v9 = vsel %vm21619_vm8, 4294967295, %v29349_v9  ;;  %vm29364_vm8 = vnez %v29301_v43  ;;  %vm21677_vm0 = vcmp.eq.s32.totalorder %v6125_v48, %v20398_v30  ;;  %vm6346_vm5 = vmand %vm21655_vm3, %vm21660_vm10  ;;  %v5935_v35 = vand.u32 15, %v29388_v5  ;;  %v14497_v43 = vld [vmem:[%s29413_s3 + $0x44] ss:$16 sps:$4 sm:$0xff]  }
 0x721   : > { %13320 = vmatprep.subr.msk.bf16.mxu1 %vm29364_vm8, %v28087_v23  ;;  %vm6349_vm8 = vmand %vm21638_vm2, %vm21643_vm14  ;;  %vm21744_vm14 = vcmp.eq.s32.totalorder %v6127_v45, %v20387_v42  ;;  %v6129_v48 = vshra.s32 %v29388_v5, 4  ;;  %vm21760_vm3 = vcmp.eq.s32.totalorder %v6126_v25, %v20398_v30  ;;  %v29502_v11 = vmov 0 }
 0x722   : > { %13322 = vmatpush1.bf16.msk.msra.mxu1 %vm21550_vm7, %v28087_v23  ;;  %vm6348_vm12 = vmand %vm21672_vm6, %vm21677_vm0  ;;  %vm21718_vm0 = vcmp.eq.s32.totalorder %v5932_v36, %v20385_v10 }
 0x723   : > { %13324 = vmatprep.subr.msk.bf16.mxu1 %vm21583_vm9, %v28087_v23  ;;  %vm29371_vm2 = vmand %vm21588_vm1, %vm21593_vm13  ;;  %vm21723_vm9 = vcmp.eq.s32.totalorder %v6126_v25, %v20387_v42  ;;  %vm29380_vm1 = vnez %v29354_v26  ;;  %v29409_v26 = vld [vmem:[#allocation47_spill] sm:$0xff]  ;;  %v14485_v25 = vld [vmem:[%s29413_s3 + $0x4] ss:$16 sps:$4 sm:$0xff]  }
 0x724   : > { %vm29372_vm10 = vmand %vm21610_vm4, %vm21615_vm11  ;;  %vm21739_vm11 = vcmp.eq.s32.totalorder %v5933_v3, %v20385_v10  ;;  %v5936_v32 = vand.u32 15, %v29409_v26  ;;  %v6130_v1 = vshra.s32 %v29409_v26, 4  ;;  %8064 = vmatprep.subr.bf16.mxu0 %v14485_v25  ;;  %v5945_v26 = vand.u32 15, %v29465_v46 }
 0x725   : > { %vm21713_vm7 = vmpackc.low %vm29372_vm10, %vm29371_vm2  ;;  %vm21777_vm2 = vcmp.eq.s32.totalorder %v6127_v45, %v20398_v30  ;;  %vm29400_vm10 = vnez %v29350_v9  ;;  %v14489_v45 = vld [vmem:[%s29413_s3 + $0x20] ss:$16 sps:$4 sm:$0xff]  }
 0x726   : > { %vm29381_vm13 = vmand %vm21624_vm15, %vm29380_vm1  ;;  %vm21755_vm15 = vcmp.eq.s32.totalorder %v5932_v36, %v20396_v7  ;;  %v14483_v36 = vld [vmem:[%s29413_s3] ss:$16 sps:$4 sm:$0xff]  }
 0x727   : > { %vm21734_vm4 = vmpackc.low %vm6349_vm8, %vm29381_vm13  ;;  %vm29395_vm8 = vnez %v29344_v50  ;;  %vm21789_vm13 = vcmp.eq.s32.totalorder %v5934_v51, %v20385_v10  ;;  %8065 = vmatpush1.bf16.msra.mxu0 %v14483_v36  ;;  %v14537_v50 = vld [vmem:[%s29413_s3 + $0x120] ss:$16 sps:$4 sm:$0xff]  }
 0x728   : > { %vm21750_vm6 = vmpackc.low %vm6348_vm12, %vm6346_vm5  ;;  %13326 = vmatpush1.bf16.msk.msra.mxu1 %vm29395_vm8, %v28087_v23  ;;  %vm21772_vm5 = vcmp.eq.s32.totalorder %v5933_v3, %v20396_v7  ;;  %vm21794_vm8 = vcmp.eq.s32.totalorder %v6128_v31, %v20387_v42  ;;  %vm21803_vm12 = vcmp.eq.s32.totalorder %v5935_v35, %v20385_v10  ;;  %v14491_v3 = vld [vmem:[%s29413_s3 + $0x24] ss:$16 sps:$4 sm:$0xff]   ;;  %v14543_v9 = vld [vmem:[%s29413_s3 + $0x140] ss:$16 sps:$4 sm:$0xff]  }
 0x729   : > { %v29390_v16 = vsel %vm21750_vm6, 4294967295, %v29389_v16  ;;  %13328 = vmatprep.subr.msk.bf16.mxu1 %vm29400_vm10, %v28087_v23  ;;  %vm6353_vm1 = vmand %vm21739_vm11, %vm21744_vm14  ;;  %vm6229_vm11 = vcmp.eq.s32.totalorder %v6129_v48, %v20387_v42  ;;  %vm6226_vm6 = vcmp.eq.s32.totalorder %v6128_v31, %v20398_v30  ;;  %8066 = vmatprep.subr.bf16.mxu0 %v14491_v3  ;;  %v14509_v31 = vld [vmem:[%s29413_s3 + $0x84] ss:$16 sps:$4 sm:$0xff]  }
 0x72a   : > { %vm6350_vm10 = vmand %vm21755_vm15, %vm21760_vm3  ;;  %v29415_v36 = vld [vmem:[#allocation64_spill] sm:$0xff] }
 0x72b   : > { %vm6352_vm14 = vmand %vm21772_vm5, %vm21777_vm2  ;;  %8067 = vmatpush1.bf16.msra.mxu0 %v14489_v45  ;;  %v5939_v25 = vand.u32 15, %v29415_v36  ;;  %v6133_v3 = vshra.s32 %v29415_v36, 4  ;;  %v14549_v45 = vld [vmem:[%s29413_s3 + $0x160] ss:$16 sps:$4 sm:$0xff]   ;;  %v29446_v36 = vmov 0 }
 0x72c   : > { %13330 = vmatpush1.bf16.msk.msra.mxu1 %vm21713_vm7, %v28087_v23  ;;  %vm6355_vm15 = vmand %vm21789_vm13, %vm21794_vm8  ;;  %vm6030_vm7 = vcmp.eq.s32.totalorder %v5934_v51, %v20396_v7  ;;  %vm6032_vm13 = vcmp.eq.s32.totalorder %v5935_v35, %v20396_v7  ;;  %8068 = vmatprep.subr.bf16.mxu0 %v14497_v43  ;;  %v14501_v51 = vld [vmem:[%s29413_s3 + $0x60] ss:$16 sps:$4 sm:$0xff]   ;;  %v14521_v35 = vld [vmem:[%s29413_s3 + $0xc4] ss:$16 sps:$4 sm:$0xff]   ;;  %v29510_v43 = vmov 0 }
 0x72d   : > { %13332 = vmatprep.subr.msk.bf16.mxu1 %vm21734_vm4, %v28087_v23  ;;  %vm6357_vm3 = vmand %vm21803_vm12, %vm6229_vm11  ;;  %vm6228_vm4 = vcmp.eq.s32.totalorder %v6129_v48, %v20398_v30  ;;  %vm29408_vm11 = vnez %v29390_v16  ;;  %v14519_v48 = vld [vmem:[%s29413_s3 + $0xc0] ss:$16 sps:$4 sm:$0xff]   ;;  %v14527_v16 = vld [vmem:[%s29413_s3 + $0xe4] ss:$16 sps:$4 sm:$0xff]  }
 0x72e   : > { %vm29407_vm5 = vmand %vm21718_vm0, %vm21723_vm9 }
 0x72f   : > { %vm13335_vm2 = vmpackc.low %vm6353_vm1, %vm29407_vm5  ;;  %vm6034_vm5 = vcmp.eq.s32.totalorder %v5936_v32, %v20396_v7  ;;  %8069 = vmatpush1.bf16.msra.mxu0 %v14495_v44  ;;  %v29523_v44 = vld [vmem:[#allocation56_spill] sm:$0xff] }
 0x730   : > { %vm13337_vm8 = vmpackc.low %vm6352_vm14, %vm6350_vm10  ;;  %13334 = vmatpush1.bf16.msk.msra.mxu1 %vm29408_vm11, %v28087_v23  ;;  %vm6035_vm10 = vcmp.eq.s32.totalorder %v5936_v32, %v20385_v10  ;;  %vm6231_vm14 = vcmp.eq.s32.totalorder %v6130_v1, %v20387_v42  ;;  %8070 = vmatprep.subr.bf16.mxu0 %v14503_v52  ;;  %v29414_v32 = vld [vmem:[#allocation33_spill] sm:$0xff]  ;;  %v29420_v52 = vld [vmem:[#allocation63_spill] sm:$0xff] }
 0x731   : > { %vm13339_vm12 = vmpackc.low %vm6357_vm3, %vm6355_vm15  ;;  %13336 = vmatprep.subr.msk.bf16.mxu1 %vm13335_vm2, %v28087_v23  ;;  %vm6233_vm15 = vcmp.eq.s32.totalorder %v6131_v39, %v20387_v42  ;;  %vm6230_vm2 = vcmp.eq.s32.totalorder %v6130_v1, %v20398_v30  ;;  %v6132_v1 = vshra.s32 %v29414_v32, 4 }
 0x732   : > { %vm6354_vm0 = vmand %vm6030_vm7, %vm6226_vm6  ;;  %vm6037_vm6 = vcmp.eq.s32.totalorder %v5937_v12, %v20385_v10 }
 0x733   : > { %vm6356_vm9 = vmand %vm6032_vm13, %vm6228_vm4  ;;  %vm6232_vm13 = vcmp.eq.s32.totalorder %v6131_v39, %v20398_v30  ;;  %8071 = vmatpush1.bf16.msra.mxu0 %v14501_v51  ;;  %v14551_v39 = vld [vmem:[%s29413_s3 + $0x164] ss:$16 sps:$4 sm:$0xff]   ;;  %v5940_v51 = vand.u32 15, %v29420_v52 }
 0x734   : > { %13338 = vmatpush1.bf16.msk.msra.mxu1 %vm13337_vm8, %v28087_v23  ;;  %vm13341_vm1 = vmpackc.low %vm6356_vm9, %vm6354_vm0  ;;  %vm6036_vm8 = vcmp.eq.s32.totalorder %v5937_v12, %v20396_v7  ;;  %8072 = vmatprep.subr.bf16.mxu0 %v14509_v31  ;;  %v5938_v12 = vand.u32 15, %v29414_v32  ;;  %v6134_v31 = vshra.s32 %v29420_v52, 4  ;;  %v29444_v52 = vmov 0 }
 0x735   : > { %13340 = vmatprep.subr.msk.bf16.mxu1 %vm13339_vm12, %v28087_v23  ;;  %vm6359_vm3 = vmand %vm6035_vm10, %vm6231_vm14  ;;  %vm21949_vm10 = vcmp.eq.s32.totalorder %v5939_v25, %v20385_v10  ;;  %v29463_v32 = vmov 0 }
 0x736   : > { %vm6361_vm7 = vmand %vm6037_vm6, %vm6233_vm15  ;;  %vm21934_vm9 = vcmp.eq.s32.totalorder %v5938_v12, %v20385_v10  ;;  %vm21954_vm6 = vcmp.eq.s32.totalorder %v6133_v3, %v20387_v42  ;;  %vm21961_vm14 = vcmp.eq.s32.totalorder %v5938_v12, %v20396_v7  ;;  %vm21966_vm15 = vcmp.eq.s32.totalorder %v6132_v1, %v20398_v30  ;;  %v29438_v12 = vld [vmem:[#allocation66_spill] sm:$0xff] }
 0x737   : > { %vm13343_vm4 = vmpackc.low %vm6361_vm7, %vm6359_vm3  ;;  %8073 = vmatpush1.bf16.msra.mxu0 %v14507_v22  ;;  %v14557_v22 = vld [vmem:[%s29413_s3 + $0x184] ss:$16 sps:$4 sm:$0xff]   ;;  %vm22032_vm3 = vcmp.eq.s32.totalorder %v6134_v31, %v20398_v30 }
 0x738   : > { %13342 = vmatpush1.bf16.msk.msra.mxu1 %vm13341_vm1, %v28087_v23  ;;  %vm6358_vm11 = vmand %vm6034_vm5, %vm6230_vm2  ;;  %8074 = vmatprep.subr.bf16.mxu0 %v14515_v19  ;;  %vm21939_vm1 = vcmp.eq.s32.totalorder %v6132_v1, %v20387_v42  ;;  %vm21975_vm5 = vcmp.eq.s32.totalorder %v5939_v25, %v20396_v7  ;;  %vm21980_vm2 = vcmp.eq.s32.totalorder %v6133_v3, %v20398_v30  ;;  %v5942_v1 = vand.u32 15, %v29438_v12  ;;  %v14563_v25 = vld [vmem:[%s29413_s3 + $0x1a4] ss:$16 sps:$4 sm:$0xff]  }
 0x739   : > { %13344 = vmatprep.subr.msk.bf16.mxu1 %vm13343_vm4, %v28087_v23  ;;  %vm6360_vm12 = vmand %vm6036_vm8, %vm6232_vm13  ;;  %vm21992_vm8 = vcmp.eq.s32.totalorder %v5940_v51, %v20385_v10  ;;  %vm21997_vm13 = vcmp.eq.s32.totalorder %v6134_v31, %v20387_v42  ;;  %vm22027_vm4 = vcmp.eq.s32.totalorder %v5940_v51, %v20396_v7  ;;  %v29447_v36 = vsel %vm22032_vm3, 4294967295, %v29446_v36  ;;  %v14561_v31 = vld [vmem:[%s29413_s3 + $0x1a0] ss:$16 sps:$4 sm:$0xff]  }
 0x73a   : > { %vm21853_vm0 = vmpackc.low %vm6360_vm12, %vm6358_vm11  ;;  %v29445_v52 = vsel %vm22027_vm4, 4294967295, %v29444_v52  ;;  %v29450_v51 = vmov 0  ;;  %v29456_v19 = vmov 0 }
 0x73b   : > { %v29412_v21 = vsel %vm21853_vm0, 4294967295, %v29411_v21  ;;  %8075 = vmatpush1.bf16.msra.mxu0 %v14513_v38  ;;  %vm29448_vm0 = vmand %vm21934_vm9, %vm21939_vm1  ;;  %vm22072_vm1 = vcmp.eq.s32.totalorder %v5942_v1, %v20385_v10  ;;  %v6142_v38 = vshra.s32 %v29523_v44, 4 }
 0x73c   : > { %8076 = vmatprep.subr.bf16.mxu0 %v14521_v35  ;;  %v29425_v35 = vld [vmem:[#allocation53_spill] sm:$0xff]  ;;  %vm29449_vm7 = vmand %vm21949_vm10, %vm21954_vm6  ;;  %v29457_v19 = vsel %vm22072_vm1, 4294967295, %v29456_v19  ;;  %vm22118_vm1 = vcmp.eq.s32.totalorder %v5942_v1, %v20396_v7 }
 0x73f   : > { %8077 = vmatpush1.bf16.msra.mxu0 %v14519_v48  ;;  %v5941_v48 = vand.u32 15, %v29425_v35 }
 0x740   : > { %8078 = vmatprep.subr.bf16.mxu0 %v14527_v16  ;;  %v6135_v16 = vshra.s32 %v29425_v35, 4 }
 0x741   : > { %vm22011_vm11 = vcmp.eq.s32.totalorder %v5941_v48, %v20385_v10 }
 0x742   : > { %vm22016_vm12 = vcmp.eq.s32.totalorder %v6135_v16, %v20387_v42  ;;  %vm22060_vm9 = vcmp.eq.s32.totalorder %v6135_v16, %v20398_v30 }
 0x743   : > { %8079 = vmatpush1.bf16.msra.mxu0 %v14525_v29  ;;  %v29473_v29 = vmov 0 }
 0x744   : > { %8080 = vmatprep.subr.bf16.mxu0 %v14533_v34  ;;  %v29428_v34 = vmov 0  ;;  %v29474_v29 = vsel %vm22118_vm1, 4294967295, %v29473_v29 }
 0x745   : > { %v29429_v34 = vsel %vm21966_vm15, 4294967295, %v29428_v34  ;;  %vm22055_vm15 = vcmp.eq.s32.totalorder %v5941_v48, %v20396_v7  ;;  %v29460_v48 = vld [vmem:[#allocation28_spill] sm:$0xff] }
 0x746   : > { %v5944_v16 = vand.u32 15, %v29460_v48 }
 0x747   : > { %8081 = vmatpush1.bf16.msra.mxu0 %v14531_v8  ;;  %v29430_v8 = vmov 0 }
 0x748   : > { %8082 = vmatprep.subr.bf16.mxu0 %v14539_v33  ;;  %v29431_v8 = vsel %vm21975_vm5, 4294967295, %v29430_v8  ;;  %v29432_v33 = vmov 0  ;;  %vm29466_vm5 = vnez %v29429_v34  ;;  %v29475_v34 = vmov 0 }
 0x749   : > { %v29433_v33 = vsel %vm21980_vm2, 4294967295, %v29432_v33  ;;  %vm22046_vm2 = vmpackc.low %vm29449_vm7, %vm29448_vm0  ;;  %vm29468_vm6 = vnez %v29431_v8  ;;  %v29479_v8 = vmov 0 }
 0x74a   : > { %v29451_v51 = vsel %vm22046_vm2, 4294967295, %v29450_v51  ;;  %vm29467_vm2 = vmand %vm21961_vm14, %vm29466_vm5  ;;  %vm29469_vm3 = vnez %v29433_v33  ;;  %v29543_v33 = vmov 0 }
 0x74b   : > { %8083 = vmatpush1.bf16.msra.mxu0 %v14537_v50  ;;  %v14555_v50 = vld [vmem:[%s29413_s3 + $0x180] ss:$16 sps:$4 sm:$0xff]   ;;  %vm29470_vm4 = vmand %vm29468_vm6, %vm29469_vm3  ;;  %vm22176_vm6 = vcmp.eq.s32.totalorder %v5945_v26, %v20385_v10 }
 0x74c   : > { %8084 = vmatprep.subr.bf16.mxu0 %v14545_v13  ;;  %vm29477_vm3 = vmand %vm21992_vm8, %vm21997_vm13  ;;  %v29609_v13 = vmov 0 }
 0x74d   : > { %vm29478_vm5 = vmand %vm22011_vm11, %vm22016_vm12 }
 0x74f   : > { %8085 = vmatpush1.bf16.msra.mxu0 %v14543_v9  ;;  %v29488_v9 = vmov 0 }
 0x750   : > { %8086 = vmatprep.subr.bf16.mxu0 %v14551_v39  ;;  %v6136_v39 = vshra.s32 %v29438_v12, 4 }
 0x752   : > { %vm22077_vm10 = vcmp.eq.s32.totalorder %v6136_v39, %v20387_v42  ;;  %vm22123_vm14 = vcmp.eq.s32.totalorder %v6136_v39, %v20398_v30 }
 0x753   : > { %8087 = vmatpush1.bf16.msra.mxu0 %v14549_v45  ;;  %v29476_v34 = vsel %vm22123_vm14, 4294967295, %v29475_v34  ;;  %v29493_v45 = vmov 0  ;;  %vm29501_vm14 = vmand %vm22055_vm15, %vm22060_vm9 }
 0x754   : > { %8088 = vmatprep.subr.bf16.mxu0 %v14557_v22  ;;  %v29443_v22 = vld [vmem:[#allocation65_spill] sm:$0xff]  ;;  %v29494_v45 = vsel %vm22176_vm6, 4294967295, %v29493_v45  ;;  %vm22234_vm6 = vcmp.eq.s32.totalorder %v5945_v26, %v20396_v7  ;;  %v29651_v26 = vmov 0 }
 0x755   : > { %v5943_v12 = vand.u32 15, %v29443_v22  ;;  %v6137_v35 = vshra.s32 %v29443_v22, 4  ;;  %v29461_v22 = vmov 0 }
 0x757   : > { %8089 = vmatpush1.bf16.msra.mxu0 %v14555_v50  ;;  %v6138_v50 = vshra.s32 %v29460_v48, 4  ;;  %vm22088_vm7 = vcmp.eq.s32.totalorder %v5943_v12, %v20385_v10  ;;  %vm22093_vm0 = vcmp.eq.s32.totalorder %v6137_v35, %v20387_v42  ;;  %v6139_v48 = vshra.s32 %v29465_v46, 4  ;;  %v29497_v46 = vld [vmem:[#allocation41_spill] sm:$0xff] }
 0x758   : > { %8090 = vmatprep.subr.bf16.mxu0 %v14563_v25  ;;  %v29462_v22 = vsel %vm22088_vm7, 4294967295, %v29461_v22  ;;  %v29464_v32 = vsel %vm22093_vm0, 4294967295, %v29463_v32  ;;  %vm22109_vm7 = vmpackc.low %vm29470_vm4, %vm29467_vm2  ;;  %v29471_v25 = vmov 0  ;;  %vm29481_vm4 = vnez %v29457_v19 }
 0x759   : > { %v29472_v25 = vsel %vm22109_vm7, 4294967295, %v29471_v25  ;;  %vm22137_vm2 = vmpackc.low %vm29478_vm5, %vm29477_vm3  ;;  %vm22146_vm0 = vcmp.eq.s32.totalorder %v5943_v12, %v20396_v7  ;;  %vm22151_vm8 = vcmp.eq.s32.totalorder %v6137_v35, %v20398_v30  ;;  %vm29486_vm13 = vnez %v29464_v32  ;;  %v29492_v35 = vld [vmem:[#allocation49_spill] sm:$0xff]  ;;  %v29811_v12 = vld [vmem:[#allocation79_spill] sm:$0xff] }
 0x75a   : > { %v29480_v8 = vsel %vm22137_vm2, 4294967295, %v29479_v8  ;;  %vm29487_vm11 = vnez %v29462_v22  ;;  %vm22160_vm3 = vcmp.eq.s32.totalorder %v5944_v16, %v20385_v10  ;;  %vm22165_vm5 = vcmp.eq.s32.totalorder %v6138_v50, %v20387_v42  ;;  %vm29508_vm15 = vmand %vm29481_vm4, %vm22077_vm10  ;;  %v14548_v22 = vld [vmem:[%s29413_s3 + $0x14c] ss:$16 sps:$4 sm:$0xff]  }
 0x75b   : > { %8091 = vmatpush1.bf16.msra.mxu0 %v14561_v31  ;;  %v29489_v9 = vsel %vm22160_vm3, 4294967295, %v29488_v9  ;;  %v5946_v1 = vand.u32 15, %v29492_v35  ;;  %v6140_v39 = vshra.s32 %v29492_v35, 4  ;;  %vm22181_vm2 = vcmp.eq.s32.totalorder %v6139_v48, %v20387_v42  ;;  %vm29509_vm9 = vmand %vm29487_vm11, %vm29486_vm13 }
 0x75c   : > { %v29495_v31 = vmov 0  ;;  %v5947_v5 = vand.u32 15, %v29497_v46  ;;  %v6141_v35 = vshra.s32 %v29497_v46, 4  ;;  %vm29498_vm7 = vnez %v29445_v52 }
 0x75d   : > { %v29496_v31 = vsel %vm22181_vm2, 4294967295, %v29495_v31  ;;  %vm29499_vm3 = vnez %v29447_v36  ;;  %vm22206_vm2 = vcmp.eq.s32.totalorder %v5944_v16, %v20396_v7  ;;  %v29504_v52 = vmov 0 }
 0x75e   : > { %vm29500_vm12 = vmand %vm29498_vm7, %vm29499_vm3  ;;  %v29505_v52 = vsel %vm22206_vm2, 4294967295, %v29504_v52  ;;  %vm22211_vm7 = vcmp.eq.s32.totalorder %v6138_v50, %v20398_v30  ;;  %v29506_v36 = vmov 0  ;;  %vm22239_vm10 = vcmp.eq.s32.totalorder %v6139_v48, %v20398_v30  ;;  %v29529_v50 = vld [vmem:[#allocation34_spill] sm:$0xff] }
 0x75f   : > { %vm22197_vm1 = vmpackc.low %vm29501_vm14, %vm29500_vm12  ;;  %v29507_v36 = vsel %vm22211_vm7, 4294967295, %v29506_v36  ;;  %vm29512_vm12 = vnez %v29489_v9  ;;  %vm29517_vm4 = vnez %v29496_v31  ;;  %vm29518_vm13 = vnez %v29494_v45 }
 0x760   : > { %v29503_v11 = vsel %vm22197_vm1, 4294967295, %v29502_v11  ;;  %vm22225_vm14 = vmpackc.low %vm29509_vm9, %vm29508_vm15  ;;  %vm22248_vm15 = vcmp.eq.s32.totalorder %v5946_v1, %v20385_v10  ;;  %vm22253_vm9 = vcmp.eq.s32.totalorder %v6140_v39, %v20387_v42  ;;  %v5948_v19 = vand.u32 15, %v29523_v44 }
 0x761   : > { %v29511_v43 = vsel %vm22225_vm14, 4294967295, %v29510_v43  ;;  %vm29524_vm3 = vnez %v29412_v21  ;;  %vm22267_vm14 = vcmp.eq.s32.totalorder %v5947_v5, %v20385_v10  ;;  %v29525_v48 = vmov 0 }
 0x762   : > { %v29526_v48 = vsel %vm22267_vm14, 4294967295, %v29525_v48  ;;  %vm22272_vm1 = vcmp.eq.s32.totalorder %v6141_v35, %v20387_v42  ;;  %v29527_v16 = vmov 0  ;;  %v6143_v21 = vshra.s32 %v29529_v50, 4  ;;  %vm29534_vm14 = vmand %vm22146_vm0, %vm22151_vm8 }
 0x763   : > { %v29528_v16 = vsel %vm22272_vm1, 4294967295, %v29527_v16  ;;  %vm29531_vm11 = vnez %v29474_v29  ;;  %vm29532_vm7 = vnez %v29476_v34  ;;  %v29535_v46 = vmov 0  ;;  %vm29541_vm0 = vmand %vm29512_vm12, %vm22165_vm5 }
 0x764   : > { %vm29533_vm2 = vmand %vm29531_vm11, %vm29532_vm7  ;;  %vm22305_vm7 = vcmp.eq.s32.totalorder %v6140_v39, %v20398_v30  ;;  %v29539_v29 = vmov 0  ;;  %vm22333_vm5 = vcmp.eq.s32.totalorder %v6141_v35, %v20398_v30  ;;  %vm29550_vm12 = vnez %v29528_v16  ;;  %v29556_v35 = vld [vmem:[#allocation26_spill] sm:$0xff] }
 0x765   : > { %vm22291_vm1 = vmpackc.low %vm29534_vm14, %vm29533_vm2  ;;  %v29540_v29 = vsel %vm22305_vm7, 4294967295, %v29539_v29  ;;  %v6144_v39 = vshra.s32 %v29556_v35, 4  ;;  %vm29557_vm11 = vnez %v29472_v25  ;;  %v29558_v45 = vmov 0 }
 0x766   : > { %v29536_v46 = vsel %vm22291_vm1, 4294967295, %v29535_v46  ;;  %vm29542_vm2 = vmand %vm29518_vm13, %vm29517_vm4  ;;  %vm29551_vm4 = vnez %v29526_v48  ;;  %vm22366_vm1 = vcmp.eq.s32.totalorder %v6143_v21, %v20387_v42  ;;  %v29560_v31 = vmov 0 }
 0x767   : > { %vm22319_vm8 = vmpackc.low %vm29542_vm2, %vm29541_vm0  ;;  %vm22342_vm0 = vcmp.eq.s32.totalorder %v5948_v19, %v20385_v10  ;;  %vm22347_vm2 = vcmp.eq.s32.totalorder %v6142_v38, %v20387_v42  ;;  %v29561_v31 = vsel %vm22366_vm1, 4294967295, %v29560_v31  ;;  %vm29564_vm13 = vnez %v29505_v52 }
 0x768   : > { %v29544_v33 = vsel %vm22319_vm8, 4294967295, %v29543_v33  ;;  %vm29545_vm14 = vmmov %vm22248_vm15  ;;  %vm22328_vm15 = vcmp.eq.s32.totalorder %v5947_v5, %v20396_v7  ;;  %vm29565_vm7 = vnez %v29507_v36  ;;  %v29572_v52 = vmov 0 }
 0x769   : > { %v29618_v5 = vmov 0  ;;  %v29784_v32 = vmov 0 }
 0x79c   : > { %v5816_v3 = vpop.f32.mrb[32].mxu1 }
 0x79d   : > { %v5818_v18 = vpop.f32.mrb[33].mxu1 }
 0x79e   : > { %6742 = vmatprep.mubr.f32.mxu1 %v5818_v18  ;;  %v29576_v18 = vmov 0 }
 0x79f   : > { %6743 = vmatmul.mubr.f32.vlgmr.msra.gmra.mrb[40].mxu1 %v5816_v3  ;;  %v5949_v3 = vand.u32 15, %v29529_v50  ;;  %v29568_v50 = vmov 0 }
 0x7a0   : > { %13346 = vmatpush1.bf16.msk.msra.mxu1 %vm29524_vm3, %v28087_v23  ;;  %vm29530_vm3 = vnez %v29451_v51  ;;  %v29537_v51 = vmov 0 }
 0x7a1   : > { %13348 = vmatprep.subr.msk.bf16.mxu1 %vm29530_vm3, %v28087_v23  ;;  %vm22300_vm3 = vcmp.eq.s32.totalorder %v5946_v1, %v20396_v7  ;;  %v5950_v1 = vand.u32 15, %v29556_v35  ;;  %vm22361_vm8 = vcmp.eq.s32.totalorder %v5949_v3, %v20385_v10 }
 0x7a2   : > { %v29538_v51 = vsel %vm22300_vm3, 4294967295, %v29537_v51  ;;  %v29559_v45 = vsel %vm22361_vm8, 4294967295, %v29558_v45  ;;  %vm29566_vm3 = vmand %vm29564_vm13, %vm29565_vm7  ;;  %vm22401_vm7 = vcmp.eq.s32.totalorder %v6142_v38, %v20398_v30  ;;  %v29589_v38 = vld [vmem:[#allocation24_spill] sm:$0xff]  ;;  %vm29590_vm13 = vnez %v29503_v11 }
 0x7a3   : > { %vm29567_vm8 = vmand %vm22234_vm6, %vm22239_vm10  ;;  %v29573_v52 = vsel %vm22401_vm7, 4294967295, %v29572_v52  ;;  %v5952_v48 = vand.u32 15, %v29589_v38  ;;  %v6146_v16 = vshra.s32 %v29589_v38, 4  ;;  %vm29598_vm7 = vnez %v29540_v29 }
 0x7a4   : > { %v5822_v44 = vpop.f32.mrb[34].mxu1  ;;  %13350 = vmatpush1.bf16.msk.msra.mxu1 %vm29557_vm11, %v28087_v23  ;;  %vm29563_vm11 = vnez %v29480_v8  ;;  %vm22387_vm1 = vmpackc.low %vm29567_vm8, %vm29566_vm3  ;;  %v29570_v8 = vmov 0 }
 0x7a5   : > { %v5824_v34 = vpop.f32.mrb[35].mxu1  ;;  %13352 = vmatprep.subr.msk.bf16.mxu1 %vm29563_vm11, %v28087_v23  ;;  %v29569_v50 = vsel %vm22387_vm1, 4294967295, %v29568_v50  ;;  %vm22396_vm11 = vcmp.eq.s32.totalorder %v5948_v19, %v20396_v7  ;;  %vm29574_vm6 = vmand %vm29545_vm14, %vm22253_vm9  ;;  %vm22429_vm9 = vcmp.eq.s32.totalorder %v6143_v21, %v20398_v30  ;;  %vm29583_vm14 = vnez %v29561_v31 }
 0x7a6   : > { %6748 = vmatprep.mubr.f32.mxu1 %v5824_v34  ;;  %v29571_v8 = vsel %vm22396_vm11, 4294967295, %v29570_v8  ;;  %vm29575_vm10 = vmand %vm29551_vm4, %vm29550_vm12  ;;  %vm29584_vm12 = vnez %v29559_v45  ;;  %v29593_v21 = vmov 0  ;;  %vm29597_vm4 = vnez %v29538_v51 }
 0x7a7   : > { %6749 = vmatmul.mubr.f32.gmra.mrb[42].mxu1 %v5822_v44  ;;  %v29562_v44 = vld [vmem:[#allocation29_spill] sm:$0xff]  ;;  %vm22415_vm3 = vmpackc.low %vm29575_vm10, %vm29574_vm6  ;;  %vm22438_vm6 = vcmp.eq.s32.totalorder %v5950_v1, %v20385_v10  ;;  %vm22443_vm10 = vcmp.eq.s32.totalorder %v6144_v39, %v20387_v42  ;;  %v29605_v51 = vmov 0  ;;  %v29719_v19 = vmov 0 }
 0x7a8   : > { %v5951_v34 = vand.u32 15, %v29562_v44  ;;  %v6145_v25 = vshra.s32 %v29562_v44, 4  ;;  %v29577_v18 = vsel %vm22415_vm3, 4294967295, %v29576_v18  ;;  %vm29578_vm8 = vmmov %vm22342_vm0  ;;  %vm22424_vm0 = vcmp.eq.s32.totalorder %v5949_v3, %v20396_v7  ;;  %13354 = vmatpush1.bf16.msk.msra.mxu1 %vm29590_vm13, %v28087_v23 }
 0x7a9   : > { %v29591_v3 = vmov 0  ;;  %vm29596_vm13 = vnez %v29511_v43  ;;  %vm29599_vm11 = vmand %vm29597_vm4, %vm29598_vm7  ;;  %v29603_v43 = vmov 0  ;;  %vm22497_vm7 = vcmp.eq.s32.totalorder %v6144_v39, %v20398_v30  ;;  %v29622_v39 = vld [vmem:[#allocation68_spill] sm:$0xff] }
 0x7aa   : > { %vm22457_vm3 = vcmp.eq.s32.totalorder %v5951_v34, %v20385_v10  ;;  %vm22462_vm1 = vcmp.eq.s32.totalorder %v6145_v25, %v20387_v42  ;;  %13356 = vmatprep.subr.msk.bf16.mxu1 %vm29596_vm13, %v28087_v23  ;;  %vm22492_vm13 = vcmp.eq.s32.totalorder %v5950_v1, %v20396_v7  ;;  %v29606_v51 = vsel %vm22497_vm7, 4294967295, %v29605_v51  ;;  %v29688_v1 = vld [vmem:[#allocation72_spill] sm:$0xff] }
 0x7ab   : > { %v29592_v3 = vsel %vm22457_vm3, 4294967295, %v29591_v3  ;;  %v29594_v21 = vsel %vm22462_vm1, 4294967295, %v29593_v21  ;;  %vm29600_vm3 = vmand %vm22328_vm15, %vm22333_vm5  ;;  %v29604_v43 = vsel %vm22492_vm13, 4294967295, %v29603_v43  ;;  %v5954_v45 = vand.u32 15, %v29622_v39 }
 0x7ac   : > { %v22372_v35 = vpop.f32.mrb[36].mxu1  ;;  %vm22483_vm1 = vmpackc.low %vm29600_vm3, %vm29599_vm11  ;;  %v6148_v31 = vshra.s32 %v29622_v39, 4  ;;  %vm29623_vm4 = vnez %v29536_v46  ;;  %v29628_v39 = vld [vmem:[#allocation69_spill] sm:$0xff]  ;;  %vm29631_vm7 = vnez %v29573_v52  ;;  %v29642_v52 = vmov 0 }
 0x7ad   : > { %v5895_v36 = vpop.f32.mrb[37].mxu1  ;;  %v29602_v53 = vsel %vm22483_vm1, 4294967295, %v29601_v53  ;;  %vm29607_vm15 = vmand %vm29578_vm8, %vm22347_vm2  ;;  %vm22527_vm2 = vcmp.eq.s32.totalorder %v6145_v25, %v20398_v30  ;;  %vm29616_vm8 = vnez %v29594_v21  ;;  %13358 = vmatpush1.bf16.msk.msra.mxu1 %vm29623_vm4, %v28087_v23  ;;  %v29626_v25 = vmov 0 }
 0x7ae   : > { %6819 = vmatprep.mubr.f32.mxu1 %v5895_v36  ;;  %v29595_v36 = vld [vmem:[#allocation67_spill] sm:$0xff]  ;;  %vm29608_vm5 = vmand %vm29584_vm12, %vm29583_vm14  ;;  %vm29617_vm14 = vnez %v29592_v3  ;;  %v6149_v46 = vshra.s32 %v29628_v39, 4  ;;  %vm29629_vm4 = vnez %v29544_v33  ;;  %vm29630_vm12 = vnez %v29571_v8 }
 0x7af   : > { %v5953_v38 = vand.u32 15, %v29595_v36  ;;  %v6147_v11 = vshra.s32 %v29595_v36, 4  ;;  %vm22513_vm11 = vmpackc.low %vm29608_vm5, %vm29607_vm15  ;;  %vm22536_vm15 = vcmp.eq.s32.totalorder %v5952_v48, %v20385_v10  ;;  %vm22541_vm5 = vcmp.eq.s32.totalorder %v6146_v16, %v20387_v42  ;;  %13360 = vmatprep.subr.msk.bf16.mxu1 %vm29629_vm4, %v28087_v23 }
 0x7b0   : > { %v29610_v13 = vsel %vm22513_vm11, 4294967295, %v29609_v13  ;;  %vm29611_vm3 = vmmov %vm22438_vm6  ;;  %vm22522_vm6 = vcmp.eq.s32.totalorder %v5951_v34, %v20396_v7  ;;  %v29619_v5 = vsel %vm22536_vm15, 4294967295, %v29618_v5  ;;  %v29624_v34 = vmov 0 }
 0x7b1   : > { %vm22555_vm11 = vcmp.eq.s32.totalorder %v5953_v38, %v20385_v10  ;;  %vm22560_vm1 = vcmp.eq.s32.totalorder %v6147_v11, %v20387_v42  ;;  %v5955_v36 = vand.u32 15, %v29628_v39  ;;  %vm29632_vm13 = vmand %vm29630_vm12, %vm29631_vm7  ;;  %vm22588_vm4 = vcmp.eq.s32.totalorder %v5952_v48, %v20396_v7 }
 0x7b2   : > { %v29625_v34 = vsel %vm22555_vm11, 4294967295, %v29624_v34  ;;  %v29627_v25 = vsel %vm22560_vm1, 4294967295, %v29626_v25  ;;  %vm29633_vm11 = vmand %vm22424_vm0, %vm22429_vm9  ;;  %v29636_v33 = vmov 0  ;;  %vm22593_vm7 = vcmp.eq.s32.totalorder %v6146_v16, %v20398_v30 }
 0x7b3   : > { %vm22579_vm15 = vmpackc.low %vm29633_vm11, %vm29632_vm13  ;;  %v29637_v33 = vsel %vm22588_vm4, 4294967295, %v29636_v33  ;;  %v29638_v8 = vmov 0  ;;  %vm29644_vm11 = vnez %v29619_v5  ;;  %vm22616_vm1 = vcmp.eq.s32.totalorder %v5953_v38, %v20396_v7  ;;  %v29655_v38 = vld [vmem:[#allocation70_spill] sm:$0xff] }
 0x7b4   : > { %v29635_v24 = vsel %vm22579_vm15, 4294967295, %v29634_v24  ;;  %v29639_v8 = vsel %vm22593_vm7, 4294967295, %v29638_v8  ;;  %vm29640_vm0 = vmand %vm29611_vm3, %vm22443_vm10  ;;  %vm22621_vm10 = vcmp.eq.s32.totalorder %v6147_v11, %v20398_v30  ;;  %vm29649_vm3 = vnez %v29627_v25  ;;  %v29661_v11 = vld [vmem:[#allocation71_spill] sm:$0xff] }
 0x7b5   : > { %v22468_v44 = vpop.f32.mrb[38].mxu1  ;;  %vm29641_vm9 = vmand %vm29617_vm14, %vm29616_vm8  ;;  %vm29650_vm8 = vnez %v29625_v34  ;;  %v5956_v48 = vand.u32 15, %v29655_v38  ;;  %v6150_v16 = vshra.s32 %v29655_v38, 4  ;;  %vm29656_vm12 = vnez %v29569_v50 }
 0x7b6   : > { %v22501_v29 = vpop.f32.mrb[39].mxu1  ;;  %vm22607_vm13 = vmpackc.low %vm29641_vm9, %vm29640_vm0  ;;  %vm22630_vm0 = vcmp.eq.s32.totalorder %v5954_v45, %v20385_v10  ;;  %vm22635_vm9 = vcmp.eq.s32.totalorder %v6148_v31, %v20387_v42  ;;  %13362 = vmatpush1.bf16.msk.msra.mxu1 %vm29656_vm12, %v28087_v23  ;;  %v29657_v3 = vmov 0  ;;  %vm22654_vm15 = vcmp.eq.s32.totalorder %v6149_v46, %v20387_v42 }
 0x7b7   : > { %v29643_v52 = vsel %vm22607_vm13, 4294967295, %v29642_v52  ;;  %v29652_v26 = vsel %vm22630_vm0, 4294967295, %v29651_v26  ;;  %vm22649_vm13 = vcmp.eq.s32.totalorder %v5955_v36, %v20385_v10  ;;  %v29659_v21 = vmov 0 }
 0x7b8   : > { %v29658_v3 = vsel %vm22649_vm13, 4294967295, %v29657_v3  ;;  %v29660_v21 = vsel %vm22654_vm15, 4294967295, %v29659_v21  ;;  %v5957_v38 = vand.u32 15, %v29661_v11  ;;  %v6151_v50 = vshra.s32 %v29661_v11, 4  ;;  %vm29666_vm13 = vmand %vm22522_vm6, %vm22527_vm2 }
 0x7b9   : > { %vm29662_vm12 = vnez %v29577_v18  ;;  %vm29663_vm14 = vnez %v29604_v43  ;;  %vm29664_vm7 = vnez %v29606_v51  ;;  %v29667_v39 = vmov 0  ;;  %vm29673_vm6 = vmand %vm29644_vm11, %vm22541_vm5 }
 0x7ba   : > { %13364 = vmatprep.subr.msk.bf16.mxu1 %vm29662_vm12, %v28087_v23  ;;  %vm29665_vm4 = vmand %vm29663_vm14, %vm29664_vm7  ;;  %vm22682_vm12 = vcmp.eq.s32.totalorder %v5954_v45, %v20396_v7  ;;  %v29669_v18 = vmov 0  ;;  %vm22687_vm7 = vcmp.eq.s32.totalorder %v6148_v31, %v20398_v30  ;;  %v29671_v43 = vmov 0 }
 0x7bb   : > { %vm22673_vm0 = vmpackc.low %vm29666_vm13, %vm29665_vm4  ;;  %v29670_v18 = vsel %vm22682_vm12, 4294967295, %v29669_v18  ;;  %v29672_v43 = vsel %vm22687_vm7, 4294967295, %v29671_v43  ;;  %v29675_v51 = vmov 0  ;;  %vm29677_vm13 = vnez %v29652_v26 }
 0x7bc   : > { %v29668_v39 = vsel %vm22673_vm0, 4294967295, %v29667_v39  ;;  %vm29674_vm2 = vmand %vm29650_vm8, %vm29649_vm3  ;;  %vm22710_vm15 = vcmp.eq.s32.totalorder %v5955_v36, %v20396_v7  ;;  %vm22715_vm5 = vcmp.eq.s32.totalorder %v6149_v46, %v20398_v30  ;;  %vm29682_vm11 = vnez %v29660_v21  ;;  %v29694_v46 = vld [vmem:[#allocation73_spill] sm:$0xff] }
 0x7bd   : > { %vm22701_vm4 = vmpackc.low %vm29674_vm2, %vm29673_vm6  ;;  %vm29683_vm3 = vnez %v29658_v3  ;;  %vm22724_vm6 = vcmp.eq.s32.totalorder %v5956_v48, %v20385_v10  ;;  %v29684_v5 = vmov 0  ;;  %vm22729_vm2 = vcmp.eq.s32.totalorder %v6150_v16, %v20387_v42 }
 0x7be   : > { %v29676_v51 = vsel %vm22701_vm4, 4294967295, %v29675_v51  ;;  %v29685_v5 = vsel %vm22724_vm6, 4294967295, %v29684_v5  ;;  %v5958_v45 = vand.u32 15, %v29688_v1  ;;  %v6152_v31 = vshra.s32 %v29688_v1, 4 }
 0x7bf   : > { %vm29689_vm14 = vnez %v29602_v53  ;;  %vm22743_vm4 = vcmp.eq.s32.totalorder %v5957_v38, %v20385_v10  ;;  %v29690_v34 = vmov 0  ;;  %vm22748_vm0 = vcmp.eq.s32.totalorder %v6151_v50, %v20387_v42 }
 0x7c0   : > { %13366 = vmatpush1.bf16.msk.msra.mxu1 %vm29689_vm14, %v28087_v23  ;;  %v29691_v34 = vsel %vm22743_vm4, 4294967295, %v29690_v34  ;;  %v29692_v25 = vmov 0  ;;  %v5959_v1 = vand.u32 15, %v29694_v46  ;;  %v6153_v53 = vshra.s32 %v29694_v46, 4  ;;  %vm29699_vm4 = vmand %vm22616_vm1, %vm22621_vm10 }
 0x7c1   : > { %v29693_v25 = vsel %vm22748_vm0, 4294967295, %v29692_v25  ;;  %vm29695_vm14 = vnez %v29610_v13  ;;  %vm29696_vm8 = vnez %v29637_v33  ;;  %vm29697_vm7 = vnez %v29639_v8  ;;  %vm29706_vm1 = vmand %vm29677_vm13, %vm22635_vm9 }
 0x7c2   : > { %13368 = vmatprep.subr.msk.bf16.mxu1 %vm29695_vm14, %v28087_v23  ;;  %vm29698_vm12 = vmand %vm29696_vm8, %vm29697_vm7  ;;  %v29700_v11 = vmov 0  ;;  %vm22776_vm14 = vcmp.eq.s32.totalorder %v5956_v48, %v20396_v7  ;;  %v29702_v13 = vmov 0  ;;  %vm22781_vm7 = vcmp.eq.s32.totalorder %v6150_v16, %v20398_v30 }
 0x7c3   : > { %vm22767_vm6 = vmpackc.low %vm29699_vm4, %vm29698_vm12  ;;  %v29703_v13 = vsel %vm22776_vm14, 4294967295, %v29702_v13  ;;  %v29704_v33 = vmov 0  ;;  %v29708_v8 = vmov 0  ;;  %vm29710_vm4 = vnez %v29685_v5 }
 0x7c4   : > { %v29701_v11 = vsel %vm22767_vm6, 4294967295, %v29700_v11  ;;  %v29705_v33 = vsel %vm22781_vm7, 4294967295, %v29704_v33  ;;  %vm29707_vm10 = vmand %vm29683_vm3, %vm29682_vm11  ;;  %vm22804_vm0 = vcmp.eq.s32.totalorder %v5957_v38, %v20396_v7  ;;  %vm22809_vm9 = vcmp.eq.s32.totalorder %v6151_v50, %v20398_v30  ;;  %v29721_v38 = vld [vmem:[#allocation74_spill] sm:$0xff]  ;;  %v29727_v50 = vld [vmem:[#allocation75_spill] sm:$0xff] }
 0x7c5   : > { %vm22795_vm12 = vmpackc.low %vm29707_vm10, %vm29706_vm1  ;;  %vm29715_vm13 = vnez %v29693_v25  ;;  %vm29716_vm11 = vnez %v29691_v34  ;;  %vm22818_vm1 = vcmp.eq.s32.totalorder %v5958_v45, %v20385_v10  ;;  %v29717_v26 = vmov 0  ;;  %v29767_v25 = vld [vmem:[#allocation77_spill] sm:$0xff] }
 0x7c6   : > { %v29709_v8 = vsel %vm22795_vm12, 4294967295, %v29708_v8  ;;  %v29718_v26 = vsel %vm22818_vm1, 4294967295, %v29717_v26  ;;  %vm22823_vm10 = vcmp.eq.s32.totalorder %v6152_v31, %v20387_v42  ;;  %v5960_v48 = vand.u32 15, %v29721_v38 }
 0x7c7   : > { %v29720_v19 = vsel %vm22823_vm10, 4294967295, %v29719_v19  ;;  %v6154_v16 = vshra.s32 %v29721_v38, 4  ;;  %vm29722_vm8 = vnez %v29635_v24  ;;  %vm22837_vm12 = vcmp.eq.s32.totalorder %v5959_v1, %v20385_v10 }
 0x7c8   : > { %13370 = vmatpush1.bf16.msk.msra.mxu1 %vm29722_vm8, %v28087_v23  ;;  %v29723_v3 = vmov 0  ;;  %vm22842_vm6 = vcmp.eq.s32.totalorder %v6153_v53, %v20387_v42  ;;  %v29725_v21 = vmov 0  ;;  %v5961_v38 = vand.u32 15, %v29727_v50 }
 0x7c9   : > { %v29724_v3 = vsel %vm22837_vm12, 4294967295, %v29723_v3  ;;  %v29726_v21 = vsel %vm22842_vm6, 4294967295, %v29725_v21  ;;  %v6155_v24 = vshra.s32 %v29727_v50, 4  ;;  %vm29728_vm8 = vnez %v29643_v52  ;;  %vm29732_vm12 = vmand %vm22710_vm15, %vm22715_vm5 }
 0x7ca   : > { %13372 = vmatprep.subr.msk.bf16.mxu1 %vm29728_vm8, %v28087_v23  ;;  %vm29729_vm3 = vnez %v29670_v18  ;;  %vm29730_vm7 = vnez %v29672_v43  ;;  %v29733_v46 = vmov 0  ;;  %vm22870_vm8 = vcmp.eq.s32.totalorder %v5958_v45, %v20396_v7  ;;  %vm29739_vm15 = vmand %vm29710_vm4, %vm22729_vm2  ;;  %v14530_v45 = vld [vmem:[%s29413_s3 + $0xec] ss:$16 sps:$4 sm:$0xff]  }
 0x7cb   : > { %vm29731_vm14 = vmand %vm29729_vm3, %vm29730_vm7  ;;  %v29735_v52 = vmov 0  ;;  %vm22875_vm7 = vcmp.eq.s32.totalorder %v6152_v31, %v20398_v30  ;;  %v29737_v18 = vmov 0  ;;  %v29741_v43 = vmov 0 }
 0x7cc   : > { %vm22861_vm1 = vmpackc.low %vm29732_vm12, %vm29731_vm14  ;;  %v29736_v52 = vsel %vm22870_vm8, 4294967295, %v29735_v52  ;;  %v29738_v18 = vsel %vm22875_vm7, 4294967295, %v29737_v18  ;;  %vm29743_vm12 = vnez %v29718_v26  ;;  %vm22898_vm6 = vcmp.eq.s32.totalorder %v5959_v1, %v20396_v7  ;;  %v14522_v1 = vld [vmem:[%s29413_s3 + $0xc8] ss:$16 sps:$4 sm:$0xff]  }
 0x7cd   : > { %v29734_v46 = vsel %vm22861_vm1, 4294967295, %v29733_v46  ;;  %vm29740_vm5 = vmand %vm29716_vm11, %vm29715_vm13  ;;  %vm22903_vm2 = vcmp.eq.s32.totalorder %v6153_v53, %v20398_v30  ;;  %vm29754_vm3 = vnez %v29668_v39  ;;  %vm22929_vm11 = vcmp.eq.s32.totalorder %v5961_v38, %v20385_v10  ;;  %v14528_v39 = vld [vmem:[%s29413_s3 + $0xe8] ss:$16 sps:$4 sm:$0xff]  }
 0x7ce   : > { %vm22889_vm14 = vmpackc.low %vm29740_vm5, %vm29739_vm15  ;;  %vm22912_vm15 = vcmp.eq.s32.totalorder %v5960_v48, %v20385_v10  ;;  %vm22917_vm5 = vcmp.eq.s32.totalorder %v6154_v16, %v20387_v42  ;;  %13374 = vmatpush1.bf16.msk.msra.mxu1 %vm29754_vm3, %v28087_v23  ;;  %vm22934_vm1 = vcmp.eq.s32.totalorder %v6155_v24, %v20387_v42  ;;  %vm29759_vm4 = vnez %v29676_v51  ;;  %v29766_v51 = vld [vmem:[#allocation76_spill] sm:$0xff] }
 0x7cf   : > { %v29742_v43 = vsel %vm22889_vm14, 4294967295, %v29741_v43  ;;  %13376 = vmatprep.subr.msk.bf16.mxu1 %vm29759_vm4, %v28087_v23  ;;  %vm29760_vm3 = vnez %v29703_v13  ;;  %vm29761_vm13 = vnez %v29705_v33  ;;  %vm29763_vm14 = vmand %vm22804_vm0, %vm22809_vm9  ;;  %v5962_v31 = vand.u32 15, %v29766_v51  ;;  %v14540_v33 = vld [vmem:[%s29413_s3 + $0x128] ss:$16 sps:$4 sm:$0xff]  }
 0x7d0   : > { %vm29762_vm10 = vmand %vm29760_vm3, %vm29761_vm13  ;;  %v6156_v34 = vshra.s32 %v29766_v51, 4  ;;  %v5963_v53 = vand.u32 15, %v29767_v25  ;;  %v6157_v13 = vshra.s32 %v29767_v25, 4  ;;  %vm29769_vm9 = vnez %v29720_v19 }
 0x7d1   : > { %vm22951_vm7 = vmpackc.low %vm29763_vm14, %vm29762_vm10  ;;  %vm29771_vm14 = vnez %v29724_v3  ;;  %vm29782_vm3 = vnez %v29738_v18  ;;  %v29810_v18 = vld [vmem:[#allocation78_spill] sm:$0xff]  ;;  %v5965_v5 = vand.u32 15, %v29811_v12  ;;  %v6159_v36 = vshra.s32 %v29811_v12, 4  ;;  %v14566_v3 = vld [vmem:[%s29413_s3 + $0x1ac] ss:$16 sps:$4 sm:$0xff]  }
 0x7d2   : > { %vm6404_vm8 = vmand %vm22898_vm6, %vm22903_vm2  ;;  %vm29768_vm6 = vnez %v29701_v11  ;;  %vm29772_vm2 = vnez %v29726_v21  ;;  %v5964_v9 = vand.u32 15, %v29810_v18  ;;  %v29829_v11 = vld [vmem:[#allocation81_spill] sm:$0xff]  ;;  %v29912_v25 = vmov 0 }
 0x7d3   : > { %vm6407_vm4 = vmand %vm22912_vm15, %vm22917_vm5  ;;  %13378 = vmatpush1.bf16.msk.msra.mxu1 %vm29768_vm6, %v28087_v23  ;;  %vm29781_vm5 = vnez %v29736_v52  ;;  %v5967_v26 = vand.u32 15, %v29829_v11  ;;  %v6161_v19 = vshra.s32 %v29829_v11, 4  ;;  %v14498_v52 = vld [vmem:[%s29413_s3 + $0x48] ss:$16 sps:$4 sm:$0xff]   ;;  %v8574_v50 = vand.u32 31, %v28967_v14 }
 0x7d4   : > { %vm6409_vm0 = vmand %vm22929_vm11, %vm22934_vm1  ;;  %vm22989_vm1 = vcmp.eq.s32.totalorder %v5960_v48, %v20396_v7  ;;  %vm22994_vm11 = vcmp.eq.s32.totalorder %v6154_v16, %v20398_v30  ;;  %v29830_v48 = vmov 0  ;;  %v14558_v16 = vld [vmem:[%s29413_s3 + $0x188] ss:$16 sps:$4 sm:$0xff]   ;;  %v30204_v11 = vmov 0 }
 0x7d5   : > { %vm29770_vm10 = vmand %vm29743_vm12, %vm29769_vm9  ;;  %vm29780_vm12 = vnez %v29709_v8  ;;  %v29790_v8 = vmov 0  ;;  %v14564_v21 = vld [vmem:[%s29413_s3 + $0x1a8] ss:$16 sps:$4 sm:$0xff]  }
 0x7d6   : > { %vm29773_vm13 = vmand %vm29771_vm14, %vm29772_vm2  ;;  %13380 = vmatprep.subr.msk.bf16.mxu1 %vm29780_vm12, %v28087_v23  ;;  %vm23016_vm14 = vcmp.eq.s32.totalorder %v6155_v24, %v20398_v30  ;;  %vm23061_vm12 = vcmp.eq.s32.totalorder %v6156_v34, %v20398_v30  ;;  %v14569_v24 = vld [vmem:[%s29413_s3 + $0x1c4] ss:$16 sps:$4 sm:$0xff]  }
 0x7d7   : > { %vm22984_vm15 = vmpackc.low %vm29773_vm13, %vm29770_vm10  ;;  %vm23011_vm10 = vcmp.eq.s32.totalorder %v5961_v38, %v20396_v7  ;;  %vm23025_vm13 = vcmp.eq.s32.totalorder %v5962_v31, %v20385_v10  ;;  %v29794_v38 = vmov 0  ;;  %8092 = vmatprep.subr.bf16.mxu0 %v14569_v24 }
 0x7d8   : > { %vm29783_vm6 = vmand %vm29781_vm5, %vm29782_vm3  ;;  %vm29800_vm5 = vnez %v29734_v46  ;;  %vm23073_vm3 = vcmp.eq.s32.totalorder %v5963_v53, %v20396_v7  ;;  %v14500_v46 = vld [vmem:[%s29413_s3 + $0x4c] ss:$16 sps:$4 sm:$0xff]  }
 0x7d9   : > { %vm23006_vm9 = vmpackc.low %vm6404_vm8, %vm29783_vm6  ;;  %vm23030_vm8 = vcmp.eq.s32.totalorder %v6156_v34, %v20387_v42  ;;  %13382 = vmatpush1.bf16.msk.msra.mxu1 %vm29800_vm5, %v28087_v23  ;;  %vm23056_vm6 = vcmp.eq.s32.totalorder %v5962_v31, %v20396_v7  ;;  %v29820_v31 = vld [vmem:[#allocation80_spill] sm:$0xff] }
 0x7da   : > { %v29785_v32 = vsel %vm23006_vm9, 4294967295, %v29784_v32  ;;  %vm23020_vm2 = vmpackc.low %vm6409_vm0, %vm6407_vm4  ;;  %v29795_v38 = vsel %vm23030_vm8, 4294967295, %v29794_v38  ;;  %vm23039_vm4 = vcmp.eq.s32.totalorder %v5963_v53, %v20385_v10  ;;  %vm23044_vm0 = vcmp.eq.s32.totalorder %v6157_v13, %v20387_v42 }
 0x7db   : > { %v29791_v8 = vsel %vm23020_vm2, 4294967295, %v29790_v8  ;;  %vm29805_vm2 = vnez %v29742_v43  ;;  %vm23078_vm9 = vcmp.eq.s32.totalorder %v6157_v13, %v20398_v30  ;;  %v6158_v43 = vshra.s32 %v29810_v18, 4  ;;  %vm6410_vm5 = vmand %vm23056_vm6, %vm23061_vm12  ;;  %v14542_v13 = vld [vmem:[%s29413_s3 + $0x12c] ss:$16 sps:$4 sm:$0xff]  }
 0x7dc   : > { %13384 = vmatprep.subr.msk.bf16.mxu1 %vm29805_vm2, %v28087_v23  ;;  %vm6413_vm2 = vmand %vm23039_vm4, %vm23044_vm0  ;;  %v5966_v34 = vand.u32 15, %v29820_v31  ;;  %v6160_v53 = vshra.s32 %v29820_v31, 4  ;;  %vm23145_vm0 = vcmp.eq.s32.totalorder %v6159_v36, %v20387_v42  ;;  %v29910_v31 = vmov 0 }
 0x7dd   : > { %13386 = vmatpush1.bf16.msk.msra.mxu1 %vm22951_vm7, %v28087_v23  ;;  %vm6412_vm8 = vmand %vm23073_vm3, %vm23078_vm9  ;;  %vm23119_vm9 = vcmp.eq.s32.totalorder %v5964_v9, %v20385_v10  ;;  %vm23161_vm6 = vcmp.eq.s32.totalorder %v6158_v43, %v20398_v30 }
 0x7de   : > { %13388 = vmatprep.subr.msk.bf16.mxu1 %vm22984_vm15, %v28087_v23  ;;  %vm29812_vm4 = vmand %vm22989_vm1, %vm22994_vm11  ;;  %vm23124_vm15 = vcmp.eq.s32.totalorder %v6158_v43, %v20387_v42  ;;  %vm29821_vm1 = vnez %v29795_v38  ;;  %v14518_v43 = vld [vmem:[%s29413_s3 + $0xac] ss:$16 sps:$4 sm:$0xff]  }
 0x7df   : > { %vm29813_vm12 = vmand %vm23011_vm10, %vm23016_vm14  ;;  %vm23140_vm14 = vcmp.eq.s32.totalorder %v5965_v5, %v20385_v10  ;;  %v14560_v38 = vld [vmem:[%s29413_s3 + $0x18c] ss:$16 sps:$4 sm:$0xff]  }
 0x7e0   : > { %vm23114_vm7 = vmpackc.low %vm29813_vm12, %vm29812_vm4  ;;  %vm23178_vm4 = vcmp.eq.s32.totalorder %v6159_v36, %v20398_v30  ;;  %vm29841_vm12 = vnez %v29791_v8  ;;  %v14524_v36 = vld [vmem:[%s29413_s3 + $0xcc] ss:$16 sps:$4 sm:$0xff]   ;;  %v14570_v8 = vld [vmem:[%s29413_s3 + $0x1c8] ss:$16 sps:$4 sm:$0xff]  }
 0x7e1   : > { %vm29822_vm11 = vmand %vm23025_vm13, %vm29821_vm1  ;;  %vm23156_vm13 = vcmp.eq.s32.totalorder %v5964_v9, %v20396_v7  ;;  %v14510_v9 = vld [vmem:[%s29413_s3 + $0x88] ss:$16 sps:$4 sm:$0xff]  }
 0x7e2   : > { %vm23135_vm10 = vmpackc.low %vm6413_vm2, %vm29822_vm11  ;;  %vm29836_vm2 = vnez %v29785_v32  ;;  %vm23190_vm11 = vcmp.eq.s32.totalorder %v5966_v34, %v20385_v10  ;;  %v14567_v32 = vld [vmem:[%s29413_s3 + $0x1c0] ss:$16 sps:$4 sm:$0xff]  }
 0x7e3   : > { %vm23151_vm3 = vmpackc.low %vm6412_vm8, %vm6410_vm5  ;;  %13390 = vmatpush1.bf16.msk.msra.mxu1 %vm29836_vm2, %v28087_v23  ;;  %vm23173_vm5 = vcmp.eq.s32.totalorder %v5965_v5, %v20396_v7  ;;  %vm23195_vm2 = vcmp.eq.s32.totalorder %v6160_v53, %v20387_v42  ;;  %vm23204_vm8 = vcmp.eq.s32.totalorder %v5967_v26, %v20385_v10  ;;  %v14488_v10 = vld [vmem:[%s29413_s3 + $0xc] ss:$16 sps:$4 sm:$0xff]   ;;  %v14516_v5 = vld [vmem:[%s29413_s3 + $0xa8] ss:$16 sps:$4 sm:$0xff]   ;;  %8093 = vmatpush1.bf16.msra.mxu0 %v14567_v32 }
 0x7e4   : > { %v29831_v48 = vsel %vm23151_vm3, 4294967295, %v29830_v48  ;;  %13392 = vmatprep.subr.msk.bf16.mxu1 %vm29841_vm12, %v28087_v23  ;;  %vm6417_vm1 = vmand %vm23140_vm14, %vm23145_vm0  ;;  %vm6293_vm14 = vcmp.eq.s32.totalorder %v6161_v19, %v20387_v42  ;;  %vm6290_vm3 = vcmp.eq.s32.totalorder %v6160_v53, %v20398_v30  ;;  %v14486_v42 = vld [vmem:[%s29413_s3 + $0x8] ss:$16 sps:$4 sm:$0xff]  }
 0x7e5   : > { %vm6414_vm12 = vmand %vm23156_vm13, %vm23161_vm6  ;;  %v14534_v53 = vld [vmem:[%s29413_s3 + $0x108] ss:$16 sps:$4 sm:$0xff]  }
 0x7e6   : > { %vm6416_vm0 = vmand %vm23173_vm5, %vm23178_vm4 }
 0x7e7   : > { %13394 = vmatpush1.bf16.msk.msra.mxu1 %vm23114_vm7, %v28087_v23  ;;  %vm6419_vm13 = vmand %vm23190_vm11, %vm23195_vm2  ;;  %vm6094_vm7 = vcmp.eq.s32.totalorder %v5966_v34, %v20396_v7  ;;  %vm6096_vm11 = vcmp.eq.s32.totalorder %v5967_v26, %v20396_v7  ;;  %v14494_v7 = vld [vmem:[%s29413_s3 + $0x2c] ss:$16 sps:$4 sm:$0xff]   ;;  %v14546_v26 = vld [vmem:[%s29413_s3 + $0x148] ss:$16 sps:$4 sm:$0xff]  }
 0x7e8   : > { %13396 = vmatprep.subr.msk.bf16.mxu1 %vm23135_vm10, %v28087_v23  ;;  %vm6421_vm6 = vmand %vm23204_vm8, %vm6293_vm14  ;;  %vm6292_vm10 = vcmp.eq.s32.totalorder %v6161_v19, %v20398_v30  ;;  %vm29849_vm8 = vnez %v29831_v48  ;;  %v14492_v30 = vld [vmem:[%s29413_s3 + $0x28] ss:$16 sps:$4 sm:$0xff]   ;;  %v14536_v34 = vld [vmem:[%s29413_s3 + $0x10c] ss:$16 sps:$4 sm:$0xff]  }
 0x7e9   : > { %vm29848_vm5 = vmand %vm23119_vm9, %vm23124_vm15  ;;  %v14554_v19 = vld [vmem:[%s29413_s3 + $0x16c] ss:$16 sps:$4 sm:$0xff]   ;;  %v14552_v48 = vld [vmem:[%s29413_s3 + $0x168] ss:$16 sps:$4 sm:$0xff]  }
 0x7ea   : > { %vm13399_vm4 = vmpackc.low %vm6417_vm1, %vm29848_vm5 }
 0x7eb   : > { %vm13401_vm2 = vmpackc.low %vm6416_vm0, %vm6414_vm12  ;;  %13398 = vmatpush1.bf16.msk.msra.mxu1 %vm29849_vm8, %v28087_v23 }
 0x7ec   : > { %vm13403_vm14 = vmpackc.low %vm6421_vm6, %vm6419_vm13  ;;  %13400 = vmatprep.subr.msk.bf16.mxu1 %vm13399_vm4, %v28087_v23  ;;  %vm29857_vm4 = vcmask 1046528  }
 0x7ed   : > { %vm6418_vm9 = vmand %vm6094_vm7, %vm6290_vm3  ;;  %vm29850_vm3 = vcmask 1040384  }
 0x7ee   : > { %vm6420_vm15 = vmand %vm6096_vm11, %vm6292_vm10 }
 0x7ef   : > { %13402 = vmatpush1.bf16.msk.msra.mxu1 %vm13401_vm2, %v28087_v23  ;;  %vm13405_vm1 = vmpackc.low %vm6420_vm15, %vm6418_vm9  ;;  %vm29859_vm2 = vcmask 1045504  }
 0x7f0   : > { %13404 = vmatprep.subr.msk.bf16.mxu1 %vm13403_vm14, %v28087_v23  ;;  %vm29851_vm12 = vmmov %vm29850_vm3 }
 0x7f1   : > { %vm29852_vm0 = vmmov %vm29850_vm3 }
 0x7f2   : > { %vm29853_vm13 = vmmov %vm29852_vm0 }
 0x7f3   : > { %13406 = vmatpush1.bf16.msk.msra.mxu1 %vm13405_vm1, %v28087_v23  ;;  %vm29854_vm6 = vmmov %vm29852_vm0 }
 0x7f4   : > { %8193 = vmatprep.subr.bf16.mxu1 %v14488_v10  ;;  %v14572_v10 = vld [vmem:[%s29413_s3 + $0x1cc] ss:$16 sps:$4 sm:$0xff]   ;;  %vm29855_vm5 = vmmov %vm29852_vm0 }
 0x7f5   : > { %vm29858_vm7 = vmmov %vm29857_vm4 }
 0x7f6   : > { %6820 = vmatmul.mubr.f32.vlgmr.msra.gmra.mrb[40].mxu1 %v22372_v35  ;;  %v14506_v35 = vld [vmem:[%s29413_s3 + $0x6c] ss:$16 sps:$4 sm:$0xff]   ;;  %vm29860_vm11 = vmmov %vm29857_vm4 }
 0x7f7   : > { %6825 = vmatprep.mubr.f32.mxu1 %v22501_v29  ;;  %8194 = vmatpush1.bf16.msra.mxu1 %v14486_v42  ;;  %v14504_v29 = vld [vmem:[%s29413_s3 + $0x68] ss:$16 sps:$4 sm:$0xff]   ;;  %v14573_v42 = vld [vmem:[%s29413_s3 + $0x1e0] ss:$16 sps:$4 sm:$0xff]   ;;  %vm29861_vm10 = vmmov %vm29857_vm4 }
 0x7f8   : > { %8195 = vmatprep.subr.bf16.mxu1 %v14494_v7  ;;  %v14575_v7 = vld [vmem:[%s29413_s3 + $0x1e4] ss:$16 sps:$4 sm:$0xff]   ;;  %vm29862_vm8 = vmmov %vm29859_vm2 }
 0x7f9   : > { %8094 = vmatprep.subr.bf16.mxu0 %v14575_v7  ;;  %vm29865_vm9 = vmmov %vm29859_vm2 }
 0x7fa   : > { %6826 = vmatmul.mubr.f32.gmra.mrb[42].mxu1 %v22468_v44  ;;  %v14512_v44 = vld [vmem:[%s29413_s3 + $0x8c] ss:$16 sps:$4 sm:$0xff]   ;;  %8095 = vmatpush1.bf16.msra.mxu0 %v14573_v42  ;;  %vm29866_vm15 = vmmov %vm29859_vm2 }
 0x7fb   : > { %8196 = vmatpush1.bf16.msra.mxu1 %v14492_v30  ;;  %v14576_v30 = vld [vmem:[%s29413_s3 + $0x1e8] ss:$16 sps:$4 sm:$0xff]   ;;  %vm29872_vm1 = vmmov %vm29857_vm4 }
 0x7fc   : > { %8197 = vmatprep.subr.bf16.mxu1 %v14500_v46  ;;  %v14578_v46 = vld [vmem:[%s29413_s3 + $0x1ec] ss:$16 sps:$4 sm:$0xff]  }
 0x7ff   : > { %8198 = vmatpush1.bf16.msra.mxu1 %v14498_v52  ;;  %v14581_v52 = vld [vmem:[%s29413_s3 + $0x204] ss:$16 sps:$4 sm:$0xff]  }
 0x800   : > { %8199 = vmatprep.subr.bf16.mxu1 %v14506_v35  ;;  %v14584_v35 = vld [vmem:[%s29413_s3 + $0x20c] ss:$16 sps:$4 sm:$0xff]   ;;  %8107 = vmatprep.subr.bf16.mxu0 %v14581_v52 }
 0x803   : > { %8200 = vmatpush1.bf16.msra.mxu1 %v14504_v29  ;;  %v9525_v29 = vld [vmem:[%s27119_s9] sm:$0xff] }
 0x804   : > { %8201 = vmatprep.subr.bf16.mxu1 %v14512_v44  ;;  %v9526_v44 = vld [vmem:[%s27119_s9 + $0x8] sm:$0xff] }
 0x807   : > { %8202 = vmatpush1.bf16.msra.mxu1 %v14510_v9 }
 0x808   : > { %8203 = vmatprep.subr.bf16.mxu1 %v14518_v43 }
 0x80b   : > { %8204 = vmatpush1.bf16.msra.mxu1 %v14516_v5 }
 0x80c   : > { %8205 = vmatprep.subr.bf16.mxu1 %v14524_v36 }
 0x80f   : > { %8206 = vmatpush1.bf16.msra.mxu1 %v14522_v1 }
 0x810   : > { %8207 = vmatprep.subr.bf16.mxu1 %v14530_v45 }
 0x813   : > { %8208 = vmatpush1.bf16.msra.mxu1 %v14528_v39  ;;  %v9527_v39 = vld [vmem:[%s27119_s9 + $0x10] sm:$0xff] }
 0x814   : > { %8209 = vmatprep.subr.bf16.mxu1 %v14536_v34 }
 0x817   : > { %8210 = vmatpush1.bf16.msra.mxu1 %v14534_v53  ;;  %v9528_v53 = vld [vmem:[%s27119_s9 + $0x18] sm:$0xff] }
 0x818   : > { %8211 = vmatprep.subr.bf16.mxu1 %v14542_v13 }
 0x81b   : > { %8212 = vmatpush1.bf16.msra.mxu1 %v14540_v33 }
 0x81c   : > { %8213 = vmatprep.subr.bf16.mxu1 %v14548_v22 }
 0x81f   : > { %8214 = vmatpush1.bf16.msra.mxu1 %v14546_v26 }
 0x820   : > { %8215 = vmatprep.subr.bf16.mxu1 %v14554_v19 }
 0x823   : > { %8216 = vmatpush1.bf16.msra.mxu1 %v14552_v48 }
 0x824   : > { %8217 = vmatprep.subr.bf16.mxu1 %v14560_v38 }
 0x827   : > { %8218 = vmatpush1.bf16.msra.mxu1 %v14558_v16 }
 0x828   : > { %8219 = vmatprep.subr.bf16.mxu1 %v14566_v3 }
 0x82b   : > { %8220 = vmatpush1.bf16.msra.mxu1 %v14564_v21 }
 0x82c   : > { %8221 = vmatprep.subr.bf16.mxu1 %v14572_v10 }
 0x82f   : > { %8222 = vmatpush1.bf16.msra.mxu1 %v14570_v8 }
 0x830   : > { %8223 = vmatprep.subr.bf16.mxu1 %v14578_v46 }
 0x833   : > { %8224 = vmatpush1.bf16.msra.mxu1 %v14576_v30 }
 0x834   : > { %8236 = vmatprep.subr.bf16.mxu1 %v14584_v35 }
 0x8c9   : > { %v6821_v9 = vpop.f32.mrb[40].mxu1 }
 0x8ca   : > { %v6836_v43 = vrot.slane %v6821_v9, 7  ;;  %v9529_v5 = vmul.f32 %v9525_v29, %v6821_v9  ;;  %v6823_v36 = vpop.f32.mrb[41].mxu1 }
 0x8cb   : > { %v6837_v1 = vrot.slane %v6823_v36, 7  ;;  %v9530_v45 = vmul.f32 %v9526_v44, %v6823_v36 }
 0x8cc   : > { %v6848_v34 = vsel %vm29850_vm3, 0.0, %v6836_v43  ;;  %vm29873_vm3 = vmmov %vm29872_vm1 }
 0x8cd   : > { %v6849_v13 = vsel %vm29851_vm12, 0.0, %v6837_v1  ;;  %v6827_v33 = vpop.f32.mrb[42].mxu1  ;;  %v23372_v22 = vadd.f32 %v9530_v45, %v9529_v5  ;;  %v6856_v38 = vrot.slane %v6848_v34, 1  ;;  %v6870_v16 = vrot.slane %v6848_v34, 2  ;;  %v14579_v34 = vld [vmem:[%s29413_s3 + $0x200] ss:$16 sps:$4 sm:$0xff]   ;;  %vm29874_vm12 = vmmov %vm29872_vm1 }
 0x8ce   : > { %v6838_v26 = vrot.slane %v6827_v33, 7  ;;  %v9531_v19 = vmul.f32 %v9527_v39, %v6827_v33  ;;  %v6829_v48 = vpop.f32.mrb[43].mxu1  ;;  %v6859_v32 = vrot.slane %v6849_v13, 1  ;;  %v6873_v24 = vrot.slane %v6849_v13, 2 }
 0x8cf   : > { %v6840_v3 = vrot.slane %v6829_v48, 7  ;;  %v9532_v21 = vmul.f32 %v9528_v53, %v6829_v48  ;;  %v14582_v53 = vld [vmem:[%s29413_s3 + $0x208] ss:$16 sps:$4 sm:$0xff]  }
 0x8d0   : > { %v6839_v8 = vsel %vm29852_vm0, %v6836_v43, %v6838_v26  ;;  %v6850_v10 = vsel %vm29853_vm13, %v6838_v26, 0.0  ;;  %vm29875_vm0 = vmmov %vm29872_vm1 }
 0x8d1   : > { %v6857_v42 = vrot.slane %v6839_v8, 1  ;;  %v6862_v7 = vrot.slane %v6850_v10, 1  ;;  %v6871_v30 = vrot.slane %v6839_v8, 2  ;;  %v6876_v46 = vrot.slane %v6850_v10, 2  ;;  %vm29876_vm13 = vmmov %vm29875_vm0 }
 0x8d2   : > { %v12475_v52 = vpack.c.bf16 %v6839_v8, %v6836_v43  ;;  %v6841_v35 = vsel %vm29854_vm6, %v6837_v1, %v6840_v3  ;;  %v6851_v29 = vsel %vm29855_vm5, %v6840_v3, 0.0  ;;  %v23378_v44 = vadd.f32 %v9532_v21, %v9531_v19  ;;  %v29863_v3 = vld [vmem:[#allocation15_spill] sm:$0xff]  ;;  %vm29877_vm6 = vmmov %vm29875_vm0 }
 0x8d3   : > { %v6860_v9 = vrot.slane %v6841_v35, 1  ;;  %v6864_v5 = vrot.slane %v6851_v29, 1  ;;  %v6874_v36 = vrot.slane %v6841_v35, 2  ;;  %v6878_v45 = vrot.slane %v6851_v29, 2  ;;  %v14599_v29 = vld [vmem:[%s29413_s3 + $0x264] ss:$16 sps:$4 sm:$0xff]   ;;  %vm29878_vm5 = vmmov %vm29875_vm0 }
 0x8d4   : > { %29856 = vst [vmem:[#allocation43_spill] sm:$0xff] %v23378_v44  ;;  %v12471_v39 = vpack.c.bf16 %v6841_v35, %v6837_v1  ;;  %v6858_v43 = vsel %vm29857_vm4, %v6856_v38, %v6857_v42  ;;  %v6863_v13 = vsel %vm29858_vm7, %v6857_v42, %v6862_v7  ;;  %v6872_v33 = vsel %vm29859_vm2, %v6870_v16, %v6871_v30  ;;  %v14587_v38 = vld [vmem:[%s29413_s3 + $0x224] ss:$16 sps:$4 sm:$0xff]   ;;  %v14590_v16 = vld [vmem:[%s29413_s3 + $0x22c] ss:$16 sps:$4 sm:$0xff]   ;;  %vm29879_vm4 = vmmov %vm29875_vm0 }
 0x8d5   : > { %v6861_v26 = vsel %vm29860_vm11, %v6859_v32, %v6860_v9  ;;  %v6865_v19 = vsel %vm29861_vm10, %v6860_v9, %v6864_v5  ;;  %v23391_v48 = vpack.c.bf16 %v6863_v13, %v6858_v43  ;;  %v6875_v1 = vsel %vm29862_vm8, %v6873_v24, %v6874_v36  ;;  %v14585_v42 = vld [vmem:[%s29413_s3 + $0x220] ss:$16 sps:$4 sm:$0xff]   ;;  %v14588_v7 = vld [vmem:[%s29413_s3 + $0x228] ss:$16 sps:$4 sm:$0xff]   ;;  %v14602_v9 = vld [vmem:[%s29413_s3 + $0x26c] ss:$16 sps:$4 sm:$0xff]  }
 0x8d6   : > { %vm29864_vm14 = vnez %v29863_v3  ;;  %v6887_v21 = vpack.c.bf16 %v6865_v19, %v6861_v26  ;;  %v6879_v32 = vsel %vm29865_vm9, %v6874_v36, %v6878_v45  ;;  %v6877_v8 = vsel %vm29866_vm15, %v6871_v30, %v6876_v46  ;;  %v14593_v30 = vld [vmem:[%s29413_s3 + $0x244] ss:$16 sps:$4 sm:$0xff]   ;;  %v14596_v46 = vld [vmem:[%s29413_s3 + $0x24c] ss:$16 sps:$4 sm:$0xff]   ;;  %v14594_v35 = vld [vmem:[%s29413_s3 + $0x248] ss:$16 sps:$4 sm:$0xff]  }
 0x8d7   : > { %12472 = vmatprep.mubr.msk.bf16.mxu0 %vm29864_vm14, %v12471_v39  ;;  %12480 = vmatprep.mubr.msk.bf16.mxu1 %vm29864_vm14, %v12471_v39  ;;  %v23410_v24 = vpack.c.bf16 %v6879_v32, %v6875_v1  ;;  %v23412_v10 = vpack.c.bf16 %v6877_v8, %v6872_v33  ;;  %v14597_v5 = vld [vmem:[%s29413_s3 + $0x260] ss:$16 sps:$4 sm:$0xff]   ;;  %v14600_v36 = vld [vmem:[%s29413_s3 + $0x268] ss:$16 sps:$4 sm:$0xff]   ;;  %v14605_v45 = vld [vmem:[%s29413_s3 + $0x284] ss:$16 sps:$4 sm:$0xff]  }
 0x8d8   : > { %12476 = vmatmul.mubr.msk.bf16.vlgmr.msra.gmra.mrb[40].mxu0 %vm29864_vm14, %v12475_v52  ;;  %12484 = vmatmul.mubr.msk.bf16.vlgmr.msra.gmra.mrb[44].mxu1 %vm29864_vm14, %v12475_v52  ;;  %v14591_v52 = vld [vmem:[%s29413_s3 + $0x240] ss:$16 sps:$4 sm:$0xff]   ;;  %v14608_v39 = vld [vmem:[%s29413_s3 + $0x28c] ss:$16 sps:$4 sm:$0xff]   ;;  %v14611_v43 = vld [vmem:[%s29413_s3 + $0x2a4] ss:$16 sps:$4 sm:$0xff]  }
 0x8d9   : > { %8108 = vmatpush1.bf16.msra.mxu0 %v14579_v34  ;;  %8237 = vmatpush1.bf16.msra.mxu1 %v14582_v53  ;;  %v14603_v34 = vld [vmem:[%s29413_s3 + $0x280] ss:$16 sps:$4 sm:$0xff]   ;;  %v14606_v53 = vld [vmem:[%s29413_s3 + $0x288] ss:$16 sps:$4 sm:$0xff]   ;;  %v14614_v13 = vld [vmem:[%s29413_s3 + $0x2ac] ss:$16 sps:$4 sm:$0xff]  }
 0x8da   : > { %8139 = vmatprep.mubr.bf16.mxu0 %v6887_v21  ;;  %8268 = vmatprep.mubr.bf16.mxu1 %v6887_v21  ;;  %v14609_v33 = vld [vmem:[%s29413_s3 + $0x2a0] ss:$16 sps:$4 sm:$0xff]   ;;  %v14612_v26 = vld [vmem:[%s29413_s3 + $0x2a8] ss:$16 sps:$4 sm:$0xff]   ;;  %v14617_v19 = vld [vmem:[%s29413_s3 + $0x2c4] ss:$16 sps:$4 sm:$0xff]  }
 0x8db   : > { %8109 = vmatprep.subr.bf16.mxu0 %v14587_v38  ;;  %8238 = vmatprep.subr.bf16.mxu1 %v14590_v16  ;;  %v14620_v1 = vld [vmem:[%s29413_s3 + $0x2cc] ss:$16 sps:$4 sm:$0xff]   ;;  %v14615_v3 = vld [vmem:[%s29413_s3 + $0x2c0] ss:$16 sps:$4 sm:$0xff]   ;;  %v14618_v21 = vld [vmem:[%s29413_s3 + $0x2c8] ss:$16 sps:$4 sm:$0xff]  }
 0x8dc   : > { %v14623_v38 = vld [vmem:[%s29413_s3 + $0x2e4] ss:$16 sps:$4 sm:$0xff]   ;;  %v14626_v16 = vld [vmem:[%s29413_s3 + $0x2ec] ss:$16 sps:$4 sm:$0xff]   ;;  %v14621_v32 = vld [vmem:[%s29413_s3 + $0x2e0] ss:$16 sps:$4 sm:$0xff]  }
 0x8dd   : > { %8110 = vmatpush1.bf16.msra.mxu0 %v14585_v42  ;;  %8239 = vmatpush1.bf16.msra.mxu1 %v14588_v7  ;;  %v14624_v8 = vld [vmem:[%s29413_s3 + $0x2e8] ss:$16 sps:$4 sm:$0xff]   ;;  %v14629_v42 = vld [vmem:[%s29413_s3 + $0x304] ss:$16 sps:$4 sm:$0xff]   ;;  %v14632_v7 = vld [vmem:[%s29413_s3 + $0x30c] ss:$16 sps:$4 sm:$0xff]  }
 0x8de   : > { %8111 = vmatprep.subr.bf16.mxu0 %v14593_v30  ;;  %8240 = vmatprep.subr.bf16.mxu1 %v14596_v46  ;;  %v14627_v30 = vld [vmem:[%s29413_s3 + $0x300] ss:$16 sps:$4 sm:$0xff]   ;;  %v14630_v46 = vld [vmem:[%s29413_s3 + $0x308] ss:$16 sps:$4 sm:$0xff]   ;;  %vm27644_vm7 = vcmask 785408  }
 0x8e1   : > { %8112 = vmatpush1.bf16.msra.mxu0 %v14591_v52  ;;  %8241 = vmatpush1.bf16.msra.mxu1 %v14594_v35  ;;  %v14635_v52 = vld [vmem:[%s29413_s3 + $0x324] ss:$16 sps:$4 sm:$0xff]   ;;  %v14638_v35 = vld [vmem:[%s29413_s3 + $0x32c] ss:$16 sps:$4 sm:$0xff]  }
 0x8e2   : > { %8113 = vmatprep.subr.bf16.mxu0 %v14599_v29  ;;  %8242 = vmatprep.subr.bf16.mxu1 %v14602_v9  ;;  %v14633_v29 = vld [vmem:[%s29413_s3 + $0x320] ss:$16 sps:$4 sm:$0xff]   ;;  %v14636_v9 = vld [vmem:[%s29413_s3 + $0x328] ss:$16 sps:$4 sm:$0xff]  }
 0x8e5   : > { %8114 = vmatpush1.bf16.msra.mxu0 %v14597_v5  ;;  %8243 = vmatpush1.bf16.msra.mxu1 %v14600_v36  ;;  %v14641_v5 = vld [vmem:[%s29413_s3 + $0x344] ss:$16 sps:$4 sm:$0xff]   ;;  %v14644_v36 = vld [vmem:[%s29413_s3 + $0x34c] ss:$16 sps:$4 sm:$0xff]  }
 0x8e6   : > { %8115 = vmatprep.subr.bf16.mxu0 %v14605_v45  ;;  %8244 = vmatprep.subr.bf16.mxu1 %v14608_v39  ;;  %v14639_v45 = vld [vmem:[%s29413_s3 + $0x340] ss:$16 sps:$4 sm:$0xff]   ;;  %v14642_v39 = vld [vmem:[%s29413_s3 + $0x348] ss:$16 sps:$4 sm:$0xff]  }
 0x8e9   : > { %8116 = vmatpush1.bf16.msra.mxu0 %v14603_v34  ;;  %8245 = vmatpush1.bf16.msra.mxu1 %v14606_v53  ;;  %v14647_v34 = vld [vmem:[%s29413_s3 + $0x364] ss:$16 sps:$4 sm:$0xff]   ;;  %v14650_v53 = vld [vmem:[%s29413_s3 + $0x36c] ss:$16 sps:$4 sm:$0xff]  }
 0x8ea   : > { %8117 = vmatprep.subr.bf16.mxu0 %v14611_v43  ;;  %8246 = vmatprep.subr.bf16.mxu1 %v14614_v13  ;;  %v14645_v43 = vld [vmem:[%s29413_s3 + $0x360] ss:$16 sps:$4 sm:$0xff]   ;;  %v14648_v13 = vld [vmem:[%s29413_s3 + $0x368] ss:$16 sps:$4 sm:$0xff]  }
 0x8ed   : > { %8118 = vmatpush1.bf16.msra.mxu0 %v14609_v33  ;;  %8247 = vmatpush1.bf16.msra.mxu1 %v14612_v26  ;;  %v14653_v33 = vld [vmem:[%s29413_s3 + $0x384] ss:$16 sps:$4 sm:$0xff]   ;;  %v14656_v26 = vld [vmem:[%s29413_s3 + $0x38c] ss:$16 sps:$4 sm:$0xff]  }
 0x8ee   : > { %8119 = vmatprep.subr.bf16.mxu0 %v14617_v19  ;;  %8248 = vmatprep.subr.bf16.mxu1 %v14620_v1  ;;  %v14651_v19 = vld [vmem:[%s29413_s3 + $0x380] ss:$16 sps:$4 sm:$0xff]   ;;  %v14654_v1 = vld [vmem:[%s29413_s3 + $0x388] ss:$16 sps:$4 sm:$0xff]  }
 0x8f1   : > { %8120 = vmatpush1.bf16.msra.mxu0 %v14615_v3  ;;  %8249 = vmatpush1.bf16.msra.mxu1 %v14618_v21  ;;  %v14659_v3 = vld [vmem:[%s29413_s3 + $0x3a4] ss:$16 sps:$4 sm:$0xff]   ;;  %v14662_v21 = vld [vmem:[%s29413_s3 + $0x3ac] ss:$16 sps:$4 sm:$0xff]  }
 0x8f2   : > { %8121 = vmatprep.subr.bf16.mxu0 %v14623_v38  ;;  %8250 = vmatprep.subr.bf16.mxu1 %v14626_v16  ;;  %v14657_v38 = vld [vmem:[%s29413_s3 + $0x3a0] ss:$16 sps:$4 sm:$0xff]   ;;  %v14660_v16 = vld [vmem:[%s29413_s3 + $0x3a8] ss:$16 sps:$4 sm:$0xff]  }
 0x8f5   : > { %8122 = vmatpush1.bf16.msra.mxu0 %v14621_v32  ;;  %8251 = vmatpush1.bf16.msra.mxu1 %v14624_v8  ;;  %v14665_v32 = vld [vmem:[%s29413_s3 + $0x3c4] ss:$16 sps:$4 sm:$0xff]   ;;  %v14668_v8 = vld [vmem:[%s29413_s3 + $0x3cc] ss:$16 sps:$4 sm:$0xff]  }
 0x8f6   : > { %8123 = vmatprep.subr.bf16.mxu0 %v14629_v42  ;;  %8252 = vmatprep.subr.bf16.mxu1 %v14632_v7  ;;  %v14663_v42 = vld [vmem:[%s29413_s3 + $0x3c0] ss:$16 sps:$4 sm:$0xff]   ;;  %v14666_v7 = vld [vmem:[%s29413_s3 + $0x3c8] ss:$16 sps:$4 sm:$0xff]  }
 0x8f9   : > { %8124 = vmatpush1.bf16.msra.mxu0 %v14627_v30  ;;  %8253 = vmatpush1.bf16.msra.mxu1 %v14630_v46  ;;  %v14671_v30 = vld [vmem:[%s29413_s3 + $0x3e4] ss:$16 sps:$4 sm:$0xff]   ;;  %v14674_v46 = vld [vmem:[%s29413_s3 + $0x3ec] ss:$16 sps:$4 sm:$0xff]  }
 0x8fa   : > { %8125 = vmatprep.subr.bf16.mxu0 %v14635_v52  ;;  %8254 = vmatprep.subr.bf16.mxu1 %v14638_v35  ;;  %v14669_v52 = vld [vmem:[%s29413_s3 + $0x3e0] ss:$16 sps:$4 sm:$0xff]   ;;  %v14672_v35 = vld [vmem:[%s29413_s3 + $0x3e8] ss:$16 sps:$4 sm:$0xff]  }
 0x8fd   : > { %8126 = vmatpush1.bf16.msra.mxu0 %v14633_v29  ;;  %8255 = vmatpush1.bf16.msra.mxu1 %v14636_v9  ;;  %v14677_v29 = vld [vmem:[%s29413_s3 + $0x404] ss:$16 sps:$4 sm:$0xff]   ;;  %v14680_v9 = vld [vmem:[%s29413_s3 + $0x40c] ss:$16 sps:$4 sm:$0xff]  }
 0x8fe   : > { %8127 = vmatprep.subr.bf16.mxu0 %v14641_v5  ;;  %8256 = vmatprep.subr.bf16.mxu1 %v14644_v36  ;;  %v14675_v5 = vld [vmem:[%s29413_s3 + $0x400] ss:$16 sps:$4 sm:$0xff]   ;;  %v14678_v36 = vld [vmem:[%s29413_s3 + $0x408] ss:$16 sps:$4 sm:$0xff]  }
 0x901   : > { %8128 = vmatpush1.bf16.msra.mxu0 %v14639_v45  ;;  %8257 = vmatpush1.bf16.msra.mxu1 %v14642_v39  ;;  %v14683_v45 = vld [vmem:[%s29413_s3 + $0x424] ss:$16 sps:$4 sm:$0xff]   ;;  %v14686_v39 = vld [vmem:[%s29413_s3 + $0x42c] ss:$16 sps:$4 sm:$0xff]  }
 0x902   : > { %8129 = vmatprep.subr.bf16.mxu0 %v14647_v34  ;;  %8258 = vmatprep.subr.bf16.mxu1 %v14650_v53  ;;  %v14681_v34 = vld [vmem:[%s29413_s3 + $0x420] ss:$16 sps:$4 sm:$0xff]   ;;  %v14684_v53 = vld [vmem:[%s29413_s3 + $0x428] ss:$16 sps:$4 sm:$0xff]  }
 0x905   : > { %8130 = vmatpush1.bf16.msra.mxu0 %v14645_v43  ;;  %8259 = vmatpush1.bf16.msra.mxu1 %v14648_v13  ;;  %v14689_v43 = vld [vmem:[%s29413_s3 + $0x444] ss:$16 sps:$4 sm:$0xff]   ;;  %v14687_v13 = vld [vmem:[%s29413_s3 + $0x440] ss:$16 sps:$4 sm:$0xff]  }
 0x906   : > { %8131 = vmatprep.subr.bf16.mxu0 %v14653_v33  ;;  %8260 = vmatprep.subr.bf16.mxu1 %v14656_v26  ;;  %v14695_v33 = vld [vmem:[%s29413_s3 + $0x464] ss:$16 sps:$4 sm:$0xff]   ;;  %v14698_v26 = vld [vmem:[%s29413_s3 + $0x46c] ss:$16 sps:$4 sm:$0xff]  }
 0x909   : > { %8132 = vmatpush1.bf16.msra.mxu0 %v14651_v19  ;;  %8261 = vmatpush1.bf16.msra.mxu1 %v14654_v1  ;;  %v14693_v19 = vld [vmem:[%s29413_s3 + $0x460] ss:$16 sps:$4 sm:$0xff]   ;;  %v14696_v1 = vld [vmem:[%s29413_s3 + $0x468] ss:$16 sps:$4 sm:$0xff]  }
 0x90a   : > { %8133 = vmatprep.subr.bf16.mxu0 %v14659_v3  ;;  %8262 = vmatprep.subr.bf16.mxu1 %v14662_v21  ;;  %v14701_v3 = vld [vmem:[%s29413_s3 + $0x484] ss:$16 sps:$4 sm:$0xff]   ;;  %v14704_v21 = vld [vmem:[%s29413_s3 + $0x48c] ss:$16 sps:$4 sm:$0xff]  }
 0x90d   : > { %8134 = vmatpush1.bf16.msra.mxu0 %v14657_v38  ;;  %8263 = vmatpush1.bf16.msra.mxu1 %v14660_v16  ;;  %v14699_v38 = vld [vmem:[%s29413_s3 + $0x480] ss:$16 sps:$4 sm:$0xff]   ;;  %v14702_v16 = vld [vmem:[%s29413_s3 + $0x488] ss:$16 sps:$4 sm:$0xff]  }
 0x90e   : > { %8135 = vmatprep.subr.bf16.mxu0 %v14665_v32  ;;  %8264 = vmatprep.subr.bf16.mxu1 %v14668_v8  ;;  %v14707_v32 = vld [vmem:[%s29413_s3 + $0x4a4] ss:$16 sps:$4 sm:$0xff]   ;;  %v14710_v8 = vld [vmem:[%s29413_s3 + $0x4ac] ss:$16 sps:$4 sm:$0xff]  }
 0x911   : > { %8136 = vmatpush1.bf16.msra.mxu0 %v14663_v42  ;;  %8265 = vmatpush1.bf16.msra.mxu1 %v14666_v7  ;;  %v14705_v42 = vld [vmem:[%s29413_s3 + $0x4a0] ss:$16 sps:$4 sm:$0xff]   ;;  %v14708_v7 = vld [vmem:[%s29413_s3 + $0x4a8] ss:$16 sps:$4 sm:$0xff]  }
 0x912   : > { %8137 = vmatprep.subr.bf16.mxu0 %v14671_v30  ;;  %8266 = vmatprep.subr.bf16.mxu1 %v14674_v46  ;;  %v14713_v30 = vld [vmem:[%s29413_s3 + $0x4c4] ss:$16 sps:$4 sm:$0xff]   ;;  %v14716_v46 = vld [vmem:[%s29413_s3 + $0x4cc] ss:$16 sps:$4 sm:$0xff]  }
 0x915   : > { %8138 = vmatpush1.bf16.msra.mxu0 %v14669_v52  ;;  %8267 = vmatpush1.bf16.msra.mxu1 %v14672_v35  ;;  %v14711_v52 = vld [vmem:[%s29413_s3 + $0x4c0] ss:$16 sps:$4 sm:$0xff]   ;;  %v14714_v35 = vld [vmem:[%s29413_s3 + $0x4c8] ss:$16 sps:$4 sm:$0xff]  }
 0x916   : > { %8150 = vmatprep.subr.bf16.mxu0 %v14677_v29  ;;  %8279 = vmatprep.subr.bf16.mxu1 %v14680_v9  ;;  %v14719_v29 = vld [vmem:[%s29413_s3 + $0x4e4] ss:$16 sps:$4 sm:$0xff]   ;;  %v14722_v9 = vld [vmem:[%s29413_s3 + $0x4ec] ss:$16 sps:$4 sm:$0xff]  }
 0x918   : > { %8140 = vmatmul.mubr.bf16.vlgmr.msra.gmra.mrb[40].mxu0 %v23391_v48  ;;  %8269 = vmatmul.mubr.bf16.vlgmr.msra.gmra.mrb[44].mxu1 %v23391_v48  ;;  %v14692_v48 = vld [vmem:[%s29413_s3 + $0x44c] ss:$16 sps:$4 sm:$0xff]  }
 0x919   : > { %8151 = vmatpush1.bf16.msra.mxu0 %v14675_v5  ;;  %8182 = vmatprep.mubr.bf16.mxu0 %v23410_v24  ;;  %v14717_v5 = vld [vmem:[%s29413_s3 + $0x4e0] ss:$16 sps:$4 sm:$0xff]  }
 0x91a   : > { %8280 = vmatpush1.bf16.msra.mxu1 %v14678_v36  ;;  %8311 = vmatprep.mubr.bf16.mxu1 %v23410_v24  ;;  %v14690_v24 = vld [vmem:[%s29413_s3 + $0x448] ss:$16 sps:$4 sm:$0xff]  }
 0x91b   : > { %8152 = vmatprep.subr.bf16.mxu0 %v14683_v45  ;;  %8281 = vmatprep.subr.bf16.mxu1 %v14686_v39  ;;  %v14720_v36 = vld [vmem:[%s29413_s3 + $0x4e8] ss:$16 sps:$4 sm:$0xff]   ;;  %v14725_v45 = vld [vmem:[%s29413_s3 + $0x504] ss:$16 sps:$4 sm:$0xff]   ;;  %v14728_v39 = vld [vmem:[%s29413_s3 + $0x50c] ss:$16 sps:$4 sm:$0xff]  }
 0x91d   : > { %8153 = vmatpush1.bf16.msra.mxu0 %v14681_v34  ;;  %v14723_v34 = vld [vmem:[%s29413_s3 + $0x500] ss:$16 sps:$4 sm:$0xff]  }
 0x91e   : > { %8282 = vmatpush1.bf16.msra.mxu1 %v14684_v53  ;;  %8154 = vmatprep.subr.bf16.mxu0 %v14689_v43  ;;  %v14726_v53 = vld [vmem:[%s29413_s3 + $0x508] ss:$16 sps:$4 sm:$0xff]   ;;  %v14731_v43 = vld [vmem:[%s29413_s3 + $0x524] ss:$16 sps:$4 sm:$0xff]  }
 0x91f   : > { %8283 = vmatprep.subr.bf16.mxu1 %v14692_v48  ;;  %v14734_v48 = vld [vmem:[%s29413_s3 + $0x52c] ss:$16 sps:$4 sm:$0xff]  }
 0x921   : > { %8155 = vmatpush1.bf16.msra.mxu0 %v14687_v13  ;;  %v14729_v13 = vld [vmem:[%s29413_s3 + $0x520] ss:$16 sps:$4 sm:$0xff]  }
 0x922   : > { %8284 = vmatpush1.bf16.msra.mxu1 %v14690_v24  ;;  %8156 = vmatprep.subr.bf16.mxu0 %v14695_v33  ;;  %v14732_v24 = vld [vmem:[%s29413_s3 + $0x528] ss:$16 sps:$4 sm:$0xff]   ;;  %v14737_v33 = vld [vmem:[%s29413_s3 + $0x544] ss:$16 sps:$4 sm:$0xff]  }
 0x923   : > { %8285 = vmatprep.subr.bf16.mxu1 %v14698_v26  ;;  %v14740_v26 = vld [vmem:[%s29413_s3 + $0x54c] ss:$16 sps:$4 sm:$0xff]  }
 0x925   : > { %8157 = vmatpush1.bf16.msra.mxu0 %v14693_v19  ;;  %v14735_v19 = vld [vmem:[%s29413_s3 + $0x540] ss:$16 sps:$4 sm:$0xff]  }
 0x926   : > { %8286 = vmatpush1.bf16.msra.mxu1 %v14696_v1  ;;  %8158 = vmatprep.subr.bf16.mxu0 %v14701_v3  ;;  %v14738_v1 = vld [vmem:[%s29413_s3 + $0x548] ss:$16 sps:$4 sm:$0xff]   ;;  %v14743_v3 = vld [vmem:[%s29413_s3 + $0x564] ss:$16 sps:$4 sm:$0xff]  }
 0x927   : > { %8287 = vmatprep.subr.bf16.mxu1 %v14704_v21  ;;  %v14746_v21 = vld [vmem:[%s29413_s3 + $0x56c] ss:$16 sps:$4 sm:$0xff]  }
 0x929   : > { %8159 = vmatpush1.bf16.msra.mxu0 %v14699_v38  ;;  %v14741_v38 = vld [vmem:[%s29413_s3 + $0x560] ss:$16 sps:$4 sm:$0xff]  }
 0x92a   : > { %8288 = vmatpush1.bf16.msra.mxu1 %v14702_v16  ;;  %8160 = vmatprep.subr.bf16.mxu0 %v14707_v32  ;;  %v14744_v16 = vld [vmem:[%s29413_s3 + $0x568] ss:$16 sps:$4 sm:$0xff]   ;;  %v14749_v32 = vld [vmem:[%s29413_s3 + $0x584] ss:$16 sps:$4 sm:$0xff]  }
 0x92b   : > { %8289 = vmatprep.subr.bf16.mxu1 %v14710_v8  ;;  %v14752_v8 = vld [vmem:[%s29413_s3 + $0x58c] ss:$16 sps:$4 sm:$0xff]  }
 0x92d   : > { %8161 = vmatpush1.bf16.msra.mxu0 %v14705_v42  ;;  %v14747_v42 = vld [vmem:[%s29413_s3 + $0x580] ss:$16 sps:$4 sm:$0xff]  }
 0x92e   : > { %8290 = vmatpush1.bf16.msra.mxu1 %v14708_v7  ;;  %8162 = vmatprep.subr.bf16.mxu0 %v14713_v30  ;;  %v14750_v7 = vld [vmem:[%s29413_s3 + $0x588] ss:$16 sps:$4 sm:$0xff]   ;;  %v14755_v30 = vld [vmem:[%s29413_s3 + $0x5a4] ss:$16 sps:$4 sm:$0xff]  }
 0x92f   : > { %8291 = vmatprep.subr.bf16.mxu1 %v14716_v46  ;;  %v14758_v46 = vld [vmem:[%s29413_s3 + $0x5ac] ss:$16 sps:$4 sm:$0xff]  }
 0x931   : > { %8163 = vmatpush1.bf16.msra.mxu0 %v14711_v52  ;;  %v14753_v52 = vld [vmem:[%s29413_s3 + $0x5a0] ss:$16 sps:$4 sm:$0xff]  }
 0x932   : > { %8292 = vmatpush1.bf16.msra.mxu1 %v14714_v35  ;;  %8164 = vmatprep.subr.bf16.mxu0 %v14719_v29  ;;  %v14756_v35 = vld [vmem:[%s29413_s3 + $0x5a8] ss:$16 sps:$4 sm:$0xff]   ;;  %v14761_v29 = vld [vmem:[%s29413_s3 + $0x5c4] ss:$16 sps:$4 sm:$0xff]  }
 0x933   : > { %8293 = vmatprep.subr.bf16.mxu1 %v14722_v9  ;;  %v14764_v9 = vld [vmem:[%s29413_s3 + $0x5cc] ss:$16 sps:$4 sm:$0xff]  }
 0x935   : > { %8165 = vmatpush1.bf16.msra.mxu0 %v14717_v5  ;;  %v14759_v5 = vld [vmem:[%s29413_s3 + $0x5c0] ss:$16 sps:$4 sm:$0xff]  }
 0x936   : > { %8294 = vmatpush1.bf16.msra.mxu1 %v14720_v36  ;;  %8166 = vmatprep.subr.bf16.mxu0 %v14725_v45  ;;  %v14762_v36 = vld [vmem:[%s29413_s3 + $0x5c8] ss:$16 sps:$4 sm:$0xff]   ;;  %v14767_v45 = vld [vmem:[%s29413_s3 + $0x5e4] ss:$16 sps:$4 sm:$0xff]  }
 0x937   : > { %8295 = vmatprep.subr.bf16.mxu1 %v14728_v39  ;;  %v14770_v39 = vld [vmem:[%s29413_s3 + $0x5ec] ss:$16 sps:$4 sm:$0xff]  }
 0x939   : > { %8167 = vmatpush1.bf16.msra.mxu0 %v14723_v34  ;;  %v14765_v34 = vld [vmem:[%s29413_s3 + $0x5e0] ss:$16 sps:$4 sm:$0xff]  }
 0x93a   : > { %8296 = vmatpush1.bf16.msra.mxu1 %v14726_v53  ;;  %8168 = vmatprep.subr.bf16.mxu0 %v14731_v43  ;;  %v14768_v53 = vld [vmem:[%s29413_s3 + $0x5e8] ss:$16 sps:$4 sm:$0xff]   ;;  %v7082_v43 = vld [vmem:[%s29867_s25] sm:$0xf]  ;;  %s30793_s25 = smov 1   ;;  %s11267_s3 = scalar_lea.sflag [#allocation10], %s27025_s1 }
 0x93b   : > { %8297 = vmatprep.subr.bf16.mxu1 %v14734_v48  ;;  %v29868_v48 = vld [vmem:[#allocation17_spill] sm:$0xff] }
 0x93d   : > { %8169 = vmatpush1.bf16.msra.mxu0 %v14729_v13  ;;  %v7087_v13 = vrot.slane %v7082_v43, %v29868_v48 }
 0x93e   : > { %8298 = vmatpush1.bf16.msra.mxu1 %v14732_v24  ;;  %8170 = vmatprep.subr.bf16.mxu0 %v14737_v33  ;;  %v29869_v24 = vld [vmem:[#allocation18_spill] sm:$0xff] }
 0x93f   : > { %8299 = vmatprep.subr.bf16.mxu1 %v14740_v26  ;;  %v7095_v33 = vrot.slane %v7082_v43, %v29869_v24  ;;  %v29870_v26 = vld [vmem:[#allocation19_spill] sm:$0xff] }
 0x941   : > { %8171 = vmatpush1.bf16.msra.mxu0 %v14735_v19  ;;  %v7091_v19 = vrot.slane %v7082_v43, %v29870_v26 }
 0x942   : > { %8300 = vmatpush1.bf16.msra.mxu1 %v14738_v1  ;;  %8172 = vmatprep.subr.bf16.mxu0 %v14743_v3  ;;  %v29871_v1 = vld [vmem:[#allocation20_spill] sm:$0xff] }
 0x943   : > { %8301 = vmatprep.subr.bf16.mxu1 %v14746_v21  ;;  %v7099_v3 = vrot.slane %v7082_v43, %v29871_v1 }
 0x945   : > { %8173 = vmatpush1.bf16.msra.mxu0 %v14741_v38 }
 0x946   : > { %8302 = vmatpush1.bf16.msra.mxu1 %v14744_v16  ;;  %8174 = vmatprep.subr.bf16.mxu0 %v14749_v32 }
 0x947   : > { %8303 = vmatprep.subr.bf16.mxu1 %v14752_v8 }
 0x949   : > { %8175 = vmatpush1.bf16.msra.mxu0 %v14747_v42 }
 0x94a   : > { %8304 = vmatpush1.bf16.msra.mxu1 %v14750_v7  ;;  %8176 = vmatprep.subr.bf16.mxu0 %v14755_v30 }
 0x94b   : > { %8305 = vmatprep.subr.bf16.mxu1 %v14758_v46 }
 0x94d   : > { %8177 = vmatpush1.bf16.msra.mxu0 %v14753_v52 }
 0x94e   : > { %8306 = vmatpush1.bf16.msra.mxu1 %v14756_v35  ;;  %8178 = vmatprep.subr.bf16.mxu0 %v14761_v29 }
 0x94f   : > { %8307 = vmatprep.subr.bf16.mxu1 %v14764_v9 }
 0x951   : > { %8179 = vmatpush1.bf16.msra.mxu0 %v14759_v5 }
 0x952   : > { %8308 = vmatpush1.bf16.msra.mxu1 %v14762_v36  ;;  %8180 = vmatprep.subr.bf16.mxu0 %v14767_v45 }
 0x953   : > { %8309 = vmatprep.subr.bf16.mxu1 %v14770_v39 }
 0x955   : > { %8181 = vmatpush1.bf16.msra.mxu0 %v14765_v34 }
 0x956   : > { %8310 = vmatpush1.bf16.msra.mxu1 %v14768_v53 }
 0x958   : > { %8183 = vmatmul.mubr.bf16.vlgmr.msra.gmra.mrb[40].mxu0 %v23412_v10 }
 0x959   : > { %8312 = vmatmul.mubr.bf16.vlgmr.msra.gmra.mrb[44].mxu1 %v23412_v10  ;;  %8492 = vmatprep.mubr.f32.mxu0 %v28081_v20 }
 0xa2b   : > { %v8184_v21 = vpop.f32.mrb[40].mxu0 }
 0xa2c   : > { %v13606_v38 = vadd.f32 %v8184_v21, %v7087_v13  ;;  %v8313_v16 = vpop.f32.mrb[44].mxu1  ;;  %v8186_v32 = vpop.f32.mrb[41].mxu0 }
 0xa2d   : > { %v13610_v8 = vadd.f32 %v8313_v16, %v7095_v33  ;;  %v13607_v10 = vadd.f32 %v8186_v32, %v7091_v19  ;;  %v8315_v42 = vpop.f32.mrb[45].mxu1  ;;  %v8188_v7 = vpop.f32.mrb[42].mxu0 }
 0xa2e   : > { %v8322_v30 = vmax.f32 %v13606_v38, 0.0  ;;  %v13611_v46 = vadd.f32 %v8315_v42, %v7099_v3  ;;  %v13608_v52 = vadd.f32 %v8188_v7, %v7087_v13  ;;  %v8317_v35 = vpop.f32.mrb[46].mxu1  ;;  %v8190_v29 = vpop.f32.mrb[43].mxu0 }
 0xa2f   : > { %v8324_v9 = vmax.f32 %v13610_v8, 0.0  ;;  %v8323_v5 = vmax.f32 %v13607_v10, 0.0  ;;  %v13612_v36 = vadd.f32 %v8317_v35, %v7095_v33  ;;  %v13609_v45 = vadd.f32 %v8190_v29, %v7091_v19  ;;  %v8319_v39 = vpop.f32.mrb[47].mxu1 }
 0xa30   : > { %v8325_v34 = vmax.f32 %v13611_v46, 0.0  ;;  %v8326_v53 = vmax.f32 %v13608_v52, 0.0  ;;  %v13613_v43 = vadd.f32 %v8319_v39, %v7099_v3  ;;  %v8338_v1 = vrot.slane %v8322_v30, 1 }
 0xa31   : > { %v8328_v24 = vmax.f32 %v13612_v36, 0.0  ;;  %v8327_v26 = vmax.f32 %v13609_v45, 0.0  ;;  %v8344_v32 = vrot.slane %v8324_v9, 1  ;;  %v8341_v48 = vrot.slane %v8323_v5, 1 }
 0xa32   : > { %v8339_v21 = vrot.slane %v8326_v53, 1  ;;  %v8329_v16 = vmax.f32 %v13613_v43, 0.0  ;;  %v8347_v13 = vrot.slane %v8325_v34, 1 }
 0xa33   : > { %v8345_v38 = vrot.slane %v8328_v24, 1  ;;  %v8342_v42 = vrot.slane %v8327_v26, 1 }
 0xa34   : > { %v8362_v7 = vsel %vm29872_vm1, %v8339_v21, %v8338_v1  ;;  %v8348_v8 = vrot.slane %v8329_v16, 1  ;;  %v8340_v33 = vsel %vm29873_vm3, %v8338_v1, %v8339_v21 }
 0xa35   : > { %v23796_v19 = vmax.f32 %v8326_v53, %v8362_v7  ;;  %v8364_v10 = vsel %vm29874_vm12, %v8345_v38, %v8344_v32  ;;  %v8363_v3 = vsel %vm29875_vm0, %v8342_v42, %v8341_v48  ;;  %v8343_v46 = vsel %vm29876_vm13, %v8341_v48, %v8342_v42 }
 0xa36   : > { %v23801_v52 = vmax.f32 %v8328_v24, %v8364_v10  ;;  %v23803_v35 = vmax.f32 %v8327_v26, %v8363_v3  ;;  %v8365_v29 = vsel %vm29877_vm6, %v8348_v8, %v8347_v13  ;;  %v8346_v36 = vsel %vm29878_vm5, %v8344_v32, %v8345_v38 }
 0xa37   : > { %v23807_v45 = vmax.f32 %v8329_v16, %v8365_v29  ;;  %v23809_v39 = vmax.f32 %v8323_v5, %v8343_v46  ;;  %v23811_v53 = vmax.f32 %v8324_v9, %v8346_v36  ;;  %v8349_v43 = vsel %vm29879_vm4, %v8347_v13, %v8348_v8  ;;  %v29881_v16 = vld [vmem:[#allocation35_spill] sm:$0xff]  ;;  %v29882_v13 = vld [vmem:[#allocation16_spill] sm:$0xff]  ;;  %v29884_v29 = vld [vmem:[#allocation38_spill] sm:$0xff] }
 0xa38   : > { %v13964_v1 = vpack.i.bf16 %v23801_v52, %v23803_v35  ;;  %v23816_v48 = vmax.f32 %v8325_v34, %v8349_v43  ;;  %v23818_v24 = vmax.f32 %v8322_v30, %v8340_v33  ;;  %v12872_v34 = vld [vmem:[%s27124_s17] ss:$0 sm:$0xff]  ;;  %v8828_v32 = vshra.s32 %v29881_v16, 5  ;;  %v29883_v8 = vld [vmem:[#allocation36_spill] sm:$0xff]  ;;  %v29885_v43 = vld [vmem:[#allocation39_spill] sm:$0xff] }
 0xa39   : > { %v13959_v26 = vpack.i.bf16 %v23811_v53, %v23809_v39  ;;  %v29880_v30 = vld [vmem:[#allocation37_spill] sm:$0xff]  ;;  %v8570_v7 = vand.u32 31, %v29882_v13  ;;  %v8571_v33 = vand.u32 31, %v29883_v8  ;;  %v8764_v10 = vshra.s32 %v29882_v13, 5 }
 0xa3a   : > { %13965 = vrot.lane.b32.xlu1 %v13964_v1, %s15002_s26  ;;  %v13974_v5 = vpack.i.bf16 %v23807_v45, %v23816_v48  ;;  %v13969_v9 = vpack.i.bf16 %v23796_v19, %v23818_v24  ;;  %v8829_v21 = vshra.s32 %v29880_v30, 5  ;;  %v23834_v38 = vand.u32 31, %v29880_v30 }
 0xa3b   : > { %13960 = vrot.lane.b32.xlu0 %v13959_v26, %s15002_s26  ;;  %v23842_v3 = vand.u32 31, %v29881_v16  ;;  %v23844_v46 = vmul.u32 2, %v8828_v32  ;;  %v8572_v36 = vand.u32 31, %v29884_v29  ;;  %v8573_v1 = vand.u32 31, %v29885_v43 }
 0xa3c   : > { %v23836_v42 = vmul.u32 2, %v8829_v21  ;;  %v8766_v26 = vshra.s32 %v29884_v29, 5  ;;  %vm23852_vm2 = vcmp.eq.s32.totalorder %v8570_v7, %v23834_v38  ;;  %vm23857_vm11 = vcmp.eq.s32.totalorder %v8571_v33, %v23834_v38 }
 0xa3d   : > { %vm23872_vm14 = vcmp.eq.s32.totalorder %v8570_v7, %v23842_v3  ;;  %v29894_v16 = vmov 0  ;;  %vm23877_vm9 = vcmp.eq.s32.totalorder %v8571_v33, %v23842_v3  ;;  %vm23882_vm15 = vcmp.eq.s32.totalorder %v8764_v10, %v23844_v46 }
 0xa3e   : > { %13975 = vrot.lane.b32.xlu1 %v13974_v5, %s15002_s26  ;;  %v8767_v5 = vshra.s32 %v29885_v43, 5  ;;  %vm23862_vm10 = vcmp.eq.s32.totalorder %v8764_v10, %v23836_v42  ;;  %v29895_v16 = vsel %vm23872_vm14, 4294967295, %v29894_v16  ;;  %v29898_v13 = vmov 0 }
 0xa3f   : > { %13970 = vrot.lane.b32.xlu0 %v13969_v9, %s15002_s26  ;;  %v29899_v13 = vsel %vm23882_vm15, 4294967295, %v29898_v13  ;;  %vm23892_vm3 = vcmp.eq.s32.totalorder %v8572_v36, %v23834_v38  ;;  %vm23897_vm12 = vcmp.eq.s32.totalorder %v8573_v1, %v23834_v38  ;;  %v29904_v33 = vmov 0 }
 0xa40   : > { %v29905_v33 = vsel %vm23897_vm12, 4294967295, %v29904_v33  ;;  %vm23902_vm0 = vcmp.eq.s32.totalorder %v8766_v26, %v23836_v42  ;;  %vm23907_vm13 = vcmp.eq.s32.totalorder %v8767_v5, %v23836_v42  ;;  %vm23912_vm6 = vcmp.eq.s32.totalorder %v8572_v36, %v23842_v3 }
 0xa41   : > { %v29911_v31 = vsel %vm23912_vm6, 4294967295, %v29910_v31  ;;  %vm23917_vm5 = vcmp.eq.s32.totalorder %v8573_v1, %v23842_v3  ;;  %vm23922_vm4 = vcmp.eq.s32.totalorder %v8766_v26, %v23844_v46  ;;  %vm23928_vm12 = vcmp.eq.s32.totalorder %v8767_v5, %v23844_v46 }
 0xa42   : > { %v29913_v25 = vsel %vm23917_vm5, 4294967295, %v29912_v25  ;;  %v29916_v36 = vmov 0  ;;  %v8575_v26 = vand.u32 31, %v28969_v17  ;;  %v8769_v5 = vshra.s32 %v28969_v17, 5 }
 0xa43   : > { %11044 = vrot.lane.b32.xlu0 %v12872_v34, %s27706_s0  ;;  %v29917_v36 = vsel %vm23928_vm12, 4294967295, %v29916_v36  ;;  %v8577_v17 = vand.u32 31, %v28991_v28  ;;  %vm23959_vm6 = vcmp.eq.s32.totalorder %v8574_v50, %v23834_v38  ;;  %vm29922_vm5 = vcmask 785408   ;;  %s15009_s0 = smov 4  }
 0xa44   : > { %vm29923_vm15 = vmmov %vm29922_vm5  ;;  %v29928_v28 = vmov 0  ;;  %v29957_v29 = vmov 0  ;;  %v8772_v7 = vshra.s32 %v29019_v40, 5  ;;  %v29968_v10 = vmov 0 }
 0xa45   : > { %vm29924_vm14 = vmmov %vm29922_vm5 }
 0xa62   : > { %9534 = vadd.xlane.f32.xlu0 %v23372_v22  ;;  %v8765_v22 = vshra.s32 %v29883_v8, 5 }
 0xa64   : > { %vm23867_vm8 = vcmp.eq.s32.totalorder %v8765_v22, %v23836_v42  ;;  %vm23887_vm1 = vcmp.eq.s32.totalorder %v8765_v22, %v23844_v46 }
 0xaac   : > { %v13966_v8 = vpop.permute.xlu1 %13965 }
 0xaad   : > { %v13968_v43 = vunpack.i.h.bf16 %v13966_v8  ;;  %v13967_v22 = vunpack.i.l.bf16 %v13966_v8  ;;  %v13961_v44 = vpop.permute.xlu0 %13960  ;;  %v29914_v8 = vmov 0 }
 0xaae   : > { %v13963_v12 = vunpack.i.h.bf16 %v13961_v44  ;;  %v13962_v18 = vunpack.i.l.bf16 %v13961_v44  ;;  %v29915_v8 = vsel %vm23922_vm4, 4294967295, %v29914_v8  ;;  %v8768_v44 = vshra.s32 %v28967_v14, 5  ;;  %vm29925_vm4 = vmmov %vm29922_vm5 }
 0xaaf   : > { %v8403_v51 = vsel %vm27644_vm7, %v13967_v22, %v13968_v43  ;;  %v8576_v14 = vand.u32 31, %v28970_v61 }
 0xab0   : > { %v8400_v1 = vsel %vm27644_vm7, %v13962_v18, %v13963_v12  ;;  %v13976_v37 = vpop.permute.xlu1 %13975  ;;  %v8422_v4 = vmax.f32 %v23803_v35, %v8403_v51  ;;  %vm23964_vm12 = vcmp.eq.s32.totalorder %v8768_v44, %v23836_v42  ;;  %vm29926_vm7 = vmand %vm23852_vm2, %vm23862_vm10 }
 0xab1   : > { %v13978_v0 = vunpack.i.h.bf16 %v13976_v37  ;;  %v13977_v49 = vunpack.i.l.bf16 %v13976_v37  ;;  %v13971_v55 = vpop.permute.xlu0 %13970  ;;  %v8418_v58 = vmax.f32 %v23809_v39, %v8400_v1  ;;  %v8770_v37 = vshra.s32 %v28970_v61, 5 }
 0xab2   : > { %v13973_v51 = vunpack.i.h.bf16 %v13971_v55  ;;  %v13972_v35 = vunpack.i.l.bf16 %v13971_v55  ;;  %v29918_v1 = vmov 0  ;;  %v29920_v55 = vmov 0 }
 0xab3   : > { %v13407_v39 = vpack.c.bf16 %v8422_v4, %v8418_v58  ;;  %v29919_v1 = vsel %vm23959_vm6, 4294967295, %v29918_v1  ;;  %v29921_v55 = vsel %vm23964_vm12, 4294967295, %v29920_v55  ;;  %v8401_v61 = vsel %vm29922_vm5, %v13963_v12, %v13977_v49  ;;  %vm29927_vm6 = vmand %vm23857_vm11, %vm23867_vm8 }
 0xab4   : > { %v8404_v58 = vsel %vm29923_vm15, %v13968_v43, %v13978_v0  ;;  %v8402_v4 = vsel %vm29924_vm14, %v13973_v51, %v13967_v22  ;;  %v8416_v41 = vsel %vm29925_vm4, %v13978_v0, %v13973_v51  ;;  %vm23983_vm12 = vmpackc.low %vm29927_vm6, %vm29926_vm7  ;;  %vm29932_vm7 = vnez %v29905_v33 }
 0xab5   : > { %v29929_v28 = vsel %vm23983_vm12, 4294967295, %v29928_v28  ;;  %v8421_v0 = vmax.f32 %v23796_v19, %v8402_v4  ;;  %vm29930_vm15 = vmmov %vm29925_vm4  ;;  %13408 = vmatprep.subr.bf16.mxu0 %v13407_v39  ;;  %v8424_v34 = vmax.f32 %v23807_v45, %v8416_v41  ;;  %vm24006_vm6 = vcmp.eq.s32.totalorder %v8575_v26, %v23834_v38  ;;  %v30155_v4 = vld [vmem:[#allocation23_spill] sm:$0xff] }
 0xab6   : > { %v8399_v12 = vsel %vm29930_vm15, %v13972_v35, %v13962_v18  ;;  %vm29931_vm5 = vmmov %vm29925_vm4  ;;  %vm24011_vm4 = vcmp.eq.s32.totalorder %v8769_v5, %v23836_v42  ;;  %vm29939_vm15 = vnez %v29895_v16  ;;  %v29943_v18 = vmov 0 }
 0xab7   : > { %v8415_v9 = vsel %vm29931_vm5, %v13977_v49, %v13972_v35  ;;  %v8417_v30 = vmax.f32 %v23818_v24, %v8399_v12  ;;  %v29935_v49 = vmov 0  ;;  %vm29940_vm5 = vnez %v29899_v13  ;;  %vm29942_vm8 = vmand %vm23877_vm9, %vm23887_vm1 }
 0xab8   : > { %v8420_v21 = vmax.f32 %v23816_v48, %v8415_v9  ;;  %v29936_v49 = vsel %vm24006_vm6, 4294967295, %v29935_v49  ;;  %vm29941_vm2 = vmand %vm29939_vm15, %vm29940_vm5  ;;  %vm29946_vm11 = vnez %v29913_v25  ;;  %vm24034_vm6 = vcmp.eq.s32.totalorder %v8574_v50, %v23842_v3 }
 0xab9   : > { %vm24025_vm14 = vmpackc.low %vm29942_vm8, %vm29941_vm2  ;;  %v29947_v19 = vmov 0  ;;  %vm24039_vm15 = vcmp.eq.s32.totalorder %v8575_v26, %v23842_v3  ;;  %v29949_v45 = vmov 0  ;;  %vm24044_vm9 = vcmp.eq.s32.totalorder %v8768_v44, %v23844_v46 }
 0xaba   : > { %v29944_v18 = vsel %vm24025_vm14, 4294967295, %v29943_v18  ;;  %v29948_v19 = vsel %vm24034_vm6, 4294967295, %v29947_v19  ;;  %v29950_v45 = vsel %vm24039_vm15, 4294967295, %v29949_v45  ;;  %v29951_v48 = vmov 0  ;;  %vm29955_vm2 = vmand %vm23892_vm3, %vm23902_vm0 }
 0xabb   : > { %v29952_v48 = vsel %vm24044_vm9, 4294967295, %v29951_v48  ;;  %vm24049_vm1 = vcmp.eq.s32.totalorder %v8769_v5, %v23844_v46  ;;  %v29953_v24 = vmov 0  ;;  %v8419_v50 = vmax.f32 %v23811_v53, %v8401_v61  ;;  %vm29956_vm8 = vmand %vm29932_vm7, %vm23907_vm13 }
 0xabc   : > { %v29954_v24 = vsel %vm24049_vm1, 4294967295, %v29953_v24  ;;  %v8423_v16 = vmax.f32 %v23801_v52, %v8404_v58  ;;  %v13409_v32 = vpack.c.bf16 %v8421_v0, %v8417_v30  ;;  %v13411_v13 = vpack.c.bf16 %v8424_v34, %v8420_v21  ;;  %vm24065_vm5 = vmpackc.low %vm29956_vm8, %vm29955_vm2 }
 0xabd   : > { %v29958_v29 = vsel %vm24065_vm5, 4294967295, %v29957_v29  ;;  %vm29959_vm10 = vnez %v29921_v55  ;;  %vm29960_vm14 = vnez %v29919_v1  ;;  %vm29961_vm1 = vnez %v29936_v49 }
 0xabe   : > { %vm24078_vm3 = vcmp.eq.s32.totalorder %v8576_v14, %v23834_v38  ;;  %v29962_v52 = vmov 0  ;;  %vm24083_vm0 = vcmp.eq.s32.totalorder %v8770_v37, %v23836_v42  ;;  %v8578_v53 = vand.u32 31, %v29019_v40  ;;  %13410 = vmatpush1.bf16.msra.mxu0 %v13409_v32 }
 0xabf   : > { %v29963_v52 = vsel %vm24078_vm3, 4294967295, %v29962_v52  ;;  %vm24094_vm7 = vcmp.eq.s32.totalorder %v8577_v17, %v23834_v38  ;;  %v29966_v33 = vmov 0  ;;  %vm24099_vm2 = vcmp.eq.s32.totalorder %v8771_v56, %v23836_v42  ;;  %13412 = vmatprep.subr.bf16.mxu0 %v13411_v13 }
 0xac0   : > { %v29967_v33 = vsel %vm24094_vm7, 4294967295, %v29966_v33  ;;  %v29969_v10 = vsel %vm24099_vm2, 4294967295, %v29968_v10  ;;  %v8579_v43 = vand.u32 31, %v29024_v54  ;;  %v8773_v40 = vshra.s32 %v29024_v54, 5 }
 0xac1   : > { %vm29970_vm8 = vnez %v29911_v31  ;;  %vm29971_vm12 = vnez %v29915_v8  ;;  %vm29973_vm15 = vnez %v29917_v36  ;;  %v29975_v22 = vmov 0 }
 0xac2   : > { %vm29972_vm13 = vmand %vm29970_vm8, %vm29971_vm12  ;;  %vm29977_vm6 = vnez %v29954_v24  ;;  %vm29978_vm7 = vnez %v29950_v45  ;;  %vm24124_vm3 = vcmp.eq.s32.totalorder %v8576_v14, %v23842_v3  ;;  %v29979_v54 = vmov 0 }
 0xac3   : > { %vm29974_vm5 = vmand %vm29946_vm11, %vm29973_vm15  ;;  %v29980_v54 = vsel %vm24124_vm3, 4294967295, %v29979_v54  ;;  %vm24129_vm12 = vcmp.eq.s32.totalorder %v8770_v37, %v23844_v46  ;;  %v29981_v25 = vmov 0  ;;  %v13413_v31 = vpack.c.bf16 %v8423_v16, %v8419_v50 }
 0xac4   : > { %vm24115_vm9 = vmpackc.low %vm29974_vm5, %vm29972_vm13  ;;  %v29982_v25 = vsel %vm24129_vm12, 4294967295, %v29981_v25  ;;  %v29985_v8 = vmov 0  ;;  %vm29987_vm13 = vnez %v29963_v52  ;;  %vm24152_vm2 = vcmp.eq.s32.totalorder %v8577_v17, %v23842_v3 }
 0xac5   : > { %v29976_v22 = vsel %vm24115_vm9, 4294967295, %v29975_v22  ;;  %vm29983_vm11 = vmand %vm29960_vm14, %vm29959_vm10  ;;  %vm24157_vm14 = vcmp.eq.s32.totalorder %v8771_v56, %v23844_v46  ;;  %vm29992_vm10 = vcmask 130048   ;;  %v29995_v26 = vmov 0 }
 0xac6   : > { %vm29984_vm15 = vmand %vm29961_vm1, %vm24011_vm4  ;;  %12485 = vmatmul.mubr.msk.f32.vlgmr.msra.gmra.mrb[44].mxu0 %vm29992_vm10, %v28051_v27  ;;  %vm29993_vm4 = vnez %v29969_v10  ;;  %vm29994_vm1 = vnez %v29967_v33  ;;  %vm24173_vm8 = vcmp.eq.s32.totalorder %v8772_v7, %v23836_v42  ;;  %v8580_v56 = vand.u32 31, %v29052_v62 }
 0xac7   : > { %vm24143_vm5 = vmpackc.low %vm29984_vm15, %vm29983_vm11  ;;  %vm24168_vm15 = vcmp.eq.s32.totalorder %v8578_v53, %v23834_v38  ;;  %v8774_v14 = vshra.s32 %v29052_v62, 5  ;;  %13414 = vmatpush1.bf16.msra.mxu0 %v13413_v31  ;;  %8563 = vmatprep.mubr.f32.mxu0 %v28081_v20  ;;  %vm24185_vm11 = vcmp.eq.s32.totalorder %v8579_v43, %v23834_v38  ;;  %v29999_v51 = vmov 0 }
 0xac8   : > { %v29986_v8 = vsel %vm24143_vm5, 4294967295, %v29985_v8  ;;  %v29996_v26 = vsel %vm24168_vm15, 4294967295, %v29995_v26  ;;  %v30000_v51 = vsel %vm24185_vm11, 4294967295, %v29999_v51  ;;  %vm24190_vm5 = vcmp.eq.s32.totalorder %v8773_v40, %v23836_v42  ;;  %vm30007_vm11 = vmand %vm29978_vm7, %vm29977_vm6 }
 0xac9   : > { %v30001_v35 = vmov 0  ;;  %v8581_v62 = vand.u32 31, %v29057_v2  ;;  %v8775_v17 = vshra.s32 %v29057_v2, 5  ;;  %vm30003_vm9 = vnez %v29929_v28  ;;  %vm30014_vm6 = vmand %vm29987_vm13, %vm24083_vm0 }
 0xaca   : > { %v30002_v35 = vsel %vm24190_vm5, 4294967295, %v30001_v35  ;;  %13416 = vmatprep.subr.msk.bf16.mxu0 %vm30003_vm9, %v28087_v23  ;;  %vm30004_vm10 = vnez %v29948_v19  ;;  %vm30005_vm12 = vnez %v29952_v48  ;;  %v30008_v37 = vmov 0 }
 0xacb   : > { %vm30006_vm3 = vmand %vm30004_vm10, %vm30005_vm12  ;;  %vm24218_vm9 = vcmp.eq.s32.totalorder %v8578_v53, %v23842_v3  ;;  %v30010_v2 = vmov 0  ;;  %vm24223_vm12 = vcmp.eq.s32.totalorder %v8772_v7, %v23844_v46  ;;  %v30012_v39 = vmov 0 }
 0xacc   : > { %vm24209_vm15 = vmpackc.low %vm30007_vm11, %vm30006_vm3  ;;  %v30011_v2 = vsel %vm24218_vm9, 4294967295, %v30010_v2  ;;  %v30013_v39 = vsel %vm24223_vm12, 4294967295, %v30012_v39  ;;  %v30016_v1 = vmov 0  ;;  %vm30018_vm11 = vnez %v29996_v26 }
 0xacd   : > { %v30009_v37 = vsel %vm24209_vm15, 4294967295, %v30008_v37  ;;  %vm30015_vm3 = vmand %vm29994_vm1, %vm29993_vm4  ;;  %vm24246_vm5 = vcmp.eq.s32.totalorder %v8579_v43, %v23842_v3  ;;  %vm24251_vm0 = vcmp.eq.s32.totalorder %v8773_v40, %v23844_v46  ;;  %vm30023_vm13 = vcmask 130048  }
 0xace   : > { %vm24237_vm7 = vmpackc.low %vm30015_vm3, %vm30014_vm6  ;;  %12486 = vmatmul.mubr.msk.f32.vlgmr.msra.gmra.mrb[46].mxu0 %vm30023_vm13, %v28051_v27  ;;  %vm30024_vm4 = vnez %v30002_v35  ;;  %vm30025_vm1 = vnez %v30000_v51  ;;  %vm24262_vm3 = vcmp.eq.s32.totalorder %v8580_v56, %v23834_v38  ;;  %v30026_v58 = vmov 0 }
 0xacf   : > { %v30017_v1 = vsel %vm24237_vm7, 4294967295, %v30016_v1  ;;  %v30027_v58 = vsel %vm24262_vm3, 4294967295, %v30026_v58  ;;  %vm24267_vm10 = vcmp.eq.s32.totalorder %v8774_v14, %v23836_v42  ;;  %v8582_v28 = vand.u32 31, %v16723_v59 }
 0xad0   : > { %v8776_v0 = vshra.s32 %v16723_v59, 5  ;;  %vm30030_vm13 = vnez %v29944_v18  ;;  %vm24281_vm7 = vcmp.eq.s32.totalorder %v8581_v62, %v23834_v38  ;;  %v30031_v27 = vmov 0 }
 0xad1   : > { %13418 = vmatpush1.bf16.msk.msra.mxu0 %vm30030_vm13, %v28087_v23  ;;  %v30032_v27 = vsel %vm24281_vm7, 4294967295, %v30031_v27  ;;  %vm24286_vm15 = vcmp.eq.s32.totalorder %v8775_v17, %v23836_v42  ;;  %v30033_v12 = vmov 0  ;;  %v8583_v59 = vand.u32 31, %v16863_v60  ;;  %vm30039_vm7 = vmand %vm24152_vm2, %vm24157_vm14 }
 0xad2   : > { %v30034_v12 = vsel %vm24286_vm15, 4294967295, %v30033_v12  ;;  %v8777_v9 = vshra.s32 %v16863_v60, 5  ;;  %vm30035_vm13 = vnez %v29958_v29  ;;  %vm30036_vm6 = vnez %v29980_v54  ;;  %vm30046_vm2 = vmand %vm30018_vm11, %vm24173_vm8 }
 0xad3   : > { %13420 = vmatprep.subr.msk.bf16.mxu0 %vm30035_vm13, %v28087_v23  ;;  %vm30037_vm12 = vnez %v29982_v25  ;;  %v30040_v34 = vmov 0  ;;  %vm24314_vm13 = vcmp.eq.s32.totalorder %v8580_v56, %v23842_v3  ;;  %v30042_v60 = vmov 0  ;;  %vm30047_vm14 = vmand %vm30025_vm1, %vm30024_vm4 }
 0xad4   : > { %vm30038_vm9 = vmand %vm30036_vm6, %vm30037_vm12  ;;  %v30043_v60 = vsel %vm24314_vm13, 4294967295, %v30042_v60  ;;  %vm24319_vm12 = vcmp.eq.s32.totalorder %v8774_v14, %v23844_v46  ;;  %v30044_v30 = vmov 0  ;;  %v30048_v21 = vmov 0 }
 0xad5   : > { %vm24305_vm3 = vmpackc.low %vm30039_vm7, %vm30038_vm9  ;;  %v30045_v30 = vsel %vm24319_vm12, 4294967295, %v30044_v30  ;;  %vm30050_vm7 = vnez %v30027_v58  ;;  %vm24342_vm15 = vcmp.eq.s32.totalorder %v8581_v62, %v23842_v3  ;;  %vm24347_vm8 = vcmp.eq.s32.totalorder %v8775_v17, %v23844_v46  ;;  %v14791_v58 = vld [vmem:[%s27121_s13 + $0x68] sm:$0xff]  }
 0xad6   : > { %v30041_v34 = vsel %vm24305_vm3, 4294967295, %v30040_v34  ;;  %vm24333_vm9 = vmpackc.low %vm30047_vm14, %vm30046_vm2  ;;  %vm30055_vm11 = vnez %v30034_v12  ;;  %vm30056_vm4 = vnez %v30032_v27  ;;  %vm24356_vm2 = vcmp.eq.s32.totalorder %v8582_v28, %v23834_v38 }
 0xad7   : > { %v30049_v21 = vsel %vm24333_vm9, 4294967295, %v30048_v21  ;;  %v30057_v18 = vmov 0  ;;  %vm24361_vm14 = vcmp.eq.s32.totalorder %v8776_v0, %v23836_v42  ;;  %v8584_v45 = vand.u32 31, %v17028_v15 }
 0xad8   : > { %v30058_v18 = vsel %vm24356_vm2, 4294967295, %v30057_v18  ;;  %v8778_v48 = vshra.s32 %v17028_v15, 5  ;;  %vm30061_vm6 = vnez %v29976_v22  ;;  %vm24375_vm9 = vcmp.eq.s32.totalorder %v8583_v59, %v23834_v38 }
 0xad9   : > { %13422 = vmatpush1.bf16.msk.msra.mxu0 %vm30061_vm6, %v28087_v23  ;;  %v30062_v24 = vmov 0  ;;  %vm24380_vm3 = vcmp.eq.s32.totalorder %v8777_v9, %v23836_v42  ;;  %v30064_v50 = vmov 0  ;;  %v8585_v15 = vand.u32 31, %v17065_v6 }
 0xada   : > { %v30063_v24 = vsel %vm24375_vm9, 4294967295, %v30062_v24  ;;  %v30065_v50 = vsel %vm24380_vm3, 4294967295, %v30064_v50  ;;  %v8779_v16 = vshra.s32 %v17065_v6, 5  ;;  %vm30066_vm6 = vnez %v29986_v8  ;;  %vm30070_vm9 = vmand %vm24246_vm5, %vm24251_vm0 }
 0xadb   : > { %13424 = vmatprep.subr.msk.bf16.mxu0 %vm30066_vm6, %v28087_v23  ;;  %vm30067_vm1 = vnez %v30011_v2  ;;  %vm30068_vm12 = vnez %v30013_v39  ;;  %v30071_v32 = vmov 0  ;;  %vm24408_vm6 = vcmp.eq.s32.totalorder %v8582_v28, %v23842_v3  ;;  %vm30077_vm5 = vmand %vm30050_vm7, %vm24267_vm10 }
 0xadc   : > { %vm30069_vm13 = vmand %vm30067_vm1, %vm30068_vm12  ;;  %v30073_v6 = vmov 0  ;;  %vm24413_vm12 = vcmp.eq.s32.totalorder %v8776_v0, %v23844_v46  ;;  %v30075_v13 = vmov 0  ;;  %v30079_v29 = vmov 0 }
 0xadd   : > { %vm24399_vm2 = vmpackc.low %vm30070_vm9, %vm30069_vm13  ;;  %v30074_v6 = vsel %vm24408_vm6, 4294967295, %v30073_v6  ;;  %v30076_v13 = vsel %vm24413_vm12, 4294967295, %v30075_v13  ;;  %vm30081_vm9 = vnez %v30058_v18  ;;  %vm24436_vm3 = vcmp.eq.s32.totalorder %v8583_v59, %v23842_v3  ;;  %v30161_v59 = vld [vmem:[#allocation25_spill] sm:$0xff] }
 0xade   : > { %v30072_v32 = vsel %vm24399_vm2, 4294967295, %v30071_v32  ;;  %vm30078_vm0 = vmand %vm30056_vm4, %vm30055_vm11  ;;  %vm24441_vm10 = vcmp.eq.s32.totalorder %v8777_v9, %v23844_v46  ;;  %vm30086_vm7 = vnez %v30065_v50  ;;  %vm30087_vm11 = vnez %v30063_v24 }
 0xadf   : > { %vm24427_vm13 = vmpackc.low %vm30078_vm0, %vm30077_vm5  ;;  %vm24450_vm5 = vcmp.eq.s32.totalorder %v8584_v45, %v23834_v38  ;;  %v30088_v53 = vmov 0  ;;  %vm24455_vm0 = vcmp.eq.s32.totalorder %v8778_v48, %v23836_v42  ;;  %v8586_v33 = vand.u32 31, %v29148_v63 }
 0xae0   : > { %v30080_v29 = vsel %vm24427_vm13, 4294967295, %v30079_v29  ;;  %v30089_v53 = vsel %vm24450_vm5, 4294967295, %v30088_v53  ;;  %v8780_v10 = vshra.s32 %v29148_v63, 5  ;;  %vm30092_vm1 = vnez %v30009_v37 }
 0xae1   : > { %13426 = vmatpush1.bf16.msk.msra.mxu0 %vm30092_vm1, %v28087_v23  ;;  %vm24469_vm13 = vcmp.eq.s32.totalorder %v8585_v15, %v23834_v38  ;;  %v30093_v43 = vmov 0  ;;  %vm24474_vm2 = vcmp.eq.s32.totalorder %v8779_v16, %v23836_v42  ;;  %v30095_v40 = vmov 0 }
 0xae2   : > { %v30094_v43 = vsel %vm24469_vm13, 4294967295, %v30093_v43  ;;  %v30096_v40 = vsel %vm24474_vm2, 4294967295, %v30095_v40  ;;  %v8587_v63 = vand.u32 31, %v29154_v47  ;;  %v8781_v22 = vshra.s32 %v29154_v47, 5  ;;  %vm30101_vm13 = vmand %vm24342_vm15, %vm24347_vm8 }
 0xae3   : > { %vm30097_vm1 = vnez %v30017_v1  ;;  %vm30098_vm4 = vnez %v30043_v60  ;;  %vm30099_vm12 = vnez %v30045_v30  ;;  %v30102_v54 = vmov 0  ;;  %vm30108_vm15 = vmand %vm30081_vm9, %vm24361_vm14  ;;  %v30267_v1 = vld [vmem:[#allocation61_spill] sm:$0xff] }
 0xae4   : > { %13428 = vmatprep.subr.msk.bf16.mxu0 %vm30097_vm1, %v28087_v23  ;;  %vm30100_vm6 = vmand %vm30098_vm4, %vm30099_vm12  ;;  %vm24502_vm1 = vcmp.eq.s32.totalorder %v8584_v45, %v23842_v3  ;;  %v30104_v47 = vmov 0  ;;  %vm24507_vm12 = vcmp.eq.s32.totalorder %v8778_v48, %v23844_v46  ;;  %v30106_v25 = vmov 0  ;;  %v30188_v48 = vld [vmem:[#allocation51_spill] sm:$0xff] }
 0xae5   : > { %vm24493_vm5 = vmpackc.low %vm30101_vm13, %vm30100_vm6  ;;  %v30105_v47 = vsel %vm24502_vm1, 4294967295, %v30104_v47  ;;  %v30107_v25 = vsel %vm24507_vm12, 4294967295, %v30106_v25  ;;  %v30110_v31 = vmov 0  ;;  %vm30112_vm13 = vnez %v30089_v53 }
 0xae6   : > { %v30103_v54 = vsel %vm24493_vm5, 4294967295, %v30102_v54  ;;  %vm30109_vm8 = vmand %vm30087_vm11, %vm30086_vm7  ;;  %vm24530_vm2 = vcmp.eq.s32.totalorder %v8585_v15, %v23842_v3  ;;  %vm24535_vm14 = vcmp.eq.s32.totalorder %v8779_v16, %v23844_v46  ;;  %vm30117_vm9 = vnez %v30096_v40  ;;  %v30221_v40 = vld [vmem:[#allocation58_spill] sm:$0xff] }
 0xae7   : > { %vm24521_vm6 = vmpackc.low %vm30109_vm8, %vm30108_vm15  ;;  %vm30118_vm7 = vnez %v30094_v43  ;;  %vm24544_vm15 = vcmp.eq.s32.totalorder %v8586_v33, %v23834_v38  ;;  %v30119_v44 = vmov 0  ;;  %vm24549_vm8 = vcmp.eq.s32.totalorder %v8780_v10, %v23836_v42 }
 0xae8   : > { %v30111_v31 = vsel %vm24521_vm6, 4294967295, %v30110_v31  ;;  %v30120_v44 = vsel %vm24544_vm15, 4294967295, %v30119_v44  ;;  %v8588_v5 = vand.u32 31, %v29181_v57  ;;  %v8782_v56 = vshra.s32 %v29181_v57, 5  ;;  %v30128_v57 = vld [vmem:[#allocation42_spill] sm:$0xff] }
 0xae9   : > { %vm30123_vm4 = vnez %v30041_v34  ;;  %vm24563_vm6 = vcmp.eq.s32.totalorder %v8587_v63, %v23834_v38  ;;  %v30124_v14 = vmov 0  ;;  %vm24568_vm5 = vcmp.eq.s32.totalorder %v8781_v22, %v23836_v42 }
 0xaea   : > { %13430 = vmatpush1.bf16.msk.msra.mxu0 %vm30123_vm4, %v28087_v23  ;;  %v30125_v14 = vsel %vm24563_vm6, 4294967295, %v30124_v14  ;;  %v30126_v51 = vmov 0  ;;  %v8589_v35 = vand.u32 31, %v30128_v57  ;;  %v8783_v62 = vshra.s32 %v30128_v57, 5  ;;  %vm30133_vm6 = vmand %vm24436_vm3, %vm24441_vm10  ;;  %v14771_v57 = vld [vmem:[%s27121_s13 + $0x40] sm:$0xff]  }
 0xaeb   : > { %v30127_v51 = vsel %vm24568_vm5, 4294967295, %v30126_v51  ;;  %vm30129_vm4 = vnez %v30049_v21  ;;  %vm30130_vm11 = vnez %v30074_v6  ;;  %vm30131_vm12 = vnez %v30076_v13  ;;  %vm30140_vm3 = vmand %vm30112_vm13, %vm24455_vm0  ;;  %12882 = vmatprep.subr.bf16.mxu1 %v14771_v57 }
 0xaec   : > { %13432 = vmatprep.subr.msk.bf16.mxu0 %vm30129_vm4, %v28087_v23  ;;  %vm30132_vm1 = vmand %vm30130_vm11, %vm30131_vm12  ;;  %v30134_v17 = vmov 0  ;;  %vm24596_vm4 = vcmp.eq.s32.totalorder %v8586_v33, %v23842_v3  ;;  %v30136_v37 = vmov 0  ;;  %vm24601_vm12 = vcmp.eq.s32.totalorder %v8780_v10, %v23844_v46  ;;  %v30329_v33 = vld [vmem:[#allocation62_spill] sm:$0xff] }
 0xaed   : > { %vm24587_vm15 = vmpackc.low %vm30133_vm6, %vm30132_vm1  ;;  %v30137_v37 = vsel %vm24596_vm4, 4294967295, %v30136_v37  ;;  %v30138_v2 = vmov 0  ;;  %v30142_v39 = vmov 0  ;;  %vm30144_vm6 = vnez %v30120_v44 }
 0xaee   : > { %v30135_v17 = vsel %vm24587_vm15, 4294967295, %v30134_v17  ;;  %v30139_v2 = vsel %vm24601_vm12, 4294967295, %v30138_v2  ;;  %vm30141_vm10 = vmand %vm30118_vm7, %vm30117_vm9  ;;  %vm24624_vm5 = vcmp.eq.s32.totalorder %v8587_v63, %v23842_v3  ;;  %vm24629_vm0 = vcmp.eq.s32.totalorder %v8781_v22, %v23844_v46 }
 0xaef   : > { %vm24615_vm1 = vmpackc.low %vm30141_vm10, %vm30140_vm3  ;;  %vm30149_vm13 = vnez %v30127_v51  ;;  %vm30150_vm9 = vnez %v30125_v14  ;;  %vm24638_vm3 = vcmp.eq.s32.totalorder %v8588_v5, %v23834_v38  ;;  %v30151_v61 = vmov 0 }
 0xaf0   : > { %v30143_v39 = vsel %vm24615_vm1, 4294967295, %v30142_v39  ;;  %v30152_v61 = vsel %vm24638_vm3, 4294967295, %v30151_v61  ;;  %vm24643_vm10 = vcmp.eq.s32.totalorder %v8782_v56, %v23836_v42  ;;  %v8590_v28 = vand.u32 31, %v30155_v4 }
 0xaf1   : > { %v8784_v0 = vshra.s32 %v30155_v4, 5  ;;  %vm30156_vm11 = vnez %v30072_v32  ;;  %vm24657_vm1 = vcmp.eq.s32.totalorder %v8589_v35, %v23834_v38  ;;  %v30157_v27 = vmov 0  ;;  %v30194_v32 = vld [vmem:[#allocation57_spill] sm:$0xff]  ;;  %v14792_v4 = vld [vmem:[%s27121_s13 + $0x28] sm:$0xff]  }
 0xaf2   : > { %13434 = vmatpush1.bf16.msk.msra.mxu0 %vm30156_vm11, %v28087_v23  ;;  %v30158_v27 = vsel %vm24657_vm1, 4294967295, %v30157_v27  ;;  %vm24662_vm15 = vcmp.eq.s32.totalorder %v8783_v62, %v23836_v42  ;;  %v30159_v12 = vmov 0  ;;  %v8591_v9 = vand.u32 31, %v30161_v59  ;;  %vm30166_vm1 = vmand %vm24530_vm2, %vm24535_vm14 }
 0xaf3   : > { %v30160_v12 = vsel %vm24662_vm15, 4294967295, %v30159_v12  ;;  %v8785_v34 = vshra.s32 %v30161_v59, 5  ;;  %vm30162_vm11 = vnez %v30080_v29  ;;  %vm30163_vm7 = vnez %v30105_v47  ;;  %vm30173_vm2 = vmand %vm30144_vm6, %vm24549_vm8 }
 0xaf4   : > { %13436 = vmatprep.subr.msk.bf16.mxu0 %vm30162_vm11, %v28087_v23  ;;  %vm30164_vm12 = vnez %v30107_v25  ;;  %v30167_v60 = vmov 0  ;;  %vm24690_vm11 = vcmp.eq.s32.totalorder %v8588_v5, %v23842_v3  ;;  %v30169_v30 = vmov 0  ;;  %vm30174_vm14 = vmand %vm30150_vm9, %vm30149_vm13  ;;  %v30227_v25 = vld [vmem:[#allocation30_spill] sm:$0xff] }
 0xaf5   : > { %vm30165_vm4 = vmand %vm30163_vm7, %vm30164_vm12  ;;  %v30170_v30 = vsel %vm24690_vm11, 4294967295, %v30169_v30  ;;  %vm24695_vm12 = vcmp.eq.s32.totalorder %v8782_v56, %v23844_v46  ;;  %v30171_v21 = vmov 0  ;;  %v30175_v49 = vmov 0 }
 0xaf6   : > { %vm24681_vm3 = vmpackc.low %vm30166_vm1, %vm30165_vm4  ;;  %v30172_v21 = vsel %vm24695_vm12, 4294967295, %v30171_v21  ;;  %vm30177_vm1 = vnez %v30152_v61  ;;  %vm24718_vm15 = vcmp.eq.s32.totalorder %v8589_v35, %v23842_v3  ;;  %vm24723_vm8 = vcmp.eq.s32.totalorder %v8783_v62, %v23844_v46  ;;  %v14772_v35 = vld [vmem:[%s27121_s13] sm:$0xff]   ;;  %v14775_v62 = vld [vmem:[%s27121_s13 + $0x48] sm:$0xff]  }
 0xaf7   : > { %v30168_v60 = vsel %vm24681_vm3, 4294967295, %v30167_v60  ;;  %vm24709_vm4 = vmpackc.low %vm30174_vm14, %vm30173_vm2  ;;  %vm30182_vm6 = vnez %v30160_v12  ;;  %vm30183_vm13 = vnez %v30158_v27  ;;  %vm24732_vm2 = vcmp.eq.s32.totalorder %v8590_v28, %v23834_v38  ;;  %12883 = vmatpush3.bf16.msra.mxu1 %v14772_v35  ;;  %v30354_v27 = vld [vmem:[#allocation33_spill] sm:$0xff] }
 0xaf8   : > { %v30176_v49 = vsel %vm24709_vm4, 4294967295, %v30175_v49  ;;  %v30184_v19 = vmov 0  ;;  %vm24737_vm14 = vcmp.eq.s32.totalorder %v8784_v0, %v23836_v42  ;;  %v8592_v24 = vand.u32 31, %v30188_v48  ;;  %12884 = vmatprep.subr.bf16.mxu1 %v14775_v62 }
 0xaf9   : > { %v30185_v19 = vsel %vm24732_vm2, 4294967295, %v30184_v19  ;;  %v8786_v50 = vshra.s32 %v30188_v48, 5  ;;  %vm30189_vm7 = vnez %v30103_v54  ;;  %vm24751_vm4 = vcmp.eq.s32.totalorder %v8591_v9, %v23834_v38 }
 0xafa   : > { %13438 = vmatpush1.bf16.msk.msra.mxu0 %vm30189_vm7, %v28087_v23  ;;  %v30190_v15 = vmov 0  ;;  %vm24756_vm3 = vcmp.eq.s32.totalorder %v8785_v34, %v23836_v42  ;;  %v30192_v16 = vmov 0  ;;  %v8593_v6 = vand.u32 31, %v30194_v32 }
 0xafb   : > { %v30191_v15 = vsel %vm24751_vm4, 4294967295, %v30190_v15  ;;  %v30193_v16 = vsel %vm24756_vm3, 4294967295, %v30192_v16  ;;  %v8787_v13 = vshra.s32 %v30194_v32, 5  ;;  %vm30195_vm7 = vnez %v30111_v31  ;;  %vm30199_vm4 = vmand %vm24624_vm5, %vm24629_vm0 }
 0xafc   : > { %13440 = vmatprep.subr.msk.bf16.mxu0 %vm30195_vm7, %v28087_v23  ;;  %vm30196_vm9 = vnez %v30137_v37  ;;  %vm30197_vm12 = vnez %v30139_v2  ;;  %v30200_v29 = vmov 0  ;;  %vm24784_vm7 = vcmp.eq.s32.totalorder %v8590_v28, %v23842_v3  ;;  %vm30206_vm5 = vmand %vm30177_vm1, %vm24643_vm10  ;;  %v30266_v37 = vld [vmem:[#allocation31_spill] sm:$0xff] }
 0xafd   : > { %vm30198_vm11 = vmand %vm30196_vm9, %vm30197_vm12  ;;  %v30202_v52 = vmov 0  ;;  %vm24789_vm12 = vcmp.eq.s32.totalorder %v8784_v0, %v23844_v46  ;;  %v30208_v53 = vmov 0  ;;  %vm24812_vm3 = vcmp.eq.s32.totalorder %v8591_v9, %v23842_v3  ;;  %v14795_v28 = vld [vmem:[%s27121_s13 + $0x70] sm:$0xff]  }
 0xafe   : > { %vm24775_vm2 = vmpackc.low %vm30199_vm4, %vm30198_vm11  ;;  %v30203_v52 = vsel %vm24784_vm7, 4294967295, %v30202_v52  ;;  %v30205_v11 = vsel %vm24789_vm12, 4294967295, %v30204_v11  ;;  %vm30210_vm4 = vnez %v30185_v19  ;;  %vm24817_vm10 = vcmp.eq.s32.totalorder %v8785_v34, %v23844_v46  ;;  %v30310_v19 = vld [vmem:[#allocation60_spill] sm:$0xff] }
 0xaff   : > { %v30201_v29 = vsel %vm24775_vm2, 4294967295, %v30200_v29  ;;  %vm30207_vm0 = vmand %vm30183_vm13, %vm30182_vm6  ;;  %vm30215_vm1 = vnez %v30193_v16  ;;  %vm30216_vm6 = vnez %v30191_v15  ;;  %v30217_v10 = vmov 0  ;;  %v30355_v9 = vld [vmem:[#allocation64_spill] sm:$0xff] }
 0xb00   : > { %vm24803_vm11 = vmpackc.low %vm30207_vm0, %vm30206_vm5  ;;  %vm24826_vm5 = vcmp.eq.s32.totalorder %v8592_v24, %v23834_v38  ;;  %vm24831_vm0 = vcmp.eq.s32.totalorder %v8786_v50, %v23836_v42  ;;  %v30219_v43 = vmov 0  ;;  %v8594_v63 = vand.u32 31, %v30221_v40 }
 0xb01   : > { %v30209_v53 = vsel %vm24803_vm11, 4294967295, %v30208_v53  ;;  %v30218_v10 = vsel %vm24826_vm5, 4294967295, %v30217_v10  ;;  %v30220_v43 = vsel %vm24831_vm0, 4294967295, %v30219_v43  ;;  %v8788_v22 = vshra.s32 %v30221_v40, 5 }
 0xb02   : > { %vm30222_vm9 = vnez %v30135_v17  ;;  %vm24845_vm11 = vcmp.eq.s32.totalorder %v8593_v6, %v23834_v38  ;;  %v30223_v54 = vmov 0  ;;  %vm24850_vm2 = vcmp.eq.s32.totalorder %v8787_v13, %v23836_v42  ;;  %v14776_v17 = vld [vmem:[%s27121_s13 + $0x8] sm:$0xff]  }
 0xb03   : > { %13442 = vmatpush1.bf16.msk.msra.mxu0 %vm30222_vm9, %v28087_v23  ;;  %v30224_v54 = vsel %vm24845_vm11, 4294967295, %v30223_v54  ;;  %v30225_v47 = vmov 0  ;;  %v8595_v31 = vand.u32 31, %v30227_v25  ;;  %v8789_v8 = vshra.s32 %v30227_v25, 5  ;;  %vm30232_vm11 = vmand %vm24718_vm15, %vm24723_vm8  ;;  %12885 = vmatpush3.bf16.msra.mxu1 %v14776_v17 }
 0xb04   : > { %v30226_v47 = vsel %vm24850_vm2, 4294967295, %v30225_v47  ;;  %vm30228_vm9 = vnez %v30143_v39  ;;  %vm30229_vm13 = vnez %v30170_v30  ;;  %vm30230_vm12 = vnez %v30172_v21  ;;  %vm30239_vm15 = vmand %vm30210_vm4, %vm24737_vm14 }
 0xb05   : > { %13444 = vmatprep.subr.msk.bf16.mxu0 %vm30228_vm9, %v28087_v23  ;;  %vm30231_vm7 = vmand %vm30229_vm13, %vm30230_vm12  ;;  %v30233_v36 = vmov 0  ;;  %vm24878_vm9 = vcmp.eq.s32.totalorder %v8592_v24, %v23842_v3  ;;  %v30235_v44 = vmov 0  ;;  %vm24883_vm12 = vcmp.eq.s32.totalorder %v8786_v50, %v23844_v46  ;;  %v30311_v24 = vld [vmem:[#allocation46_spill] sm:$0xff] }
 0xb06   : > { %vm24869_vm5 = vmpackc.low %vm30232_vm11, %vm30231_vm7  ;;  %v30236_v44 = vsel %vm24878_vm9, 4294967295, %v30235_v44  ;;  %v30237_v26 = vmov 0  ;;  %v30241_v5 = vmov 0  ;;  %vm30243_vm11 = vnez %v30218_v10 }
 0xb07   : > { %v30234_v36 = vsel %vm24869_vm5, 4294967295, %v30233_v36  ;;  %v30238_v26 = vsel %vm24883_vm12, 4294967295, %v30237_v26  ;;  %vm30240_vm8 = vmand %vm30216_vm6, %vm30215_vm1  ;;  %vm24906_vm2 = vcmp.eq.s32.totalorder %v8593_v6, %v23842_v3  ;;  %vm24911_vm14 = vcmp.eq.s32.totalorder %v8787_v13, %v23844_v46  ;;  %v30320_v13 = vld [vmem:[#allocation40_spill] sm:$0xff] }
 0xb08   : > { %vm24897_vm7 = vmpackc.low %vm30240_vm8, %vm30239_vm15  ;;  %vm24920_vm15 = vcmp.eq.s32.totalorder %v8594_v63, %v23834_v38  ;;  %vm24925_vm8 = vcmp.eq.s32.totalorder %v8788_v22, %v23836_v42  ;;  %vm30254_vm13 = vnez %v30168_v60  ;;  %vm24937_vm6 = vcmp.eq.s32.totalorder %v8595_v31, %v23834_v38 }
 0xb09   : > { %v30242_v5 = vsel %vm24897_vm7, 4294967295, %v30241_v5  ;;  %13446 = vmatpush1.bf16.msk.msra.mxu0 %vm30254_vm13, %v28087_v23  ;;  %vm24942_vm5 = vcmp.eq.s32.totalorder %v8789_v8, %v23836_v42  ;;  %vm30259_vm4 = vnez %v30176_v49  ;;  %vm30260_vm13 = vnez %v30203_v52  ;;  %vm30263_vm7 = vmand %vm24812_vm3, %vm24817_vm10  ;;  %v30360_v49 = vld [vmem:[#allocation63_spill] sm:$0xff] }
 0xb0a   : > { %13448 = vmatprep.subr.msk.bf16.mxu0 %vm30259_vm4, %v28087_v23  ;;  %vm30261_vm1 = vnez %v30205_v11  ;;  %vm9006_vm9 = vmand %vm24906_vm2, %vm24911_vm14  ;;  %v8596_v2 = vand.u32 31, %v30266_v37  ;;  %v8790_v39 = vshra.s32 %v30266_v37, 5  ;;  %v8597_v55 = vand.u32 31, %v30267_v1  ;;  %v14779_v37 = vld [vmem:[%s27121_s13 + $0x50] sm:$0xff]  }
 0xb0b   : > { %vm30262_vm0 = vmand %vm30260_vm13, %vm30261_vm1  ;;  %v8791_v61 = vshra.s32 %v30267_v1, 5  ;;  %vm30268_vm2 = vnez %v30201_v29  ;;  %vm30269_vm10 = vnez %v30220_v43  ;;  %vm30272_vm14 = vnez %v30226_v47  ;;  %12886 = vmatprep.subr.bf16.mxu1 %v14779_v37  ;;  %v14784_v1 = vld [vmem:[%s27121_s13 + $0x18] sm:$0xff]  }
 0xb0c   : > { %vm24959_vm12 = vmpackc.low %vm30263_vm7, %vm30262_vm0  ;;  %vm30271_vm7 = vnez %v30224_v54  ;;  %vm30282_vm13 = vnez %v30238_v26  ;;  %v30284_v0 = vmov 0  ;;  %v30290_v59 = vmov 0  ;;  %v30351_v26 = vld [vmem:[#allocation32_spill] sm:$0xff] }
 0xb0d   : > { %vm9009_vm4 = vmand %vm24920_vm15, %vm24925_vm8  ;;  %13450 = vmatpush1.bf16.msk.msra.mxu0 %vm30268_vm2, %v28087_v23  ;;  %vm30281_vm8 = vnez %v30236_v44  ;;  %v30294_v34 = vmov 0  ;;  %v8598_v45 = vand.u32 31, %v30310_v19  ;;  %v8792_v48 = vshra.s32 %v30310_v19, 5  ;;  %v30563_v19 = vld [vmem:[#allocation69_spill] sm:$0xff] }
 0xb0e   : > { %vm9011_vm3 = vmand %vm24937_vm6, %vm24942_vm5  ;;  %vm24997_vm5 = vcmp.eq.s32.totalorder %v8594_v63, %v23842_v3  ;;  %vm25002_vm6 = vcmp.eq.s32.totalorder %v8788_v22, %v23844_v46  ;;  %v8599_v50 = vand.u32 31, %v30311_v24  ;;  %v8793_v15 = vshra.s32 %v30311_v24, 5 }
 0xb0f   : > { %vm30270_vm0 = vmand %vm30243_vm11, %vm30269_vm10  ;;  %vm30280_vm11 = vnez %v30209_v53  ;;  %v8600_v29 = vand.u32 31, %v30320_v13  ;;  %v8794_v52 = vshra.s32 %v30320_v13, 5  ;;  %v8601_v10 = vand.u32 31, %v30329_v33 }
 0xb10   : > { %vm30273_vm1 = vmand %vm30271_vm7, %vm30272_vm14  ;;  %13452 = vmatprep.subr.msk.bf16.mxu0 %vm30280_vm11, %v28087_v23  ;;  %vm25024_vm7 = vcmp.eq.s32.totalorder %v8789_v8, %v23844_v46  ;;  %vm25069_vm11 = vcmp.eq.s32.totalorder %v8790_v39, %v23844_v46  ;;  %v8795_v43 = vshra.s32 %v30329_v33, 5  ;;  %v30330_v40 = vmov 0  ;;  %v30497_v8 = vld [vmem:[#allocation29_spill] sm:$0xff] }
 0xb11   : > { %vm24992_vm15 = vmpackc.low %vm30273_vm1, %vm30270_vm0  ;;  %vm25019_vm0 = vcmp.eq.s32.totalorder %v8595_v31, %v23842_v3  ;;  %vm25033_vm1 = vcmp.eq.s32.totalorder %v8596_v2, %v23834_v38  ;;  %v8797_v14 = vshra.s32 %v30351_v26, 5  ;;  %v30352_v51 = vmov 0 }
 0xb12   : > { %vm30283_vm2 = vmand %vm30281_vm8, %vm30282_vm13  ;;  %vm30300_vm8 = vnez %v30234_v36  ;;  %vm25081_vm13 = vcmp.eq.s32.totalorder %v8597_v55, %v23842_v3  ;;  %v30350_v36 = vld [vmem:[#allocation47_spill] sm:$0xff]  ;;  %v8604_v12 = vand.u32 31, %v30354_v27  ;;  %v8799_v60 = vshra.s32 %v30355_v9, 5 }
 0xb13   : > { %vm25014_vm10 = vmpackc.low %vm9006_vm9, %vm30283_vm2  ;;  %vm25038_vm9 = vcmp.eq.s32.totalorder %v8790_v39, %v23836_v42  ;;  %13454 = vmatpush1.bf16.msk.msra.mxu0 %vm30300_vm8, %v28087_v23  ;;  %vm25064_vm2 = vcmp.eq.s32.totalorder %v8596_v2, %v23842_v3  ;;  %v8602_v44 = vand.u32 31, %v30350_v36  ;;  %v8796_v56 = vshra.s32 %v30350_v36, 5  ;;  %v14780_v2 = vld [vmem:[%s27121_s13 + $0x10] sm:$0xff]   ;;  %v14783_v39 = vld [vmem:[%s27121_s13 + $0x58] sm:$0xff]  }
 0xb14   : > { %v30285_v0 = vsel %vm25014_vm10, 4294967295, %v30284_v0  ;;  %vm25028_vm14 = vmpackc.low %vm9011_vm3, %vm9009_vm4  ;;  %v30295_v34 = vsel %vm25038_vm9, 4294967295, %v30294_v34  ;;  %vm25047_vm4 = vcmp.eq.s32.totalorder %v8597_v55, %v23834_v38  ;;  %vm25052_vm3 = vcmp.eq.s32.totalorder %v8791_v61, %v23836_v42  ;;  %12887 = vmatpush3.bf16.msra.mxu1 %v14780_v2  ;;  %v14787_v55 = vld [vmem:[%s27121_s13 + $0x60] sm:$0xff]   ;;  %v30398_v36 = vld [vmem:[#allocation28_spill] sm:$0xff] }
 0xb15   : > { %v30291_v59 = vsel %vm25028_vm14, 4294967295, %v30290_v59  ;;  %vm30305_vm14 = vnez %v30242_v5  ;;  %vm25086_vm10 = vcmp.eq.s32.totalorder %v8791_v61, %v23844_v46  ;;  %vm9012_vm8 = vmand %vm25064_vm2, %vm25069_vm11  ;;  %vm25169_vm2 = vcmp.eq.s32.totalorder %v8792_v48, %v23844_v46  ;;  %12888 = vmatprep.subr.bf16.mxu1 %v14783_v39  ;;  %v14788_v61 = vld [vmem:[%s27121_s13 + $0x20] sm:$0xff]  }
 0xb16   : > { %13456 = vmatprep.subr.msk.bf16.mxu0 %vm30305_vm14, %v28087_v23  ;;  %vm9015_vm14 = vmand %vm25047_vm4, %vm25052_vm3  ;;  %vm25153_vm3 = vcmp.eq.s32.totalorder %v8793_v15, %v23836_v42  ;;  %v8603_v5 = vand.u32 31, %v30351_v26  ;;  %v8606_v41 = vand.u32 31, %v30360_v49  ;;  %v8800_v18 = vshra.s32 %v30360_v49, 5 }
 0xb17   : > { %13458 = vmatpush1.bf16.msk.msra.mxu0 %vm24959_vm12, %v28087_v23  ;;  %vm9014_vm9 = vmand %vm25081_vm13, %vm25086_vm10  ;;  %vm25127_vm10 = vcmp.eq.s32.totalorder %v8598_v45, %v23834_v38  ;;  %v30370_v32 = vmov 0  ;;  %v30372_v6 = vmov 0  ;;  %v30384_v63 = vmov 0 }
 0xb18   : > { %13460 = vmatprep.subr.msk.bf16.mxu0 %vm24992_vm15, %v28087_v23  ;;  %vm30312_vm4 = vmand %vm24997_vm5, %vm25002_vm6  ;;  %vm25132_vm15 = vcmp.eq.s32.totalorder %v8792_v48, %v23836_v42  ;;  %vm30321_vm5 = vnez %v30295_v34  ;;  %12889 = vmatpush3.bf16.msra.mxu1 %v14784_v1  ;;  %v8605_v34 = vand.u32 31, %v30355_v9  ;;  %v30365_v48 = vld [vmem:[#allocation53_spill] sm:$0xff]  ;;  %v30386_v22 = vmov 0 }
 0xb19   : > { %vm30313_vm11 = vmand %vm25019_vm0, %vm25024_vm7  ;;  %vm25148_vm7 = vcmp.eq.s32.totalorder %v8599_v50, %v23834_v38  ;;  %12890 = vmatprep.subr.bf16.mxu1 %v14787_v55  ;;  %v8607_v24 = vand.u32 31, %v30365_v48  ;;  %v30388_v54 = vmov 0  ;;  %v8804_v26 = vshra.s32 %v30398_v36, 5 }
 0xb1a   : > { %vm25122_vm12 = vmpackc.low %vm30313_vm11, %vm30312_vm4  ;;  %vm25186_vm4 = vcmp.eq.s32.totalorder %v8793_v15, %v23844_v46  ;;  %vm30341_vm11 = vnez %v30291_v59  ;;  %v8798_v59 = vshra.s32 %v30354_v27, 5  ;;  %v30408_v62 = vmov 0 }
 0xb1b   : > { %vm30322_vm6 = vmand %vm25033_vm1, %vm30321_vm5  ;;  %vm25164_vm1 = vcmp.eq.s32.totalorder %v8598_v45, %v23842_v3  ;;  %v30410_v17 = vmov 0  ;;  %v30412_v37 = vmov 0  ;;  %v30415_v2 = vmov 0 }
 0xb1c   : > { %vm25143_vm0 = vmpackc.low %vm9015_vm14, %vm30322_vm6  ;;  %vm30336_vm14 = vnez %v30285_v0  ;;  %vm25198_vm6 = vcmp.eq.s32.totalorder %v8600_v29, %v23834_v38  ;;  %12891 = vmatpush3.bf16.msra.mxu1 %v14788_v61  ;;  %v14796_v0 = vld [vmem:[%s27121_s13 + $0x30] sm:$0xff]   ;;  %v30423_v55 = vmov 0  ;;  %v30428_v27 = vmov 0 }
 0xb1d   : > { %vm25159_vm13 = vmpackc.low %vm9014_vm9, %vm9012_vm8  ;;  %13462 = vmatpush1.bf16.msk.msra.mxu0 %vm30336_vm14, %v28087_v23  ;;  %vm25181_vm8 = vcmp.eq.s32.totalorder %v8599_v50, %v23842_v3  ;;  %vm25203_vm14 = vcmp.eq.s32.totalorder %v8794_v52, %v23836_v42  ;;  %vm25212_vm9 = vcmp.eq.s32.totalorder %v8601_v10, %v23834_v38  ;;  %12892 = vmatprep.subr.bf16.mxu1 %v14791_v58  ;;  %v8801_v50 = vshra.s32 %v30365_v48, 5  ;;  %v30427_v58 = vld [vmem:[#allocation49_spill] sm:$0xff]  ;;  %v30530_v61 = vld [vmem:[#allocation67_spill] sm:$0xff] }
 0xb1e   : > { %v30331_v40 = vsel %vm25159_vm13, 4294967295, %v30330_v40  ;;  %13464 = vmatprep.subr.msk.bf16.mxu0 %vm30341_vm11, %v28087_v23  ;;  %vm9019_vm5 = vmand %vm25148_vm7, %vm25153_vm3  ;;  %vm8895_vm7 = vcmp.eq.s32.totalorder %v8795_v43, %v23836_v42  ;;  %vm8892_vm13 = vcmp.eq.s32.totalorder %v8794_v52, %v23844_v46  ;;  %v30378_v52 = vld [vmem:[#allocation66_spill] sm:$0xff]  ;;  %v30437_v30 = vmov 0 }
 0xb1f   : > { %vm9016_vm11 = vmand %vm25164_vm1, %vm25169_vm2  ;;  %v8608_v11 = vand.u32 31, %v30378_v52  ;;  %v8802_v53 = vshra.s32 %v30378_v52, 5  ;;  %v30439_v21 = vmov 0  ;;  %v30441_v49 = vmov 0 }
 0xb20   : > { %vm9018_vm3 = vmand %vm25181_vm8, %vm25186_vm4  ;;  %12893 = vmatpush3.bf16.msra.mxu1 %v14792_v4  ;;  %v8612_v4 = vand.u32 31, %v30427_v58  ;;  %v30460_v16 = vmov 0  ;;  %v30470_v52 = vmov 0  ;;  %v30478_v33 = vmov 0 }
 0xb21   : > { %13466 = vmatpush1.bf16.msk.msra.mxu0 %vm25122_vm12, %v28087_v23  ;;  %vm9021_vm1 = vmand %vm25198_vm6, %vm25203_vm14  ;;  %vm8696_vm12 = vcmp.eq.s32.totalorder %v8600_v29, %v23842_v3  ;;  %vm8698_vm14 = vcmp.eq.s32.totalorder %v8601_v10, %v23842_v3  ;;  %12894 = vmatprep.subr.bf16.mxu1 %v14795_v28  ;;  %v30383_v10 = vld [vmem:[#allocation65_spill] sm:$0xff]  ;;  %v8806_v28 = vshra.s32 %v30427_v58, 5  ;;  %v30493_v25 = vmov 0 }
 0xb22   : > { %13468 = vmatprep.subr.msk.bf16.mxu0 %vm25143_vm0, %v28087_v23  ;;  %vm9023_vm2 = vmand %vm25212_vm9, %vm8895_vm7  ;;  %vm8894_vm0 = vcmp.eq.s32.totalorder %v8795_v43, %v23844_v46  ;;  %vm30349_vm7 = vnez %v30331_v40  ;;  %v8609_v43 = vand.u32 31, %v30383_v10  ;;  %v8803_v40 = vshra.s32 %v30383_v10, 5  ;;  %v30596_v10 = vld [vmem:[#allocation71_spill] sm:$0xff] }
 0xb23   : > { %vm30348_vm8 = vmand %vm25127_vm10, %vm25132_vm15  ;;  %v30495_v31 = vmov 0  ;;  %v30526_v1 = vmov 0  ;;  %v8619_v58 = vand.u32 31, %v30530_v61  ;;  %v8621_v45 = vand.u32 31, %v30563_v19 }
 0xb24   : > { %vm13471_vm4 = vmpackc.low %vm9019_vm5, %vm30348_vm8  ;;  %vm8700_vm8 = vcmp.eq.s32.totalorder %v8602_v44, %v23842_v3  ;;  %12895 = vmatpush3.bf16.msra.mxu1 %v14796_v0  ;;  %v8815_v48 = vshra.s32 %v30563_v19, 5  ;;  %v14794_v19 = vld [vmem:[%s27121_s13 + $0x228] sm:$0xff]  }
 0xb25   : > { %vm13473_vm6 = vmpackc.low %vm9018_vm3, %vm9016_vm11  ;;  %13470 = vmatpush1.bf16.msk.msra.mxu0 %vm30349_vm7, %v28087_v23  ;;  %vm8701_vm11 = vcmp.eq.s32.totalorder %v8602_v44, %v23834_v38  ;;  %vm8897_vm3 = vcmp.eq.s32.totalorder %v8796_v56, %v23836_v42  ;;  %v8610_v44 = vand.u32 31, %v30398_v36  ;;  %v8617_v36 = vand.u32 31, %v30497_v8 }
 0xb26   : > { %vm13475_vm9 = vmpackc.low %vm9023_vm2, %vm9021_vm1  ;;  %13472 = vmatprep.subr.msk.bf16.mxu0 %vm13471_vm4, %v28087_v23  ;;  %vm8899_vm1 = vcmp.eq.s32.totalorder %v8797_v14, %v23836_v42  ;;  %vm8896_vm4 = vcmp.eq.s32.totalorder %v8796_v56, %v23844_v46  ;;  %v30401_v56 = vmov 0 }
 0xb27   : > { %vm9020_vm10 = vmand %vm8696_vm12, %vm8892_vm13  ;;  %vm8703_vm13 = vcmp.eq.s32.totalorder %v8603_v5, %v23834_v38 }
 0xb28   : > { %vm9022_vm15 = vmand %vm8698_vm14, %vm8894_vm0  ;;  %vm8898_vm14 = vcmp.eq.s32.totalorder %v8797_v14, %v23844_v46  ;;  %v30403_v14 = vld [vmem:[#allocation27_spill] sm:$0xff] }
 0xb29   : > { %13474 = vmatpush1.bf16.msk.msra.mxu0 %vm13473_vm6, %v28087_v23  ;;  %vm13477_vm5 = vmpackc.low %vm9022_vm15, %vm9020_vm10  ;;  %vm8702_vm6 = vcmp.eq.s32.totalorder %v8603_v5, %v23842_v3  ;;  %vm25313_vm15 = vcmp.eq.s32.totalorder %v8604_v12, %v23834_v38  ;;  %v8611_v57 = vand.u32 31, %v30403_v14  ;;  %v8805_v35 = vshra.s32 %v30403_v14, 5 }
 0xb2a   : > { %13476 = vmatprep.subr.msk.bf16.mxu0 %vm13475_vm9, %v28087_v23  ;;  %vm9025_vm2 = vmand %vm8701_vm11, %vm8897_vm3  ;;  %vm25325_vm11 = vcmp.eq.s32.totalorder %v8605_v34, %v23834_v38  ;;  %vm25337_vm3 = vcmp.eq.s32.totalorder %v8604_v12, %v23842_v3  ;;  %v30430_v12 = vmov 0  ;;  %v30505_v5 = vmov 0 }
 0xb2b   : > { %vm9027_vm12 = vmand %vm8703_vm13, %vm8899_vm1  ;;  %vm25330_vm13 = vcmp.eq.s32.totalorder %v8799_v60, %v23836_v42  ;;  %vm25342_vm1 = vcmp.eq.s32.totalorder %v8798_v59, %v23844_v46  ;;  %v30511_v14 = vmov 0 }
 0xb2c   : > { %vm13479_vm0 = vmpackc.low %vm9027_vm12, %vm9025_vm2 }
 0xb2d   : > { %13478 = vmatpush1.bf16.msk.msra.mxu0 %vm13477_vm5, %v28087_v23  ;;  %vm9024_vm7 = vmand %vm8700_vm8, %vm8896_vm4  ;;  %vm25318_vm5 = vcmp.eq.s32.totalorder %v8798_v59, %v23836_v42  ;;  %vm25351_vm8 = vcmp.eq.s32.totalorder %v8605_v34, %v23842_v3  ;;  %vm25356_vm4 = vcmp.eq.s32.totalorder %v8799_v60, %v23844_v46  ;;  %v30432_v59 = vld [vmem:[#allocation41_spill] sm:$0xff] }
 0xb2e   : > { %13480 = vmatprep.subr.msk.bf16.mxu0 %vm13479_vm0, %v28087_v23  ;;  %vm9026_vm9 = vmand %vm8702_vm6, %vm8898_vm14  ;;  %v30371_v32 = vsel %vm25351_vm8, 4294967295, %v30370_v32  ;;  %v30373_v6 = vsel %vm25356_vm4, 4294967295, %v30372_v6  ;;  %vm25365_vm6 = vcmp.eq.s32.totalorder %v8606_v41, %v23834_v38  ;;  %vm25370_vm14 = vcmp.eq.s32.totalorder %v8800_v18, %v23836_v42 }
 0xb2f   : > { %vm25262_vm10 = vmpackc.low %vm9026_vm9, %vm9024_vm7  ;;  %vm25381_vm7 = vcmp.eq.s32.totalorder %v8607_v24, %v23834_v38  ;;  %vm25386_vm9 = vcmp.eq.s32.totalorder %v8801_v50, %v23836_v42  ;;  %vm25402_vm0 = vcmp.eq.s32.totalorder %v8800_v18, %v23844_v46  ;;  %vm25420_vm4 = vcmp.eq.s32.totalorder %v8607_v24, %v23842_v3  ;;  %v30458_v24 = vld [vmem:[#allocation56_spill] sm:$0xff] }
 0xb30   : > { %v30353_v51 = vsel %vm25262_vm10, 4294967295, %v30352_v51  ;;  %vm9029_vm2 = vmand %vm25313_vm15, %vm25318_vm5  ;;  %v30387_v22 = vsel %vm25402_vm0, 4294967295, %v30386_v22  ;;  %vm25425_vm8 = vcmp.eq.s32.totalorder %v8801_v50, %v23844_v46  ;;  %vm25434_vm5 = vcmp.eq.s32.totalorder %v8608_v11, %v23834_v38 }
 0xb31   : > { %vm9031_vm12 = vmand %vm25325_vm11, %vm25330_vm13  ;;  %vm25397_vm13 = vcmp.eq.s32.totalorder %v8606_v41, %v23842_v3  ;;  %v8613_v9 = vand.u32 31, %v30432_v59  ;;  %v8807_v34 = vshra.s32 %v30432_v59, 5  ;;  %v30445_v41 = vmov 0  ;;  %v30662_v59 = vld [vmem:[#allocation75_spill] sm:$0xff] }
 0xb32   : > { %v30385_v63 = vsel %vm25397_vm13, 4294967295, %v30384_v63  ;;  %vm25411_vm10 = vmpackc.low %vm9031_vm12, %vm9029_vm2  ;;  %vm25439_vm2 = vcmp.eq.s32.totalorder %v8802_v53, %v23836_v42  ;;  %vm30405_vm12 = vnez %v30371_v32  ;;  %v8614_v50 = vand.u32 31, %v30458_v24 }
 0xb33   : > { %v30389_v54 = vsel %vm25411_vm10, 4294967295, %v30388_v54  ;;  %vm9035_vm15 = vmand %vm25381_vm7, %vm25386_vm9  ;;  %vm25450_vm7 = vcmp.eq.s32.totalorder %v8609_v43, %v23834_v38  ;;  %vm25455_vm9 = vcmp.eq.s32.totalorder %v8803_v40, %v23836_v42  ;;  %vm30406_vm10 = vnez %v30373_v6  ;;  %v30464_v6 = vld [vmem:[#allocation34_spill] sm:$0xff] }
 0xb34   : > { %v30402_v56 = vsel %vm25455_vm9, 4294967295, %v30401_v56  ;;  %vm30404_vm11 = vmand %vm25337_vm3, %vm25342_vm1  ;;  %vm25480_vm9 = vcmp.eq.s32.totalorder %v8608_v11, %v23842_v3  ;;  %vm25485_vm3 = vcmp.eq.s32.totalorder %v8802_v53, %v23844_v46  ;;  %v8808_v15 = vshra.s32 %v30458_v24, 5 }
 0xb35   : > { %vm30407_vm0 = vmand %vm30405_vm12, %vm30406_vm10  ;;  %v30411_v17 = vsel %vm25480_vm9, 4294967295, %v30410_v17  ;;  %v30413_v37 = vsel %vm25485_vm3, 4294967295, %v30412_v37  ;;  %vm25508_vm12 = vcmp.eq.s32.totalorder %v8803_v40, %v23844_v46  ;;  %v30462_v32 = vmov 0 }
 0xb36   : > { %vm25471_vm13 = vmpackc.low %vm30407_vm0, %vm30404_vm11  ;;  %vm25503_vm11 = vcmp.eq.s32.totalorder %v8609_v43, %v23842_v3  ;;  %vm25522_vm0 = vcmp.eq.s32.totalorder %v8804_v26, %v23836_v42  ;;  %v8615_v13 = vand.u32 31, %v30464_v6  ;;  %v30472_v11 = vmov 0 }
 0xb37   : > { %v30409_v62 = vsel %vm25471_vm13, 4294967295, %v30408_v62  ;;  %vm30414_vm10 = vmand %vm25365_vm6, %vm25370_vm14  ;;  %vm30421_vm6 = vnez %v30402_v56  ;;  %vm30433_vm13 = vnez %v30385_v63  ;;  %v30474_v53 = vmov 0 }
 0xb38   : > { %vm25494_vm1 = vmpackc.low %vm9035_vm15, %vm30414_vm10  ;;  %vm25517_vm10 = vcmp.eq.s32.totalorder %v8610_v44, %v23834_v38  ;;  %v30487_v40 = vmov 0  ;;  %v30507_v56 = vmov 0  ;;  %v30561_v18 = vmov 0 }
 0xb39   : > { %v30416_v2 = vsel %vm25494_vm1, 4294967295, %v30415_v2  ;;  %vm30422_vm14 = vmmov %vm25450_vm7  ;;  %v30424_v55 = vsel %vm25517_vm10, 4294967295, %v30423_v55  ;;  %vm25533_vm7 = vcmp.eq.s32.totalorder %v8611_v57, %v23834_v38  ;;  %vm25538_vm1 = vcmp.eq.s32.totalorder %v8805_v35, %v23836_v42 }
 0xb3a   : > { %v30429_v27 = vsel %vm25533_vm7, 4294967295, %v30428_v27  ;;  %v30431_v12 = vsel %vm25538_vm1, 4294967295, %v30430_v12  ;;  %vm30434_vm10 = vnez %v30387_v22  ;;  %vm30436_vm3 = vmand %vm25420_vm4, %vm25425_vm8  ;;  %vm25563_vm1 = vcmp.eq.s32.totalorder %v8610_v44, %v23842_v3  ;;  %v30491_v22 = vld [vmem:[#allocation26_spill] sm:$0xff] }
 0xb3b   : > { %vm30435_vm15 = vmand %vm30433_vm13, %vm30434_vm10  ;;  %v30440_v21 = vsel %vm25563_vm1, 4294967295, %v30439_v21  ;;  %vm25568_vm13 = vcmp.eq.s32.totalorder %v8804_v26, %v23844_v46  ;;  %vm25591_vm7 = vcmp.eq.s32.totalorder %v8611_v57, %v23842_v3  ;;  %vm30459_vm10 = vnez %v30353_v51  ;;  %v30629_v57 = vld [vmem:[#allocation73_spill] sm:$0xff] }
 0xb3c   : > { %vm25554_vm9 = vmpackc.low %vm30436_vm3, %vm30435_vm15  ;;  %v30442_v49 = vsel %vm25568_vm13, 4294967295, %v30441_v49  ;;  %vm30447_vm15 = vnez %v30424_v55  ;;  %v8809_v51 = vshra.s32 %v30464_v6, 5  ;;  %vm30467_vm13 = vnez %v30413_v37  ;;  %v30524_v37 = vld [vmem:[#allocation24_spill] sm:$0xff]  ;;  %v30702_v6 = vld [vmem:[#allocation77_spill] sm:$0xff] }
 0xb3d   : > { %v30438_v30 = vsel %vm25554_vm9, 4294967295, %v30437_v30  ;;  %vm30443_vm8 = vmand %vm25434_vm5, %vm25439_vm2  ;;  %vm25596_vm5 = vcmp.eq.s32.totalorder %v8805_v35, %v23844_v46  ;;  %vm30452_vm2 = vnez %v30431_v12  ;;  %vm25629_vm9 = vcmp.eq.s32.totalorder %v8807_v34, %v23836_v42 }
 0xb3e   : > { %vm30444_vm4 = vmand %vm30422_vm14, %vm30421_vm6  ;;  %vm30453_vm6 = vnez %v30429_v27  ;;  %v30463_v32 = vsel %vm25629_vm9, 4294967295, %v30462_v32  ;;  %vm30466_vm14 = vnez %v30411_v17  ;;  %v8810_v47 = vshra.s32 %v30491_v22, 5 }
 0xb3f   : > { %vm25582_vm3 = vmpackc.low %vm30444_vm4, %vm30443_vm8  ;;  %vm25605_vm8 = vcmp.eq.s32.totalorder %v8612_v4, %v23834_v38  ;;  %vm25610_vm4 = vcmp.eq.s32.totalorder %v8806_v28, %v23836_v42  ;;  %v8811_v44 = vshra.s32 %v30497_v8, 5  ;;  %v30503_v26 = vmov 0 }
 0xb40   : > { %v30446_v41 = vsel %vm25582_vm3, 4294967295, %v30445_v41  ;;  %vm25624_vm3 = vcmp.eq.s32.totalorder %v8613_v9, %v23834_v38  ;;  %vm30468_vm1 = vmand %vm30466_vm14, %vm30467_vm13  ;;  %vm25664_vm13 = vcmp.eq.s32.totalorder %v8806_v28, %v23844_v46  ;;  %vm30492_vm14 = vnez %v30409_v62 }
 0xb41   : > { %v30461_v16 = vsel %vm25624_vm3, 4294967295, %v30460_v16  ;;  %vm30469_vm3 = vmand %vm25503_vm11, %vm25508_vm12  ;;  %v30475_v53 = vsel %vm25664_vm13, 4294967295, %v30474_v53  ;;  %vm30500_vm13 = vnez %v30442_v49  ;;  %v30520_v62 = vmov 0 }
 0xb42   : > { %vm25650_vm9 = vmpackc.low %vm30469_vm3, %vm30468_vm1  ;;  %v8812_v39 = vshra.s32 %v30524_v37, 5  ;;  %v30528_v55 = vmov 0  ;;  %v30536_v28 = vmov 0  ;;  %v30540_v27 = vmov 0 }
 0xb43   : > { %v30471_v52 = vsel %vm25650_vm9, 4294967295, %v30470_v52  ;;  %vm30476_vm1 = vmand %vm30447_vm15, %vm25522_vm0  ;;  %vm25692_vm0 = vcmp.eq.s32.totalorder %v8807_v34, %v23844_v46  ;;  %vm30485_vm15 = vnez %v30463_v32  ;;  %vm25725_vm9 = vcmp.eq.s32.totalorder %v8809_v51, %v23836_v42 }
 0xb44   : > { %vm30477_vm11 = vmand %vm30453_vm6, %vm30452_vm2  ;;  %vm30486_vm2 = vnez %v30461_v16  ;;  %v30496_v31 = vsel %vm25725_vm9, 4294967295, %v30495_v31  ;;  %vm30499_vm6 = vnez %v30440_v21  ;;  %vm25781_vm9 = vcmp.eq.s32.totalorder %v8615_v13, %v23842_v3 }
 0xb45   : > { %vm25678_vm12 = vmpackc.low %vm30477_vm11, %vm30476_vm1  ;;  %vm25701_vm1 = vcmp.eq.s32.totalorder %v8614_v50, %v23834_v38  ;;  %vm25706_vm11 = vcmp.eq.s32.totalorder %v8808_v15, %v23836_v42  ;;  %v30544_v12 = vmov 0  ;;  %v30553_v34 = vmov 0 }
 0xb46   : > { %v30479_v33 = vsel %vm25678_vm12, 4294967295, %v30478_v33  ;;  %vm30480_vm3 = vmmov %vm25605_vm8  ;;  %vm25687_vm8 = vcmp.eq.s32.totalorder %v8613_v9, %v23842_v3  ;;  %v30488_v40 = vsel %vm25701_vm1, 4294967295, %v30487_v40  ;;  %vm25720_vm12 = vcmp.eq.s32.totalorder %v8615_v13, %v23834_v38 }
 0xb47   : > { %v30494_v25 = vsel %vm25720_vm12, 4294967295, %v30493_v25  ;;  %vm30502_vm12 = vmand %vm25591_vm7, %vm25596_vm5  ;;  %v30569_v24 = vmov 0  ;;  %v30577_v16 = vmov 0  ;;  %v30586_v13 = vmov 0 }
 0xb48   : > { %vm30509_vm7 = vmand %vm30480_vm3, %vm25610_vm4  ;;  %vm25786_vm4 = vcmp.eq.s32.totalorder %v8809_v51, %v23844_v46  ;;  %vm30518_vm3 = vnez %v30496_v31  ;;  %v8623_v43 = vand.u32 31, %v30596_v10  ;;  %v30602_v63 = vmov 0 }
 0xb49   : > { %vm30510_vm5 = vmand %vm30486_vm2, %vm30485_vm15  ;;  %vm30519_vm15 = vnez %v30494_v25  ;;  %v30619_v8 = vmov 0  ;;  %v8625_v35 = vand.u32 31, %v30629_v57  ;;  %v30635_v17 = vmov 0 }
 0xb4a   : > { %v8627_v9 = vand.u32 31, %v30662_v59  ;;  %v8823_v51 = vshra.s32 %v30702_v6, 5 }
 0xb99   : > { %v8494_v0 = vpop.f32.mrb[44].mxu0 }
 0xb9a   : > { %v8496_v60 = vpop.f32.mrb[45].mxu0 }
 0xb9b   : > { %9408 = vmatprep.mubr.f32.mxu0 %v8496_v60  ;;  %v30668_v60 = vmov 0 }
 0xb9c   : > { %9409 = vmatmul.mubr.f32.vlgmr.msra.gmra.mrb[48].mxu0 %v8494_v0  ;;  %v30538_v0 = vmov 0 }
 0xb9d   : > { %13482 = vmatpush1.bf16.msk.msra.mxu0 %vm30459_vm10, %v28087_v23  ;;  %vm30465_vm10 = vnez %v30389_v54  ;;  %v8616_v54 = vand.u32 31, %v30491_v22  ;;  %v30604_v22 = vmov 0 }
 0xb9e   : > { %13484 = vmatprep.subr.msk.bf16.mxu0 %vm30465_vm10, %v28087_v23  ;;  %vm25659_vm10 = vcmp.eq.s32.totalorder %v8612_v4, %v23842_v3  ;;  %v8813_v4 = vshra.s32 %v30530_v61, 5  ;;  %v30652_v61 = vmov 0 }
 0xb9f   : > { %v30473_v11 = vsel %vm25659_vm10, 4294967295, %v30472_v11  ;;  %vm30501_vm10 = vmand %vm30499_vm6, %vm30500_vm13  ;;  %vm25758_vm13 = vcmp.eq.s32.totalorder %v8808_v15, %v23844_v46  ;;  %vm30525_vm6 = vnez %v30438_v30  ;;  %v30557_v30 = vld [vmem:[#allocation68_spill] sm:$0xff]  ;;  %v30573_v15 = vmov 0 }
 0xba0   : > { %vm25744_vm1 = vmpackc.low %vm30502_vm12, %vm30501_vm10  ;;  %v30508_v56 = vsel %vm25758_vm13, 4294967295, %v30507_v56  ;;  %vm30513_vm12 = vnez %v30488_v40  ;;  %vm30532_vm2 = vnez %v30473_v11  ;;  %vm30533_vm13 = vnez %v30475_v53 }
 0xba1   : > { %v25635_v29 = vpop.f32.mrb[46].mxu0  ;;  %13486 = vmatpush1.bf16.msk.msra.mxu0 %vm30492_vm14, %v28087_v23  ;;  %vm30498_vm14 = vnez %v30416_v2  ;;  %v30504_v26 = vsel %vm25744_vm1, 4294967295, %v30503_v26  ;;  %vm25772_vm10 = vmpackc.low %vm30510_vm5, %vm30509_vm7  ;;  %vm25795_vm7 = vcmp.eq.s32.totalorder %v8616_v54, %v23834_v38  ;;  %vm25800_vm5 = vcmp.eq.s32.totalorder %v8810_v47, %v23836_v42 }
 0xba2   : > { %v8567_v7 = vpop.f32.mrb[47].mxu0  ;;  %13488 = vmatprep.subr.msk.bf16.mxu0 %vm30498_vm14, %v28087_v23  ;;  %vm25753_vm14 = vcmp.eq.s32.totalorder %v8614_v50, %v23842_v3  ;;  %v30512_v14 = vsel %vm25772_vm10, 4294967295, %v30511_v14  ;;  %v30521_v62 = vsel %vm25795_vm7, 4294967295, %v30520_v62  ;;  %v8618_v2 = vand.u32 31, %v30524_v37 }
 0xba3   : > { %9479 = vmatprep.mubr.f32.mxu0 %v8567_v7  ;;  %v30506_v5 = vsel %vm25753_vm14, 4294967295, %v30505_v5  ;;  %vm25814_vm10 = vcmp.eq.s32.totalorder %v8617_v36, %v23834_v38  ;;  %vm25819_vm1 = vcmp.eq.s32.totalorder %v8811_v44, %v23836_v42  ;;  %vm30534_vm14 = vmand %vm30532_vm2, %vm30533_vm13  ;;  %vm25852_vm13 = vcmp.eq.s32.totalorder %v8810_v47, %v23844_v46 }
 0xba4   : > { %v30527_v1 = vsel %vm25814_vm10, 4294967295, %v30526_v1  ;;  %v30529_v55 = vsel %vm25819_vm1, 4294967295, %v30528_v55  ;;  %vm30535_vm10 = vmand %vm25687_vm8, %vm25692_vm0  ;;  %v30541_v27 = vsel %vm25852_vm13, 4294967295, %v30540_v27  ;;  %vm25875_vm1 = vcmp.eq.s32.totalorder %v8617_v36, %v23842_v3  ;;  %v30745_v36 = vld [vmem:[#allocation78_spill] sm:$0xff] }
 0xba5   : > { %13490 = vmatpush1.bf16.msk.msra.mxu0 %vm30525_vm6, %v28087_v23  ;;  %vm30531_vm6 = vnez %v30446_v41  ;;  %vm25838_vm7 = vmpackc.low %vm30535_vm10, %vm30534_vm14  ;;  %vm30546_vm10 = vnez %v30521_v62  ;;  %v8620_v21 = vand.u32 31, %v30557_v30  ;;  %v8814_v49 = vshra.s32 %v30557_v30, 5 }
 0xba6   : > { %13492 = vmatprep.subr.msk.bf16.mxu0 %vm30531_vm6, %v28087_v23  ;;  %v30537_v28 = vsel %vm25838_vm7, 4294967295, %v30536_v28  ;;  %vm25847_vm6 = vcmp.eq.s32.totalorder %v8616_v54, %v23842_v3  ;;  %vm30542_vm8 = vmand %vm30513_vm12, %vm25706_vm11  ;;  %vm25880_vm11 = vcmp.eq.s32.totalorder %v8811_v44, %v23844_v46  ;;  %vm30551_vm12 = vnez %v30529_v55  ;;  %v30623_v44 = vld [vmem:[#allocation72_spill] sm:$0xff]  ;;  %v30786_v55 = vld [vmem:[#allocation83_spill] sm:$0xff] }
 0xba7   : > { %v30539_v0 = vsel %vm25847_vm6, 4294967295, %v30538_v0  ;;  %vm30543_vm0 = vmand %vm30519_vm15, %vm30518_vm3  ;;  %vm30552_vm3 = vnez %v30527_v1  ;;  %vm30558_vm2 = vnez %v30471_v52  ;;  %v30559_v41 = vmov 0  ;;  %v30590_v52 = vld [vmem:[#allocation70_spill] sm:$0xff]  ;;  %v14817_v1 = vld [vmem:[%s27121_s13 + $0x358] sm:$0xff]  }
 0xba8   : > { %vm25866_vm14 = vmpackc.low %vm30543_vm0, %vm30542_vm8  ;;  %vm25889_vm8 = vcmp.eq.s32.totalorder %v8618_v2, %v23834_v38  ;;  %vm25894_vm0 = vcmp.eq.s32.totalorder %v8812_v39, %v23836_v42  ;;  %vm25913_vm7 = vcmp.eq.s32.totalorder %v8813_v4, %v23836_v42  ;;  %vm30565_vm15 = vnez %v30506_v5 }
 0xba9   : > { %v30545_v12 = vsel %vm25866_vm14, 4294967295, %v30544_v12  ;;  %v30554_v34 = vsel %vm25889_vm8, 4294967295, %v30553_v34  ;;  %13494 = vmatpush1.bf16.msk.msra.mxu0 %vm30558_vm2, %v28087_v23  ;;  %vm25908_vm14 = vcmp.eq.s32.totalorder %v8619_v58, %v23834_v38  ;;  %v30562_v18 = vsel %vm25913_vm7, 4294967295, %v30561_v18 }
 0xbaa   : > { %v30560_v41 = vsel %vm25908_vm14, 4294967295, %v30559_v41  ;;  %vm30564_vm2 = vnez %v30479_v33  ;;  %vm30566_vm13 = vnez %v30508_v56  ;;  %vm30568_vm14 = vmand %vm25781_vm9, %vm25786_vm4  ;;  %v30571_v50 = vmov 0 }
 0xbab   : > { %13496 = vmatprep.subr.msk.bf16.mxu0 %vm30564_vm2, %v28087_v23  ;;  %vm30567_vm6 = vmand %vm30565_vm15, %vm30566_vm13  ;;  %vm25941_vm2 = vcmp.eq.s32.totalorder %v8618_v2, %v23842_v3  ;;  %vm25946_vm13 = vcmp.eq.s32.totalorder %v8812_v39, %v23844_v46  ;;  %vm25969_vm7 = vcmp.eq.s32.totalorder %v8619_v58, %v23842_v3  ;;  %v8622_v11 = vand.u32 31, %v30590_v52 }
 0xbac   : > { %vm25932_vm8 = vmpackc.low %vm30568_vm14, %vm30567_vm6  ;;  %v30572_v50 = vsel %vm25941_vm2, 4294967295, %v30571_v50  ;;  %v30574_v15 = vsel %vm25946_vm13, 4294967295, %v30573_v15  ;;  %vm30579_vm14 = vnez %v30554_v34  ;;  %v8816_v53 = vshra.s32 %v30590_v52, 5 }
 0xbad   : > { %v30570_v24 = vsel %vm25932_vm8, 4294967295, %v30569_v24  ;;  %vm30575_vm9 = vmand %vm30546_vm10, %vm25800_vm5  ;;  %vm25974_vm5 = vcmp.eq.s32.totalorder %v8813_v4, %v23844_v46  ;;  %vm30584_vm10 = vnez %v30562_v18  ;;  %vm30591_vm15 = vnez %v30504_v26  ;;  %v30656_v4 = vld [vmem:[#allocation74_spill] sm:$0xff] }
 0xbae   : > { %vm30576_vm4 = vmand %vm30552_vm3, %vm30551_vm12  ;;  %vm30585_vm12 = vnez %v30560_v41  ;;  %13498 = vmatpush1.bf16.msk.msra.mxu0 %vm30591_vm15, %v28087_v23  ;;  %v30592_v7 = vmov 0  ;;  %vm26007_vm8 = vcmp.eq.s32.totalorder %v8815_v48, %v23836_v42  ;;  %v30594_v33 = vmov 0  ;;  %v14790_v41 = vld [vmem:[%s27121_s13 + $0x220] sm:$0xff]   ;;  %v14793_v18 = vld [vmem:[%s27121_s13 + $0x268] sm:$0xff]  }
 0xbaf   : > { %vm25960_vm6 = vmpackc.low %vm30576_vm4, %vm30575_vm9  ;;  %vm25983_vm9 = vcmp.eq.s32.totalorder %v8620_v21, %v23834_v38  ;;  %vm25988_vm4 = vcmp.eq.s32.totalorder %v8814_v49, %v23836_v42  ;;  %v30595_v33 = vsel %vm26007_vm8, 4294967295, %v30594_v33  ;;  %v8817_v40 = vshra.s32 %v30596_v10, 5  ;;  %v14804_v10 = vld [vmem:[%s27121_s13 + $0x80] sm:$0xff]  }
 0xbb0   : > { %v30578_v16 = vsel %vm25960_vm6, 4294967295, %v30577_v16  ;;  %v30587_v13 = vsel %vm25983_vm9, 4294967295, %v30586_v13  ;;  %vm26002_vm6 = vcmp.eq.s32.totalorder %v8621_v45, %v23834_v38  ;;  %vm30597_vm15 = vnez %v30512_v14 }
 0xbb1   : > { %v30593_v7 = vsel %vm26002_vm6, 4294967295, %v30592_v7  ;;  %13500 = vmatprep.subr.msk.bf16.mxu0 %vm30597_vm15, %v28087_v23  ;;  %vm30598_vm3 = vnez %v30539_v0  ;;  %vm30599_vm13 = vnez %v30541_v27  ;;  %vm30601_vm6 = vmand %vm25875_vm1, %vm25880_vm11  ;;  %vm26035_vm15 = vcmp.eq.s32.totalorder %v8620_v21, %v23842_v3 }
 0xbb2   : > { %vm30600_vm2 = vmand %vm30598_vm3, %vm30599_vm13  ;;  %v30605_v22 = vsel %vm26035_vm15, 4294967295, %v30604_v22  ;;  %vm26040_vm13 = vcmp.eq.s32.totalorder %v8814_v49, %v23844_v46  ;;  %v30606_v54 = vmov 0  ;;  %v30610_v47 = vmov 0 }
 0xbb3   : > { %vm26026_vm9 = vmpackc.low %vm30601_vm6, %vm30600_vm2  ;;  %v30607_v54 = vsel %vm26040_vm13, 4294967295, %v30606_v54  ;;  %vm30612_vm6 = vnez %v30587_v13  ;;  %vm26063_vm8 = vcmp.eq.s32.totalorder %v8621_v45, %v23842_v3  ;;  %v8624_v26 = vand.u32 31, %v30623_v44  ;;  %v14797_v45 = vld [vmem:[%s27121_s13 + $0x270] sm:$0xff]  }
 0xbb4   : > { %v30603_v63 = vsel %vm26026_vm9, 4294967295, %v30602_v63  ;;  %vm30608_vm1 = vmand %vm30579_vm14, %vm25894_vm0  ;;  %vm26068_vm0 = vcmp.eq.s32.totalorder %v8815_v48, %v23844_v46  ;;  %vm30617_vm14 = vnez %v30595_v33  ;;  %v8818_v5 = vshra.s32 %v30623_v44, 5  ;;  %v14798_v48 = vld [vmem:[%s27121_s13 + $0x230] sm:$0xff]  }
 0xbb5   : > { %vm30609_vm11 = vmand %vm30585_vm12, %vm30584_vm10  ;;  %vm30618_vm10 = vnez %v30593_v7  ;;  %vm30624_vm3 = vnez %v30537_v28  ;;  %v30625_v56 = vmov 0  ;;  %vm26101_vm9 = vcmp.eq.s32.totalorder %v8817_v40, %v23836_v42 }
 0xbb6   : > { %vm26054_vm2 = vmpackc.low %vm30609_vm11, %vm30608_vm1  ;;  %vm26077_vm1 = vcmp.eq.s32.totalorder %v8622_v11, %v23834_v38  ;;  %vm26082_vm11 = vcmp.eq.s32.totalorder %v8816_v53, %v23836_v42  ;;  %13502 = vmatpush1.bf16.msk.msra.mxu0 %vm30624_vm3, %v28087_v23  ;;  %v30627_v14 = vmov 0  ;;  %v8819_v62 = vshra.s32 %v30629_v57, 5  ;;  %v14810_v57 = vld [vmem:[%s27121_s13 + $0x308] sm:$0xff]  }
 0xbb7   : > { %v30611_v47 = vsel %vm26054_vm2, 4294967295, %v30610_v47  ;;  %v30620_v8 = vsel %vm26077_vm1, 4294967295, %v30619_v8  ;;  %vm26096_vm2 = vcmp.eq.s32.totalorder %v8623_v43, %v23834_v38  ;;  %v30628_v14 = vsel %vm26101_vm9, 4294967295, %v30627_v14 }
 0xbb8   : > { %v30626_v56 = vsel %vm26096_vm2, 4294967295, %v30625_v56  ;;  %vm30630_vm3 = vnez %v30545_v12  ;;  %vm30631_vm12 = vnez %v30572_v50  ;;  %vm30632_vm13 = vnez %v30574_v15  ;;  %vm30634_vm2 = vmand %vm25969_vm7, %vm25974_vm5  ;;  %v30701_v15 = vld [vmem:[#allocation76_spill] sm:$0xff] }
 0xbb9   : > { %13504 = vmatprep.subr.msk.bf16.mxu0 %vm30630_vm3, %v28087_v23  ;;  %vm30633_vm15 = vmand %vm30631_vm12, %vm30632_vm13  ;;  %vm26129_vm3 = vcmp.eq.s32.totalorder %v8622_v11, %v23842_v3  ;;  %v30637_v37 = vmov 0  ;;  %vm26134_vm13 = vcmp.eq.s32.totalorder %v8816_v53, %v23844_v46  ;;  %v30639_v2 = vmov 0  ;;  %v14800_v50 = vld [vmem:[%s27121_s13 + $0x38] sm:$0xff]  }
 0xbba   : > { %vm26120_vm1 = vmpackc.low %vm30634_vm2, %vm30633_vm15  ;;  %v30638_v37 = vsel %vm26129_vm3, 4294967295, %v30637_v37  ;;  %v30640_v2 = vsel %vm26134_vm13, 4294967295, %v30639_v2  ;;  %v30643_v39 = vmov 0  ;;  %vm30645_vm2 = vnez %v30620_v8  ;;  %v14807_v8 = vld [vmem:[%s27121_s13 + $0xc8] sm:$0xff]  }
 0xbbb   : > { %v30636_v17 = vsel %vm26120_vm1, 4294967295, %v30635_v17  ;;  %vm30641_vm7 = vmand %vm30612_vm6, %vm25988_vm4  ;;  %vm26157_vm9 = vcmp.eq.s32.totalorder %v8623_v43, %v23842_v3  ;;  %vm26162_vm4 = vcmp.eq.s32.totalorder %v8817_v40, %v23844_v46  ;;  %vm30650_vm6 = vnez %v30628_v14 }
 0xbbc   : > { %vm30642_vm5 = vmand %vm30618_vm10, %vm30617_vm14  ;;  %vm30651_vm14 = vnez %v30626_v56  ;;  %v30654_v58 = vmov 0  ;;  %v8626_v28 = vand.u32 31, %v30656_v4  ;;  %v8820_v0 = vshra.s32 %v30656_v4, 5 }
 0xbbd   : > { %vm26148_vm15 = vmpackc.low %vm30642_vm5, %vm30641_vm7  ;;  %vm26171_vm7 = vcmp.eq.s32.totalorder %v8624_v26, %v23834_v38  ;;  %vm26176_vm5 = vcmp.eq.s32.totalorder %v8818_v5, %v23836_v42  ;;  %vm30657_vm12 = vnez %v30570_v24  ;;  %v30658_v27 = vmov 0  ;;  %v14799_v24 = vld [vmem:[%s27121_s13 + $0x78] sm:$0xff]  }
 0xbbe   : > { %v30644_v39 = vsel %vm26148_vm15, 4294967295, %v30643_v39  ;;  %v30653_v61 = vsel %vm26171_vm7, 4294967295, %v30652_v61  ;;  %v30655_v58 = vsel %vm26176_vm5, 4294967295, %v30654_v58  ;;  %13506 = vmatpush1.bf16.msk.msra.mxu0 %vm30657_vm12, %v28087_v23  ;;  %vm26190_vm15 = vcmp.eq.s32.totalorder %v8625_v35, %v23834_v38  ;;  %12896 = vmatprep.subr.bf16.mxu1 %v14799_v24 }
 0xbbf   : > { %v30659_v27 = vsel %vm26190_vm15, 4294967295, %v30658_v27  ;;  %vm26195_vm1 = vcmp.eq.s32.totalorder %v8819_v62, %v23836_v42  ;;  %v30660_v12 = vmov 0  ;;  %v8821_v34 = vshra.s32 %v30662_v59, 5  ;;  %vm30667_vm15 = vmand %vm26063_vm8, %vm26068_vm0  ;;  %12897 = vmatpush3.bf16.msra.mxu1 %v14800_v50  ;;  %v14825_v59 = vld [vmem:[%s27121_s13 + $0x368] sm:$0xff]  }
 0xbc0   : > { %v30661_v12 = vsel %vm26195_vm1, 4294967295, %v30660_v12  ;;  %vm30663_vm12 = vnez %v30578_v16  ;;  %vm30664_vm10 = vnez %v30605_v22  ;;  %vm30665_vm13 = vnez %v30607_v54  ;;  %vm30674_vm8 = vmand %vm30645_vm2, %vm26082_vm11  ;;  %v14838_v50 = vld [vmem:[%s27121_s13 + $0x108] sm:$0xff]  }
 0xbc1   : > { %13508 = vmatprep.subr.msk.bf16.mxu0 %vm30663_vm12, %v28087_v23  ;;  %vm30666_vm3 = vmand %vm30664_vm10, %vm30665_vm13  ;;  %vm26223_vm12 = vcmp.eq.s32.totalorder %v8624_v26, %v23842_v3  ;;  %v30670_v30 = vmov 0  ;;  %vm26228_vm13 = vcmp.eq.s32.totalorder %v8818_v5, %v23844_v46  ;;  %v30672_v21 = vmov 0  ;;  %v30746_v5 = vld [vmem:[#allocation79_spill] sm:$0xff] }
 0xbc2   : > { %vm26214_vm7 = vmpackc.low %vm30667_vm15, %vm30666_vm3  ;;  %v30671_v30 = vsel %vm26223_vm12, 4294967295, %v30670_v30  ;;  %v30673_v21 = vsel %vm26228_vm13, 4294967295, %v30672_v21  ;;  %v30676_v49 = vmov 0  ;;  %vm30678_vm15 = vnez %v30653_v61  ;;  %v30764_v61 = vld [vmem:[#allocation81_spill] sm:$0xff] }
 0xbc3   : > { %v30669_v60 = vsel %vm26214_vm7, 4294967295, %v30668_v60  ;;  %vm30675_vm0 = vmand %vm30651_vm14, %vm30650_vm6  ;;  %vm26251_vm1 = vcmp.eq.s32.totalorder %v8625_v35, %v23842_v3  ;;  %vm26256_vm11 = vcmp.eq.s32.totalorder %v8819_v62, %v23844_v46  ;;  %vm30689_vm10 = vnez %v30603_v63  ;;  %v14812_v35 = vld [vmem:[%s27121_s13 + $0x90] sm:$0xff]  }
 0xbc4   : > { %vm26242_vm3 = vmpackc.low %vm30675_vm0, %vm30674_vm8  ;;  %vm26265_vm8 = vcmp.eq.s32.totalorder %v8626_v28, %v23834_v38  ;;  %vm26270_vm0 = vcmp.eq.s32.totalorder %v8820_v0, %v23836_v42  ;;  %13510 = vmatpush1.bf16.msk.msra.mxu0 %vm30689_vm10, %v28087_v23  ;;  %vm26282_vm14 = vcmp.eq.s32.totalorder %v8627_v9, %v23834_v38  ;;  %vm26287_vm7 = vcmp.eq.s32.totalorder %v8821_v34, %v23836_v42  ;;  %v14813_v62 = vld [vmem:[%s27121_s13 + $0x350] sm:$0xff]  }
 0xbc5   : > { %v30677_v49 = vsel %vm26242_vm3, 4294967295, %v30676_v49  ;;  %vm30694_vm2 = vnez %v30611_v47  ;;  %vm30695_vm10 = vnez %v30638_v37  ;;  %vm30696_vm6 = vnez %v30640_v2  ;;  %vm30698_vm3 = vmand %vm26157_vm9, %vm26162_vm4 }
 0xbc6   : > { %13512 = vmatprep.subr.msk.bf16.mxu0 %vm30694_vm2, %v28087_v23  ;;  %vm30697_vm5 = vmand %vm30695_vm10, %vm30696_vm6  ;;  %v8628_v16 = vand.u32 31, %v30701_v15  ;;  %v8822_v32 = vshra.s32 %v30701_v15, 5  ;;  %v8629_v13 = vand.u32 31, %v30702_v6  ;;  %vm30704_vm4 = vnez %v30655_v58  ;;  %v14801_v15 = vld [vmem:[%s27121_s13 + $0x278] sm:$0xff]   ;;  %v14805_v6 = vld [vmem:[%s27121_s13 + $0x340] sm:$0xff]  }
 0xbc7   : > { %vm26304_vm13 = vmpackc.low %vm30698_vm3, %vm30697_vm5  ;;  %vm30706_vm3 = vnez %v30659_v27  ;;  %vm30717_vm10 = vnez %v30673_v21  ;;  %v30719_v7 = vmov 0  ;;  %v30725_v43 = vmov 0  ;;  %v14786_v21 = vld [vmem:[%s27121_s13 + $0x218] sm:$0xff]   ;;  %v14822_v27 = vld [vmem:[%s27121_s13 + $0x320] sm:$0xff]  }
 0xbc8   : > { %vm9070_vm12 = vmand %vm26251_vm1, %vm26256_vm11  ;;  %vm30703_vm1 = vnez %v30636_v17  ;;  %vm30707_vm11 = vnez %v30661_v12  ;;  %v30729_v63 = vmov 0  ;;  %v8630_v44 = vand.u32 31, %v30745_v36  ;;  %v30755_v17 = vld [vmem:[#allocation80_spill] sm:$0xff]  ;;  %v14824_v12 = vld [vmem:[%s27121_s13 + $0xa8] sm:$0xff]  }
 0xbc9   : > { %vm9073_vm2 = vmand %vm26265_vm8, %vm26270_vm0  ;;  %13514 = vmatpush1.bf16.msk.msra.mxu0 %vm30703_vm1, %v28087_v23  ;;  %vm30716_vm0 = vnez %v30671_v30  ;;  %v8824_v26 = vshra.s32 %v30745_v36, 5  ;;  %v8631_v56 = vand.u32 31, %v30746_v5  ;;  %v8825_v14 = vshra.s32 %v30746_v5, 5  ;;  %v14782_v30 = vld [vmem:[%s27121_s13 + $0x210] sm:$0xff]   ;;  %v14806_v36 = vld [vmem:[%s27121_s13 + $0x300] sm:$0xff]  }
 0xbca   : > { %vm9075_vm9 = vmand %vm26282_vm14, %vm26287_vm7  ;;  %vm26342_vm7 = vcmp.eq.s32.totalorder %v8626_v28, %v23842_v3  ;;  %vm26347_vm14 = vcmp.eq.s32.totalorder %v8820_v0, %v23844_v46  ;;  %v8632_v37 = vand.u32 31, %v30755_v17  ;;  %v8826_v2 = vshra.s32 %v30755_v17, 5  ;;  %v14809_v5 = vld [vmem:[%s27121_s13 + $0x348] sm:$0xff]  }
 0xbcb   : > { %vm30705_vm5 = vmand %vm30678_vm15, %vm30704_vm4  ;;  %vm30715_vm15 = vnez %v30644_v39  ;;  %v8633_v58 = vand.u32 31, %v30764_v61  ;;  %v8827_v4 = vshra.s32 %v30764_v61, 5  ;;  %v30765_v28 = vmov 0  ;;  %v30785_v17 = vld [vmem:[#allocation82_spill] sm:$0xff]  ;;  %v14816_v39 = vld [vmem:[%s27121_s13 + $0x98] sm:$0xff]  }
 0xbcc   : > { %vm30708_vm6 = vmand %vm30706_vm3, %vm30707_vm11  ;;  %13516 = vmatprep.subr.msk.bf16.mxu0 %vm30715_vm15, %v28087_v23  ;;  %vm26369_vm3 = vcmp.eq.s32.totalorder %v8821_v34, %v23844_v46  ;;  %vm26414_vm15 = vcmp.eq.s32.totalorder %v8822_v32, %v23844_v46  ;;  %v14819_v61 = vld [vmem:[%s27121_s13 + $0xe0] sm:$0xff]   ;;  %v14823_v0 = vld [vmem:[%s27121_s13 + $0xe8] sm:$0xff]  }
 0xbcd   : > { %vm26337_vm8 = vmpackc.low %vm30708_vm6, %vm30705_vm5  ;;  %vm26364_vm5 = vcmp.eq.s32.totalorder %v8627_v9, %v23842_v3  ;;  %vm26378_vm6 = vcmp.eq.s32.totalorder %v8628_v16, %v23834_v38  ;;  %v14827_v9 = vld [vmem:[%s27121_s13 + $0xf0] sm:$0xff]   ;;  %v14826_v34 = vld [vmem:[%s27121_s13 + $0x328] sm:$0xff]  }
 0xbce   : > { %vm30718_vm1 = vmand %vm30716_vm0, %vm30717_vm10  ;;  %vm30735_vm0 = vnez %v30669_v60  ;;  %vm26426_vm10 = vcmp.eq.s32.totalorder %v8629_v13, %v23842_v3  ;;  %v14828_v60 = vld [vmem:[%s27121_s13 + $0xb0] sm:$0xff]  }
 0xbcf   : > { %vm26359_vm4 = vmpackc.low %vm9070_vm12, %vm30718_vm1  ;;  %vm26383_vm12 = vcmp.eq.s32.totalorder %v8822_v32, %v23836_v42  ;;  %13518 = vmatpush1.bf16.msk.msra.mxu0 %vm30735_vm0, %v28087_v23  ;;  %vm26409_vm1 = vcmp.eq.s32.totalorder %v8628_v16, %v23842_v3  ;;  %v14802_v16 = vld [vmem:[%s27121_s13 + $0x238] sm:$0xff]   ;;  %v14803_v32 = vld [vmem:[%s27121_s13 + $0xc0] sm:$0xff]  }
 0xbd0   : > { %v30720_v7 = vsel %vm26359_vm4, 4294967295, %v30719_v7  ;;  %vm26373_vm11 = vmpackc.low %vm9075_vm9, %vm9073_vm2  ;;  %v30730_v63 = vsel %vm26383_vm12, 4294967295, %v30729_v63  ;;  %vm26392_vm2 = vcmp.eq.s32.totalorder %v8629_v13, %v23834_v38  ;;  %vm26397_vm9 = vcmp.eq.s32.totalorder %v8823_v51, %v23836_v42  ;;  %12904 = vmatprep.subr.bf16.mxu1 %v14803_v32  ;;  %v9548_v13 = vld [vmem:[%s27120_s11] sm:$0xff]  ;;  %v14841_v32 = vld [vmem:[%s27121_s13 + $0x158] sm:$0xff]  }
 0xbd1   : > { %v30726_v43 = vsel %vm26373_vm11, 4294967295, %v30725_v43  ;;  %vm30740_vm11 = vnez %v30677_v49  ;;  %vm26431_vm4 = vcmp.eq.s32.totalorder %v8823_v51, %v23844_v46  ;;  %vm9076_vm0 = vmand %vm26409_vm1, %vm26414_vm15  ;;  %vm26514_vm1 = vcmp.eq.s32.totalorder %v8824_v26, %v23844_v46  ;;  %v14789_v49 = vld [vmem:[%s27121_s13 + $0x260] sm:$0xff]   ;;  %v9549_v51 = vld [vmem:[%s27120_s11 + $0x8] sm:$0xff] }
 0xbd2   : > { %13520 = vmatprep.subr.msk.bf16.mxu0 %vm30740_vm11, %v28087_v23  ;;  %vm9079_vm11 = vmand %vm26392_vm2, %vm26397_vm9  ;;  %vm26498_vm9 = vcmp.eq.s32.totalorder %v8825_v14, %v23836_v42 }
 0xbd3   : > { %13522 = vmatpush1.bf16.msk.msra.mxu0 %vm26304_vm13, %v28087_v23  ;;  %vm9078_vm12 = vmand %vm26426_vm10, %vm26431_vm4  ;;  %vm26472_vm4 = vcmp.eq.s32.totalorder %v8630_v44, %v23834_v38 }
 0xbd4   : > { %13524 = vmatprep.subr.msk.bf16.mxu0 %vm26337_vm8, %v28087_v23  ;;  %vm30747_vm2 = vmand %vm26342_vm7, %vm26347_vm14  ;;  %vm26477_vm8 = vcmp.eq.s32.totalorder %v8824_v26, %v23836_v42  ;;  %vm30756_vm7 = vnez %v30730_v63  ;;  %v14808_v26 = vld [vmem:[%s27121_s13 + $0x88] sm:$0xff]  }
 0xbd5   : > { %vm30748_vm15 = vmand %vm26364_vm5, %vm26369_vm3  ;;  %vm26493_vm3 = vcmp.eq.s32.totalorder %v8631_v56, %v23834_v38 }
 0xbd6   : > { %vm26467_vm13 = vmpackc.low %vm30748_vm15, %vm30747_vm2  ;;  %vm26531_vm2 = vcmp.eq.s32.totalorder %v8825_v14, %v23844_v46  ;;  %vm30776_vm15 = vnez %v30726_v43  ;;  %v14811_v14 = vld [vmem:[%s27121_s13 + $0xd0] sm:$0xff]  }
 0xbd7   : > { %vm30757_vm14 = vmand %vm26378_vm6, %vm30756_vm7  ;;  %vm26509_vm6 = vcmp.eq.s32.totalorder %v8630_v44, %v23842_v3 }
 0xbd8   : > { %vm26488_vm5 = vmpackc.low %vm9079_vm11, %vm30757_vm14  ;;  %vm30771_vm11 = vnez %v30720_v7  ;;  %vm26543_vm14 = vcmp.eq.s32.totalorder %v8632_v37, %v23834_v38 }
 0xbd9   : > { %vm26504_vm10 = vmpackc.low %vm9078_vm12, %vm9076_vm0  ;;  %13526 = vmatpush1.bf16.msk.msra.mxu0 %vm30771_vm11, %v28087_v23  ;;  %vm26526_vm0 = vcmp.eq.s32.totalorder %v8631_v56, %v23842_v3  ;;  %vm26548_vm11 = vcmp.eq.s32.totalorder %v8826_v2, %v23836_v42  ;;  %vm26557_vm12 = vcmp.eq.s32.totalorder %v8633_v58, %v23834_v38  ;;  %v14773_v38 = vld [vmem:[%s27121_s13 + $0x240] sm:$0xff]  }
 0xbda   : > { %v30766_v28 = vsel %vm26504_vm10, 4294967295, %v30765_v28  ;;  %13528 = vmatprep.subr.msk.bf16.mxu0 %vm30776_vm15, %v28087_v23  ;;  %vm9083_vm7 = vmand %vm26493_vm3, %vm26498_vm9  ;;  %vm8959_vm3 = vcmp.eq.s32.totalorder %v8827_v4, %v23836_v42  ;;  %vm8956_vm10 = vcmp.eq.s32.totalorder %v8826_v2, %v23844_v46  ;;  %v14774_v42 = vld [vmem:[%s27121_s13 + $0x200] sm:$0xff]   ;;  %v14814_v2 = vld [vmem:[%s27121_s13 + $0x310] sm:$0xff]  }
 0xbdb   : > { %vm9080_vm15 = vmand %vm26509_vm6, %vm26514_vm1 }
 0xbdc   : > { %vm9082_vm9 = vmand %vm26526_vm0, %vm26531_vm2 }
 0xbdd   : > { %13530 = vmatpush1.bf16.msk.msra.mxu0 %vm26467_vm13, %v28087_v23  ;;  %vm9085_vm6 = vmand %vm26543_vm14, %vm26548_vm11  ;;  %vm8760_vm13 = vcmp.eq.s32.totalorder %v8632_v37, %v23842_v3  ;;  %vm8762_vm14 = vcmp.eq.s32.totalorder %v8633_v58, %v23842_v3  ;;  %v14777_v3 = vld [vmem:[%s27121_s13 + $0x248] sm:$0xff]   ;;  %v14815_v37 = vld [vmem:[%s27121_s13 + $0xd8] sm:$0xff]  }
 0xbde   : > { %13532 = vmatprep.subr.msk.bf16.mxu0 %vm26488_vm5, %v28087_v23  ;;  %vm9087_vm1 = vmand %vm26557_vm12, %vm8959_vm3  ;;  %vm8958_vm5 = vcmp.eq.s32.totalorder %v8827_v4, %v23844_v46  ;;  %vm30784_vm3 = vnez %v30766_v28  ;;  %v14778_v46 = vld [vmem:[%s27121_s13 + $0x208] sm:$0xff]   ;;  %v14818_v58 = vld [vmem:[%s27121_s13 + $0x318] sm:$0xff]  }
 0xbdf   : > { %vm30783_vm0 = vmand %vm26472_vm4, %vm26477_vm8  ;;  %v14820_v4 = vld [vmem:[%s27121_s13 + $0xa0] sm:$0xff]  }
 0xbe0   : > { %vm13535_vm2 = vmpackc.low %vm9083_vm7, %vm30783_vm0  ;;  %v14821_v28 = vld [vmem:[%s27121_s13 + $0x360] sm:$0xff]   ;;  %vm11154_vm0 = vcmask 15360  }
 0xbe1   : > { %vm13537_vm11 = vmpackc.low %vm9082_vm9, %vm9080_vm15  ;;  %13534 = vmatpush1.bf16.msk.msra.mxu0 %vm30784_vm3, %v28087_v23  ;;  %vm30787_vm15 = vcmask 523264   ;;  %vm30792_vm9 = vcmask 130048  }
 0xbe2   : > { %vm13539_vm12 = vmpackc.low %vm9087_vm1, %vm9085_vm6  ;;  %13536 = vmatprep.subr.msk.bf16.mxu0 %vm13535_vm2, %v28087_v23  ;;  %vm11167_vm6 = vcmask 1044480   ;;  %vm11152_vm1 = vcmask 7168   ;;  %vm11156_vm2 = vcmask 23552  }
 0xbe3   : > { %vm9084_vm4 = vmand %vm8760_vm13, %vm8956_vm10  ;;  %vm15005_vm10 = vmmov 0   ;;  %vm11158_vm13 = vcmask 31744  }
 0xbe4   : > { %vm9086_vm8 = vmand %vm8762_vm14, %vm8958_vm5  ;;  %vm11160_vm14 = vcmask 32768  }
 0xbe5   : > { %13538 = vmatpush1.bf16.msk.msra.mxu0 %vm13537_vm11, %v28087_v23  ;;  %vm13541_vm7 = vmpackc.low %vm9086_vm8, %vm9084_vm4  ;;  %vm11163_vm11 = vcmask 39936  }
 0xbe6   : > { %13540 = vmatprep.subr.msk.bf16.mxu0 %vm13539_vm12, %v28087_v23 }
 0xbe9   : > { %13542 = vmatpush1.bf16.msk.msra.mxu0 %vm13541_vm7, %v28087_v23  ;;  %v14781_v23 = vld [vmem:[%s27121_s13 + $0x250] sm:$0xff]  }
 0xbea   : > { %12970 = vmatprep.subr.bf16.mxu0 %v14773_v38  ;;  %v14829_v38 = vld [vmem:[%s27121_s13 + $0x370] sm:$0xff]  }
 0xbec   : > { %9480 = vmatmul.mubr.f32.vlgmr.msra.gmra.mrb[48].mxu0 %v25635_v29  ;;  %v14785_v29 = vld [vmem:[%s27121_s13 + $0x258] sm:$0xff]  }
 0xbed   : > { %12971 = vmatpush3.bf16.msra.mxu0 %v14774_v42  ;;  %v14831_v42 = vld [vmem:[%s27121_s13 + $0xf8] sm:$0xff]  }
 0xbee   : > { %12972 = vmatprep.subr.bf16.mxu0 %v14777_v3  ;;  %v14830_v3 = vld [vmem:[%s27121_s13 + $0x330] sm:$0xff]  }
 0xbf1   : > { %12973 = vmatpush3.bf16.msra.mxu0 %v14778_v46  ;;  %v14832_v46 = vld [vmem:[%s27121_s13 + $0xb8] sm:$0xff]  }
 0xbf2   : > { %12974 = vmatprep.subr.bf16.mxu0 %v14781_v23  ;;  %v14833_v23 = vld [vmem:[%s27121_s13 + $0x378] sm:$0xff]  }
 0xbf5   : > { %12975 = vmatpush3.bf16.msra.mxu0 %v14782_v30 }
 0xbf6   : > { %12976 = vmatprep.subr.bf16.mxu0 %v14785_v29  ;;  %v14835_v29 = vld [vmem:[%s27121_s13 + $0x140] sm:$0xff]  }
 0xbf9   : > { %12977 = vmatpush3.bf16.msra.mxu0 %v14786_v21 }
 0xbfa   : > { %12978 = vmatprep.subr.bf16.mxu0 %v14789_v49  ;;  %v14834_v49 = vld [vmem:[%s27121_s13 + $0x338] sm:$0xff]  }
 0xbfd   : > { %12979 = vmatpush3.bf16.msra.mxu0 %v14790_v41  ;;  %v14836_v41 = vld [vmem:[%s27121_s13 + $0x100] sm:$0xff]  }
 0xbfe   : > { %12980 = vmatprep.subr.bf16.mxu0 %v14793_v18 }
 0xc01   : > { %12981 = vmatpush3.bf16.msra.mxu0 %v14794_v19 }
 0xc02   : > { %12982 = vmatprep.subr.bf16.mxu0 %v14797_v45  ;;  %v14837_v45 = vld [vmem:[%s27121_s13 + $0x148] sm:$0xff]  }
 0xc05   : > { %12983 = vmatpush3.bf16.msra.mxu0 %v14798_v48 }
 0xc06   : > { %12984 = vmatprep.subr.bf16.mxu0 %v14801_v15  ;;  %v14839_v15 = vld [vmem:[%s27121_s13 + $0x150] sm:$0xff]  }
 0xc09   : > { %12985 = vmatpush3.bf16.msra.mxu0 %v14802_v16  ;;  %v14840_v16 = vld [vmem:[%s27121_s13 + $0x110] sm:$0xff]  }
 0xc0a   : > { %13014 = vmatprep.subr.bf16.mxu0 %v14805_v6  ;;  %v14842_v6 = vld [vmem:[%s27121_s13 + $0x118] sm:$0xff]  }
 0xcbf   : > { %v26661_v52 = vpop.f32.mrb[48].mxu0 }
 0xcc0   : > { %v26663_v11 = vpop.f32.mrb[49].mxu0  ;;  %v9550_v53 = vmul.f32 %v9548_v13, %v26661_v52  ;;  %v9577_v7 = vrot.slane %v26661_v52, 4  ;;  %v9593_v22 = vpack.c.bf16 %v26661_v52, %v26661_v52  ;;  %v9565_v30 = vrot.slane %v26661_v52, 1  ;;  %v14843_v13 = vld [vmem:[%s27121_s13 + $0x160] sm:$0xff]  }
 0xcc1   : > { %v9594_v33 = vpack.c.bf16 %v26663_v11, %v26663_v11  ;;  %v9566_v43 = vrot.slane %v26663_v11, 1  ;;  %v9578_v40 = vrot.slane %v26663_v11, 4  ;;  %v9551_v63 = vmul.f32 %v9549_v51, %v26663_v11  ;;  %v14844_v51 = vld [vmem:[%s27121_s13 + $0x120] sm:$0xff]  }
 0xcc2   : > { %v9586_v54 = vrot.slane %v26663_v11, 6  ;;  %v9601_v44 = vpack.c.bf16 %v9577_v7, %v9577_v7  ;;  %v9570_v21 = vrot.slane %v26663_v11, 2  ;;  %v9585_v18 = vrot.slane %v26661_v52, 6  ;;  %v14846_v7 = vld [vmem:[%s27121_s13 + $0x128] sm:$0xff]  }
 0xcc3   : > { %10666 = vmatprep.mubr.bf16.mxu1 %v9594_v33  ;;  %v9596_v47 = vpack.c.bf16 %v9566_v43, %v9566_v43  ;;  %v9602_v25 = vpack.c.bf16 %v9578_v40, %v9578_v40  ;;  %v9552_v31 = vadd.f32 %v9551_v63, %v9550_v53  ;;  %v9595_v19 = vpack.c.bf16 %v9565_v30, %v9565_v30  ;;  %v14845_v53 = vld [vmem:[%s27121_s13 + $0x168] sm:$0xff]   ;;  %v14847_v33 = vld [vmem:[%s27121_s13 + $0x170] sm:$0xff]   ;;  %v14849_v43 = vld [vmem:[%s27121_s13 + $0x178] sm:$0xff]  }
 0xcc4   : > { %10667 = vmatmul.mubr.bf16.vlgmr.msra.gmra.mrb[48].mxu1 %v9593_v22  ;;  %v9606_v56 = vpack.c.bf16 %v9586_v54, %v9586_v54  ;;  %v9598_v48 = vpack.c.bf16 %v9570_v21, %v9570_v21  ;;  %v9605_v24 = vpack.c.bf16 %v9585_v18, %v9585_v18  ;;  %v14850_v40 = vld [vmem:[%s27121_s13 + $0x138] sm:$0xff]   ;;  %v9569_v63 = vrot.slane %v26661_v52, 2  ;;  %v14851_v22 = vld [vmem:[%s27121_s13 + $0x1c0] sm:$0xff]  }
 0xcc5   : > { %12905 = vmatpush3.bf16.msra.mxu1 %v14804_v10  ;;  %10706 = vmatprep.mubr.bf16.mxu1 %v9596_v47  ;;  %v14848_v10 = vld [vmem:[%s27121_s13 + $0x130] sm:$0xff]   ;;  %v9574_v54 = vrot.slane %v26663_v11, 3  ;;  %v14852_v47 = vld [vmem:[%s27121_s13 + $0x180] sm:$0xff]   ;;  %v14881_v30 = vld [vmem:[%s27121_s13 + $0x2f8] sm:$0xff]   ;;  %v9581_v21 = vrot.slane %v26661_v52, 5 }
 0xcc6   : > { %10826 = vmatprep.mubr.bf16.mxu0 %v9602_v25  ;;  %9553 = vadd.xlane.f32.xlu0 %v9552_v31  ;;  %v9597_v25 = vpack.c.bf16 %v9569_v63, %v9569_v63  ;;  %v14853_v31 = vld [vmem:[%s27121_s13 + $0x1c8] sm:$0xff]   ;;  %v14884_v18 = vld [vmem:[%s27121_s13 + $0x380] sm:$0xff]  }
 0xcc7   : > { %10827 = vmatmul.mubr.bf16.vlgmr.msra.gmra.mrb[52].mxu0 %v9601_v44  ;;  %12906 = vmatprep.subr.bf16.mxu1 %v14807_v8  ;;  %v9600_v8 = vpack.c.bf16 %v9574_v54, %v9574_v54  ;;  %v14855_v44 = vld [vmem:[%s27121_s13 + $0x1d0] sm:$0xff]  }
 0xcc8   : > { %13015 = vmatpush3.bf16.msra.mxu0 %v14806_v36  ;;  %10906 = vmatprep.mubr.bf16.mxu0 %v9606_v56  ;;  %v14854_v36 = vld [vmem:[%s27121_s13 + $0x188] sm:$0xff]   ;;  %v14858_v56 = vld [vmem:[%s27121_s13 + $0x198] sm:$0xff]  }
 0xcc9   : > { %12907 = vmatpush3.bf16.msra.mxu1 %v14808_v26  ;;  %13016 = vmatprep.subr.bf16.mxu0 %v14809_v5  ;;  %v14856_v26 = vld [vmem:[%s27121_s13 + $0x190] sm:$0xff]   ;;  %v14857_v5 = vld [vmem:[%s27121_s13 + $0x1d8] sm:$0xff]  }
 0xcca   : > { %9503 = vadd.xlane.f32.xlu0 %v30785_v17  ;;  %12908 = vmatprep.subr.bf16.mxu1 %v14811_v14  ;;  %v14859_v14 = vld [vmem:[%s27121_s13 + $0x1e0] sm:$0xff]   ;;  %v14863_v17 = vld [vmem:[%s27121_s13 + $0x1f0] sm:$0xff]  }
 0xccc   : > { %13017 = vmatpush3.bf16.msra.mxu0 %v14810_v57  ;;  %v14860_v57 = vld [vmem:[%s27121_s13 + $0x1a0] sm:$0xff]  }
 0xccd   : > { %12909 = vmatpush3.bf16.msra.mxu1 %v14812_v35  ;;  %13018 = vmatprep.subr.bf16.mxu0 %v14813_v62  ;;  %v14861_v35 = vld [vmem:[%s27121_s13 + $0x1e8] sm:$0xff]  }
 0xcce   : > { %9509 = vadd.xlane.f32.xlu0 %v30786_v55  ;;  %12910 = vmatprep.subr.bf16.mxu1 %v14815_v37  ;;  %v14862_v62 = vld [vmem:[%s27121_s13 + $0x1a8] sm:$0xff]   ;;  %v14864_v37 = vld [vmem:[%s27121_s13 + $0x1b0] sm:$0xff]   ;;  %v14867_v55 = vld [vmem:[%s27121_s13 + $0x2c0] sm:$0xff]  }
 0xcd0   : > { %13019 = vmatpush3.bf16.msra.mxu0 %v14814_v2  ;;  %v14865_v2 = vld [vmem:[%s27121_s13 + $0x1f8] sm:$0xff]  }
 0xcd1   : > { %12911 = vmatpush3.bf16.msra.mxu1 %v14816_v39  ;;  %13020 = vmatprep.subr.bf16.mxu0 %v14817_v1  ;;  %v14866_v39 = vld [vmem:[%s27121_s13 + $0x1b8] sm:$0xff]   ;;  %v9573_v1 = vrot.slane %v26661_v52, 3 }
 0xcd2   : > { %12912 = vmatprep.subr.bf16.mxu1 %v14819_v61  ;;  %v9582_v61 = vrot.slane %v26663_v11, 5 }
 0xcd4   : > { %13021 = vmatpush3.bf16.msra.mxu0 %v14818_v58  ;;  %v14868_v58 = vld [vmem:[%s27121_s13 + $0x280] sm:$0xff]  }
 0xcd5   : > { %12913 = vmatpush3.bf16.msra.mxu1 %v14820_v4  ;;  %13022 = vmatprep.subr.bf16.mxu0 %v14821_v28  ;;  %v9599_v4 = vpack.c.bf16 %v9573_v1, %v9573_v1  ;;  %v14869_v28 = vld [vmem:[%s27121_s13 + $0x2c8] sm:$0xff]  }
 0xcd6   : > { %12914 = vmatprep.subr.bf16.mxu1 %v14823_v0  ;;  %v9604_v0 = vpack.c.bf16 %v9582_v61, %v9582_v61 }
 0xcd8   : > { %13023 = vmatpush3.bf16.msra.mxu0 %v14822_v27  ;;  %v14870_v27 = vld [vmem:[%s27121_s13 + $0x288] sm:$0xff]  }
 0xcd9   : > { %12915 = vmatpush3.bf16.msra.mxu1 %v14824_v12  ;;  %13024 = vmatprep.subr.bf16.mxu0 %v14825_v59  ;;  %v14871_v12 = vld [vmem:[%s27121_s13 + $0x2d0] sm:$0xff]  }
 0xcda   : > { %12916 = vmatprep.subr.bf16.mxu1 %v14827_v9  ;;  %v14872_v59 = vld [vmem:[%s27121_s13 + $0x290] sm:$0xff]   ;;  %v14873_v9 = vld [vmem:[%s27121_s13 + $0x2d8] sm:$0xff]  }
 0xcdc   : > { %13025 = vmatpush3.bf16.msra.mxu0 %v14826_v34  ;;  %v14874_v34 = vld [vmem:[%s27121_s13 + $0x298] sm:$0xff]  }
 0xcdd   : > { %12917 = vmatpush3.bf16.msra.mxu1 %v14828_v60  ;;  %13026 = vmatprep.subr.bf16.mxu0 %v14829_v38  ;;  %v14875_v60 = vld [vmem:[%s27121_s13 + $0x2e0] sm:$0xff]  }
 0xcde   : > { %12918 = vmatprep.subr.bf16.mxu1 %v14831_v42  ;;  %v14876_v38 = vld [vmem:[%s27121_s13 + $0x2a0] sm:$0xff]   ;;  %v14877_v42 = vld [vmem:[%s27121_s13 + $0x2e8] sm:$0xff]  }
 0xce0   : > { %13027 = vmatpush3.bf16.msra.mxu0 %v14830_v3  ;;  %v14878_v3 = vld [vmem:[%s27121_s13 + $0x2a8] sm:$0xff]  }
 0xce1   : > { %12919 = vmatpush3.bf16.msra.mxu1 %v14832_v46  ;;  %13028 = vmatprep.subr.bf16.mxu0 %v14833_v23  ;;  %v14879_v46 = vld [vmem:[%s27121_s13 + $0x2f0] sm:$0xff]  }
 0xce2   : > { %12926 = vmatprep.subr.bf16.mxu1 %v14835_v29  ;;  %v14880_v23 = vld [vmem:[%s27121_s13 + $0x2b0] sm:$0xff]   ;;  %v14882_v29 = vld [vmem:[%s27121_s13 + $0x2b8] sm:$0xff]  }
 0xce4   : > { %13029 = vmatpush3.bf16.msra.mxu0 %v14834_v49  ;;  %10707 = vmatmul.mubr.bf16.vlgmr.msra.gmra.mrb[52].mxu1 %v9595_v19  ;;  %v14883_v49 = vld [vmem:[%s27121_s13 + $0x3c0] sm:$0xff]   ;;  %v9603_v19 = vpack.c.bf16 %v9581_v21, %v9581_v21 }
 0xce5   : > { %12927 = vmatpush3.bf16.msra.mxu1 %v14836_v41  ;;  %10746 = vmatprep.mubr.bf16.mxu1 %v9598_v48  ;;  %v9590_v41 = vrot.slane %v26663_v11, 7  ;;  %v14887_v11 = vld [vmem:[%s27121_s13 + $0x3d0] sm:$0xff]  }
 0xce6   : > { %12928 = vmatprep.subr.bf16.mxu1 %v14837_v45  ;;  %v14885_v45 = vld [vmem:[%s27121_s13 + $0x3c8] sm:$0xff]  }
 0xce7   : > { %10907 = vmatmul.mubr.bf16.vlgmr.msra.gmra.mrb[56].mxu0 %v9605_v24  ;;  %v9608_v48 = vpack.c.bf16 %v9590_v41, %v9590_v41  ;;  %v14886_v24 = vld [vmem:[%s27121_s13 + $0x388] sm:$0xff]  }
 0xce8   : > { %13088 = vmatprep.mubr.msk.f32.mxu0 %vm15005_vm10, %v28081_v20 }
 0xce9   : > { %12929 = vmatpush3.bf16.msra.mxu1 %v14838_v50  ;;  %v14888_v50 = vld [vmem:[%s27121_s13 + $0x390] sm:$0xff]  }
 0xcea   : > { %12930 = vmatprep.subr.bf16.mxu1 %v14839_v15  ;;  %v14889_v15 = vld [vmem:[%s27121_s13 + $0x3d8] sm:$0xff]  }
 0xced   : > { %12931 = vmatpush3.bf16.msra.mxu1 %v14840_v16  ;;  %v14890_v16 = vld [vmem:[%s27121_s13 + $0x398] sm:$0xff]  }
 0xcee   : > { %12932 = vmatprep.subr.bf16.mxu1 %v14841_v32  ;;  %v14891_v32 = vld [vmem:[%s27121_s13 + $0x3e0] sm:$0xff]  }
 0xcf1   : > { %12933 = vmatpush3.bf16.msra.mxu1 %v14842_v6  ;;  %v14892_v6 = vld [vmem:[%s27121_s13 + $0x3a0] sm:$0xff]  }
 0xcf2   : > { %12934 = vmatprep.subr.bf16.mxu1 %v14843_v13  ;;  %v14893_v13 = vld [vmem:[%s27121_s13 + $0x3e8] sm:$0xff]  }
 0xcf5   : > { %12935 = vmatpush3.bf16.msra.mxu1 %v14844_v51  ;;  %v14894_v51 = vld [vmem:[%s27121_s13 + $0x3a8] sm:$0xff]  }
 0xcf6   : > { %12936 = vmatprep.subr.bf16.mxu1 %v14845_v53  ;;  %v14895_v53 = vld [vmem:[%s27121_s13 + $0x3f0] sm:$0xff]  }
 0xcf9   : > { %12937 = vmatpush3.bf16.msra.mxu1 %v14846_v7  ;;  %v14896_v7 = vld [vmem:[%s27121_s13 + $0x3b0] sm:$0xff]  }
 0xcfa   : > { %12938 = vmatprep.subr.bf16.mxu1 %v14847_v33  ;;  %v14897_v33 = vld [vmem:[%s27121_s13 + $0x3f8] sm:$0xff]  }
 0xcfd   : > { %12939 = vmatpush3.bf16.msra.mxu1 %v14848_v10  ;;  %v14898_v10 = vld [vmem:[%s27121_s13 + $0x3b8] sm:$0xff]  }
 0xcfe   : > { %12940 = vmatprep.subr.bf16.mxu1 %v14849_v43  ;;  %v9589_v43 = vrot.slane %v26661_v52, 7  ;;  %v10956_v52 = vld [vmem:[%s27123_s15 + $0x8] sm:$0xff] }
 0xd01   : > { %12941 = vmatpush3.bf16.msra.mxu1 %v14850_v40  ;;  %v9607_v40 = vpack.c.bf16 %v9589_v43, %v9589_v43 }
 0xd02   : > { %12948 = vmatprep.subr.bf16.mxu1 %v14851_v22 }
 0xd04   : > { %10747 = vmatmul.mubr.bf16.vlgmr.msra.gmra.mrb[56].mxu1 %v9597_v25 }
 0xd05   : > { %12949 = vmatpush3.bf16.msra.mxu1 %v14852_v47  ;;  %10786 = vmatprep.mubr.bf16.mxu1 %v9600_v8 }
 0xd06   : > { %12950 = vmatprep.subr.bf16.mxu1 %v14853_v31 }
 0xd09   : > { %12951 = vmatpush3.bf16.msra.mxu1 %v14854_v36  ;;  %v10955_v36 = vld [vmem:[%s27123_s15] sm:$0xff] }
 0xd0a   : > { %12952 = vmatprep.subr.bf16.mxu1 %v14855_v44  ;;  %v10957_v44 = vld [vmem:[%s27123_s15 + $0x10] sm:$0xff] }
 0xd0d   : > { %12953 = vmatpush3.bf16.msra.mxu1 %v14856_v26 }
 0xd0e   : > { %12954 = vmatprep.subr.bf16.mxu1 %v14857_v5 }
 0xd11   : > { %12955 = vmatpush3.bf16.msra.mxu1 %v14858_v56  ;;  %v15004_v56 = vmov 0.0|0.0  }
 0xd12   : > { %12956 = vmatprep.subr.bf16.mxu1 %v14859_v14  ;;  %13543 = vmatprep.subr.bf16.mxu0 %v15004_v56  ;;  %v13544_v14 = vpack.c.bf16 %v10956_v52, %v10955_v36 }
 0xd14   : > { %13545 = vmatpush3.bf16.msra.mxu0 %v13544_v14  ;;  %v30789_v14 = vld [vmem:[#allocation84_spill] sm:$0xff] }
 0xd15   : > { %12957 = vmatpush3.bf16.msra.mxu1 %v14860_v57  ;;  %v10958_v57 = vld [vmem:[%s27123_s15 + $0x18] sm:$0xff]  ;;  %13546 = vmatprep.subr.bf16.mxu0 %v15004_v56 }
 0xd16   : > { %12958 = vmatprep.subr.bf16.mxu1 %v14861_v35 }
 0xd19   : > { %12959 = vmatpush3.bf16.msra.mxu1 %v14862_v62  ;;  %v13547_v62 = vpack.c.bf16 %v10958_v57, %v10957_v44 }
 0xd1a   : > { %12960 = vmatprep.subr.bf16.mxu1 %v14863_v17  ;;  %v9865_v17 = vld [vmem:[%s27122_s14] sm:$0x1] }
 0xd1b   : > { %13548 = vmatpush3.bf16.msra.mxu0 %v13547_v62 }
 0xd1c   : > { %13549 = vmatprep.subr.bf16.mxu0 %v15004_v56 }
 0xd1d   : > { %12961 = vmatpush3.bf16.msra.mxu1 %v14864_v37 }
 0xd1e   : > { %12962 = vmatprep.subr.bf16.mxu1 %v14865_v2 }
 0xd21   : > { %12963 = vmatpush3.bf16.msra.mxu1 %v14866_v39 }
 0xd22   : > { %12992 = vmatprep.subr.bf16.mxu1 %v14867_v55 }
 0xd24   : > { %10787 = vmatmul.mubr.bf16.vlgmr.msra.gmra.mrb[60].mxu1 %v9599_v4  ;;  %v10959_v4 = vld [vmem:[%s27123_s15 + $0x20] sm:$0xff] }
 0xd25   : > { %12993 = vmatpush3.bf16.msra.mxu1 %v14868_v58  ;;  %10866 = vmatprep.mubr.bf16.mxu1 %v9604_v0 }
 0xd26   : > { %12994 = vmatprep.subr.bf16.mxu1 %v14869_v28  ;;  %v10960_v28 = vld [vmem:[%s27123_s15 + $0x28] sm:$0xff] }
 0xd29   : > { %12995 = vmatpush3.bf16.msra.mxu1 %v14870_v27 }
 0xd2a   : > { %12996 = vmatprep.subr.bf16.mxu1 %v14871_v12  ;;  %v13550_v12 = vpack.c.bf16 %v10960_v28, %v10959_v4 }
 0xd2c   : > { %13551 = vmatpush3.bf16.msra.mxu0 %v13550_v12 }
 0xd2d   : > { %12997 = vmatpush3.bf16.msra.mxu1 %v14872_v59  ;;  %13552 = vmatprep.subr.bf16.mxu0 %v15004_v56 }
 0xd2e   : > { %12998 = vmatprep.subr.bf16.mxu1 %v14873_v9 }
 0xd31   : > { %12999 = vmatpush3.bf16.msra.mxu1 %v14874_v34 }
 0xd32   : > { %13000 = vmatprep.subr.bf16.mxu1 %v14875_v60  ;;  %v10961_v60 = vld [vmem:[%s27123_s15 + $0x30] sm:$0xff] }
 0xd35   : > { %13001 = vmatpush3.bf16.msra.mxu1 %v14876_v38  ;;  %v10962_v38 = vld [vmem:[%s27123_s15 + $0x38] sm:$0xff] }
 0xd36   : > { %13002 = vmatprep.subr.bf16.mxu1 %v14877_v42  ;;  %v13553_v42 = vpack.c.bf16 %v10962_v38, %v10961_v60 }
 0xd38   : > { %13554 = vmatpush3.bf16.msra.mxu0 %v13553_v42 }
 0xd39   : > { %13003 = vmatpush3.bf16.msra.mxu1 %v14878_v3  ;;  %13555 = vmatprep.subr.bf16.mxu0 %v15004_v56 }
 0xd3a   : > { %13004 = vmatprep.subr.bf16.mxu1 %v14879_v46 }
 0xd3d   : > { %13005 = vmatpush3.bf16.msra.mxu1 %v14880_v23 }
 0xd3e   : > { %13006 = vmatprep.subr.bf16.mxu1 %v14881_v30 }
 0xd41   : > { %13007 = vmatpush3.bf16.msra.mxu1 %v14882_v29 }
 0xd42   : > { %13036 = vmatprep.subr.bf16.mxu1 %v14883_v49 }
 0xd44   : > { %10867 = vmatmul.mubr.bf16.vlgmr.msra.gmra.mrb[64].mxu1 %v9603_v19 }
 0xd45   : > { %13037 = vmatpush3.bf16.msra.mxu1 %v14884_v18  ;;  %10946 = vmatprep.mubr.bf16.mxu1 %v9608_v48 }
 0xd46   : > { %13038 = vmatprep.subr.bf16.mxu1 %v14885_v45 }
 0xd49   : > { %13039 = vmatpush3.bf16.msra.mxu1 %v14886_v24 }
 0xd4a   : > { %13040 = vmatprep.subr.bf16.mxu1 %v14887_v11 }
 0xd4d   : > { %13041 = vmatpush3.bf16.msra.mxu1 %v14888_v50 }
 0xd4e   : > { %13042 = vmatprep.subr.bf16.mxu1 %v14889_v15 }
 0xd51   : > { %13043 = vmatpush3.bf16.msra.mxu1 %v14890_v16 }
 0xd52   : > { %13044 = vmatprep.subr.bf16.mxu1 %v14891_v32 }
 0xd55   : > { %13045 = vmatpush3.bf16.msra.mxu1 %v14892_v6 }
 0xd56   : > { %13046 = vmatprep.subr.bf16.mxu1 %v14893_v13 }
 0xd59   : > { %13047 = vmatpush3.bf16.msra.mxu1 %v14894_v51 }
 0xd5a   : > { %13048 = vmatprep.subr.bf16.mxu1 %v14895_v53 }
 0xd5d   : > { %13049 = vmatpush3.bf16.msra.mxu1 %v14896_v7 }
 0xd5e   : > { %13050 = vmatprep.subr.bf16.mxu1 %v14897_v33 }
 0xd61   : > { %13051 = vmatpush3.bf16.msra.mxu1 %v14898_v10 }
 0xd62   : > { %13098 = vmatprep.subr.mxu1 %v28081_v20 }
 0xd64   : > { %10947 = vmatmul.mubr.bf16.vlgmr.msra.gmra.mrb[68].mxu1 %v9607_v40 }
 0xd65   : > { %13100 = vmatprep.mubr.msk.f32.mxu1 %vm15005_vm10, %v28081_v20 }
 0xd97   : > { %v12898_v63 = vpop.f32.mrb[48].mxu1 }
 0xd98   : > { %v12899_v22 = vpop.f32.mrb[49].mxu1 }
 0xd99   : > { %v12900_v54 = vadd.f32 %v12899_v22, %v12898_v63  ;;  %v12901_v47 = vpop.f32.mrb[50].mxu1  ;;  %v11049_v63 = vld [vmem:[%s27125_s18] sm:$0xff]  ;;  %v11050_v22 = vld [vmem:[%s27125_s18 + $0x8] sm:$0xff] }
 0xd9a   : > { %v12986_v25 = vpop.f32.mrb[52].mxu0  ;;  %v12902_v31 = vpop.f32.mrb[51].mxu1 }
 0xd9b   : > { %v12987_v8 = vpop.f32.mrb[53].mxu0  ;;  %v10669_v39 = vadd.f32 %v12900_v54, %v9865_v17  ;;  %v13556_v54 = vpack.c.bf16 %v11050_v22, %v11049_v63  ;;  %v11045_v47 = vpop.permute.xlu0 %11044  ;;  %v12876_v22 = vld [vmem:[%s27127_s21] ss:$0 sm:$0xff] }
 0xd9c   : > { %v12988_v26 = vadd.f32 %v12987_v8, %v12986_v25  ;;  %v12989_v5 = vpop.f32.mrb[54].mxu0 }
 0xd9d   : > { %v12990_v35 = vpop.f32.mrb[55].mxu0  ;;  %v30788_v5 = vld [vmem:[#allocation43_spill] sm:$0xff] }
 0xd9e   : > { %v30790_v35 = vld [vmem:[#allocation85_spill] sm:$0xff] }
 0xd9f   : > { %v9535_v52 = vpop.xlane.xlu0 %9534 }
 0xdb7   : > { %v12920_v37 = vpop.f32.mrb[52].mxu1 }
 0xdb8   : > { %v12921_v2 = vpop.f32.mrb[53].mxu1 }
 0xdb9   : > { %v12922_v1 = vadd.f32 %v12921_v2, %v12920_v37  ;;  %v12923_v55 = vpop.f32.mrb[54].mxu1  ;;  %v9561_v37 = vld [vmem:[#allocation4] sm:$0x1] }
 0xdba   : > { %v13030_v61 = vpop.f32.mrb[56].mxu0  ;;  %v12924_v58 = vpop.f32.mrb[55].mxu1  ;;  %v11036_v55 = vld [vmem:[#allocation5] sm:$0x1] }
 0xdbb   : > { %v10709_v0 = vadd.f32 %v12922_v1, %v10669_v39  ;;  %v13031_v27 = vpop.f32.mrb[57].mxu0  ;;  %v30791_v39 = vld [vmem:[#allocation17_spill] sm:$0xff] }
 0xdbc   : > { %v13032_v59 = vadd.f32 %v13031_v27, %v13030_v61  ;;  %v13033_v9 = vpop.f32.mrb[58].mxu0 }
 0xdbd   : > { %v13034_v34 = vpop.f32.mrb[59].mxu0 }
 0xdbe   : > { %v9546_v34 = vld [vmem:[#allocation3] sm:$0x1] }
 0xdd7   : > { %v12942_v3 = vpop.f32.mrb[56].mxu1 }
 0xdd8   : > { %v12943_v46 = vpop.f32.mrb[57].mxu1 }
 0xdd9   : > { %v12944_v23 = vadd.f32 %v12943_v46, %v12942_v3  ;;  %v12945_v30 = vpop.f32.mrb[58].mxu1  ;;  %v11162_v3 = vld [vmem:[%s27126_s20] sm:$0x1f] }
 0xdda   : > { %v12946_v29 = vpop.f32.mrb[59].mxu1  ;;  %13099 = vmatpush3.msk.msra.mxu1 %vm11167_vm6, %v11162_v3  ;;  %v11126_v46 = vld [vmem:[#allocation6] sm:$0x1] }
 0xddb   : > { %v10749_v21 = vadd.f32 %v12944_v23, %v10709_v0 }
 0xdf7   : > { %v12964_v49 = vpop.f32.mrb[60].mxu1 }
 0xdf8   : > { %v12965_v41 = vpop.f32.mrb[61].mxu1 }
 0xdf9   : > { %v12966_v18 = vadd.f32 %v12965_v41, %v12964_v49  ;;  %v12967_v19 = vpop.f32.mrb[62].mxu1 }
 0xdfa   : > { %v12968_v45 = vpop.f32.mrb[63].mxu1 }
 0xdfb   : > { %v10789_v48 = vadd.f32 %v12966_v18, %v10749_v21 }
 0xdfd   : > { %v10829_v24 = vadd.f32 %v12988_v26, %v10789_v48 }
 0xe17   : > { %v13008_v11 = vpop.f32.mrb[64].mxu1 }
 0xe18   : > { %v13009_v50 = vpop.f32.mrb[65].mxu1 }
 0xe19   : > { %v13010_v15 = vadd.f32 %v13009_v50, %v13008_v11  ;;  %v13011_v16 = vpop.f32.mrb[66].mxu1 }
 0xe1a   : > { %v13012_v32 = vpop.f32.mrb[67].mxu1 }
 0xe1b   : > { %v10869_v6 = vadd.f32 %v13010_v15, %v10829_v24 }
 0xe1d   : > { %v10909_v13 = vadd.f32 %v13032_v59, %v10869_v6  ;;  %v9523_v6 = vld [vmem:[#allocation2] sm:$0x1] }
 0xe37   : > { %v13052_v51 = vpop.f32.mrb[68].mxu1 }
 0xe38   : > { %v13053_v53 = vpop.f32.mrb[69].mxu1 }
 0xe39   : > { %v13054_v7 = vadd.f32 %v13053_v53, %v13052_v51  ;;  %v13055_v33 = vpop.f32.mrb[70].mxu1 }
 0xe3a   : > { %v13056_v10 = vpop.f32.mrb[71].mxu1 }
 0xe3b   : > { %v10949_v43 = vadd.f32 %v13054_v7, %v10909_v13 }
 0xe3d   : > { %v10954_v40 = vmax.f32 %v10949_v43, 0.0 }
 0xe3f   : > { %13089 = vmatmul.mubr.msk.f32.vlgmr.msra.gmra.mrb[50].mxu0 %vm30787_vm15, %v10954_v40 }
 0xe40   : > { %13095 = vmatprep.mubr.msk.f32.mxu0 %vm15005_vm10, %v28081_v20  ;;  %13557 = vmatpush3.bf16.msra.mxu0 %v13556_v54  ;;  %v9554_v20 = vpop.xlane.xlu0 %9553 }
 0xe41   : > { %v9555_v44 = vrot.slane %v9554_v20, 4 }
 0xe43   : > { %v9556_v26 = vadd.f32 %v9555_v44, %v9554_v20 }
 0xe44   : > { %v9504_v21 = vpop.xlane.xlu0 %9503 }
 0xe45   : > { %v9557_v56 = vrot.slane %v9556_v26, 2 }
 0xe47   : > { %v9558_v57 = vadd.f32 %v9557_v56, %v9556_v26 }
 0xe48   : > { %v9510_v18 = vpop.xlane.xlu0 %9509 }
 0xe49   : > { %v9559_v62 = vrot.slane %v9558_v57, 1 }
 0xe4b   : > { %v9560_v17 = vadd.f32 %v9559_v62, %v9558_v57 }
 0xe4d   : > { %v9562_v2 = vadd.f32 %v9561_v37, %v9560_v17 }
 0xe4f   : > { %v11140_v1 = vrot.slane %v9562_v2, %v30791_v39 }
 0xf12   : > { %v11032_v25 = vpop.f32.mrb[50].mxu0 }
 0xf13   : > { %v11047_v31 = vadd.f32 %v11045_v47, %v11032_v25  ;;  %v13090_v8 = vpop.f32.mrb[51].mxu0  ;;  %v11037_v61 = vadd.f32 %v11036_v55, %v11032_v25 }
 0xf15   : > { %v11048_v36 = vmax.f32 %v11047_v31, 0.0 }
 0xf17   : > { %11052 = vrot.lane.b32.xlu1 %v11048_v36, %s27758_s29  ;;  %s11292_s29 = sshll.u32 %s722_s6, 4  ;;  %s11293_s29 = int_to_ptr.vmem [resolvable:$true] %s11292_s29 }
 0xf18   : > { %s14899_s5 = scalar_lea.vmem %s11293_s29, 16 }
 0xf19   : > { %p14900_p11 = scmp.ne.s32.totalorder %s11293_s29, %s14899_s5 }
 0xf1b   : > { %p14901_p12 = pnand %p14900_p11, %p15185_p5 }
 0xf1d   : > { %p14902_p13 = pneg %p14901_p12 }
 0xf3b   : > { %9537 = vadd.xlane.f32.xlu1 %v30788_v5 }
 0xf3f   : > { %9506 = vadd.xlane.f32.xlu1 %v30789_v14 }
 0xf43   : > { %9512 = vadd.xlane.f32.xlu1 %v30790_v35 }
 0xf54   : > { %11141 = vrot.lane.b32.xlu1 %v11140_v1, %s15007_s27  ;;  %s14903_s27 = sshll.u32 %s15010_s12, 4  ;;  %s14904_s27 = int_to_ptr.vmem [resolvable:$false] %s14903_s27 }
 0xf55   : > { %p14906_p0 = scmp.lt.s32.totalorder %s11293_s29, %s14904_s27 }
 0xf58   : > { %11145 = vrot.lane.b32.xlu1 %v11037_v61, %s15008_s24  ;;  %s27761_s24 = sshll.u32 %s15168_s19, 4 }
 0xf89   : > { %v11053_v58 = vpop.permute.xlu1 %11052 }
 0xf8a   : > { %13096 = vmatmul.mubr.msk.f32.vlgmr.msra.gmra.mrb[60].mxu0 %vm30792_vm9, %v11053_v58 }
 0xfc8   : > { %v9538_v4 = vpop.xlane.xlu1 %9537 }
 0xfc9   : > { %v9539_v28 = vadd.f32 %v9538_v4, %v9535_v52 }
 0xfcb   : > { %v9540_v0 = vrot.slane %v9539_v28, 4 }
 0xfcc   : > { %v9507_v49 = vpop.xlane.xlu1 %9506 }
 0xfcd   : > { %v9541_v27 = vadd.f32 %v9540_v0, %v9539_v28  ;;  %v9514_v41 = vadd.f32 %v9507_v49, %v9504_v21 }
 0xfcf   : > { %v9542_v12 = vrot.slane %v9541_v27, 2  ;;  %v9515_v19 = vadd.f32 %v9514_v41, %v9510_v18 }
 0xfd0   : > { %v9513_v45 = vpop.xlane.xlu1 %9512 }
 0xfd1   : > { %v9543_v59 = vadd.f32 %v9542_v12, %v9541_v27  ;;  %v9516_v48 = vadd.f32 %v9515_v19, %v9513_v45 }
 0xfd3   : > { %v9544_v9 = vrot.slane %v9543_v59, 1  ;;  %v9517_v24 = vrot.slane %v9516_v48, 4 }
 0xfd4   : > { %v11142_v53 = vpop.permute.xlu1 %11141 }
 0xfd5   : > { %v9545_v60 = vadd.f32 %v9544_v9, %v9543_v59  ;;  %v9518_v11 = vadd.f32 %v9517_v24, %v9516_v48 }
 0xfd7   : > { %v9547_v38 = vadd.f32 %v9546_v34, %v9545_v60  ;;  %v9519_v50 = vrot.slane %v9518_v11, 2 }
 0xfd8   : > { %v11146_v10 = vpop.permute.xlu1 %11145 }
 0xfd9   : > { %v11132_v42 = vrot.slane %v9547_v38, %v30791_v39  ;;  %v9520_v15 = vadd.f32 %v9519_v50, %v9518_v11 }
 0xfdb   : > { %11133 = vrot.lane.b32.xlu0 %v11132_v42, %s30793_s25  ;;  %v9521_v16 = vrot.slane %v9520_v15, 1 }
 0xfdd   : > { %v9522_v32 = vadd.f32 %v9521_v16, %v9520_v15 }
 0xfdf   : > { %v9524_v51 = vadd.f32 %v9523_v6, %v9522_v32 }
0x104d   : > { %v11134_v13 = vpop.permute.xlu0 %11133 }
0x104e   : > { %v11153_v7 = vsel %vm11152_vm1, %v9524_v51, %v11134_v13 }
0x104f   : > { %v11155_v33 = vsel %vm11154_vm0, %v11153_v7, %v11142_v53 }
0x1050   : > { %v11157_v43 = vsel %vm11156_vm2, %v11155_v33, %v11146_v10 }
0x105d   : > { %v27021_v23 = vpop.f32.mrb[60].mxu0 }
0x105e   : > { %v11127_v30 = vadd.f32 %v11126_v46, %v27021_v23  ;;  %v13097_v29 = vpop.f32.mrb[61].mxu0 }
0x1060   : > { %11149 = vrot.lane.b32.xlu0 %v11127_v30, %s15009_s0  ;;  %s27039_s0 = scalar_lea.hbm %s27129_s23, %s27761_s24 }
0x1064   : > { %11252 = vrot.lane.b32.xlu0 %v12876_v22, %s30793_s25 }
0x10d2   : > { %v11150_v40 = vpop.permute.xlu0 %11149 }
0x10d3   : > { %v11159_v63 = vsel %vm11158_vm13, %v11157_v43, %v11150_v40 }
0x10d4   : > { %13101 = vmatmul.mubr.msk.f32.vlgmr.msra.gmra.mrb[72].mxu1 %vm11163_vm11, %v11159_v63  ;;  %11161 = vst.msk [vmem:[%s722_s6] sm:$0x1] %vm11160_vm14, %v11159_v63 }
0x11a7   : > { %v11237_v54 = vpop.f32.mrb[72].mxu1 }
0x11a8   : > { %11242 = vrot.lane.b32.xlu1 %v11237_v54, %s30793_s25  ;;  %v13102_v47 = vpop.f32.mrb[73].mxu1  ;;  %s14905_s25 = scalar_lea.vmem %s14904_s27, 32 }
0x11a9   : > { %p14907_p1 = scmp.lt.s32.totalorder %s14905_s25, %s14899_s5 }
0x11ab   : > { %p14908_p2 = por %p14907_p1, %p14906_p0 }
0x11ad   : > { %p14909_p3 = pnand %p14908_p2, %p14902_p13 }
0x11af   : > { %14912 = shalt.err (!%p14909_p3)
}
0x11b0   : > { %s14913_s6 = scalar_lea.hbm %s27039_s0, 16  ;;  %s14917_s12 = scalar_lea.hbm %s27129_s23, 32 }
0x11b1   : > { %p14914_p4 = scmp.ne.s32.totalorder %s27039_s0, %s14913_s6  ;;  %p14918_p9 = scmp.lt.u32.totalorder %s27039_s0, %s27129_s23 }
0x11b2   : > { %p14919_p10 = scmp.lt.u32.totalorder %s14917_s12, %s14913_s6  ;;  %p14921_p12 = scmp.lt.u32.totalorder %s14913_s6, %s27039_s0 }
0x11b3   : > { %p14915_p7 = pnand %p14914_p4, %p15185_p5 }
0x11b4   : > { %p14920_p11 = por %p14919_p10, %p14918_p9 }
0x11b5   : > { %p14916_p8 = pneg %p14915_p7 }
0x11b6   : > { %p14922_p13 = por %p14921_p12, %p14920_p11 }
0x11b8   : > { %p14923_p0 = pnand %p14922_p13, %p14916_p8 }
0x11ba   : > { %14926 = shalt.err (!%p14923_p0)
}
0x11bb   : > { %13741 = dma.vmem_to_hbm [thread:$0]  (%p15185_p5), %s11293_s29, 16, %s27039_s0, %s11267_s3   ;;  %v11253_v31 = vpop.permute.xlu0 %11252  ;;  %vm11260_vm5 = vcmask 16384  }
0x11bc   : > { %s30794_s5 = smov 127   ;;  %s716_s24 = scalar_lea.vmem [#allocation7], %s27025_s1 }
0x11bd   : > { %s11279_s25 = sshll.u32 %s716_s24, 4  ;;  %s30795_s6 = sshll.u32 %s15168_s19, 4  ;;  %s27069_s25 = int_to_ptr.vmem [resolvable:$true] %s11279_s25 }
0x11be   : > { %s27067_s12 = scalar_lea.hbm %s27128_s22, %s30795_s6  ;;  %s11263_s3 = scalar_lea.sflag [#allocation8], %s27025_s1 }
0x11bf   : > { %s14927_s29 = scalar_lea.vmem %s27069_s25, 16  ;;  %s15011_s0 = smov [#allocation7]  }
0x11c0   : > { %p14928_p1 = scmp.ne.s32.totalorder %s27069_s25, %s14927_s29  ;;  %s14931_s19 = sshll.u32 %s15011_s0, 4  ;;  %s14932_s19 = int_to_ptr.vmem [resolvable:$false] %s14931_s19 }
0x11c1   : > { %s14933_s27 = scalar_lea.vmem %s14932_s19, 32  ;;  %p14934_p4 = scmp.lt.s32.totalorder %s27069_s25, %s14932_s19 }
0x11c2   : > { %p14929_p2 = pnand %p14928_p1, %p15185_p5  ;;  %p14935_p7 = scmp.lt.s32.totalorder %s14933_s27, %s14927_s29 }
0x11c4   : > { %p14930_p3 = pneg %p14929_p2  ;;  %p14936_p8 = por %p14935_p7, %p14934_p4 }
0x11c6   : > { %p14937_p9 = pnand %p14936_p8, %p14930_p3 }
0x121a   : > { %v11243_v25 = vpop.permute.xlu1 %11242 }
0x121b   : > { %v11245_v8 = vadd.f32 %v11243_v25, %v27021_v23 }
0x121d   : > { %v11255_v36 = vadd.f32 %v11253_v31, %v11245_v8 }
0x121f   : > { %11257 = vrot.lane.b32.xlu1 %v11255_v36, %s30794_s5 }
0x1291   : > { %v11258_v52 = vpop.permute.xlu1 %11257 }
0x1292   : > { %11261 = vst.msk [vmem:[%s716_s24] sm:$0x1] %vm11260_vm5, %v11258_v52 }
0x1293   : > { %14940 = shalt.err (!%p14937_p9)
}
0x1294   : > { %s14941_s1 = scalar_lea.hbm %s27067_s12, 16  ;;  %s14945_s6 = scalar_lea.hbm %s27128_s22, 32 }
0x1295   : > { %p14942_p10 = scmp.ne.s32.totalorder %s27067_s12, %s14941_s1  ;;  %p14946_p13 = scmp.lt.u32.totalorder %s27067_s12, %s27128_s22 }
0x1296   : > { %p14947_p0 = scmp.lt.u32.totalorder %s14945_s6, %s14941_s1  ;;  %p14949_p2 = scmp.lt.u32.totalorder %s14941_s1, %s27067_s12 }
0x1297   : > { %p14943_p11 = pnand %p14942_p10, %p15185_p5 }
0x1298   : > { %p14948_p1 = por %p14947_p0, %p14946_p13 }
0x1299   : > { %p14944_p12 = pneg %p14943_p11 }
0x129a   : > { %p14950_p3 = por %p14949_p2, %p14948_p1 }
0x129c   : > { %p14951_p4 = pnand %p14950_p3, %p14944_p12 }
0x129e   : > { %14954 = shalt.err (!%p14951_p4)
}
0x129f   : > { %13740 = dma.vmem_to_hbm [thread:$0]  (%p15185_p5), %s27069_s25, 16, %s27067_s12, %s11263_s3  }
0x12a0 PF: > { %p13751_p7 = scmp.ge.s32.totalorder %s14993_s16, 2  ;;  %s11304_s29 = sand.u32 1, %s14981_s8  }
0x12a1   : > { %s11305_s0 = scalar_lea.sflag [#allocation8], %s11304_s29 }
0x12a2   : > { %p13745_p8 = pnand %p13751_p7, %p15189_p6 }
0x12a4   : > { %14972 = dma.done.wait (!%p13745_p8), %s11305_s0, 16  }
0x12a5   : > { %14974 = vsyncadd (!%p13745_p8), %s11305_s0, 4294967280  ;;  %s11313_s19 = scalar_lea.sflag [#allocation10], %s11304_s29 }
0x12a6   : > { %14976 = dma.done.wait (!%p13745_p8), %s11313_s19, 16  }
0x12a7   : > { %14978 = vsyncadd (!%p13745_p8), %s11313_s19, 4294967280  ;;  %s30796_s4 = sld [smem:[#allocation13_spill]]  ;;  %s30797_s12 = sld [smem:[#allocation14_spill]] }
0x12a8   : > { %p47_p5 = scmp.ge.s32.totalorder %s15172_s28, 4   ;;  %s30798_s8 = smov %s14985_s10 }
0x12a9   : > { %s30800_s16 = smov %s15172_s28 }
0x12aa   :  { %49 = sbr.rel (!%p47_p5) target bundleno = 14 (0xe), region = 160 }
0x12ad   : > { %s30799_s10 = smov %s30796_s4 }
0x12b1   :  { %11317 = vsyncpa [#allocation8], 1 }
0x12b2   :  { %11319 = vsyncpa [#allocation8 + $0x1], 1 }
0x12b3   :  { %11320 = vsyncpa [#allocation10], 1 }
0x12b4   :  { %11322 = vsyncpa [#allocation10 + $0x1], 1 }

</bundles_post_ra>
